<compile_context>
chip_gen: v7x
topology: tpu7x:2x2x1
jax: 0.10.0
libtpu: 0.0.40
codegen_flags: <defaults>
</compile_context>

<pallas_src>
import functools

import jax
import jax.numpy as jnp
from jax import lax
from jax.experimental import pallas as pl
from jax.experimental.pallas import tpu as pltpu


def _conv3x3_im2col(pad_ref, w_flat_ref, b, mask_w_first, mask_w_last,
                    nb, H, W, C, mm_dtype):
    """3x3 'SAME' conv as a single deep-K im2col MXU matmul.

    pad_ref: (nb, H+2, W, C) f32 scratch; rows 0 and H+1 are zero, rows 1..H
    hold the conv input.  Column +-1 taps come from pltpu.roll along W plus a
    boundary mask (all slices stay (8,128)-aligned); row +-1 taps are aligned
    outer-dim slices.  Returns (nb*H*W, C) float32 with the bias added.
    """
    pc = pad_ref[...]                                       # (nb, H+2, W, C) f32
    # value at column (w-1): rotate right by 1, zero column 0
    pm = jnp.where(mask_w_first, 0.0, pltpu.roll(pc, 1, 2))
    # value at column (w+1): rotate left by 1 (== right by W-1), zero column W-1
    pp = jnp.where(mask_w_last, 0.0, pltpu.roll(pc, W - 1, 2))

    # Cast the three planes once (3 casts of H+2 rows, not 9 casts of H rows)
    # so the big concatenated slab is built directly in the MXU operand dtype.
    pm = pm.astype(mm_dtype)
    pcc = pc.astype(mm_dtype)
    pp = pp.astype(mm_dtype)

    taps = []
    for dy in range(3):                                     # (ky, kx) weight row order
        rows = slice(dy, dy + H)
        taps += [pm[:, rows], pcc[:, rows], pp[:, rows]]    # kx = 0, 1, 2
    t = jnp.concatenate(taps, axis=-1)                      # (nb, H, W, 9*C) mm_dtype
    t = t.reshape(nb * H * W, 9 * C)

    acc = jnp.dot(t, w_flat_ref[...], preferred_element_type=jnp.float32)
    return acc + b                                          # b: (1, C) broadcast


def lca_kernel(x_ref, w1_ref, b1_ref, w2_ref, b2_ref, w3_ref, b3_ref,
               o_ref, pad_ref, *, mm_dtype):
    nb, H, W, C = x_ref.shape

    # Boundary-column masks shared by both convs (hoisted once per step).
    w_idx = lax.broadcasted_iota(jnp.int32, (W, C), 0)
    mask_w_first = w_idx == 0
    mask_w_last = w_idx == W - 1

    # Zero only the two 1-pixel halo rows; the interior is fully overwritten
    # below and column padding is handled by roll+mask (no full-buffer fills).
    zero_row = jnp.zeros((nb, 1, W, C), jnp.float32)
    pad_ref[:, 0:1, :, :] = zero_row
    pad_ref[:, H + 1:H + 2, :, :] = zero_row

    x = x_ref[...].astype(jnp.float32)                      # (nb, H, W, C)

    # proj_1: 3x3 conv, padding 1
    pad_ref[:, 1:H + 1, :, :] = x
    c1 = _conv3x3_im2col(pad_ref, w1_ref, b1_ref[...], mask_w_first,
                         mask_w_last, nb, H, W, C, mm_dtype)   # (nb*H*W, C)

    # leaky_relu with negative slope 0.2 (f32, VPU)
    x1 = jnp.where(c1 > 0, c1, 0.2 * c1)

    # proj_3: AdaptiveAvgPool2d(1) -> 1x1 conv (per image)
    x1_img = x1.reshape(nb, H * W, C)
    pooled = jnp.mean(x1_img, axis=1)                       # (nb, C)
    y = jnp.dot(pooled.astype(mm_dtype), w3_ref[...],
                preferred_element_type=jnp.float32) + b3_ref[...]   # (nb, C)

    # channel attention: x1 * y (broadcast over spatial positions)
    z = x1_img * y[:, None, :]                              # (nb, H*W, C)

    # proj_2: 3x3 conv, padding 1 (halo rows are still zero)
    pad_ref[:, 1:H + 1, :, :] = z.reshape(nb, H, W, C)
    c2 = _conv3x3_im2col(pad_ref, w2_ref, b2_ref[...], mask_w_first,
                         mask_w_last, nb, H, W, C, mm_dtype)   # (nb*H*W, C)

    # residual
    out = x.reshape(nb * H * W, C) + c2
    o_ref[...] = out.reshape(nb, H, W, C).astype(o_ref.dtype)


def lca_forward(x_nchw, w1, b1, w2, b2, w3, b3, *, block_n=2,
                matmul_dtype=jnp.bfloat16):
    """NCHW in / NCHW out.  Kernel runs in NHWC, block_n images per grid step.

    matmul_dtype: dtype of the MXU operands (im2col taps / weights); the
    accumulation is always float32 and all element-wise math stays float32.
    """
    x = jnp.transpose(x_nchw, (0, 2, 3, 1))                 # -> NHWC
    N, H, W, C = x.shape
    nb = block_n if N % block_n == 0 else 1

    # im2col weight layout: rows ordered (ky, kx, cin) -> (9*C, C)
    w1f = w1.reshape(9 * C, C).astype(matmul_dtype)
    w2f = w2.reshape(9 * C, C).astype(matmul_dtype)
    w3c = w3.astype(matmul_dtype)

    kernel = functools.partial(lca_kernel, mm_dtype=matmul_dtype)
    out_nhwc = pl.pallas_call(
        kernel,
        out_shape=jax.ShapeDtypeStruct((N, H, W, C), x.dtype),
        grid_spec=pltpu.PrefetchScalarGridSpec(
            num_scalar_prefetch=0,
            grid=(N // nb,),
            in_specs=[
                pl.BlockSpec((nb, H, W, C), lambda n: (n, 0, 0, 0)),   # x
                pl.BlockSpec((9 * C, C), lambda n: (0, 0)),            # w1 (im2col)
                pl.BlockSpec((1, C), lambda n: (0, 0)),                # b1
                pl.BlockSpec((9 * C, C), lambda n: (0, 0)),            # w2 (im2col)
                pl.BlockSpec((1, C), lambda n: (0, 0)),                # b2
                pl.BlockSpec((C, C), lambda n: (0, 0)),                # w3 (1x1)
                pl.BlockSpec((1, C), lambda n: (0, 0)),                # b3
            ],
            out_specs=pl.BlockSpec((nb, H, W, C), lambda n: (n, 0, 0, 0)),
            scratch_shapes=[pltpu.VMEM((nb, H + 2, W, C), jnp.float32)],
        ),
        compiler_params=pltpu.CompilerParams(
            # Batch steps are independent -> shard across both TCs on v7x.
            dimension_semantics=("parallel",),
            vmem_limit_bytes=32 * 1024 * 1024,
        ),
    )(x, w1f, b1, w2f, b2, w3c, b3)
    return jnp.transpose(out_nhwc, (0, 3, 1, 2))            # -> NCHW


def lca_reference(x_nchw, w1, b1, w2, b2, w3, b3):
    """Plain-JAX reference for numerical verification."""
    x = jnp.transpose(x_nchw, (0, 2, 3, 1))  # NHWC
    dn = lax.conv_dimension_numbers(x.shape, w1.shape, ('NHWC', 'HWIO', 'NHWC'))
    c1 = lax.conv_general_dilated(x, w1, (1, 1), 'SAME',
                                  dimension_numbers=dn) + b1
    x1 = jnp.where(c1 > 0, c1, 0.2 * c1)
    pooled = jnp.mean(x1, axis=(1, 2))                # (N, C)
    y = pooled @ w3 + b3                              # (N, C)
    z = x1 * y[:, None, None, :]
    c2 = lax.conv_general_dilated(z, w2, (1, 1), 'SAME',
                                  dimension_numbers=dn) + b2
    out = x + c2
    return jnp.transpose(out, (0, 3, 1, 2))


if __name__ == "__main__":
    # Small, TPU-friendly shapes consistent with the module: d_model = C = 128.
    N, C, H, W = 4, 128, 16, 16
    key = jax.random.PRNGKey(0)
    ks = jax.random.split(key, 7)
    scale = 0.05
    x = jax.random.normal(ks[0], (N, C, H, W), jnp.float32)
    w1 = scale * jax.random.normal(ks[1], (3, 3, C, C), jnp.float32)
    b1 = scale * jax.random.normal(ks[2], (1, C), jnp.float32)
    w2 = scale * jax.random.normal(ks[3], (3, 3, C, C), jnp.float32)
    b2 = scale * jax.random.normal(ks[4], (1, C), jnp.float32)
    w3 = scale * jax.random.normal(ks[5], (C, C), jnp.float32)
    b3 = scale * jax.random.normal(ks[6], (1, C), jnp.float32)

    ref = lca_reference(x, w1, b1, w2, b2, w3, b3)

    # Full-f32 MXU path: faithful to the module's numerics.
    out_f32 = jax.block_until_ready(
        lca_forward(x, w1, b1, w2, b2, w3, b3, matmul_dtype=jnp.float32))
    assert out_f32.shape == x.shape, (out_f32.shape, x.shape)
    err_f32 = float(jnp.max(jnp.abs(out_f32 - ref)))
    assert err_f32 < 1e-3, f"f32 path max abs error vs reference: {err_f32}"

    # bf16-input MXU path (f32 accumulation): the v6e/v7x-recommended config.
    out_bf16 = jax.block_until_ready(
        lca_forward(x, w1, b1, w2, b2, w3, b3, matmul_dtype=jnp.bfloat16))
    err_bf16 = float(jnp.max(jnp.abs(out_bf16 - ref)))
    assert err_bf16 < 1e-1, f"bf16 path max abs error vs reference: {err_bf16}"

    print("KERNEL_OK")
</pallas_src>

<mosaic_0001>
module attributes {stable_mosaic.version = 11 : i64} {
  func.func @lca_kernel(%arg0: i32, %arg1: memref<2x16x16x128xf32, #tpu.memory_space<vmem>>, %arg2: memref<1152x128xf32, #tpu.memory_space<vmem>>, %arg3: memref<1x128xf32, #tpu.memory_space<vmem>>, %arg4: memref<1152x128xf32, #tpu.memory_space<vmem>>, %arg5: memref<1x128xf32, #tpu.memory_space<vmem>>, %arg6: memref<128x128xf32, #tpu.memory_space<vmem>>, %arg7: memref<1x128xf32, #tpu.memory_space<vmem>>, %arg8: memref<2x16x16x128xf32, #tpu.memory_space<vmem>>, %arg9: memref<2x18x16x128xf32, #tpu.memory_space<vmem>>) attributes {dimension_semantics = [#tpu.dimension_semantics<parallel>], iteration_bounds = array<i64: 2>, scalar_prefetch = 0 : i64, scratch_operands = 1 : i64, tpu.core_type = #tpu.core_type<tc>, window_params = [{transform_indices = @transform_0, window_bounds = array<i64: 2, 16, 16, 128>}, {pipeline_mode = #tpu.pipeline_mode<synchronous>, transform_indices = @transform_1, window_bounds = array<i64: 1152, 128>}, {pipeline_mode = #tpu.pipeline_mode<synchronous>, transform_indices = @transform_2, window_bounds = array<i64: 1, 128>}, {pipeline_mode = #tpu.pipeline_mode<synchronous>, transform_indices = @transform_3, window_bounds = array<i64: 1152, 128>}, {pipeline_mode = #tpu.pipeline_mode<synchronous>, transform_indices = @transform_4, window_bounds = array<i64: 1, 128>}, {pipeline_mode = #tpu.pipeline_mode<synchronous>, transform_indices = @transform_5, window_bounds = array<i64: 128, 128>}, {pipeline_mode = #tpu.pipeline_mode<synchronous>, transform_indices = @transform_6, window_bounds = array<i64: 1, 128>}, {transform_indices = @transform_7, window_bounds = array<i64: 2, 16, 16, 128>}]} {
    %0 = tpu.iota {dimensions = array<i32: 0>} : vector<16x128xi32>
    %c0_i32 = arith.constant 0 : i32
    %1 = vector.broadcast %c0_i32 : i32 to vector<16x128xi32>
    %2 = arith.cmpi eq, %0, %1 : vector<16x128xi32>
    %c15_i32 = arith.constant 15 : i32
    %3 = vector.broadcast %c15_i32 : i32 to vector<16x128xi32>
    %4 = arith.cmpi eq, %0, %3 : vector<16x128xi32>
    %cst = arith.constant 0.000000e+00 : f32
    %5 = vector.broadcast %cst : f32 to vector<2x1x16x128xf32>
    %c0 = arith.constant 0 : index
    %c0_0 = arith.constant 0 : index
    %c0_1 = arith.constant 0 : index
    %c0_2 = arith.constant 0 : index
    %6 = vector.load %arg9[%c0, %c0_0, %c0_1, %c0_2] : memref<2x18x16x128xf32, #tpu.memory_space<vmem>>, vector<2x1x16x128xf32>
    tpu.vector_store %arg9[%c0, %c0_0, %c0_1, %c0_2], %5 {strides = array<i32>} : memref<2x18x16x128xf32, #tpu.memory_space<vmem>>, vector<2x1x16x128xf32>,
    %c0_3 = arith.constant 0 : index
    %c17 = arith.constant 17 : index
    %c0_4 = arith.constant 0 : index
    %c0_5 = arith.constant 0 : index
    %7 = vector.load %arg9[%c0_3, %c17, %c0_4, %c0_5] : memref<2x18x16x128xf32, #tpu.memory_space<vmem>>, vector<2x1x16x128xf32>
    tpu.vector_store %arg9[%c0_3, %c17, %c0_4, %c0_5], %5 {strides = array<i32>} : memref<2x18x16x128xf32, #tpu.memory_space<vmem>>, vector<2x1x16x128xf32>,
    %c0_6 = arith.constant 0 : index
    %c0_7 = arith.constant 0 : index
    %c0_8 = arith.constant 0 : index
    %c0_9 = arith.constant 0 : index
    %8 = vector.load %arg1[%c0_6, %c0_7, %c0_8, %c0_9] : memref<2x16x16x128xf32, #tpu.memory_space<vmem>>, vector<2x16x16x128xf32>
    %c0_10 = arith.constant 0 : index
    %c1 = arith.constant 1 : index
    %c0_11 = arith.constant 0 : index
    %c0_12 = arith.constant 0 : index
    %9 = vector.load %arg9[%c0_10, %c1, %c0_11, %c0_12] : memref<2x18x16x128xf32, #tpu.memory_space<vmem>>, vector<2x16x16x128xf32>
    tpu.vector_store %arg9[%c0_10, %c1, %c0_11, %c0_12], %8 {strides = array<i32>} : memref<2x18x16x128xf32, #tpu.memory_space<vmem>>, vector<2x16x16x128xf32>,
    %c0_13 = arith.constant 0 : index
    %c0_14 = arith.constant 0 : index
    %10 = vector.load %arg3[%c0_13, %c0_14] : memref<1x128xf32, #tpu.memory_space<vmem>>, vector<1x128xf32>
    %c0_15 = arith.constant 0 : index
    %c0_16 = arith.constant 0 : index
    %c0_17 = arith.constant 0 : index
    %c0_18 = arith.constant 0 : index
    %11 = vector.load %arg9[%c0_15, %c0_16, %c0_17, %c0_18] : memref<2x18x16x128xf32, #tpu.memory_space<vmem>>, vector<2x18x16x128xf32>
    %c1_i32 = arith.constant 1 : i32
    %12 = tpu.dynamic_rotate %11 by %c1_i32 dim 2 : vector<2x18x16x128xf32>, i32 -> vector<2x18x16x128xf32>
    %cst_19 = arith.constant 0.000000e+00 : f32
    %13 = vector.shape_cast %2 : vector<16x128xi1> to vector<1x1x16x128xi1>
    %14 = vector.broadcast %13 : vector<1x1x16x128xi1> to vector<2x18x16x128xi1>
    %15 = vector.broadcast %cst_19 : f32 to vector<2x18x16x128xf32>
    %16 = arith.select %14, %15, %12 : vector<2x18x16x128xi1>, vector<2x18x16x128xf32>
    %c15_i32_20 = arith.constant 15 : i32
    %17 = tpu.dynamic_rotate %11 by %c15_i32_20 dim 2 : vector<2x18x16x128xf32>, i32 -> vector<2x18x16x128xf32>
    %cst_21 = arith.constant 0.000000e+00 : f32
    %18 = vector.shape_cast %4 : vector<16x128xi1> to vector<1x1x16x128xi1>
    %19 = vector.broadcast %18 : vector<1x1x16x128xi1> to vector<2x18x16x128xi1>
    %20 = vector.broadcast %cst_21 : f32 to vector<2x18x16x128xf32>
    %21 = arith.select %19, %20, %17 : vector<2x18x16x128xi1>, vector<2x18x16x128xf32>
    %22 = vector.extract_strided_slice %16 {offsets = [0, 0, 0, 0], sizes = [2, 16, 16, 128], strides = [1, 1, 1, 1]} : vector<2x18x16x128xf32> to vector<2x16x16x128xf32>
    %23 = vector.extract_strided_slice %11 {offsets = [0, 0, 0, 0], sizes = [2, 16, 16, 128], strides = [1, 1, 1, 1]} : vector<2x18x16x128xf32> to vector<2x16x16x128xf32>
    %24 = vector.extract_strided_slice %21 {offsets = [0, 0, 0, 0], sizes = [2, 16, 16, 128], strides = [1, 1, 1, 1]} : vector<2x18x16x128xf32> to vector<2x16x16x128xf32>
    %25 = vector.extract_strided_slice %16 {offsets = [0, 1, 0, 0], sizes = [2, 16, 16, 128], strides = [1, 1, 1, 1]} : vector<2x18x16x128xf32> to vector<2x16x16x128xf32>
    %26 = vector.extract_strided_slice %11 {offsets = [0, 1, 0, 0], sizes = [2, 16, 16, 128], strides = [1, 1, 1, 1]} : vector<2x18x16x128xf32> to vector<2x16x16x128xf32>
    %27 = vector.extract_strided_slice %21 {offsets = [0, 1, 0, 0], sizes = [2, 16, 16, 128], strides = [1, 1, 1, 1]} : vector<2x18x16x128xf32> to vector<2x16x16x128xf32>
    %28 = vector.extract_strided_slice %16 {offsets = [0, 2, 0, 0], sizes = [2, 16, 16, 128], strides = [1, 1, 1, 1]} : vector<2x18x16x128xf32> to vector<2x16x16x128xf32>
    %29 = vector.extract_strided_slice %11 {offsets = [0, 2, 0, 0], sizes = [2, 16, 16, 128], strides = [1, 1, 1, 1]} : vector<2x18x16x128xf32> to vector<2x16x16x128xf32>
    %30 = vector.extract_strided_slice %21 {offsets = [0, 2, 0, 0], sizes = [2, 16, 16, 128], strides = [1, 1, 1, 1]} : vector<2x18x16x128xf32> to vector<2x16x16x128xf32>
    %31 = tpu.concatenate %22, %23, %24, %25, %26, %27, %28, %29, %30 in 3 : vector<2x16x16x128xf32>, vector<2x16x16x128xf32>, vector<2x16x16x128xf32>, vector<2x16x16x128xf32>, vector<2x16x16x128xf32>, vector<2x16x16x128xf32>, vector<2x16x16x128xf32>, vector<2x16x16x128xf32>, vector<2x16x16x128xf32> -> vector<2x16x16x1152xf32>
    %32 = vector.shape_cast %31 : vector<2x16x16x1152xf32> to vector<512x1152xf32>
    %c0_22 = arith.constant 0 : index
    %c0_23 = arith.constant 0 : index
    %33 = vector.load %arg2[%c0_22, %c0_23] : memref<1152x128xf32, #tpu.memory_space<vmem>>, vector<1152x128xf32>
    %cst_24 = arith.constant dense<0.000000e+00> : vector<512x128xf32>
    %34 = tpu.matmul %32, %33, %cst_24 {dimension_numbers = #tpu.dot_dimension_numbers<[1], [0], [0], [1], [0, 0, 1, 1], [], []>} : vector<512x1152xf32>, vector<1152x128xf32>, vector<512x128xf32> -> vector<512x128xf32>
    %35 = vector.broadcast %10 : vector<1x128xf32> to vector<512x128xf32>
    %36 = arith.addf %34, %35 : vector<512x128xf32>
    %cst_25 = arith.constant 0.000000e+00 : f32
    %37 = vector.broadcast %cst_25 : f32 to vector<512x128xf32>
    %38 = arith.cmpf ogt, %36, %37 : vector<512x128xf32>
    %cst_26 = arith.constant 2.000000e-01 : f32
    %39 = vector.broadcast %cst_26 : f32 to vector<512x128xf32>
    %40 = arith.mulf %39, %36 : vector<512x128xf32>
    %41 = arith.select %38, %36, %40 : vector<512x128xi1>, vector<512x128xf32>
    %42 = vector.shape_cast %41 : vector<512x128xf32> to vector<2x256x128xf32>
    %cst_27 = arith.constant dense<0.000000e+00> : vector<2x128xf32>
    %43 = vector.multi_reduction <add>, %42, %cst_27 [1] : vector<2x256x128xf32> to vector<2x128xf32>
    %cst_28 = arith.constant 2.560000e+02 : f32
    %44 = vector.broadcast %cst_28 : f32 to vector<2x128xf32>
    %45 = arith.divf %43, %44 : vector<2x128xf32>
    %c0_29 = arith.constant 0 : index
    %c0_30 = arith.constant 0 : index
    %46 = vector.load %arg6[%c0_29, %c0_30] : memref<128x128xf32, #tpu.memory_space<vmem>>, vector<128x128xf32>
    %cst_31 = arith.constant dense<0.000000e+00> : vector<2x128xf32>
    %47 = tpu.matmul %45, %46, %cst_31 {dimension_numbers = #tpu.dot_dimension_numbers<[1], [0], [0], [1], [0, 0, 1, 1], [], []>} : vector<2x128xf32>, vector<128x128xf32>, vector<2x128xf32> -> vector<2x128xf32>
    %c0_32 = arith.constant 0 : index
    %c0_33 = arith.constant 0 : index
    %48 = vector.load %arg7[%c0_32, %c0_33] : memref<1x128xf32, #tpu.memory_space<vmem>>, vector<1x128xf32>
    %49 = vector.broadcast %48 : vector<1x128xf32> to vector<2x128xf32>
    %50 = arith.addf %47, %49 : vector<2x128xf32>
    %51 = vector.shape_cast %50 : vector<2x128xf32> to vector<2x1x128xf32>
    %52 = vector.broadcast %51 : vector<2x1x128xf32> to vector<2x256x128xf32>
    %53 = arith.mulf %42, %52 : vector<2x256x128xf32>
    %54 = vector.shape_cast %53 : vector<2x256x128xf32> to vector<2x16x16x128xf32>
    %c0_34 = arith.constant 0 : index
    %c1_35 = arith.constant 1 : index
    %c0_36 = arith.constant 0 : index
    %c0_37 = arith.constant 0 : index
    %55 = vector.load %arg9[%c0_34, %c1_35, %c0_36, %c0_37] : memref<2x18x16x128xf32, #tpu.memory_space<vmem>>, vector<2x16x16x128xf32>
    tpu.vector_store %arg9[%c0_34, %c1_35, %c0_36, %c0_37], %54 {strides = array<i32>} : memref<2x18x16x128xf32, #tpu.memory_space<vmem>>, vector<2x16x16x128xf32>,
    %c0_38 = arith.constant 0 : index
    %c0_39 = arith.constant 0 : index
    %56 = vector.load %arg5[%c0_38, %c0_39] : memref<1x128xf32, #tpu.memory_space<vmem>>, vector<1x128xf32>
    %c0_40 = arith.constant 0 : index
    %c0_41 = arith.constant 0 : index
    %c0_42 = arith.constant 0 : index
    %c0_43 = arith.constant 0 : index
    %57 = vector.load %arg9[%c0_40, %c0_41, %c0_42, %c0_43] : memref<2x18x16x128xf32, #tpu.memory_space<vmem>>, vector<2x18x16x128xf32>
    %c1_i32_44 = arith.constant 1 : i32
    %58 = tpu.dynamic_rotate %57 by %c1_i32_44 dim 2 : vector<2x18x16x128xf32>, i32 -> vector<2x18x16x128xf32>
    %cst_45 = arith.constant 0.000000e+00 : f32
    %59 = vector.shape_cast %2 : vector<16x128xi1> to vector<1x1x16x128xi1>
    %60 = vector.broadcast %59 : vector<1x1x16x128xi1> to vector<2x18x16x128xi1>
    %61 = vector.broadcast %cst_45 : f32 to vector<2x18x16x128xf32>
    %62 = arith.select %60, %61, %58 : vector<2x18x16x128xi1>, vector<2x18x16x128xf32>
    %c15_i32_46 = arith.constant 15 : i32
    %63 = tpu.dynamic_rotate %57 by %c15_i32_46 dim 2 : vector<2x18x16x128xf32>, i32 -> vector<2x18x16x128xf32>
    %cst_47 = arith.constant 0.000000e+00 : f32
    %64 = vector.shape_cast %4 : vector<16x128xi1> to vector<1x1x16x128xi1>
    %65 = vector.broadcast %64 : vector<1x1x16x128xi1> to vector<2x18x16x128xi1>
    %66 = vector.broadcast %cst_47 : f32 to vector<2x18x16x128xf32>
    %67 = arith.select %65, %66, %63 : vector<2x18x16x128xi1>, vector<2x18x16x128xf32>
    %68 = vector.extract_strided_slice %62 {offsets = [0, 0, 0, 0], sizes = [2, 16, 16, 128], strides = [1, 1, 1, 1]} : vector<2x18x16x128xf32> to vector<2x16x16x128xf32>
    %69 = vector.extract_strided_slice %57 {offsets = [0, 0, 0, 0], sizes = [2, 16, 16, 128], strides = [1, 1, 1, 1]} : vector<2x18x16x128xf32> to vector<2x16x16x128xf32>
    %70 = vector.extract_strided_slice %67 {offsets = [0, 0, 0, 0], sizes = [2, 16, 16, 128], strides = [1, 1, 1, 1]} : vector<2x18x16x128xf32> to vector<2x16x16x128xf32>
    %71 = vector.extract_strided_slice %62 {offsets = [0, 1, 0, 0], sizes = [2, 16, 16, 128], strides = [1, 1, 1, 1]} : vector<2x18x16x128xf32> to vector<2x16x16x128xf32>
    %72 = vector.extract_strided_slice %57 {offsets = [0, 1, 0, 0], sizes = [2, 16, 16, 128], strides = [1, 1, 1, 1]} : vector<2x18x16x128xf32> to vector<2x16x16x128xf32>
    %73 = vector.extract_strided_slice %67 {offsets = [0, 1, 0, 0], sizes = [2, 16, 16, 128], strides = [1, 1, 1, 1]} : vector<2x18x16x128xf32> to vector<2x16x16x128xf32>
    %74 = vector.extract_strided_slice %62 {offsets = [0, 2, 0, 0], sizes = [2, 16, 16, 128], strides = [1, 1, 1, 1]} : vector<2x18x16x128xf32> to vector<2x16x16x128xf32>
    %75 = vector.extract_strided_slice %57 {offsets = [0, 2, 0, 0], sizes = [2, 16, 16, 128], strides = [1, 1, 1, 1]} : vector<2x18x16x128xf32> to vector<2x16x16x128xf32>
    %76 = vector.extract_strided_slice %67 {offsets = [0, 2, 0, 0], sizes = [2, 16, 16, 128], strides = [1, 1, 1, 1]} : vector<2x18x16x128xf32> to vector<2x16x16x128xf32>
    %77 = tpu.concatenate %68, %69, %70, %71, %72, %73, %74, %75, %76 in 3 : vector<2x16x16x128xf32>, vector<2x16x16x128xf32>, vector<2x16x16x128xf32>, vector<2x16x16x128xf32>, vector<2x16x16x128xf32>, vector<2x16x16x128xf32>, vector<2x16x16x128xf32>, vector<2x16x16x128xf32>, vector<2x16x16x128xf32> -> vector<2x16x16x1152xf32>
    %78 = vector.shape_cast %77 : vector<2x16x16x1152xf32> to vector<512x1152xf32>
    %c0_48 = arith.constant 0 : index
    %c0_49 = arith.constant 0 : index
    %79 = vector.load %arg4[%c0_48, %c0_49] : memref<1152x128xf32, #tpu.memory_space<vmem>>, vector<1152x128xf32>
    %cst_50 = arith.constant dense<0.000000e+00> : vector<512x128xf32>
    %80 = tpu.matmul %78, %79, %cst_50 {dimension_numbers = #tpu.dot_dimension_numbers<[1], [0], [0], [1], [0, 0, 1, 1], [], []>} : vector<512x1152xf32>, vector<1152x128xf32>, vector<512x128xf32> -> vector<512x128xf32>
    %81 = vector.broadcast %56 : vector<1x128xf32> to vector<512x128xf32>
    %82 = arith.addf %80, %81 : vector<512x128xf32>
    %83 = vector.shape_cast %8 : vector<2x16x16x128xf32> to vector<512x128xf32>
    %84 = arith.addf %83, %82 : vector<512x128xf32>
    %85 = vector.shape_cast %84 : vector<512x128xf32> to vector<2x16x16x128xf32>
    %c0_51 = arith.constant 0 : index
    %c0_52 = arith.constant 0 : index
    %c0_53 = arith.constant 0 : index
    %c0_54 = arith.constant 0 : index
    %86 = vector.load %arg8[%c0_51, %c0_52, %c0_53, %c0_54] : memref<2x16x16x128xf32, #tpu.memory_space<vmem>>, vector<2x16x16x128xf32>
    tpu.vector_store %arg8[%c0_51, %c0_52, %c0_53, %c0_54], %85 {strides = array<i32>} : memref<2x16x16x128xf32, #tpu.memory_space<vmem>>, vector<2x16x16x128xf32>,
    return
  }
  func.func @transform_0(%arg0: i32) -> (i32, i32, i32, i32) {
    %c0_i32 = arith.constant 0 : i32
    %c0_i32_0 = arith.constant 0 : i32
    %c0_i32_1 = arith.constant 0 : i32
    %c0_i32_2 = arith.constant 0 : i32
    return %arg0, %c0_i32, %c0_i32_0, %c0_i32_1 : i32, i32, i32, i32
  }
  func.func @transform_1(%arg0: i32) -> (i32, i32) {
    %c0_i32 = arith.constant 0 : i32
    %c0_i32_0 = arith.constant 0 : i32
    %c0_i32_1 = arith.constant 0 : i32
    return %c0_i32, %c0_i32_0 : i32, i32
  }
  func.func @transform_2(%arg0: i32) -> (i32, i32) {
    %c0_i32 = arith.constant 0 : i32
    %c0_i32_0 = arith.constant 0 : i32
    %c0_i32_1 = arith.constant 0 : i32
    return %c0_i32, %c0_i32_0 : i32, i32
  }
  func.func @transform_3(%arg0: i32) -> (i32, i32) {
    %c0_i32 = arith.constant 0 : i32
    %c0_i32_0 = arith.constant 0 : i32
    %c0_i32_1 = arith.constant 0 : i32
    return %c0_i32, %c0_i32_0 : i32, i32
  }
  func.func @transform_4(%arg0: i32) -> (i32, i32) {
    %c0_i32 = arith.constant 0 : i32
    %c0_i32_0 = arith.constant 0 : i32
    %c0_i32_1 = arith.constant 0 : i32
    return %c0_i32, %c0_i32_0 : i32, i32
  }
  func.func @transform_5(%arg0: i32) -> (i32, i32) {
    %c0_i32 = arith.constant 0 : i32
    %c0_i32_0 = arith.constant 0 : i32
    %c0_i32_1 = arith.constant 0 : i32
    return %c0_i32, %c0_i32_0 : i32, i32
  }
  func.func @transform_6(%arg0: i32) -> (i32, i32) {
    %c0_i32 = arith.constant 0 : i32
    %c0_i32_0 = arith.constant 0 : i32
    %c0_i32_1 = arith.constant 0 : i32
    return %c0_i32, %c0_i32_0 : i32, i32
  }
  func.func @transform_7(%arg0: i32) -> (i32, i32, i32, i32) {
    %c0_i32 = arith.constant 0 : i32
    %c0_i32_0 = arith.constant 0 : i32
    %c0_i32_1 = arith.constant 0 : i32
    %c0_i32_2 = arith.constant 0 : i32
    return %arg0, %c0_i32, %c0_i32_0, %c0_i32_1 : i32, i32, i32, i32
  }
}

</mosaic_0001>

<bundles_post_ra>
// kernel: tpu_custom_call.1
= control target key start
LH: loop header
LB: loop body
LE: loop exit
PB: predicated region body
PF: predicated region fallthrough
CT: control target
= control target key end

     0   :  { %12 = vsyncpa [#allocation4], 0  ;;  %s14911_s0 = inlined_call_operand.hbm [shape: f32[4,16,16,128], index: 0, kind: input, shape index: {}]   ;;  %s14912_s1 = inlined_call_operand.hbm [shape: f32[1152,128], index: 1, kind: input, shape index: {}]   ;;  %s14913_s2 = inlined_call_operand.vmem [shape: f32[1,128], index: 2, kind: input, shape index: {}]   ;;  %s14914_s3 = inlined_call_operand.hbm [shape: f32[1152,128], index: 3, kind: input, shape index: {}]   ;;  %s14915_s4 = inlined_call_operand.vmem [shape: f32[1,128], index: 4, kind: input, shape index: {}]   ;;  %s14916_s5 = inlined_call_operand.hbm [shape: f32[128,128], index: 5, kind: input, shape index: {}]   ;;  %s14917_s6 = inlined_call_operand.vmem [shape: f32[1,128], index: 6, kind: input, shape index: {}]   ;;  %s14918_s7 = inlined_call_operand.hbm [shape: f32[4,16,16,128], index: 7, kind: output, shape index: {}]  }
   0x1   :  { %14 = vsyncpa [#allocation4 + $0x1], 0 }
   0x2   :  { %15 = vsyncpa [#allocation7], 0 }
   0x3   :  { %16 = vsyncpa [#allocation10], 0 }
   0x4   :  { %17 = vsyncpa [#allocation5], 0 }
   0x5   :  { %19 = vsyncpa [#allocation5 + $0x1], 0  ;;  %s9524_s24 = smov 0   ;;  %s9526_s25 = smov 0  }
   0x6   :  { %s9528_s26 = smov 0   ;;  %s9530_s27 = smov 0  }
   0x7 LB: > { %s9545_s28 = sadd.s32 4294967295, %s9469_s27   ;;  %s6432_s29 = sadd.s32 4294967294, %s9469_s27   ;;  %s9469_s27 = sphi %s9530_s27, %s16391_s27   ;;  %s9465_s26 = sphi %s9528_s26, %s16390_s26   ;;  %s9461_s25 = sphi %s9526_s25, %s16389_s25   ;;  %s9457_s24 = sphi %s9524_s24, %s16388_s24  }
   0x8   : > { %p45_p0 = scmp.ne.s32.totalorder %s9461_s25, %s9457_s24  ;;  %p14919_p1 = scmp.eq.s32.totalorder %s9545_s28, 0 }
   0x9   : > { %p201_p3 = scmp.eq.s32.totalorder %s6432_s29, 1  ;;  %p6433_p5 = scmp.ge.s32.totalorder %s9469_s27, 1 }
   0xa   : > { %p9554_p4 = por %p14919_p1, %p45_p0  ;;  %p208_p7 = scmp.lt.s32.totalorder %s9469_s27, 3 }
   0xb   : > { %p9559_p6 = por %p201_p3, %p45_p0  ;;  %s9471_s10 = smov [#allocation6]  }
   0xc   : > { %s15452_s30 = scalar_select %p9554_p4, 1, 0 }
   0xd   : > { %s15453_s8 = scalar_select %p9559_p6, 1, 0 }
   0xe   : > { %p9564_p8 = pnand %p6433_p5, %p208_p7  ;;  %s220_s11 = sshll.u32 %s9471_s10, 4  ;;  %s9568_s11 = int_to_ptr.vmem [resolvable:$true] %s220_s11 }
   0xf   : > { %15454 = sst [smem:[#allocation16_spill]] %s15453_s8  ;;  %s9472_s13 = smov [#allocation8]  }
  0x10   : > { %s15455_s9 = scalar_select %p9564_p8, 1, 0 }
  0x11   : > { %p9083_p9 = pneg %p9564_p8  ;;  %s236_s14 = sshll.u32 %s9472_s13, 4  ;;  %s9579_s14 = int_to_ptr.vmem [resolvable:$true] %s236_s14 }
  0x12   : > { %s9473_s15 = smov [#allocation9]   ;;  %s9281_s19 = scalar_lea.hbm %s14912_s1, 18432 }
  0x13   : > { %p9575_p11 = pnand %p9083_p9, %p14919_p1  ;;  %s9581_s16 = sshll.u32 %s9473_s15, 4  ;;  %s253_s16 = int_to_ptr.vmem [resolvable:$true] %s9581_s16 }
  0x14   : > { %p9282_p12 = scmp.ne.s32.totalorder %s14912_s1, %s9281_s19  ;;  %p9288_p5 = scmp.lt.u32.totalorder %s9281_s19, %s14912_s1 }
  0x15   : > { %p9591_p13 = pneg %p9575_p11 }
  0x17   : > { %p9284_p0 = pnand %p9591_p13, %p9282_p12 }
  0x19   : > { %p9285_p3 = pneg %p9284_p0 }
  0x1b   : > { %p9290_p7 = pnand %p9288_p5, %p9285_p3 }
  0x1d   : > { %9293 = shalt.err (!%p9290_p7)
}
  0x1e   : > { %s9294_s10 = scalar_lea.vmem %s9568_s11, 18432  ;;  %p9302_p2 = scmp.lt.s32.totalorder %s9568_s11, %s9568_s11 }
  0x1f   : > { %p9295_p9 = scmp.ne.s32.totalorder %s9568_s11, %s9294_s10  ;;  %p9303_p6 = scmp.lt.s32.totalorder %s9294_s10, %s9294_s10 }
  0x21   : > { %p9297_p10 = pnand %p9295_p9, %p9591_p13  ;;  %p9304_p12 = por %p9303_p6, %p9302_p2 }
  0x23   : > { %p9298_p1 = pneg %p9297_p10 }
  0x25   : > { %p9305_p0 = pnand %p9304_p12, %p9298_p1 }
  0x27   : > { %9308 = shalt.err (!%p9305_p0)
}
  0x28   : > { %s9474_s13 = smov 128   ;;  %s9475_s15 = smov 8  }
  0x29   : > { %9086 = dma.hbm_to_vmem [thread:$0]  (!%p9575_p11), %s14912_s1, 18432, %s9568_s11, [#allocation7], %s9474_s13, %s9474_s13, %s9475_s15  }
  0x2a   : > { %s9309_s21 = scalar_lea.hbm %s14914_s3, 18432 }
  0x2b   : > { %p9310_p1 = scmp.ne.s32.totalorder %s14914_s3, %s9309_s21  ;;  %p9316_p10 = scmp.lt.u32.totalorder %s9309_s21, %s14914_s3 }
  0x2d   : > { %p9312_p2 = pnand %p9310_p1, %p9591_p13 }
  0x2f   : > { %p9313_p6 = pneg %p9312_p2 }
  0x31   : > { %p9318_p3 = pnand %p9316_p10, %p9313_p6 }
  0x33   : > { %9321 = shalt.err (!%p9318_p3)
}
  0x34   : > { %s9322_s11 = scalar_lea.vmem %s9579_s14, 18432  ;;  %p9330_p12 = scmp.lt.s32.totalorder %s9579_s14, %s9579_s14 }
  0x35   : > { %p9323_p5 = scmp.ne.s32.totalorder %s9579_s14, %s9322_s11  ;;  %p9331_p0 = scmp.lt.s32.totalorder %s9322_s11, %s9322_s11 }
  0x37   : > { %p9325_p7 = pnand %p9323_p5, %p9591_p13  ;;  %p9332_p1 = por %p9331_p0, %p9330_p12 }
  0x39   : > { %p9326_p9 = pneg %p9325_p7 }
  0x3b   : > { %p9333_p2 = pnand %p9332_p1, %p9326_p9 }
  0x3d   : > { %9336 = shalt.err (!%p9333_p2)
}
  0x3e   : > { %9089 = dma.hbm_to_vmem [thread:$0]  (!%p9575_p11), %s14914_s3, 18432, %s9579_s14, [#allocation7], %s9474_s13, %s9474_s13, %s9475_s15  }
  0x3f   : > { %s9337_s20 = scalar_lea.hbm %s14916_s5, 2048 }
  0x40   : > { %p9338_p6 = scmp.ne.s32.totalorder %s14916_s5, %s9337_s20  ;;  %p9344_p5 = scmp.lt.u32.totalorder %s9337_s20, %s14916_s5 }
  0x42   : > { %p9340_p10 = pnand %p9338_p6, %p9591_p13 }
  0x44   : > { %p9341_p3 = pneg %p9340_p10 }
  0x46   : > { %p9346_p7 = pnand %p9344_p5, %p9341_p3 }
  0x48   : > { %9349 = shalt.err (!%p9346_p7)
}
  0x49   : > { %s9350_s11 = scalar_lea.vmem %s253_s16, 2048  ;;  %p9358_p1 = scmp.lt.s32.totalorder %s253_s16, %s253_s16 }
  0x4a   : > { %p9351_p9 = scmp.ne.s32.totalorder %s253_s16, %s9350_s11  ;;  %p9359_p2 = scmp.lt.s32.totalorder %s9350_s11, %s9350_s11 }
  0x4c   : > { %p9353_p12 = pnand %p9351_p9, %p9591_p13  ;;  %p9360_p4 = por %p9359_p2, %p9358_p1 }
  0x4e   : > { %p9354_p0 = pneg %p9353_p12 }
  0x50   : > { %p9361_p8 = pnand %p9360_p4, %p9354_p0 }
  0x52   : > { %9364 = shalt.err (!%p9361_p8)
}
  0x53   : > { %9092 = dma.hbm_to_vmem [thread:$0]  (!%p9575_p11), %s14916_s5, 2048, %s253_s16, [#allocation10], %s9474_s13, %s9474_s13, %s9475_s15  }
  0x54   : > { %s9664_s22 = sadd.s32 1, %s9469_s27   ;;  %s32_s17 = sadd.s32 1, %s9465_s26 }
  0x55   : > { %s29_s12 = ssub.s32 %s9469_s27, %s9664_s22  ;;  %p39_p8 = scmp.ne.s32.totalorder %s9465_s26, %s9461_s25 }
  0x56   : > { %p30_p4 = scmp.eq.s32.totalorder %s29_s12, 0  ;;  %p40_p13 = scmp.eq.s32.totalorder %s9469_s27, 0 }
  0x57   : > { %p9104_p6 = scmp.lt.s32.totalorder %s9469_s27, 2  ;;  %p15458_p3 = scmp.eq.s32.totalorder %s9545_s28, 1 }
  0x58   : > { %s9674_s18 = scalar_select %p30_p4, %s9465_s26, %s32_s17  }
  0x59   : > { %p41_p10 = por %p40_p13, %p39_p8  ;;  %p9678_p5 = por %p15458_p3, %p39_p8 }
  0x5a   : > { %s269_s20 = sand.u32 1, %s9465_s26   ;;  %s7226_s21 = sshll.u32 %s9469_s27, 13 }
  0x5b   : > { %s6438_s16 = sshll.u32 %s269_s20, 9  ;;  %s9687_s10 = scalar_lea.hbm %s14911_s0, %s7226_s21 }
  0x5c   : > { %s273_s11 = scalar_lea.vmem [#allocation3], %s6438_s16  ;;  %p9689_p11 = pnand %p9104_p6, %p41_p10 }
  0x5d   : > { %s281_s14 = sshll.u32 %s273_s11, 4  ;;  %s9695_s12 = scalar_lea.sflag [#allocation4], %s269_s20  ;;  %s9693_s14 = int_to_ptr.vmem [resolvable:$true] %s281_s14 }
  0x5e   : > { %s9365_s17 = scalar_lea.hbm %s9687_s10, 8192  ;;  %p9367_p9 = pneg %p9689_p11 }
  0x5f   : > { %p9366_p7 = scmp.ne.s32.totalorder %s9687_s10, %s9365_s17  ;;  %s9370_s23 = scalar_lea.hbm %s14911_s0, 16384 }
  0x60   : > { %p9371_p1 = scmp.lt.u32.totalorder %s9687_s10, %s14911_s0  ;;  %p9372_p2 = scmp.lt.u32.totalorder %s9370_s23, %s9365_s17 }
  0x61   : > { %p9368_p12 = pnand %p9367_p9, %p9366_p7  ;;  %p9374_p8 = scmp.lt.u32.totalorder %s9365_s17, %s9687_s10 }
  0x62   : > { %p9373_p4 = por %p9372_p2, %p9371_p1 }
  0x63   : > { %p9369_p0 = pneg %p9368_p12 }
  0x64   : > { %p9375_p13 = por %p9374_p8, %p9373_p4 }
  0x66   : > { %p9376_p6 = pnand %p9375_p13, %p9369_p0 }
  0x68   : > { %9379 = shalt.err (!%p9376_p6)
}
  0x69   : > { %s9380_s20 = scalar_lea.vmem %s9693_s14, 8192  ;;  %s9476_s21 = smov [#allocation3]  }
  0x6a   : > { %p9381_p10 = scmp.ne.s32.totalorder %s9693_s14, %s9380_s20  ;;  %s9385_s16 = sshll.u32 %s9476_s21, 4  ;;  %s9386_s16 = int_to_ptr.vmem [resolvable:$false] %s9385_s16 }
  0x6b   : > { %s9387_s29 = scalar_lea.vmem %s9386_s16, 16384  ;;  %p9388_p12 = scmp.lt.s32.totalorder %s9693_s14, %s9386_s16 }
  0x6c   : > { %p9383_p3 = pnand %p9381_p10, %p9367_p9  ;;  %p9389_p1 = scmp.lt.s32.totalorder %s9387_s29, %s9380_s20 }
  0x6e   : > { %p9384_p7 = pneg %p9383_p3  ;;  %p9390_p2 = por %p9389_p1, %p9388_p12 }
  0x70   : > { %p9391_p4 = pnand %p9390_p2, %p9384_p7 }
  0x72   : > { %9394 = shalt.err (!%p9391_p4)
}
  0x73   : > { %9096 = dma.hbm_to_vmem [thread:$0]  (!%p9689_p11), %s9687_s10, 8192, %s9693_s14, %s9695_s12, %s9474_s13, %s9474_s13, %s9475_s15  }
  0x74   : > { %p15461_p9 = scmp.ne.s32.totalorder %s15455_s9, 0 }
  0x76   : > { %293 = sbr.rel (%p15461_p9) target bundleno = 2928 (0xb70), region = 48 }
  0x7d   : > { %s9729_s17 = sand.u32 1, %s9461_s25   ;;  %p15462_p0 = scmp.ne.s32.totalorder %s15452_s30, 0 }
  0x7e   : > { %s6443_s23 = sshll.u32 %s9729_s17, 9  ;;  %s296_s11 = scalar_lea.sflag [#allocation4], %s9729_s17 }
  0x7f   : > { %s9735_s8 = scalar_lea.vmem [#allocation3], %s6443_s23 }
  0x80   : > { %9440 = dma.done.wait (%p15462_p0), %s296_s11, 8192  }
  0x81   : > { %9442 = vsyncadd (%p15462_p0), %s296_s11, 4294959104  ;;  %p15463_p11 = scmp.eq.s32.totalorder %s9545_s28, 0 }
  0x83   : > { %9444 = dma.done.wait (%p15463_p11), [#allocation7], 36864   ;;  %p15464_p8 = pmov %p15463_p11 }
  0x85   : > { %9446 = vsyncadd (%p15464_p8), [#allocation7], 4294930432  ;;  %p15465_p13 = pmov %p15464_p8 }
  0x86   : > { %p15466_p6 = pmov %p15464_p8 }
  0x87   : > { %9448 = dma.done.wait (%p15465_p13), [#allocation10], 2048  }
  0x88   : > { %9450 = vsyncadd (%p15466_p6), [#allocation10], 4294965248  ;;  %v14925_v0 = vmov 0.0|0.0   ;;  %v14923_v1 = vmov 0.0   ;;  %v1004_v2 = vld [vmem:[#allocation6] sm:$0xff]  ;;  %v1005_v3 = vld [vmem:[#allocation6 + $0x8] sm:$0xff]  ;;  %v344_v47 = vlaneseq }
  0x89   : > { %7699 = vmatprep.subr.bf16.mxu0 %v14925_v0  ;;  %1218 = vmatprep.mubr.f32.mxu0 %v14923_v1  ;;  %v1006_v4 = vld [vmem:[#allocation6 + $0x10] sm:$0xff]  ;;  %v7700_v5 = vpack.c.bf16 %v1005_v3, %v1004_v2  ;;  %v1007_v6 = vld [vmem:[#allocation6 + $0x18] sm:$0xff]  ;;  %v1008_v8 = vld [vmem:[#allocation6 + $0x20] sm:$0xff]  ;;  %v9769_v54 = vrot.slane %v14923_v1, 7  ;;  %vm9479_vm4 = vmmov 0   ;;  %s14577_s21 = scalar_lea.vmem [#allocation11], %s6443_s23 }
  0x8a   : > { %v7703_v7 = vpack.c.bf16 %v1007_v6, %v1006_v4  ;;  %v1009_v9 = vld [vmem:[#allocation6 + $0x28] sm:$0xff]  ;;  %v1010_v11 = vld [vmem:[#allocation6 + $0x30] sm:$0xff]  ;;  %v1011_v12 = vld [vmem:[#allocation6 + $0x38] sm:$0xff]  ;;  %v9765_v51 = vshrl.u32 %v344_v47, 7  ;;  %s7228_s16 = sshll.u32 %s9545_s28, 13  ;;  %s6330_s29 = sshll.u32 %s14577_s21, 4  ;;  %s14865_s29 = int_to_ptr.vmem [resolvable:$true] %s6330_s29 }
  0x8b   : > { %7701 = vmatpush1.bf16.msra.mxu0 %v7700_v5  ;;  %v7706_v10 = vpack.c.bf16 %v1009_v9, %v1008_v8  ;;  %v7709_v13 = vpack.c.bf16 %v1011_v12, %v1010_v11  ;;  %v1012_v14 = vld [vmem:[#allocation6 + $0x40] sm:$0xff]  ;;  %v1013_v15 = vld [vmem:[#allocation6 + $0x48] sm:$0xff]  ;;  %v1014_v17 = vld [vmem:[#allocation6 + $0x50] sm:$0xff]  ;;  %15468 = vst [vmem:[#allocation18_spill] sm:$0xff] %v9769_v54  ;;  %s14863_s30 = scalar_lea.hbm %s14918_s7, %s7228_s16  ;;  %s6316_s9 = scalar_lea.sflag [#allocation5], %s9729_s17 }
  0x8c   : > { %7702 = vmatprep.subr.bf16.mxu0 %v14925_v0  ;;  %v7712_v16 = vpack.c.bf16 %v1013_v15, %v1012_v14  ;;  %v1015_v18 = vld [vmem:[#allocation6 + $0x58] sm:$0xff]  ;;  %v1016_v20 = vld [vmem:[#allocation6 + $0x60] sm:$0xff]  ;;  %v1017_v21 = vld [vmem:[#allocation6 + $0x68] sm:$0xff]  ;;  %15467 = vst [vmem:[#allocation17_spill] sm:$0xff] %v9765_v51  ;;  %vm7229_vm0 = vcmp.ne.s32.totalorder %v9765_v51, 0  ;;  %vm634_vm1 = vcmp.lt.s32.totalorder %v9765_v51, 1 }
  0x8d   : > { %v7715_v19 = vpack.c.bf16 %v1015_v18, %v1014_v17  ;;  %v7718_v22 = vpack.c.bf16 %v1017_v21, %v1016_v20  ;;  %v1018_v23 = vld [vmem:[#allocation6 + $0x70] sm:$0xff]  ;;  %v1019_v24 = vld [vmem:[#allocation6 + $0x78] sm:$0xff]  ;;  %v1020_v26 = vld [vmem:[#allocation6 + $0x80] sm:$0xff]  ;;  %vm855_vm2 = vcmp.lt.s32.totalorder %v9765_v51, 7  ;;  %s9395_s13 = scalar_lea.vmem %s14865_s29, 8192  ;;  %s9481_s28 = smov [#allocation11]  }
  0x8e   : > { %v7721_v25 = vpack.c.bf16 %v1019_v24, %v1018_v23  ;;  %v1021_v27 = vld [vmem:[#allocation6 + $0x88] sm:$0xff]  ;;  %v1022_v29 = vld [vmem:[#allocation6 + $0x90] sm:$0xff]  ;;  %v1023_v30 = vld [vmem:[#allocation6 + $0x98] sm:$0xff]  ;;  %p9396_p10 = scmp.ne.s32.totalorder %s14865_s29, %s9395_s13  ;;  %s9399_s15 = sshll.u32 %s9481_s28, 4  ;;  %s9400_s15 = int_to_ptr.vmem [resolvable:$false] %s9399_s15 }
  0x8f   : > { %7704 = vmatpush1.bf16.msra.mxu0 %v7703_v7  ;;  %v7724_v28 = vpack.c.bf16 %v1021_v27, %v1020_v26  ;;  %v7727_v31 = vpack.c.bf16 %v1023_v30, %v1022_v29  ;;  %v1024_v32 = vld [vmem:[#allocation6 + $0xa0] sm:$0xff]  ;;  %v1025_v33 = vld [vmem:[#allocation6 + $0xa8] sm:$0xff]  ;;  %v1026_v35 = vld [vmem:[#allocation6 + $0xb0] sm:$0xff]  ;;  %s9401_s10 = scalar_lea.vmem %s9400_s15, 16384  ;;  %p9402_p12 = scmp.lt.s32.totalorder %s14865_s29, %s9400_s15 }
  0x90   : > { %7705 = vmatprep.subr.bf16.mxu0 %v14925_v0  ;;  %v7730_v34 = vpack.c.bf16 %v1025_v33, %v1024_v32  ;;  %v1027_v36 = vld [vmem:[#allocation6 + $0xb8] sm:$0xff]  ;;  %v1028_v38 = vld [vmem:[#allocation6 + $0xc0] sm:$0xff]  ;;  %v1029_v39 = vld [vmem:[#allocation6 + $0xc8] sm:$0xff]  ;;  %p9397_p3 = pnand %p9396_p10, %p9678_p5  ;;  %p9403_p1 = scmp.lt.s32.totalorder %s9401_s10, %s9395_s13 }
  0x91   : > { %v7733_v37 = vpack.c.bf16 %v1027_v36, %v1026_v35  ;;  %v7736_v40 = vpack.c.bf16 %v1029_v39, %v1028_v38  ;;  %v1030_v41 = vld [vmem:[#allocation6 + $0xd0] sm:$0xff]  ;;  %v1031_v42 = vld [vmem:[#allocation6 + $0xd8] sm:$0xff]  ;;  %v1032_v44 = vld [vmem:[#allocation6 + $0xe0] sm:$0xff] }
  0x92   : > { %v7739_v43 = vpack.c.bf16 %v1031_v42, %v1030_v41  ;;  %v1033_v45 = vld [vmem:[#allocation6 + $0xe8] sm:$0xff]  ;;  %v1034_v48 = vld [vmem:[#allocation6 + $0xf0] sm:$0xff]  ;;  %v1035_v49 = vld [vmem:[#allocation6 + $0xf8] sm:$0xff]  ;;  %p9398_p7 = pneg %p9397_p3  ;;  %p9404_p2 = por %p9403_p1, %p9402_p12 }
  0x93   : > { %7707 = vmatpush1.bf16.msra.mxu0 %v7706_v10  ;;  %v7742_v46 = vpack.c.bf16 %v1033_v45, %v1032_v44  ;;  %v7745_v50 = vpack.c.bf16 %v1035_v49, %v1034_v48  ;;  %v1036_v52 = vld [vmem:[#allocation6 + $0x100] sm:$0xff]  ;;  %v1037_v53 = vld [vmem:[#allocation6 + $0x108] sm:$0xff]  ;;  %v1038_v58 = vld [vmem:[#allocation6 + $0x110] sm:$0xff] }
  0x94   : > { %7708 = vmatprep.subr.bf16.mxu0 %v14925_v0  ;;  %v7748_v55 = vpack.c.bf16 %v1037_v53, %v1036_v52  ;;  %v9773_v56 = vld [vmem:[%s9735_s8] sm:$0xff]  ;;  %v9777_v57 = vld [vmem:[%s9735_s8 + $0x8] sm:$0xff]  ;;  %v1039_v59 = vld [vmem:[#allocation6 + $0x118] sm:$0xff]  ;;  %p9405_p4 = pnand %p9404_p2, %p9398_p7 }
  0x95   : > { %v563_v60 = vrot.slane %v9773_v56, 7  ;;  %v599_v61 = vrot.slane %v9777_v57, 7  ;;  %v7751_v62 = vpack.c.bf16 %v1039_v59, %v1038_v58  ;;  %v1040_v63 = vld [vmem:[#allocation6 + $0x120] sm:$0xff]  ;;  %v1041_v2 = vld [vmem:[#allocation6 + $0x128] sm:$0xff]  ;;  %v9794_v4 = vld [vmem:[%s9735_s8 + $0x10] sm:$0xff] }
  0x96   : > { %v7754_v5 = vpack.c.bf16 %v1041_v2, %v1040_v63  ;;  %v9797_v6 = vld [vmem:[%s9735_s8 + $0x18] sm:$0xff]  ;;  %v1042_v7 = vld [vmem:[#allocation6 + $0x130] sm:$0xff]  ;;  %v564_v10 = vrot.slane %v9794_v4, 7  ;;  %v1045_v14 = vld [vmem:[#allocation6 + $0x148] sm:$0xff] }
  0x97   : > { %7710 = vmatpush1.bf16.msra.mxu0 %v7709_v13  ;;  %v9791_v3 = vsel %vm634_vm1, %v599_v61, %v563_v60  ;;  %v1043_v8 = vld [vmem:[#allocation6 + $0x138] sm:$0xff]  ;;  %v9806_v9 = vsel %vm634_vm1, %v563_v60, %v599_v61  ;;  %v600_v11 = vrot.slane %v9797_v6, 7  ;;  %v1044_v13 = vld [vmem:[#allocation6 + $0x140] sm:$0xff]  ;;  %v9821_v18 = vld [vmem:[%s9735_s8 + $0x28] sm:$0xff] }
  0x98   : > { %7711 = vmatprep.subr.bf16.mxu0 %v14925_v0  ;;  %v7757_v12 = vpack.c.bf16 %v1043_v8, %v1042_v7  ;;  %v7760_v17 = vpack.c.bf16 %v1045_v14, %v1044_v13  ;;  %v1047_v20 = vld [vmem:[#allocation6 + $0x158] sm:$0xff]  ;;  %v601_v23 = vrot.slane %v9821_v18, 7  ;;  %v1049_v26 = vld [vmem:[#allocation6 + $0x168] sm:$0xff]  ;;  %v1056_v49 = vld [vmem:[#allocation6 + $0x1a0] sm:$0xff] }
  0x99   : > { %v9815_v15 = vsel %vm634_vm1, %v600_v11, %v564_v10  ;;  %v9830_v21 = vsel %vm634_vm1, %v564_v10, %v600_v11  ;;  %v9845_v30 = vld [vmem:[%s9735_s8 + $0x38] sm:$0xff]  ;;  %v1053_v38 = vld [vmem:[#allocation6 + $0x188] sm:$0xff]  ;;  %v9914_v63 = vld [vmem:[%s9735_s8 + $0x60] sm:$0xff] }
  0x9a   : > { %15469 = vst [vmem:[#allocation19_spill] sm:$0xff] %v9815_v15  ;;  %15470 = vst [vmem:[#allocation20_spill] sm:$0xff] %v9830_v21  ;;  %v1051_v32 = vld [vmem:[#allocation6 + $0x178] sm:$0xff]  ;;  %v602_v35 = vrot.slane %v9845_v30, 7  ;;  %v9869_v42 = vld [vmem:[%s9735_s8 + $0x48] sm:$0xff]  ;;  %v569_v10 = vrot.slane %v9914_v63, 7 }
  0x9b   : > { %7713 = vmatpush1.bf16.msra.mxu0 %v7712_v16  ;;  %v9818_v16 = vld [vmem:[%s9735_s8 + $0x20] sm:$0xff]  ;;  %v1055_v44 = vld [vmem:[#allocation6 + $0x198] sm:$0xff]  ;;  %v603_v47 = vrot.slane %v9869_v42, 7  ;;  %v9917_v2 = vld [vmem:[%s9735_s8 + $0x68] sm:$0xff] }
  0x9c   : > { %7714 = vmatprep.subr.bf16.mxu0 %v14925_v0  ;;  %v9893_v58 = vld [vmem:[%s9735_s8 + $0x58] sm:$0xff]  ;;  %v605_v11 = vrot.slane %v9917_v2, 7  ;;  %v9937_v14 = vld [vmem:[%s9735_s8 + $0x70] sm:$0xff] }
  0x9d   : > { %v604_v61 = vrot.slane %v9893_v58, 7  ;;  %v1059_v7 = vld [vmem:[#allocation6 + $0x1b8] sm:$0xff] }
  0x9e   : > { %v9934_v13 = vsel %vm634_vm1, %v605_v11, %v569_v10 }
  0x9f   : > { %7716 = vmatpush1.bf16.msra.mxu0 %v7715_v19  ;;  %v1046_v19 = vld [vmem:[#allocation6 + $0x150] sm:$0xff]  ;;  %15479 = vst [vmem:[#allocation29_spill] sm:$0xff] %v9934_v13 }
  0xa0   : > { %7717 = vmatprep.subr.bf16.mxu0 %v14925_v0  ;;  %v7763_v24 = vpack.c.bf16 %v1047_v20, %v1046_v19  ;;  %v9948_v19 = vsel %vm634_vm1, %v569_v10, %v605_v11  ;;  %v570_v20 = vrot.slane %v9937_v14, 7  ;;  %v10027_v10 = vld [vmem:[%s9735_s8 + $0xb0] sm:$0xff]  ;;  %v10030_v11 = vld [vmem:[%s9735_s8 + $0xb8] sm:$0xff] }
  0xa1   : > { %15480 = vst [vmem:[#allocation30_spill] sm:$0xff] %v9948_v19 }
  0xa3   : > { %7719 = vmatpush1.bf16.msra.mxu0 %v7718_v22  ;;  %v565_v22 = vrot.slane %v9818_v16, 7 }
  0xa4   : > { %7720 = vmatprep.subr.bf16.mxu0 %v14925_v0 }
  0xa5   : > { %v9839_v27 = vsel %vm634_vm1, %v601_v23, %v565_v22  ;;  %v9854_v33 = vsel %vm634_vm1, %v565_v22, %v601_v23 }
  0xa6   : > { %15471 = vst [vmem:[#allocation21_spill] sm:$0xff] %v9839_v27  ;;  %15472 = vst [vmem:[#allocation22_spill] sm:$0xff] %v9854_v33 }
  0xa7   : > { %7722 = vmatpush1.bf16.msra.mxu0 %v7721_v25  ;;  %v1048_v25 = vld [vmem:[#allocation6 + $0x160] sm:$0xff] }
  0xa8   : > { %7723 = vmatprep.subr.bf16.mxu0 %v14925_v0  ;;  %v7766_v29 = vpack.c.bf16 %v1049_v26, %v1048_v25  ;;  %v9962_v25 = vld [vmem:[%s9735_s8 + $0x88] sm:$0xff]  ;;  %v1060_v26 = vld [vmem:[#allocation6 + $0x1c0] sm:$0xff] }
  0xab   : > { %7725 = vmatpush1.bf16.msra.mxu0 %v7724_v28  ;;  %v9842_v28 = vld [vmem:[%s9735_s8 + $0x30] sm:$0xff] }
  0xac   : > { %7726 = vmatprep.subr.bf16.mxu0 %v14925_v0 }
  0xaf   : > { %7728 = vmatpush1.bf16.msra.mxu0 %v7727_v31  ;;  %v1050_v31 = vld [vmem:[#allocation6 + $0x170] sm:$0xff] }
  0xb0   : > { %7729 = vmatprep.subr.bf16.mxu0 %v14925_v0  ;;  %v7769_v36 = vpack.c.bf16 %v1051_v32, %v1050_v31 }
  0xb3   : > { %7731 = vmatpush1.bf16.msra.mxu0 %v7730_v34  ;;  %v566_v34 = vrot.slane %v9842_v28, 7 }
  0xb4   : > { %7732 = vmatprep.subr.bf16.mxu0 %v14925_v0 }
  0xb5   : > { %v9863_v39 = vsel %vm634_vm1, %v602_v35, %v566_v34  ;;  %v9878_v45 = vsel %vm634_vm1, %v566_v34, %v602_v35  ;;  %v607_v34 = vrot.slane %v9962_v25, 7 }
  0xb6   : > { %15473 = vst [vmem:[#allocation23_spill] sm:$0xff] %v9863_v39  ;;  %15474 = vst [vmem:[#allocation24_spill] sm:$0xff] %v9878_v45 }
  0xb7   : > { %7734 = vmatpush1.bf16.msra.mxu0 %v7733_v37  ;;  %v1052_v37 = vld [vmem:[#allocation6 + $0x180] sm:$0xff] }
  0xb8   : > { %7735 = vmatprep.subr.bf16.mxu0 %v14925_v0  ;;  %v7772_v41 = vpack.c.bf16 %v1053_v38, %v1052_v37  ;;  %v9982_v37 = vld [vmem:[%s9735_s8 + $0x90] sm:$0xff]  ;;  %v9985_v38 = vld [vmem:[%s9735_s8 + $0x98] sm:$0xff] }
  0xbb   : > { %7737 = vmatpush1.bf16.msra.mxu0 %v7736_v40  ;;  %v9866_v40 = vld [vmem:[%s9735_s8 + $0x40] sm:$0xff] }
  0xbc   : > { %7738 = vmatprep.subr.bf16.mxu0 %v14925_v0 }
  0xbf   : > { %7740 = vmatpush1.bf16.msra.mxu0 %v7739_v43  ;;  %v1054_v43 = vld [vmem:[#allocation6 + $0x190] sm:$0xff] }
  0xc0   : > { %7741 = vmatprep.subr.bf16.mxu0 %v14925_v0  ;;  %v7775_v48 = vpack.c.bf16 %v1055_v44, %v1054_v43  ;;  %v572_v43 = vrot.slane %v9982_v37, 7  ;;  %v608_v44 = vrot.slane %v9985_v38, 7 }
  0xc3   : > { %7743 = vmatpush1.bf16.msra.mxu0 %v7742_v46  ;;  %v567_v46 = vrot.slane %v9866_v40, 7 }
  0xc4   : > { %7744 = vmatprep.subr.bf16.mxu0 %v14925_v0 }
  0xc5   : > { %v9887_v52 = vsel %vm634_vm1, %v603_v47, %v567_v46  ;;  %v9902_v59 = vsel %vm634_vm1, %v567_v46, %v603_v47  ;;  %v10001_v46 = vsel %vm634_vm1, %v608_v44, %v572_v43  ;;  %v10004_v47 = vld [vmem:[%s9735_s8 + $0xa0] sm:$0xff] }
  0xc6   : > { %15475 = vst [vmem:[#allocation25_spill] sm:$0xff] %v9887_v52  ;;  %15476 = vst [vmem:[#allocation26_spill] sm:$0xff] %v9902_v59 }
  0xc7   : > { %7746 = vmatpush1.bf16.msra.mxu0 %v7745_v50  ;;  %v1057_v50 = vld [vmem:[#allocation6 + $0x1a8] sm:$0xff]  ;;  %15485 = vst [vmem:[#allocation35_spill] sm:$0xff] %v10001_v46 }
  0xc8   : > { %7747 = vmatprep.subr.bf16.mxu0 %v14925_v0  ;;  %v7778_v53 = vpack.c.bf16 %v1057_v50, %v1056_v49  ;;  %v1062_v49 = vld [vmem:[#allocation6 + $0x1d0] sm:$0xff]  ;;  %v1063_v50 = vld [vmem:[#allocation6 + $0x1d8] sm:$0xff] }
  0xca   : > { %6450 = vmatmul.mubr.msk.f32.vlgmr.msra.gmra.mrb[0].mxu0 %vm7229_vm0, %v9769_v54 }
  0xcb   : > { %7749 = vmatpush1.bf16.msra.mxu0 %v7748_v55  ;;  %1223 = vmatprep.mubr.f32.mxu0 %v14923_v1  ;;  %v9890_v55 = vld [vmem:[%s9735_s8 + $0x50] sm:$0xff]  ;;  %v10097_v1 = vld [vmem:[%s9735_s8 + $0xe8] sm:$0xff] }
  0xcc   : > { %7750 = vmatprep.subr.bf16.mxu0 %v14925_v0  ;;  %v568_v60 = vrot.slane %v9890_v55, 7  ;;  %15499 = vst [vmem:[#allocation49_spill] sm:$0xff] %v10097_v1 }
  0xce   : > { %1224 = vmatmul.mubr.f32.gmra.mrb[2].mxu0 %v9769_v54  ;;  %v9925_v8 = vsel %vm634_vm1, %v568_v60, %v604_v61 }
  0xcf   : > { %1228 = vmatprep.mubr.f32.mxu0 %v9773_v56  ;;  %7752 = vmatpush1.bf16.msra.mxu0 %v7751_v62  ;;  %v9911_v62 = vsel %vm634_vm1, %v604_v61, %v568_v60  ;;  %15478 = vst [vmem:[#allocation28_spill] sm:$0xff] %v9925_v8  ;;  %v573_v60 = vrot.slane %v10004_v47, 7 }
  0xd0   : > { %7753 = vmatprep.subr.bf16.mxu0 %v14925_v0  ;;  %15477 = vst [vmem:[#allocation27_spill] sm:$0xff] %v9911_v62 }
  0xd2   : > { %6452 = vmatmul.mubr.msk.f32.gmra.mrb[4].mxu0 %vm7229_vm0, %v9791_v3 }
  0xd3   : > { %1233 = vmatprep.mubr.f32.mxu0 %v9777_v57  ;;  %7755 = vmatpush1.bf16.msra.mxu0 %v7754_v5  ;;  %v1058_v5 = vld [vmem:[#allocation6 + $0x1b0] sm:$0xff] }
  0xd4   : > { %7756 = vmatprep.subr.bf16.mxu0 %v14925_v0 }
  0xd6   : > { %1234 = vmatmul.mubr.f32.gmra.mrb[6].mxu0 %v9806_v9 }
  0xd7   : > { %1238 = vmatprep.mubr.f32.mxu0 %v9794_v4  ;;  %7758 = vmatpush1.bf16.msra.mxu0 %v7757_v12  ;;  %v7781_v12 = vpack.c.bf16 %v1059_v7, %v1058_v5  ;;  %v7787_v5 = vpack.c.bf16 %v1063_v50, %v1062_v49 }
  0xd8   : > { %7759 = vmatprep.subr.bf16.mxu0 %v14925_v0 }
  0xda   : > { %6454 = vmatmul.mubr.msk.f32.gmra.mrb[8].mxu0 %vm7229_vm0, %v9815_v15 }
  0xdb   : > { %1243 = vmatprep.mubr.f32.mxu0 %v9797_v6  ;;  %7761 = vmatpush1.bf16.msra.mxu0 %v7760_v17  ;;  %v9940_v17 = vld [vmem:[%s9735_s8 + $0x78] sm:$0xff] }
  0xdc   : > { %7762 = vmatprep.subr.bf16.mxu0 %v14925_v0  ;;  %v606_v22 = vrot.slane %v9940_v17, 7 }
  0xde   : > { %1244 = vmatmul.mubr.f32.gmra.mrb[10].mxu0 %v9830_v21  ;;  %v9956_v23 = vsel %vm634_vm1, %v606_v22, %v570_v20  ;;  %v9970_v31 = vsel %vm634_vm1, %v570_v20, %v606_v22  ;;  %v574_v20 = vrot.slane %v10027_v10, 7  ;;  %v610_v22 = vrot.slane %v10030_v11, 7 }
  0xdf   : > { %1248 = vmatprep.mubr.f32.mxu0 %v9818_v16  ;;  %7764 = vmatpush1.bf16.msra.mxu0 %v7763_v24  ;;  %15481 = vst [vmem:[#allocation31_spill] sm:$0xff] %v9956_v23  ;;  %v9959_v24 = vld [vmem:[%s9735_s8 + $0x80] sm:$0xff]  ;;  %15482 = vst [vmem:[#allocation32_spill] sm:$0xff] %v9970_v31 }
  0xe0   : > { %7765 = vmatprep.subr.bf16.mxu0 %v14925_v0  ;;  %v571_v32 = vrot.slane %v9959_v24, 7 }
  0xe2   : > { %6456 = vmatmul.mubr.msk.f32.gmra.mrb[12].mxu0 %vm7229_vm0, %v9839_v27 }
  0xe3   : > { %1253 = vmatprep.mubr.f32.mxu0 %v9821_v18  ;;  %7767 = vmatpush1.bf16.msra.mxu0 %v7766_v29  ;;  %v1061_v29 = vld [vmem:[#allocation6 + $0x1c8] sm:$0xff] }
  0xe4   : > { %7768 = vmatprep.subr.bf16.mxu0 %v14925_v0  ;;  %v7784_v35 = vpack.c.bf16 %v1061_v29, %v1060_v26  ;;  %v10046_v26 = vsel %vm634_vm1, %v610_v22, %v574_v20  ;;  %v10049_v29 = vld [vmem:[%s9735_s8 + $0xc0] sm:$0xff] }
  0xe5   : > { %15489 = vst [vmem:[#allocation39_spill] sm:$0xff] %v10046_v26  ;;  %15490 = vst [vmem:[#allocation40_spill] sm:$0xff] %v10049_v29 }
  0xe6   : > { %1254 = vmatmul.mubr.f32.gmra.mrb[14].mxu0 %v9854_v33 }
  0xe7   : > { %1258 = vmatprep.mubr.f32.mxu0 %v9842_v28  ;;  %7770 = vmatpush1.bf16.msra.mxu0 %v7769_v36  ;;  %v9979_v36 = vsel %vm634_vm1, %v607_v34, %v571_v32 }
  0xe8   : > { %7771 = vmatprep.subr.bf16.mxu0 %v14925_v0  ;;  %15483 = vst [vmem:[#allocation33_spill] sm:$0xff] %v9979_v36 }
  0xea   : > { %6458 = vmatmul.mubr.msk.f32.gmra.mrb[16].mxu0 %vm7229_vm0, %v9863_v39 }
  0xeb   : > { %1263 = vmatprep.mubr.f32.mxu0 %v9845_v30  ;;  %7773 = vmatpush1.bf16.msra.mxu0 %v7772_v41  ;;  %v9993_v41 = vsel %vm634_vm1, %v571_v32, %v607_v34  ;;  %v10052_v32 = vld [vmem:[%s9735_s8 + $0xc8] sm:$0xff]  ;;  %v1064_v34 = vld [vmem:[#allocation6 + $0x1e0] sm:$0xff] }
  0xec   : > { %7774 = vmatprep.subr.bf16.mxu0 %v14925_v0  ;;  %15484 = vst [vmem:[#allocation34_spill] sm:$0xff] %v9993_v41  ;;  %15491 = vst [vmem:[#allocation41_spill] sm:$0xff] %v10052_v32  ;;  %v611_v49 = vrot.slane %v10052_v32, 7 }
  0xee   : > { %1264 = vmatmul.mubr.f32.gmra.mrb[18].mxu0 %v9878_v45 }
  0xef   : > { %1268 = vmatprep.mubr.f32.mxu0 %v9866_v40  ;;  %7776 = vmatpush1.bf16.msra.mxu0 %v7775_v48  ;;  %v10007_v48 = vld [vmem:[%s9735_s8 + $0xa8] sm:$0xff] }
  0xf0   : > { %7777 = vmatprep.subr.bf16.mxu0 %v14925_v0  ;;  %v609_v61 = vrot.slane %v10007_v48, 7 }
  0xf2   : > { %6460 = vmatmul.mubr.msk.f32.gmra.mrb[20].mxu0 %vm7229_vm0, %v9887_v52  ;;  %v10024_v7 = vsel %vm634_vm1, %v609_v61, %v573_v60 }
  0xf3   : > { %1273 = vmatprep.mubr.f32.mxu0 %v9869_v42  ;;  %7779 = vmatpush1.bf16.msra.mxu0 %v7778_v53  ;;  %v10015_v53 = vsel %vm634_vm1, %v572_v43, %v608_v44  ;;  %15487 = vst [vmem:[#allocation37_spill] sm:$0xff] %v10024_v7  ;;  %v10060_v43 = vsel %vm634_vm1, %v574_v20, %v610_v22  ;;  %v575_v44 = vrot.slane %v10049_v29, 7 }
  0xf4   : > { %7780 = vmatprep.subr.bf16.mxu0 %v14925_v0  ;;  %15486 = vst [vmem:[#allocation36_spill] sm:$0xff] %v10015_v53  ;;  %15492 = vst [vmem:[#allocation42_spill] sm:$0xff] %v10060_v43 }
  0xf5   : > { %v10083_v20 = vsel %vm634_vm1, %v575_v44, %v611_v49 }
  0xf6   : > { %1274 = vmatmul.mubr.f32.gmra.mrb[22].mxu0 %v9902_v59  ;;  %15496 = vst [vmem:[#allocation46_spill] sm:$0xff] %v10083_v20 }
  0xf7   : > { %1278 = vmatprep.mubr.f32.mxu0 %v9890_v55  ;;  %7782 = vmatpush1.bf16.msra.mxu0 %v7781_v12  ;;  %v10038_v12 = vsel %vm634_vm1, %v573_v60, %v609_v61  ;;  %v10069_v60 = vsel %vm634_vm1, %v611_v49, %v575_v44  ;;  %v10072_v61 = vld [vmem:[%s9735_s8 + $0xd0] sm:$0xff]  ;;  %v1067_v49 = vld [vmem:[#allocation6 + $0x1f8] sm:$0xff] }
  0xf8   : > { %7783 = vmatprep.subr.bf16.mxu0 %v14925_v0  ;;  %15488 = vst [vmem:[#allocation38_spill] sm:$0xff] %v10038_v12  ;;  %15493 = vst [vmem:[#allocation43_spill] sm:$0xff] %v10069_v60  ;;  %v576_v22 = vrot.slane %v10072_v61, 7  ;;  %v1066_v44 = vld [vmem:[#allocation6 + $0x1f0] sm:$0xff] }
  0xf9   : > { %15494 = vst [vmem:[#allocation44_spill] sm:$0xff] %v10072_v61 }
  0xfa   : > { %6462 = vmatmul.mubr.msk.f32.gmra.mrb[24].mxu0 %vm7229_vm0, %v9911_v62 }
  0xfb   : > { %1283 = vmatprep.mubr.f32.mxu0 %v9893_v58  ;;  %7785 = vmatpush1.bf16.msra.mxu0 %v7784_v35  ;;  %v1065_v35 = vld [vmem:[#allocation6 + $0x1e8] sm:$0xff] }
  0xfc   : > { %7786 = vmatprep.subr.bf16.mxu0 %v14925_v0  ;;  %v7790_v50 = vpack.c.bf16 %v1065_v35, %v1064_v34 }
  0xfe   : > { %1284 = vmatmul.mubr.f32.gmra.mrb[26].mxu0 %v9925_v8 }
  0xff   : > { %1288 = vmatprep.mubr.f32.mxu0 %v9914_v63  ;;  %7788 = vmatpush1.bf16.msra.mxu0 %v7787_v5  ;;  %v10075_v5 = vld [vmem:[%s9735_s8 + $0xd8] sm:$0xff] }
 0x100   : > { %7789 = vmatprep.subr.bf16.mxu0 %v14925_v0  ;;  %15495 = vst [vmem:[#allocation45_spill] sm:$0xff] %v10075_v5  ;;  %v612_v34 = vrot.slane %v10075_v5, 7 }
 0x102   : > { %6464 = vmatmul.mubr.msk.f32.gmra.mrb[28].mxu0 %vm7229_vm0, %v9934_v13  ;;  %v10091_v35 = vsel %vm634_vm1, %v612_v34, %v576_v22 }
 0x103   : > { %1293 = vmatprep.mubr.f32.mxu0 %v9917_v2  ;;  %7791 = vmatpush1.bf16.msra.mxu0 %v7790_v50  ;;  %15497 = vst [vmem:[#allocation47_spill] sm:$0xff] %v10091_v35  ;;  %v10094_v50 = vld [vmem:[%s9735_s8 + $0xe0] sm:$0xff] }
 0x104   : > { %7792 = vmatprep.subr.bf16.mxu0 %v14925_v0  ;;  %15498 = vst [vmem:[#allocation48_spill] sm:$0xff] %v10094_v50  ;;  %v10105_v0 = vsel %vm634_vm1, %v576_v22, %v612_v34  ;;  %v15504_v22 = vmov 0.0   ;;  %v10127_v34 = vld [vmem:[%s9735_s8 + $0x100] sm:$0xff] }
 0x105   : > { %15500 = vst [vmem:[#allocation50_spill] sm:$0xff] %v10105_v0  ;;  %15505 = vst [vmem:[#allocation53_spill] sm:$0xff] %v10127_v34 }
 0x106   : > { %1294 = vmatmul.mubr.f32.gmra.mrb[30].mxu0 %v9948_v19 }
 0x107   : > { %1298 = vmatprep.mubr.f32.mxu0 %v9937_v14 }
 0x10a   : > { %6466 = vmatmul.mubr.msk.f32.gmra.mrb[32].mxu0 %vm7229_vm0, %v9956_v23 }
 0x10b   : > { %1303 = vmatprep.mubr.f32.mxu0 %v9940_v17 }
 0x10e   : > { %1304 = vmatmul.mubr.f32.gmra.mrb[34].mxu0 %v9970_v31 }
 0x10f   : > { %1308 = vmatprep.mubr.f32.mxu0 %v9959_v24 }
 0x112   : > { %6468 = vmatmul.mubr.msk.f32.gmra.mrb[36].mxu0 %vm7229_vm0, %v9979_v36 }
 0x113   : > { %1313 = vmatprep.mubr.f32.mxu0 %v9962_v25 }
 0x116   : > { %1314 = vmatmul.mubr.f32.gmra.mrb[38].mxu0 %v9993_v41 }
 0x117   : > { %1318 = vmatprep.mubr.f32.mxu0 %v9982_v37 }
 0x11a   : > { %6470 = vmatmul.mubr.msk.f32.gmra.mrb[40].mxu0 %vm7229_vm0, %v10001_v46 }
 0x11b   : > { %1323 = vmatprep.mubr.f32.mxu0 %v9985_v38 }
 0x11e   : > { %1324 = vmatmul.mubr.f32.gmra.mrb[42].mxu0 %v10015_v53 }
 0x11f   : > { %1328 = vmatprep.mubr.f32.mxu0 %v10004_v47 }
 0x122   : > { %6472 = vmatmul.mubr.msk.f32.gmra.mrb[44].mxu0 %vm7229_vm0, %v10024_v7 }
 0x123   : > { %1333 = vmatprep.mubr.f32.mxu0 %v10007_v48 }
 0x126   : > { %1334 = vmatmul.mubr.f32.gmra.mrb[46].mxu0 %v10038_v12 }
 0x127   : > { %1338 = vmatprep.mubr.f32.mxu0 %v10027_v10 }
 0x12a   : > { %6474 = vmatmul.mubr.msk.f32.gmra.mrb[48].mxu0 %vm7229_vm0, %v10046_v26 }
 0x12b   : > { %1343 = vmatprep.mubr.f32.mxu0 %v10030_v11 }
 0x12e   : > { %1344 = vmatmul.mubr.f32.gmra.mrb[50].mxu0 %v10060_v43 }
 0x12f   : > { %1348 = vmatprep.mubr.f32.mxu0 %v10049_v29  ;;  %v7793_v29 = vpack.c.bf16 %v1067_v49, %v1066_v44  ;;  %v10130_v44 = vld [vmem:[%s9735_s8 + $0x108] sm:$0xff]  ;;  %v581_v49 = vrot.slane %v10127_v34, 7 }
 0x130   : > { %15506 = vst [vmem:[#allocation54_spill] sm:$0xff] %v10130_v44 }
 0x131   : > { %7794 = vmatpush1.bf16.msra.mxu0 %v7793_v29 }
 0x132   : > { %6476 = vmatmul.mubr.msk.f32.gmra.mrb[52].mxu0 %vm7229_vm0, %v10069_v60 }
 0x133   : > { %1353 = vmatprep.mubr.f32.mxu0 %v10052_v32  ;;  %v613_v32 = vrot.slane %v10097_v1, 7 }
 0x136   : > { %1354 = vmatmul.mubr.f32.gmra.mrb[54].mxu0 %v10083_v20  ;;  %v15501_v20 = vmov 0.0|0.0  }
 0x137   : > { %1358 = vmatprep.mubr.f32.mxu0 %v10072_v61  ;;  %v577_v61 = vrot.slane %v10094_v50, 7  ;;  %7795 = vmatprep.subr.bf16.mxu0 %v15501_v20 }
 0x139   : > { %v10122_v29 = vsel %vm634_vm1, %v577_v61, %v613_v32 }
 0x13a   : > { %6478 = vmatmul.mubr.msk.f32.gmra.mrb[56].mxu0 %vm7229_vm0, %v10091_v35  ;;  %15503 = vst [vmem:[#allocation52_spill] sm:$0xff] %v10122_v29 }
 0x13b   : > { %1363 = vmatprep.mubr.f32.mxu0 %v10075_v5  ;;  %v10114_v5 = vsel %vm634_vm1, %v613_v32, %v577_v61  ;;  %v10145_v61 = vld [vmem:[%s9735_s8 + $0x110] sm:$0xff] }
 0x13c   : > { %15502 = vst [vmem:[#allocation51_spill] sm:$0xff] %v10114_v5  ;;  %15508 = vst [vmem:[#allocation56_spill] sm:$0xff] %v10145_v61 }
 0x13e   : > { %1364 = vmatmul.mubr.f32.gmra.mrb[58].mxu0 %v10105_v0 }
 0x13f   : > { %1368 = vmatprep.mubr.f32.mxu0 %v10094_v50  ;;  %v10148_v50 = vld [vmem:[%s9735_s8 + $0x118] sm:$0xff] }
 0x140   : > { %15509 = vst [vmem:[#allocation57_spill] sm:$0xff] %v10148_v50 }
 0x142   : > { %6480 = vmatmul.mubr.msk.f32.gmra.mrb[60].mxu0 %vm7229_vm0, %v10114_v5 }
 0x143   : > { %1373 = vmatprep.mubr.f32.mxu0 %v10097_v1  ;;  %v617_v1 = vrot.slane %v10130_v44, 7 }
 0x145   : > { %v10142_v32 = vsel %vm634_vm1, %v617_v1, %v581_v49 }
 0x146   : > { %1374 = vmatmul.mubr.f32.gmra.mrb[62].mxu0 %v10122_v29  ;;  %15507 = vst [vmem:[#allocation55_spill] sm:$0xff] %v10142_v32  ;;  %v618_v29 = vrot.slane %v10148_v50, 7 }
 0x147   : > { %1378 = vmatprep.mubr.f32.mxu0 %v15504_v22 }
 0x14a   : > { %6482 = vmatmul.mubr.msk.f32.gmra.mrb[64].mxu0 %vm7229_vm0, %v9769_v54 }
 0x14b   : > { %1383 = vmatprep.mubr.f32.mxu0 %v15504_v22 }
 0x14e   : > { %1384 = vmatmul.mubr.f32.gmra.mrb[66].mxu0 %v9769_v54  ;;  %v10156_v54 = vsel %vm634_vm1, %v581_v49, %v617_v1  ;;  %v10169_v1 = vld [vmem:[%s9735_s8 + $0x120] sm:$0xff]  ;;  %v10172_v49 = vld [vmem:[%s9735_s8 + $0x128] sm:$0xff] }
 0x14f   : > { %1388 = vmatprep.mubr.f32.mxu0 %v10127_v34  ;;  %15510 = vst [vmem:[#allocation58_spill] sm:$0xff] %v10156_v54  ;;  %v582_v34 = vrot.slane %v10145_v61, 7  ;;  %15512 = vst [vmem:[#allocation60_spill] sm:$0xff] %v10169_v1 }
 0x150   : > { %15513 = vst [vmem:[#allocation61_spill] sm:$0xff] %v10172_v49 }
 0x151   : > { %v10164_v5 = vsel %vm634_vm1, %v618_v29, %v582_v34 }
 0x152   : > { %6484 = vmatmul.mubr.msk.f32.gmra.mrb[68].mxu0 %vm7229_vm0, %v10142_v32  ;;  %15511 = vst [vmem:[#allocation59_spill] sm:$0xff] %v10164_v5  ;;  %v785_v32 = vrot.slane %v9794_v4, 1  ;;  %v10186_v4 = vsel %vm634_vm1, %v582_v34, %v618_v29  ;;  %v10201_v29 = vld [vmem:[%s9735_s8 + $0x130] sm:$0xff]  ;;  %v10204_v34 = vld [vmem:[%s9735_s8 + $0x138] sm:$0xff] }
 0x153   : > { %1393 = vmatprep.mubr.f32.mxu0 %v10130_v44  ;;  %v821_v44 = vrot.slane %v9797_v6, 1  ;;  %15514 = vst [vmem:[#allocation62_spill] sm:$0xff] %v10186_v4  ;;  %v583_v6 = vrot.slane %v10169_v1, 7  ;;  %15516 = vst [vmem:[#allocation64_spill] sm:$0xff] %v10201_v29 }
 0x154   : > { %15517 = vst [vmem:[#allocation65_spill] sm:$0xff] %v10204_v34 }
 0x155   : > { %v10192_v0 = vsel %vm855_vm2, %v821_v44, %v785_v32 }
 0x156   : > { %1394 = vmatmul.mubr.f32.gmra.mrb[70].mxu0 %v10156_v54  ;;  %v10177_v54 = vsel %vm855_vm2, %v785_v32, %v821_v44  ;;  %v584_v32 = vrot.slane %v10201_v29, 7 }
 0x157   : > { %1398 = vmatprep.mubr.f32.mxu0 %v10145_v61  ;;  %7440 = vmatprep.mubr.f32.mxu1 %v10177_v54  ;;  %v619_v61 = vrot.slane %v10172_v49, 7 }
 0x159   : > { %v10212_v44 = vsel %vm634_vm1, %v583_v6, %v619_v61 }
 0x15a   : > { %6486 = vmatmul.mubr.msk.f32.gmra.mrb[72].mxu0 %vm7229_vm0, %v10164_v5  ;;  %15518 = vst [vmem:[#allocation66_spill] sm:$0xff] %v10212_v44  ;;  %v10443_v5 = vld [vmem:[%s9735_s8 + $0x1e0] sm:$0xff] }
 0x15b   : > { %1403 = vmatprep.mubr.f32.mxu0 %v10148_v50  ;;  %v10198_v50 = vsel %vm634_vm1, %v619_v61, %v583_v6  ;;  %15560 = vst [vmem:[#allocation108_spill] sm:$0xff] %v10443_v5 }
 0x15c   : > { %15515 = vst [vmem:[#allocation63_spill] sm:$0xff] %v10198_v50 }
 0x15e   : > { %1404 = vmatmul.mubr.f32.gmra.mrb[74].mxu0 %v10186_v4 }
 0x15f   : > { %1408 = vmatprep.mubr.f32.mxu0 %v10169_v1  ;;  %v620_v1 = vrot.slane %v10204_v34, 7 }
 0x161   : > { %v10220_v4 = vsel %vm634_vm1, %v620_v1, %v584_v32  ;;  %v10234_v61 = vsel %vm634_vm1, %v584_v32, %v620_v1 }
 0x162   : > { %6488 = vmatmul.mubr.msk.f32.gmra.mrb[76].mxu0 %vm7229_vm0, %v10198_v50  ;;  %15519 = vst [vmem:[#allocation67_spill] sm:$0xff] %v10220_v4  ;;  %v10223_v50 = vld [vmem:[%s9735_s8 + $0x140] sm:$0xff]  ;;  %15522 = vst [vmem:[#allocation70_spill] sm:$0xff] %v10234_v61 }
 0x163   : > { %1413 = vmatprep.mubr.f32.mxu0 %v10172_v49  ;;  %15520 = vst [vmem:[#allocation68_spill] sm:$0xff] %v10223_v50  ;;  %v10226_v49 = vld [vmem:[%s9735_s8 + $0x148] sm:$0xff]  ;;  %v585_v6 = vrot.slane %v10223_v50, 7 }
 0x164   : > { %15521 = vst [vmem:[#allocation69_spill] sm:$0xff] %v10226_v49 }
 0x166   : > { %1414 = vmatmul.mubr.f32.gmra.mrb[78].mxu0 %v10212_v44 }
 0x167   : > { %1418 = vmatprep.mubr.f32.mxu0 %v10201_v29  ;;  %v621_v29 = vrot.slane %v10226_v49, 7 }
 0x169   : > { %v10242_v44 = vsel %vm634_vm1, %v621_v29, %v585_v6  ;;  %v10256_v1 = vsel %vm634_vm1, %v585_v6, %v621_v29 }
 0x16a   : > { %6490 = vmatmul.mubr.msk.f32.gmra.mrb[80].mxu0 %vm7229_vm0, %v10220_v4  ;;  %15523 = vst [vmem:[#allocation71_spill] sm:$0xff] %v10242_v44  ;;  %v10245_v4 = vld [vmem:[%s9735_s8 + $0x150] sm:$0xff]  ;;  %15526 = vst [vmem:[#allocation74_spill] sm:$0xff] %v10256_v1 }
 0x16b   : > { %1423 = vmatprep.mubr.f32.mxu0 %v10204_v34  ;;  %15524 = vst [vmem:[#allocation72_spill] sm:$0xff] %v10245_v4  ;;  %v10248_v34 = vld [vmem:[%s9735_s8 + $0x158] sm:$0xff]  ;;  %v586_v32 = vrot.slane %v10245_v4, 7 }
 0x16c   : > { %15525 = vst [vmem:[#allocation73_spill] sm:$0xff] %v10248_v34 }
 0x16e   : > { %1424 = vmatmul.mubr.f32.gmra.mrb[82].mxu0 %v10234_v61 }
 0x16f   : > { %1428 = vmatprep.mubr.f32.mxu0 %v10223_v50  ;;  %v622_v50 = vrot.slane %v10248_v34, 7 }
 0x171   : > { %v10264_v61 = vsel %vm634_vm1, %v622_v50, %v586_v32  ;;  %v10278_v29 = vsel %vm634_vm1, %v586_v32, %v622_v50 }
 0x172   : > { %6492 = vmatmul.mubr.msk.f32.gmra.mrb[84].mxu0 %vm7229_vm0, %v10242_v44  ;;  %15527 = vst [vmem:[#allocation75_spill] sm:$0xff] %v10264_v61  ;;  %v10267_v44 = vld [vmem:[%s9735_s8 + $0x160] sm:$0xff]  ;;  %15530 = vst [vmem:[#allocation78_spill] sm:$0xff] %v10278_v29 }
 0x173   : > { %1433 = vmatprep.mubr.f32.mxu0 %v10226_v49  ;;  %15528 = vst [vmem:[#allocation76_spill] sm:$0xff] %v10267_v44  ;;  %v10270_v49 = vld [vmem:[%s9735_s8 + $0x168] sm:$0xff]  ;;  %v587_v6 = vrot.slane %v10267_v44, 7 }
 0x174   : > { %15529 = vst [vmem:[#allocation77_spill] sm:$0xff] %v10270_v49 }
 0x176   : > { %1434 = vmatmul.mubr.f32.gmra.mrb[86].mxu0 %v10256_v1 }
 0x177   : > { %1438 = vmatprep.mubr.f32.mxu0 %v10245_v4  ;;  %v623_v4 = vrot.slane %v10270_v49, 7 }
 0x179   : > { %v10286_v1 = vsel %vm634_vm1, %v623_v4, %v587_v6  ;;  %v10300_v50 = vsel %vm634_vm1, %v587_v6, %v623_v4 }
 0x17a   : > { %6494 = vmatmul.mubr.msk.f32.gmra.mrb[88].mxu0 %vm7229_vm0, %v10264_v61  ;;  %15531 = vst [vmem:[#allocation79_spill] sm:$0xff] %v10286_v1  ;;  %v10289_v61 = vld [vmem:[%s9735_s8 + $0x170] sm:$0xff]  ;;  %15534 = vst [vmem:[#allocation82_spill] sm:$0xff] %v10300_v50 }
 0x17b   : > { %1443 = vmatprep.mubr.f32.mxu0 %v10248_v34  ;;  %15532 = vst [vmem:[#allocation80_spill] sm:$0xff] %v10289_v61  ;;  %v10292_v34 = vld [vmem:[%s9735_s8 + $0x178] sm:$0xff]  ;;  %v588_v32 = vrot.slane %v10289_v61, 7 }
 0x17c   : > { %15533 = vst [vmem:[#allocation81_spill] sm:$0xff] %v10292_v34 }
 0x17e   : > { %1444 = vmatmul.mubr.f32.gmra.mrb[90].mxu0 %v10278_v29 }
 0x17f   : > { %1448 = vmatprep.mubr.f32.mxu0 %v10267_v44  ;;  %v624_v44 = vrot.slane %v10292_v34, 7 }
 0x181   : > { %v10308_v29 = vsel %vm634_vm1, %v624_v44, %v588_v32  ;;  %v10322_v4 = vsel %vm634_vm1, %v588_v32, %v624_v44 }
 0x182   : > { %6496 = vmatmul.mubr.msk.f32.gmra.mrb[92].mxu0 %vm7229_vm0, %v10286_v1  ;;  %15535 = vst [vmem:[#allocation83_spill] sm:$0xff] %v10308_v29  ;;  %v10311_v1 = vld [vmem:[%s9735_s8 + $0x180] sm:$0xff]  ;;  %15538 = vst [vmem:[#allocation86_spill] sm:$0xff] %v10322_v4 }
 0x183   : > { %1453 = vmatprep.mubr.f32.mxu0 %v10270_v49  ;;  %15536 = vst [vmem:[#allocation84_spill] sm:$0xff] %v10311_v1  ;;  %v10314_v49 = vld [vmem:[%s9735_s8 + $0x188] sm:$0xff]  ;;  %v589_v6 = vrot.slane %v10311_v1, 7 }
 0x184   : > { %15537 = vst [vmem:[#allocation85_spill] sm:$0xff] %v10314_v49 }
 0x186   : > { %1454 = vmatmul.mubr.f32.gmra.mrb[94].mxu0 %v10300_v50 }
 0x187   : > { %1458 = vmatprep.mubr.f32.mxu0 %v10289_v61  ;;  %v625_v61 = vrot.slane %v10314_v49, 7 }
 0x189   : > { %v10330_v50 = vsel %vm634_vm1, %v625_v61, %v589_v6  ;;  %v10344_v44 = vsel %vm634_vm1, %v589_v6, %v625_v61 }
 0x18a   : > { %6498 = vmatmul.mubr.msk.f32.gmra.mrb[96].mxu0 %vm7229_vm0, %v10308_v29  ;;  %15539 = vst [vmem:[#allocation87_spill] sm:$0xff] %v10330_v50  ;;  %v10333_v29 = vld [vmem:[%s9735_s8 + $0x190] sm:$0xff]  ;;  %15542 = vst [vmem:[#allocation90_spill] sm:$0xff] %v10344_v44 }
 0x18b   : > { %1463 = vmatprep.mubr.f32.mxu0 %v10292_v34  ;;  %15540 = vst [vmem:[#allocation88_spill] sm:$0xff] %v10333_v29  ;;  %v10336_v34 = vld [vmem:[%s9735_s8 + $0x198] sm:$0xff]  ;;  %v590_v32 = vrot.slane %v10333_v29, 7 }
 0x18c   : > { %15541 = vst [vmem:[#allocation89_spill] sm:$0xff] %v10336_v34 }
 0x18e   : > { %1464 = vmatmul.mubr.f32.gmra.mrb[98].mxu0 %v10322_v4 }
 0x18f   : > { %1468 = vmatprep.mubr.f32.mxu0 %v10311_v1  ;;  %v626_v1 = vrot.slane %v10336_v34, 7 }
 0x191   : > { %v10352_v4 = vsel %vm634_vm1, %v626_v1, %v590_v32  ;;  %v10366_v61 = vsel %vm634_vm1, %v590_v32, %v626_v1 }
 0x192   : > { %6500 = vmatmul.mubr.msk.f32.gmra.mrb[100].mxu0 %vm7229_vm0, %v10330_v50  ;;  %15543 = vst [vmem:[#allocation91_spill] sm:$0xff] %v10352_v4  ;;  %v10355_v50 = vld [vmem:[%s9735_s8 + $0x1a0] sm:$0xff]  ;;  %15546 = vst [vmem:[#allocation94_spill] sm:$0xff] %v10366_v61 }
 0x193   : > { %1473 = vmatprep.mubr.f32.mxu0 %v10314_v49  ;;  %15544 = vst [vmem:[#allocation92_spill] sm:$0xff] %v10355_v50  ;;  %v10358_v49 = vld [vmem:[%s9735_s8 + $0x1a8] sm:$0xff]  ;;  %v591_v6 = vrot.slane %v10355_v50, 7 }
 0x194   : > { %15545 = vst [vmem:[#allocation93_spill] sm:$0xff] %v10358_v49 }
 0x196   : > { %1474 = vmatmul.mubr.f32.gmra.mrb[102].mxu0 %v10344_v44 }
 0x197   : > { %1478 = vmatprep.mubr.f32.mxu0 %v10333_v29  ;;  %v627_v29 = vrot.slane %v10358_v49, 7 }
 0x199   : > { %v10374_v44 = vsel %vm634_vm1, %v627_v29, %v591_v6  ;;  %v10388_v1 = vsel %vm634_vm1, %v591_v6, %v627_v29 }
 0x19a   : > { %6502 = vmatmul.mubr.msk.f32.gmra.mrb[104].mxu0 %vm7229_vm0, %v10352_v4  ;;  %15547 = vst [vmem:[#allocation95_spill] sm:$0xff] %v10374_v44  ;;  %v10377_v4 = vld [vmem:[%s9735_s8 + $0x1b0] sm:$0xff]  ;;  %15550 = vst [vmem:[#allocation98_spill] sm:$0xff] %v10388_v1 }
 0x19b   : > { %1483 = vmatprep.mubr.f32.mxu0 %v10336_v34  ;;  %15548 = vst [vmem:[#allocation96_spill] sm:$0xff] %v10377_v4  ;;  %v10380_v34 = vld [vmem:[%s9735_s8 + $0x1b8] sm:$0xff]  ;;  %v592_v32 = vrot.slane %v10377_v4, 7 }
 0x19c   : > { %15549 = vst [vmem:[#allocation97_spill] sm:$0xff] %v10380_v34 }
 0x19e   : > { %1484 = vmatmul.mubr.f32.gmra.mrb[106].mxu0 %v10366_v61 }
 0x19f   : > { %1488 = vmatprep.mubr.f32.mxu0 %v10355_v50  ;;  %v628_v50 = vrot.slane %v10380_v34, 7 }
 0x1a1   : > { %v10396_v61 = vsel %vm634_vm1, %v628_v50, %v592_v32  ;;  %v10410_v29 = vsel %vm634_vm1, %v592_v32, %v628_v50 }
 0x1a2   : > { %6504 = vmatmul.mubr.msk.f32.gmra.mrb[108].mxu0 %vm7229_vm0, %v10374_v44  ;;  %15551 = vst [vmem:[#allocation99_spill] sm:$0xff] %v10396_v61  ;;  %v10399_v44 = vld [vmem:[%s9735_s8 + $0x1c0] sm:$0xff]  ;;  %15554 = vst [vmem:[#allocation102_spill] sm:$0xff] %v10410_v29 }
 0x1a3   : > { %1493 = vmatprep.mubr.f32.mxu0 %v10358_v49  ;;  %15552 = vst [vmem:[#allocation100_spill] sm:$0xff] %v10399_v44  ;;  %v10402_v49 = vld [vmem:[%s9735_s8 + $0x1c8] sm:$0xff]  ;;  %v593_v6 = vrot.slane %v10399_v44, 7 }
 0x1a4   : > { %15553 = vst [vmem:[#allocation101_spill] sm:$0xff] %v10402_v49 }
 0x1a6   : > { %1494 = vmatmul.mubr.f32.gmra.mrb[110].mxu0 %v10388_v1 }
 0x1a7   : > { %1498 = vmatprep.mubr.f32.mxu0 %v10377_v4  ;;  %v629_v4 = vrot.slane %v10402_v49, 7 }
 0x1a9   : > { %v10418_v1 = vsel %vm634_vm1, %v629_v4, %v593_v6  ;;  %v10432_v50 = vsel %vm634_vm1, %v593_v6, %v629_v4  ;;  %v595_v6 = vrot.slane %v10443_v5, 7 }
 0x1aa   : > { %6506 = vmatmul.mubr.msk.f32.gmra.mrb[112].mxu0 %vm7229_vm0, %v10396_v61  ;;  %15555 = vst [vmem:[#allocation103_spill] sm:$0xff] %v10418_v1  ;;  %v10421_v61 = vld [vmem:[%s9735_s8 + $0x1d0] sm:$0xff]  ;;  %15558 = vst [vmem:[#allocation106_spill] sm:$0xff] %v10432_v50 }
 0x1ab   : > { %1503 = vmatprep.mubr.f32.mxu0 %v10380_v34  ;;  %15556 = vst [vmem:[#allocation104_spill] sm:$0xff] %v10421_v61  ;;  %v10424_v34 = vld [vmem:[%s9735_s8 + $0x1d8] sm:$0xff]  ;;  %v594_v32 = vrot.slane %v10421_v61, 7 }
 0x1ac   : > { %15557 = vst [vmem:[#allocation105_spill] sm:$0xff] %v10424_v34 }
 0x1ae   : > { %1504 = vmatmul.mubr.f32.gmra.mrb[114].mxu0 %v10410_v29 }
 0x1af   : > { %1508 = vmatprep.mubr.f32.mxu0 %v10399_v44  ;;  %v630_v44 = vrot.slane %v10424_v34, 7 }
 0x1b1   : > { %v10440_v29 = vsel %vm634_vm1, %v630_v44, %v594_v32  ;;  %v10454_v4 = vsel %vm634_vm1, %v594_v32, %v630_v44  ;;  %v1068_v32 = vld [vmem:[#allocation6 + $0x200] sm:$0xff] }
 0x1b2   : > { %6508 = vmatmul.mubr.msk.f32.gmra.mrb[116].mxu0 %vm7229_vm0, %v10418_v1  ;;  %15559 = vst [vmem:[#allocation107_spill] sm:$0xff] %v10440_v29  ;;  %v10446_v1 = vld [vmem:[%s9735_s8 + $0x1e8] sm:$0xff]  ;;  %15562 = vst [vmem:[#allocation110_spill] sm:$0xff] %v10454_v4 }
 0x1b3   : > { %1513 = vmatprep.mubr.f32.mxu0 %v10402_v49  ;;  %15561 = vst [vmem:[#allocation109_spill] sm:$0xff] %v10446_v1 }
 0x1b6   : > { %1514 = vmatmul.mubr.f32.gmra.mrb[118].mxu0 %v10432_v50 }
 0x1b7   : > { %1518 = vmatprep.mubr.f32.mxu0 %v10421_v61  ;;  %v631_v61 = vrot.slane %v10446_v1, 7 }
 0x1b9   : > { %v10462_v49 = vsel %vm634_vm1, %v631_v61, %v595_v6  ;;  %v10470_v44 = vsel %vm634_vm1, %v595_v6, %v631_v61  ;;  %v784_v61 = vrot.slane %v9773_v56, 1  ;;  %v820_v6 = vrot.slane %v9777_v57, 1  ;;  %v1074_v57 = vld [vmem:[#allocation6 + $0x230] sm:$0xff] }
 0x1ba   : > { %6510 = vmatmul.mubr.msk.f32.gmra.mrb[120].mxu0 %vm7229_vm0, %v10440_v29  ;;  %15563 = vst [vmem:[#allocation111_spill] sm:$0xff] %v10462_v49  ;;  %15564 = vst [vmem:[#allocation112_spill] sm:$0xff] %v10470_v44  ;;  %v1071_v29 = vld [vmem:[#allocation6 + $0x218] sm:$0xff] }
 0x1bb   : > { %1523 = vmatprep.mubr.f32.mxu0 %v10424_v34  ;;  %v1069_v34 = vld [vmem:[#allocation6 + $0x208] sm:$0xff] }
 0x1be   : > { %1524 = vmatmul.mubr.f32.gmra.mrb[122].mxu0 %v10454_v4  ;;  %v7796_v4 = vpack.c.bf16 %v1069_v34, %v1068_v32  ;;  %v1073_v34 = vld [vmem:[#allocation6 + $0x228] sm:$0xff]  ;;  %v1076_v32 = vld [vmem:[#allocation6 + $0x240] sm:$0xff] }
 0x1bf   : > { %1528 = vmatprep.mubr.f32.mxu0 %v10443_v5  ;;  %v10474_v5 = vrot.slane %v15504_v22, 1 }
 0x1c1   : > { %15565 = vst [vmem:[#allocation113_spill] sm:$0xff] %v10474_v5 }
 0x1c2   : > { %6512 = vmatmul.mubr.msk.f32.gmra.mrb[124].mxu0 %vm7229_vm0, %v10462_v49  ;;  %v10480_v49 = vadd.s32 8, %v9765_v51 }
 0x1c3   : > { %1533 = vmatprep.mubr.f32.mxu0 %v10446_v1  ;;  %v1070_v1 = vld [vmem:[#allocation6 + $0x210] sm:$0xff] }
 0x1c4   : > { %15566 = vst [vmem:[#allocation114_spill] sm:$0xff] %v10480_v49  ;;  %vm7230_vm3 = vcmp.ne.s32.totalorder %v10480_v49, 15  ;;  %v7799_v22 = vpack.c.bf16 %v1071_v29, %v1070_v1  ;;  %v1075_v1 = vld [vmem:[#allocation6 + $0x238] sm:$0xff]  ;;  %v10503_v29 = vsel %vm855_vm2, %v820_v6, %v784_v61 }
 0x1c6   : > { %1534 = vmatmul.mubr.f32.gmra.mrb[126].mxu0 %v10470_v44 }
 0x1c7   : > { %6514 = vmatprep.mubr.msk.f32.mxu0 %vm7229_vm0, %v9791_v3  ;;  %v1072_v3 = vld [vmem:[#allocation6 + $0x220] sm:$0xff] }
 0x1c8   : > { %v7802_v56 = vpack.c.bf16 %v1073_v34, %v1072_v3  ;;  %v786_v3 = vrot.slane %v9818_v16, 1  ;;  %v822_v34 = vrot.slane %v9821_v18, 1  ;;  %v1082_v18 = vld [vmem:[#allocation6 + $0x270] sm:$0xff] }
 0x1ca   : > { %1604 = vmatmul.mubr.f32.vlgmr.msra.gmra.mrb[0].mxu0 %v10474_v5 }
 0x1cb   : > { %7797 = vmatpush1.bf16.msra.mxu0 %v7796_v4  ;;  %1608 = vmatprep.mubr.f32.mxu0 %v9806_v9  ;;  %v10496_v9 = vsel %vm855_vm2, %v784_v61, %v820_v6  ;;  %v7805_v4 = vpack.c.bf16 %v1075_v1, %v1074_v57  ;;  %v1078_v61 = vld [vmem:[#allocation6 + $0x250] sm:$0xff]  ;;  %v1079_v6 = vld [vmem:[#allocation6 + $0x258] sm:$0xff]  ;;  %v1080_v57 = vld [vmem:[#allocation6 + $0x260] sm:$0xff] }
 0x1cc   : > { %7798 = vmatprep.subr.bf16.mxu0 %v15501_v20  ;;  %v1081_v1 = vld [vmem:[#allocation6 + $0x268] sm:$0xff] }
 0x1cd   : > { %v7814_v16 = vpack.c.bf16 %v1081_v1, %v1080_v57  ;;  %v1085_v57 = vld [vmem:[#allocation6 + $0x288] sm:$0xff] }
 0x1ce   : > { %6516 = vmatmul.mubr.msk.f32.gmra.mrb[2].mxu0 %vm7230_vm3, %v10474_v5 }
 0x1cf   : > { %6518 = vmatprep.mubr.msk.f32.mxu0 %vm7229_vm0, %v9815_v15  ;;  %7800 = vmatpush1.bf16.msra.mxu0 %v7799_v22  ;;  %v1077_v15 = vld [vmem:[#allocation6 + $0x248] sm:$0xff] }
 0x1d0   : > { %7801 = vmatprep.subr.bf16.mxu0 %v15501_v20  ;;  %v7808_v22 = vpack.c.bf16 %v1077_v15, %v1076_v32  ;;  %v10526_v15 = vsel %vm855_vm2, %v786_v3, %v822_v34  ;;  %v10533_v32 = vsel %vm855_vm2, %v822_v34, %v786_v3  ;;  %v1087_v34 = vld [vmem:[#allocation6 + $0x298] sm:$0xff] }
 0x1d2   : > { %1614 = vmatmul.mubr.f32.gmra.mrb[4].mxu0 %v10496_v9 }
 0x1d3   : > { %1618 = vmatprep.mubr.f32.mxu0 %v9830_v21  ;;  %7803 = vmatpush1.bf16.msra.mxu0 %v7802_v56  ;;  %v7811_v56 = vpack.c.bf16 %v1079_v6, %v1078_v61  ;;  %v823_v61 = vrot.slane %v9845_v30, 1  ;;  %v1086_v30 = vld [vmem:[#allocation6 + $0x290] sm:$0xff] }
 0x1d4   : > { %7804 = vmatprep.subr.bf16.mxu0 %v15501_v20 }
 0x1d6   : > { %6520 = vmatmul.mubr.msk.f32.gmra.mrb[6].mxu0 %vm7230_vm3, %v10503_v29 }
 0x1d7   : > { %6522 = vmatprep.mubr.msk.f32.mxu0 %vm7229_vm0, %v9839_v27  ;;  %7806 = vmatpush1.bf16.msra.mxu0 %v7805_v4  ;;  %v1083_v4 = vld [vmem:[#allocation6 + $0x278] sm:$0xff] }
 0x1d8   : > { %7807 = vmatprep.subr.bf16.mxu0 %v15501_v20  ;;  %v7817_v6 = vpack.c.bf16 %v1083_v4, %v1082_v18  ;;  %v824_v18 = vrot.slane %v9869_v42, 1  ;;  %v7823_v4 = vpack.c.bf16 %v1087_v34, %v1086_v30  ;;  %v1091_v30 = vld [vmem:[#allocation6 + $0x2b8] sm:$0xff]  ;;  %v790_v34 = vrot.slane %v9914_v63, 1 }
 0x1da   : > { %1624 = vmatmul.mubr.f32.gmra.mrb[8].mxu0 %v10177_v54 }
 0x1db   : > { %1628 = vmatprep.mubr.f32.mxu0 %v9854_v33  ;;  %7809 = vmatpush1.bf16.msra.mxu0 %v7808_v22  ;;  %v787_v22 = vrot.slane %v9842_v28, 1 }
 0x1dc   : > { %7810 = vmatprep.subr.bf16.mxu0 %v15501_v20 }
 0x1dd   : > { %v10546_v3 = vsel %vm855_vm2, %v787_v22, %v823_v61  ;;  %v10553_v1 = vsel %vm855_vm2, %v823_v61, %v787_v22  ;;  %v789_v61 = vrot.slane %v9890_v55, 1  ;;  %v1090_v55 = vld [vmem:[#allocation6 + $0x2b0] sm:$0xff] }
 0x1de   : > { %6524 = vmatmul.mubr.msk.f32.gmra.mrb[10].mxu0 %vm7230_vm3, %v10192_v0 }
 0x1df   : > { %6526 = vmatprep.mubr.msk.f32.mxu0 %vm7229_vm0, %v9863_v39  ;;  %7812 = vmatpush1.bf16.msra.mxu0 %v7811_v56  ;;  %v1084_v56 = vld [vmem:[#allocation6 + $0x280] sm:$0xff] }
 0x1e0   : > { %7813 = vmatprep.subr.bf16.mxu0 %v15501_v20  ;;  %v7820_v28 = vpack.c.bf16 %v1085_v57, %v1084_v56  ;;  %v1089_v56 = vld [vmem:[#allocation6 + $0x2a8] sm:$0xff]  ;;  %v825_v57 = vrot.slane %v9893_v58, 1 }
 0x1e2   : > { %1634 = vmatmul.mubr.f32.gmra.mrb[12].mxu0 %v10526_v15  ;;  %v10592_v58 = vsel %vm855_vm2, %v825_v57, %v789_v61 }
 0x1e3   : > { %1638 = vmatprep.mubr.f32.mxu0 %v9878_v45  ;;  %7815 = vmatpush1.bf16.msra.mxu0 %v7814_v16  ;;  %v788_v16 = vrot.slane %v9866_v40, 1 }
 0x1e4   : > { %7816 = vmatprep.subr.bf16.mxu0 %v15501_v20 }
 0x1e5   : > { %v10566_v22 = vsel %vm855_vm2, %v788_v16, %v824_v18  ;;  %v10573_v42 = vsel %vm855_vm2, %v824_v18, %v788_v16  ;;  %v826_v16 = vrot.slane %v9917_v2, 1  ;;  %v7829_v18 = vpack.c.bf16 %v1091_v30, %v1090_v55 }
 0x1e6   : > { %6528 = vmatmul.mubr.msk.f32.gmra.mrb[14].mxu0 %vm7230_vm3, %v10533_v32  ;;  %v791_v2 = vrot.slane %v9937_v14, 1 }
 0x1e7   : > { %6530 = vmatprep.mubr.msk.f32.mxu0 %vm7229_vm0, %v9887_v52  ;;  %7818 = vmatpush1.bf16.msra.mxu0 %v7817_v6  ;;  %v1088_v6 = vld [vmem:[#allocation6 + $0x2a0] sm:$0xff]  ;;  %v10611_v63 = vsel %vm855_vm2, %v826_v16, %v790_v34 }
 0x1e8   : > { %7819 = vmatprep.subr.bf16.mxu0 %v15501_v20  ;;  %v7826_v40 = vpack.c.bf16 %v1089_v56, %v1088_v6  ;;  %v827_v6 = vrot.slane %v9940_v17, 1  ;;  %v792_v17 = vrot.slane %v9959_v24, 1 }
 0x1ea   : > { %1644 = vmatmul.mubr.f32.gmra.mrb[16].mxu0 %v10546_v3  ;;  %v10623_v56 = vsel %vm855_vm2, %v791_v2, %v827_v6  ;;  %v10629_v14 = vsel %vm855_vm2, %v827_v6, %v791_v2  ;;  %v1095_v2 = vld [vmem:[#allocation6 + $0x2d8] sm:$0xff]  ;;  %v830_v6 = vrot.slane %v10007_v48, 1  ;;  %v795_v48 = vrot.slane %v10027_v10, 1 }
 0x1eb   : > { %1648 = vmatprep.mubr.f32.mxu0 %v9902_v59  ;;  %7821 = vmatpush1.bf16.msra.mxu0 %v7820_v28  ;;  %v10586_v28 = vsel %vm855_vm2, %v789_v61, %v825_v57  ;;  %v1093_v61 = vld [vmem:[#allocation6 + $0x2c8] sm:$0xff]  ;;  %v828_v57 = vrot.slane %v9962_v25, 1  ;;  %v793_v25 = vrot.slane %v9982_v37, 1 }
 0x1ec   : > { %7822 = vmatprep.subr.bf16.mxu0 %v15501_v20 }
 0x1ed   : > { %v10642_v30 = vsel %vm855_vm2, %v792_v17, %v828_v57  ;;  %v10648_v24 = vsel %vm855_vm2, %v828_v57, %v792_v17  ;;  %v831_v17 = vrot.slane %v10030_v11, 1  ;;  %v15568_v11 = vld [vmem:[#allocation40_spill] sm:$0xff] }
 0x1ee   : > { %6532 = vmatmul.mubr.msk.f32.gmra.mrb[18].mxu0 %vm7230_vm3, %v10553_v1 }
 0x1ef   : > { %6534 = vmatprep.mubr.msk.f32.mxu0 %vm7229_vm0, %v9911_v62  ;;  %7824 = vmatpush1.bf16.msra.mxu0 %v7823_v4  ;;  %v10605_v4 = vsel %vm855_vm2, %v790_v34, %v826_v16  ;;  %v829_v34 = vrot.slane %v9985_v38, 1  ;;  %v794_v38 = vrot.slane %v10004_v47, 1  ;;  %v10697_v57 = vsel %vm855_vm2, %v795_v48, %v831_v17 }
 0x1f0   : > { %7825 = vmatprep.subr.bf16.mxu0 %v15501_v20  ;;  %v10703_v10 = vsel %vm855_vm2, %v831_v17, %v795_v48  ;;  %v15570_v48 = vld [vmem:[#allocation50_spill] sm:$0xff] }
 0x1f1   : > { %v10660_v16 = vsel %vm855_vm2, %v793_v25, %v829_v34  ;;  %v10666_v37 = vsel %vm855_vm2, %v829_v34, %v793_v25  ;;  %v10685_v47 = vsel %vm855_vm2, %v830_v6, %v794_v38  ;;  %v1097_v25 = vld [vmem:[#allocation6 + $0x2e8] sm:$0xff] }
 0x1f2   : > { %1654 = vmatmul.mubr.f32.gmra.mrb[20].mxu0 %v10566_v22  ;;  %v15567_v34 = vld [vmem:[#allocation46_spill] sm:$0xff] }
 0x1f3   : > { %1658 = vmatprep.mubr.f32.mxu0 %v9925_v8  ;;  %7827 = vmatpush1.bf16.msra.mxu0 %v7826_v40  ;;  %v1092_v40 = vld [vmem:[#allocation6 + $0x2c0] sm:$0xff] }
 0x1f4   : > { %7828 = vmatprep.subr.bf16.mxu0 %v15501_v20  ;;  %v7832_v55 = vpack.c.bf16 %v1093_v61, %v1092_v40  ;;  %v10679_v61 = vsel %vm855_vm2, %v794_v38, %v830_v6 }
 0x1f6   : > { %6536 = vmatmul.mubr.msk.f32.gmra.mrb[22].mxu0 %vm7230_vm3, %v10573_v42 }
 0x1f7   : > { %6538 = vmatprep.mubr.msk.f32.mxu0 %vm7229_vm0, %v9934_v13  ;;  %7830 = vmatpush1.bf16.msra.mxu0 %v7829_v18  ;;  %v1094_v18 = vld [vmem:[#allocation6 + $0x2d0] sm:$0xff] }
 0x1f8   : > { %7831 = vmatprep.subr.bf16.mxu0 %v15501_v20  ;;  %v7835_v40 = vpack.c.bf16 %v1095_v2, %v1094_v18  ;;  %v796_v18 = vrot.slane %v15568_v11, 1  ;;  %v15569_v2 = vld [vmem:[#allocation41_spill] sm:$0xff] }
 0x1f9   : > { %v832_v38 = vrot.slane %v15569_v2, 1  ;;  %v15572_v11 = vld [vmem:[#allocation45_spill] sm:$0xff] }
 0x1fa   : > { %1664 = vmatmul.mubr.f32.gmra.mrb[24].mxu0 %v10586_v28  ;;  %v833_v2 = vrot.slane %v15572_v11, 1  ;;  %v1098_v11 = vld [vmem:[#allocation6 + $0x2f0] sm:$0xff] }
 0x1fb   : > { %1668 = vmatprep.mubr.f32.mxu0 %v9948_v19  ;;  %7833 = vmatpush1.bf16.msra.mxu0 %v7832_v55  ;;  %v1096_v55 = vld [vmem:[#allocation6 + $0x2e0] sm:$0xff]  ;;  %v10722_v17 = vsel %vm855_vm2, %v832_v38, %v796_v18 }
 0x1fc   : > { %7834 = vmatprep.subr.bf16.mxu0 %v15501_v20  ;;  %v7838_v6 = vpack.c.bf16 %v1097_v25, %v1096_v55  ;;  %v15571_v55 = vld [vmem:[#allocation44_spill] sm:$0xff] }
 0x1fd   : > { %v797_v25 = vrot.slane %v15571_v55, 1 }
 0x1fe   : > { %6540 = vmatmul.mubr.msk.f32.gmra.mrb[26].mxu0 %vm7230_vm3, %v10592_v58 }
 0x1ff   : > { %6542 = vmatprep.mubr.msk.f32.mxu0 %vm7229_vm0, %v9956_v23  ;;  %7836 = vmatpush1.bf16.msra.mxu0 %v7835_v40  ;;  %v10716_v40 = vsel %vm855_vm2, %v796_v18, %v832_v38  ;;  %v10740_v18 = vsel %vm855_vm2, %v797_v25, %v833_v2 }
 0x200   : > { %7837 = vmatprep.subr.bf16.mxu0 %v15501_v20 }
 0x202   : > { %1674 = vmatmul.mubr.f32.gmra.mrb[28].mxu0 %v10605_v4 }
 0x203   : > { %1678 = vmatprep.mubr.f32.mxu0 %v9970_v31  ;;  %7839 = vmatpush1.bf16.msra.mxu0 %v7838_v6  ;;  %v10727_v6 = vld [vmem:[%s9735_s8 + $0xf0] sm:$0xff] }
 0x204   : > { %7840 = vmatprep.subr.bf16.mxu0 %v15501_v20  ;;  %v578_v38 = vrot.slane %v10727_v6, 7 }
 0x206   : > { %6544 = vmatmul.mubr.msk.f32.gmra.mrb[30].mxu0 %vm7230_vm3, %v10611_v63 }
 0x207   : > { %6546 = vmatprep.mubr.msk.f32.mxu0 %vm7229_vm0, %v9979_v36 }
 0x20a   : > { %1684 = vmatmul.mubr.f32.gmra.mrb[32].mxu0 %v10623_v56 }
 0x20b   : > { %1688 = vmatprep.mubr.f32.mxu0 %v9993_v41 }
 0x20e   : > { %6548 = vmatmul.mubr.msk.f32.gmra.mrb[34].mxu0 %vm7230_vm3, %v10629_v14 }
 0x20f   : > { %6550 = vmatprep.mubr.msk.f32.mxu0 %vm7229_vm0, %v10001_v46 }
 0x212   : > { %1694 = vmatmul.mubr.f32.gmra.mrb[36].mxu0 %v10642_v30 }
 0x213   : > { %1698 = vmatprep.mubr.f32.mxu0 %v10015_v53 }
 0x216   : > { %6552 = vmatmul.mubr.msk.f32.gmra.mrb[38].mxu0 %vm7230_vm3, %v10648_v24 }
 0x217   : > { %6554 = vmatprep.mubr.msk.f32.mxu0 %vm7229_vm0, %v10024_v7 }
 0x21a   : > { %1704 = vmatmul.mubr.f32.gmra.mrb[40].mxu0 %v10660_v16 }
 0x21b   : > { %1708 = vmatprep.mubr.f32.mxu0 %v10038_v12  ;;  %v15576_v12 = vld [vmem:[#allocation49_spill] sm:$0xff] }
 0x21c   : > { %v834_v7 = vrot.slane %v15576_v12, 1 }
 0x21e   : > { %6556 = vmatmul.mubr.msk.f32.gmra.mrb[42].mxu0 %vm7230_vm3, %v10666_v37 }
 0x21f   : > { %6558 = vmatprep.mubr.msk.f32.mxu0 %vm7229_vm0, %v10046_v26  ;;  %v15575_v26 = vld [vmem:[#allocation48_spill] sm:$0xff] }
 0x222   : > { %1714 = vmatmul.mubr.f32.gmra.mrb[44].mxu0 %v10679_v61 }
 0x223   : > { %1718 = vmatprep.mubr.f32.mxu0 %v10060_v43  ;;  %v10748_v43 = vsel %vm855_vm2, %v833_v2, %v797_v25  ;;  %v15580_v25 = vld [vmem:[#allocation58_spill] sm:$0xff]  ;;  %v15581_v2 = vld [vmem:[#allocation53_spill] sm:$0xff] }
 0x226   : > { %6560 = vmatmul.mubr.msk.f32.gmra.mrb[46].mxu0 %vm7230_vm3, %v10685_v47 }
 0x227   : > { %6562 = vmatprep.mubr.msk.f32.mxu0 %vm7229_vm0, %v10069_v60  ;;  %v15574_v60 = vld [vmem:[#allocation52_spill] sm:$0xff] }
 0x22a   : > { %1724 = vmatmul.mubr.f32.gmra.mrb[48].mxu0 %v10697_v57 }
 0x22b   : > { %1728 = vmatprep.mubr.f32.mxu0 %v15567_v34  ;;  %v10730_v34 = vld [vmem:[%s9735_s8 + $0xf8] sm:$0xff] }
 0x22c   : > { %v614_v55 = vrot.slane %v10730_v34, 7 }
 0x22e   : > { %6564 = vmatmul.mubr.msk.f32.gmra.mrb[50].mxu0 %vm7230_vm3, %v10703_v10  ;;  %v10754_v46 = vsel %vm634_vm1, %v614_v55, %v578_v38  ;;  %v10769_v12 = vsel %vm634_vm1, %v578_v38, %v614_v55  ;;  %v802_v38 = vrot.slane %v15581_v2, 1  ;;  %v15582_v55 = vld [vmem:[#allocation54_spill] sm:$0xff]  ;;  %v15585_v2 = vld [vmem:[#allocation56_spill] sm:$0xff] }
 0x22f   : > { %6566 = vmatprep.mubr.msk.f32.mxu0 %vm7229_vm0, %v10091_v35  ;;  %v15573_v35 = vld [vmem:[#allocation51_spill] sm:$0xff]  ;;  %15577 = vst [vmem:[#allocation40_spill] sm:$0xff] %v10754_v46  ;;  %15578 = vst [vmem:[#allocation41_spill] sm:$0xff] %v10769_v12 }
 0x232   : > { %1734 = vmatmul.mubr.f32.gmra.mrb[52].mxu0 %v10716_v40 }
 0x233   : > { %1738 = vmatprep.mubr.f32.mxu0 %v15570_v48  ;;  %v1099_v48 = vld [vmem:[#allocation6 + $0x2f8] sm:$0xff] }
 0x234   : > { %v7841_v53 = vpack.c.bf16 %v1099_v48, %v1098_v11  ;;  %v15579_v48 = vld [vmem:[#allocation55_spill] sm:$0xff]  ;;  %v838_v11 = vrot.slane %v15582_v55, 1  ;;  %v803_v55 = vrot.slane %v15585_v2, 1 }
 0x236   : > { %6568 = vmatmul.mubr.msk.f32.gmra.mrb[54].mxu0 %vm7230_vm3, %v10722_v17 }
 0x237   : > { %6570 = vmatprep.mubr.msk.f32.mxu0 %vm7229_vm0, %v15573_v35  ;;  %v798_v35 = vrot.slane %v15575_v26, 1  ;;  %7842 = vmatpush1.bf16.msra.mxu0 %v7841_v53 }
 0x238   : > { %7843 = vmatprep.subr.bf16.mxu0 %v15501_v20 }
 0x239   : > { %v10765_v26 = vsel %vm855_vm2, %v798_v35, %v834_v7  ;;  %v10775_v53 = vsel %vm855_vm2, %v834_v7, %v798_v35  ;;  %v15583_v7 = vld [vmem:[#allocation59_spill] sm:$0xff]  ;;  %v10795_v35 = vsel %vm855_vm2, %v802_v38, %v838_v11 }
 0x23a   : > { %1744 = vmatmul.mubr.f32.gmra.mrb[56].mxu0 %v10740_v18 }
 0x23b   : > { %1748 = vmatprep.mubr.f32.mxu0 %v15574_v60 }
 0x23e   : > { %6572 = vmatmul.mubr.msk.f32.gmra.mrb[58].mxu0 %vm7230_vm3, %v10748_v43 }
 0x23f   : > { %6574 = vmatprep.mubr.msk.f32.mxu0 %vm7229_vm0, %v10754_v46 }
 0x242   : > { %1754 = vmatmul.mubr.f32.gmra.mrb[60].mxu0 %v10765_v26 }
 0x243   : > { %1758 = vmatprep.mubr.f32.mxu0 %v10769_v12  ;;  %v15586_v12 = vld [vmem:[#allocation57_spill] sm:$0xff] }
 0x244   : > { %v839_v46 = vrot.slane %v15586_v12, 1  ;;  %v15589_v12 = vld [vmem:[#allocation60_spill] sm:$0xff] }
 0x245   : > { %v804_v2 = vrot.slane %v15589_v12, 1 }
 0x246   : > { %6576 = vmatmul.mubr.msk.f32.gmra.mrb[62].mxu0 %vm7230_vm3, %v10775_v53  ;;  %v10813_v60 = vsel %vm855_vm2, %v803_v55, %v839_v46 }
 0x247   : > { %6578 = vmatprep.mubr.msk.f32.mxu0 %vm7229_vm0, %v15579_v48  ;;  %v15584_v48 = vld [vmem:[#allocation62_spill] sm:$0xff] }
 0x24a   : > { %1764 = vmatmul.mubr.f32.gmra.mrb[64].mxu0 %v10474_v5 }
 0x24b   : > { %1768 = vmatprep.mubr.f32.mxu0 %v15580_v25  ;;  %v10801_v25 = vsel %vm855_vm2, %v838_v11, %v802_v38  ;;  %v15588_v38 = vld [vmem:[#allocation66_spill] sm:$0xff]  ;;  %v10819_v11 = vsel %vm855_vm2, %v839_v46, %v803_v55 }
 0x24c   : > { %v15592_v46 = vld [vmem:[#allocation70_spill] sm:$0xff] }
 0x24e   : > { %6580 = vmatmul.mubr.msk.f32.gmra.mrb[66].mxu0 %vm7230_vm3, %v10474_v5  ;;  %v11025_v5 = vld [vmem:[%s9735_s8 + $0x1f8] sm:$0xff] }
 0x24f   : > { %6582 = vmatprep.mubr.msk.f32.mxu0 %vm7229_vm0, %v15583_v7  ;;  %v15587_v7 = vld [vmem:[#allocation63_spill] sm:$0xff] }
 0x252   : > { %1774 = vmatmul.mubr.f32.gmra.mrb[68].mxu0 %v10795_v35 }
 0x253   : > { %1778 = vmatprep.mubr.f32.mxu0 %v15584_v48  ;;  %v15590_v48 = vld [vmem:[#allocation61_spill] sm:$0xff] }
 0x254   : > { %v840_v41 = vrot.slane %v15590_v48, 1  ;;  %v15593_v48 = vld [vmem:[#allocation64_spill] sm:$0xff] }
 0x255   : > { %v805_v12 = vrot.slane %v15593_v48, 1  ;;  %15646 = vst [vmem:[#allocation64_spill] sm:$0xff] %v11025_v5 }
 0x256   : > { %6584 = vmatmul.mubr.msk.f32.gmra.mrb[70].mxu0 %vm7230_vm3, %v10801_v25  ;;  %v10831_v36 = vsel %vm855_vm2, %v804_v2, %v840_v41  ;;  %v10837_v55 = vsel %vm855_vm2, %v840_v41, %v804_v2  ;;  %v15596_v41 = vld [vmem:[#allocation74_spill] sm:$0xff] }
 0x257   : > { %6586 = vmatprep.mubr.msk.f32.mxu0 %vm7229_vm0, %v15587_v7  ;;  %v15591_v7 = vld [vmem:[#allocation67_spill] sm:$0xff] }
 0x25a   : > { %1784 = vmatmul.mubr.f32.gmra.mrb[72].mxu0 %v10813_v60 }
 0x25b   : > { %1788 = vmatprep.mubr.f32.mxu0 %v15588_v38  ;;  %v15594_v38 = vld [vmem:[#allocation65_spill] sm:$0xff] }
 0x25c   : > { %v841_v31 = vrot.slane %v15594_v38, 1  ;;  %v15597_v38 = vld [vmem:[#allocation68_spill] sm:$0xff] }
 0x25d   : > { %v806_v48 = vrot.slane %v15597_v38, 1 }
 0x25e   : > { %6588 = vmatmul.mubr.msk.f32.gmra.mrb[74].mxu0 %vm7230_vm3, %v10819_v11  ;;  %v10849_v23 = vsel %vm855_vm2, %v805_v12, %v841_v31  ;;  %v10855_v2 = vsel %vm855_vm2, %v841_v31, %v805_v12  ;;  %v15600_v31 = vld [vmem:[#allocation78_spill] sm:$0xff] }
 0x25f   : > { %6590 = vmatprep.mubr.msk.f32.mxu0 %vm7229_vm0, %v15591_v7  ;;  %v15595_v7 = vld [vmem:[#allocation71_spill] sm:$0xff] }
 0x262   : > { %1794 = vmatmul.mubr.f32.gmra.mrb[76].mxu0 %v10831_v36 }
 0x263   : > { %1798 = vmatprep.mubr.f32.mxu0 %v15592_v46  ;;  %v15598_v46 = vld [vmem:[#allocation69_spill] sm:$0xff] }
 0x264   : > { %v842_v19 = vrot.slane %v15598_v46, 1  ;;  %v15601_v46 = vld [vmem:[#allocation72_spill] sm:$0xff] }
 0x265   : > { %v807_v38 = vrot.slane %v15601_v46, 1 }
 0x266   : > { %6592 = vmatmul.mubr.msk.f32.gmra.mrb[78].mxu0 %vm7230_vm3, %v10837_v55  ;;  %v10867_v13 = vsel %vm855_vm2, %v806_v48, %v842_v19  ;;  %v10873_v12 = vsel %vm855_vm2, %v842_v19, %v806_v48  ;;  %v15604_v19 = vld [vmem:[#allocation82_spill] sm:$0xff] }
 0x267   : > { %6594 = vmatprep.mubr.msk.f32.mxu0 %vm7229_vm0, %v15595_v7  ;;  %v15599_v7 = vld [vmem:[#allocation75_spill] sm:$0xff] }
 0x26a   : > { %1804 = vmatmul.mubr.f32.gmra.mrb[80].mxu0 %v10849_v23 }
 0x26b   : > { %1808 = vmatprep.mubr.f32.mxu0 %v15596_v41  ;;  %v15602_v41 = vld [vmem:[#allocation73_spill] sm:$0xff] }
 0x26c   : > { %v843_v8 = vrot.slane %v15602_v41, 1  ;;  %v15605_v41 = vld [vmem:[#allocation76_spill] sm:$0xff] }
 0x26d   : > { %v808_v46 = vrot.slane %v15605_v41, 1 }
 0x26e   : > { %6596 = vmatmul.mubr.msk.f32.gmra.mrb[82].mxu0 %vm7230_vm3, %v10855_v2  ;;  %v10885_v62 = vsel %vm855_vm2, %v807_v38, %v843_v8  ;;  %v10891_v48 = vsel %vm855_vm2, %v843_v8, %v807_v38  ;;  %v15608_v8 = vld [vmem:[#allocation86_spill] sm:$0xff] }
 0x26f   : > { %6598 = vmatprep.mubr.msk.f32.mxu0 %vm7229_vm0, %v15599_v7  ;;  %v15603_v7 = vld [vmem:[#allocation79_spill] sm:$0xff] }
 0x272   : > { %1814 = vmatmul.mubr.f32.gmra.mrb[84].mxu0 %v10867_v13 }
 0x273   : > { %1818 = vmatprep.mubr.f32.mxu0 %v15600_v31  ;;  %v15606_v31 = vld [vmem:[#allocation77_spill] sm:$0xff] }
 0x274   : > { %v844_v59 = vrot.slane %v15606_v31, 1  ;;  %v15609_v31 = vld [vmem:[#allocation80_spill] sm:$0xff] }
 0x275   : > { %v809_v41 = vrot.slane %v15609_v31, 1 }
 0x276   : > { %6600 = vmatmul.mubr.msk.f32.gmra.mrb[86].mxu0 %vm7230_vm3, %v10873_v12  ;;  %v10903_v52 = vsel %vm855_vm2, %v808_v46, %v844_v59  ;;  %v10909_v38 = vsel %vm855_vm2, %v844_v59, %v808_v46  ;;  %v15612_v59 = vld [vmem:[#allocation90_spill] sm:$0xff] }
 0x277   : > { %6602 = vmatprep.mubr.msk.f32.mxu0 %vm7229_vm0, %v15603_v7  ;;  %v15607_v7 = vld [vmem:[#allocation83_spill] sm:$0xff] }
 0x27a   : > { %1824 = vmatmul.mubr.f32.gmra.mrb[88].mxu0 %v10885_v62 }
 0x27b   : > { %1828 = vmatprep.mubr.f32.mxu0 %v15604_v19  ;;  %v15610_v19 = vld [vmem:[#allocation81_spill] sm:$0xff] }
 0x27c   : > { %v845_v45 = vrot.slane %v15610_v19, 1  ;;  %v15614_v19 = vld [vmem:[#allocation84_spill] sm:$0xff] }
 0x27d   : > { %v810_v31 = vrot.slane %v15614_v19, 1 }
 0x27e   : > { %6604 = vmatmul.mubr.msk.f32.gmra.mrb[90].mxu0 %vm7230_vm3, %v10891_v48  ;;  %v10921_v39 = vsel %vm855_vm2, %v809_v41, %v845_v45  ;;  %v10927_v46 = vsel %vm855_vm2, %v845_v45, %v809_v41  ;;  %v15618_v45 = vld [vmem:[#allocation94_spill] sm:$0xff] }
 0x27f   : > { %6606 = vmatprep.mubr.msk.f32.mxu0 %vm7229_vm0, %v15607_v7  ;;  %v15611_v7 = vld [vmem:[#allocation87_spill] sm:$0xff]  ;;  %15613 = vst [vmem:[#allocation44_spill] sm:$0xff] %v10927_v46 }
 0x282   : > { %1834 = vmatmul.mubr.f32.gmra.mrb[92].mxu0 %v10903_v52 }
 0x283   : > { %1838 = vmatprep.mubr.f32.mxu0 %v15608_v8  ;;  %v15615_v8 = vld [vmem:[#allocation85_spill] sm:$0xff] }
 0x284   : > { %v846_v33 = vrot.slane %v15615_v8, 1  ;;  %v15620_v8 = vld [vmem:[#allocation88_spill] sm:$0xff] }
 0x285   : > { %v811_v19 = vrot.slane %v15620_v8, 1 }
 0x286   : > { %6608 = vmatmul.mubr.msk.f32.gmra.mrb[94].mxu0 %vm7230_vm3, %v10909_v38  ;;  %v10939_v27 = vsel %vm855_vm2, %v810_v31, %v846_v33  ;;  %v10945_v41 = vsel %vm855_vm2, %v846_v33, %v810_v31  ;;  %v15624_v33 = vld [vmem:[#allocation98_spill] sm:$0xff] }
 0x287   : > { %6610 = vmatprep.mubr.msk.f32.mxu0 %vm7229_vm0, %v15611_v7  ;;  %v15616_v7 = vld [vmem:[#allocation91_spill] sm:$0xff]  ;;  %15617 = vst [vmem:[#allocation45_spill] sm:$0xff] %v10939_v27  ;;  %15619 = vst [vmem:[#allocation48_spill] sm:$0xff] %v10945_v41 }
 0x28a   : > { %1844 = vmatmul.mubr.f32.gmra.mrb[96].mxu0 %v10921_v39 }
 0x28b   : > { %1848 = vmatprep.mubr.f32.mxu0 %v15612_v59  ;;  %v15621_v59 = vld [vmem:[#allocation89_spill] sm:$0xff] }
 0x28c   : > { %v847_v21 = vrot.slane %v15621_v59, 1  ;;  %v15626_v59 = vld [vmem:[#allocation92_spill] sm:$0xff] }
 0x28d   : > { %v812_v8 = vrot.slane %v15626_v59, 1 }
 0x28e   : > { %6612 = vmatmul.mubr.msk.f32.gmra.mrb[98].mxu0 %vm7230_vm3, %v10927_v46  ;;  %v10963_v31 = vsel %vm855_vm2, %v847_v21, %v811_v19 }
 0x28f   : > { %6614 = vmatprep.mubr.msk.f32.mxu0 %vm7229_vm0, %v15616_v7  ;;  %v15622_v7 = vld [vmem:[#allocation95_spill] sm:$0xff]  ;;  %15625 = vst [vmem:[#allocation55_spill] sm:$0xff] %v10963_v31 }
 0x292   : > { %1854 = vmatmul.mubr.f32.gmra.mrb[100].mxu0 %v10939_v27  ;;  %v10957_v27 = vsel %vm855_vm2, %v811_v19, %v847_v21  ;;  %v15630_v21 = vld [vmem:[#allocation102_spill] sm:$0xff] }
 0x293   : > { %1858 = vmatprep.mubr.f32.mxu0 %v15618_v45  ;;  %15623 = vst [vmem:[#allocation49_spill] sm:$0xff] %v10957_v27  ;;  %v15627_v45 = vld [vmem:[#allocation93_spill] sm:$0xff] }
 0x296   : > { %6616 = vmatmul.mubr.msk.f32.gmra.mrb[102].mxu0 %vm7230_vm3, %v10945_v41  ;;  %v848_v41 = vrot.slane %v15627_v45, 1  ;;  %v15632_v45 = vld [vmem:[#allocation96_spill] sm:$0xff] }
 0x297   : > { %6618 = vmatprep.mubr.msk.f32.mxu0 %vm7229_vm0, %v15622_v7  ;;  %v15628_v7 = vld [vmem:[#allocation99_spill] sm:$0xff]  ;;  %v813_v59 = vrot.slane %v15632_v45, 1  ;;  %v15638_v45 = vld [vmem:[#allocation101_spill] sm:$0xff] }
 0x298   : > { %v10981_v19 = vsel %vm855_vm2, %v848_v41, %v812_v8 }
 0x299   : > { %15631 = vst [vmem:[#allocation53_spill] sm:$0xff] %v10981_v19 }
 0x29a   : > { %1864 = vmatmul.mubr.f32.gmra.mrb[104].mxu0 %v10957_v27  ;;  %v10975_v27 = vsel %vm855_vm2, %v812_v8, %v848_v41 }
 0x29b   : > { %1868 = vmatprep.mubr.f32.mxu0 %v15624_v33  ;;  %15629 = vst [vmem:[#allocation58_spill] sm:$0xff] %v10975_v27  ;;  %v15633_v33 = vld [vmem:[#allocation97_spill] sm:$0xff] }
 0x29e   : > { %6620 = vmatmul.mubr.msk.f32.gmra.mrb[106].mxu0 %vm7230_vm3, %v10963_v31  ;;  %v849_v31 = vrot.slane %v15633_v33, 1  ;;  %v15637_v33 = vld [vmem:[#allocation100_spill] sm:$0xff] }
 0x29f   : > { %6622 = vmatprep.mubr.msk.f32.mxu0 %vm7229_vm0, %v15628_v7  ;;  %v15634_v7 = vld [vmem:[#allocation103_spill] sm:$0xff]  ;;  %v814_v8 = vrot.slane %v15637_v33, 1  ;;  %v15643_v33 = vld [vmem:[#allocation104_spill] sm:$0xff] }
 0x2a0   : > { %v10999_v41 = vsel %vm855_vm2, %v849_v31, %v813_v59 }
 0x2a1   : > { %15636 = vst [vmem:[#allocation56_spill] sm:$0xff] %v10999_v41 }
 0x2a2   : > { %1874 = vmatmul.mubr.f32.gmra.mrb[108].mxu0 %v10975_v27  ;;  %v11022_v27 = vld [vmem:[%s9735_s8 + $0x1f0] sm:$0xff] }
 0x2a3   : > { %1878 = vmatprep.mubr.f32.mxu0 %v15630_v21  ;;  %v10993_v21 = vsel %vm855_vm2, %v813_v59, %v849_v31  ;;  %v15641_v31 = vld [vmem:[#allocation110_spill] sm:$0xff]  ;;  %15645 = vst [vmem:[#allocation61_spill] sm:$0xff] %v11022_v27 }
 0x2a4   : > { %15635 = vst [vmem:[#allocation54_spill] sm:$0xff] %v10993_v21 }
 0x2a6   : > { %6624 = vmatmul.mubr.msk.f32.gmra.mrb[110].mxu0 %vm7230_vm3, %v10981_v19  ;;  %v850_v19 = vrot.slane %v15638_v45, 1  ;;  %v815_v45 = vrot.slane %v15643_v33, 1 }
 0x2a7   : > { %6626 = vmatprep.mubr.msk.f32.mxu0 %vm7229_vm0, %v15634_v7  ;;  %v15639_v7 = vld [vmem:[#allocation107_spill] sm:$0xff] }
 0x2a8   : > { %v11017_v59 = vsel %vm855_vm2, %v850_v19, %v814_v8 }
 0x2a9   : > { %15642 = vst [vmem:[#allocation60_spill] sm:$0xff] %v11017_v59 }
 0x2aa   : > { %1884 = vmatmul.mubr.f32.gmra.mrb[112].mxu0 %v10993_v21  ;;  %v11011_v21 = vsel %vm855_vm2, %v814_v8, %v850_v19  ;;  %v596_v8 = vrot.slane %v11022_v27, 7  ;;  %v9153_v27 = vld [vmem:[%s9735_s8 + $0x8] sm:$0xff] }
 0x2ab   : > { %1888 = vmatprep.mubr.f32.mxu0 %v10432_v50  ;;  %15640 = vst [vmem:[#allocation57_spill] sm:$0xff] %v11011_v21  ;;  %v15644_v50 = vld [vmem:[#allocation105_spill] sm:$0xff] }
 0x2ae   : > { %6628 = vmatmul.mubr.msk.f32.gmra.mrb[114].mxu0 %vm7230_vm3, %v10999_v41  ;;  %v851_v41 = vrot.slane %v15644_v50, 1  ;;  %v632_v50 = vrot.slane %v11025_v5, 7  ;;  %v9152_v5 = vld [vmem:[%s9735_s8] sm:$0xff] }
 0x2af   : > { %6630 = vmatprep.mubr.msk.f32.mxu0 %vm7229_vm0, %v15639_v7  ;;  %v15647_v7 = vld [vmem:[#allocation111_spill] sm:$0xff] }
 0x2b0   : > { %v11035_v19 = vsel %vm855_vm2, %v815_v45, %v851_v41  ;;  %v11043_v33 = vsel %vm855_vm2, %v851_v41, %v815_v45  ;;  %v11049_v46 = vsel %vm634_vm1, %v632_v50, %v596_v8  ;;  %v1100_v45 = vld [vmem:[#allocation6 + $0x300] sm:$0xff] }
 0x2b1   : > { %15650 = vst [vmem:[#allocation65_spill] sm:$0xff] %v11049_v46 }
 0x2b2   : > { %1894 = vmatmul.mubr.f32.gmra.mrb[116].mxu0 %v11011_v21  ;;  %v15649_v21 = vld [vmem:[#allocation109_spill] sm:$0xff] }
 0x2b3   : > { %1898 = vmatprep.mubr.f32.mxu0 %v15641_v31  ;;  %v15648_v31 = vld [vmem:[#allocation108_spill] sm:$0xff] }
 0x2b6   : > { %6632 = vmatmul.mubr.msk.f32.gmra.mrb[118].mxu0 %vm7230_vm3, %v11017_v59  ;;  %v816_v59 = vrot.slane %v15648_v31, 1 }
 0x2b7   : > { %6634 = vmatprep.mubr.msk.f32.mxu0 %vm7229_vm0, %v15647_v7  ;;  %v852_v7 = vrot.slane %v15649_v21, 1  ;;  %v11063_v21 = vsel %vm634_vm1, %v596_v8, %v632_v50  ;;  %v1102_v8 = vld [vmem:[#allocation6 + $0x310] sm:$0xff]  ;;  %v1103_v50 = vld [vmem:[#allocation6 + $0x318] sm:$0xff] }
 0x2b8   : > { %15651 = vst [vmem:[#allocation68_spill] sm:$0xff] %v11063_v21 }
 0x2b9   : > { %v11059_v41 = vsel %vm855_vm2, %v816_v59, %v852_v7  ;;  %v11069_v31 = vsel %vm855_vm2, %v852_v7, %v816_v59  ;;  %v7847_v7 = vpack.c.bf16 %v1103_v50, %v1102_v8  ;;  %v1104_v59 = vld [vmem:[#allocation6 + $0x320] sm:$0xff]  ;;  %v1110_v8 = vld [vmem:[#allocation6 + $0x350] sm:$0xff]  ;;  %v1111_v50 = vld [vmem:[#allocation6 + $0x358] sm:$0xff] }
 0x2ba   : > { %1904 = vmatmul.mubr.f32.gmra.mrb[120].mxu0 %v11035_v19 }
 0x2bb   : > { %1908 = vmatprep.mubr.f32.mxu0 %v10470_v44  ;;  %v1101_v44 = vld [vmem:[#allocation6 + $0x308] sm:$0xff] }
 0x2be   : > { %6636 = vmatmul.mubr.msk.f32.gmra.mrb[122].mxu0 %vm7230_vm3, %v11043_v33 }
 0x2bf   : > { %6638 = vmatprep.mubr.msk.f32.mxu0 %vm7229_vm0, %v11049_v46  ;;  %v7844_v46 = vpack.c.bf16 %v1101_v44, %v1100_v45 }
 0x2c2   : > { %1914 = vmatmul.mubr.f32.gmra.mrb[124].mxu0 %v11059_v41 }
 0x2c3   : > { %1918 = vmatprep.mubr.f32.mxu0 %v11063_v21  ;;  %v1105_v21 = vld [vmem:[#allocation6 + $0x328] sm:$0xff] }
 0x2c4   : > { %v7850_v44 = vpack.c.bf16 %v1105_v21, %v1104_v59  ;;  %v11092_v21 = vld [vmem:[%s9735_s8 + $0x18] sm:$0xff]  ;;  %v7859_v59 = vpack.c.bf16 %v1111_v50, %v1110_v8  ;;  %v1116_v8 = vld [vmem:[#allocation6 + $0x380] sm:$0xff]  ;;  %v1117_v50 = vld [vmem:[#allocation6 + $0x388] sm:$0xff] }
 0x2c5   : > { %15652 = vst [vmem:[#allocation69_spill] sm:$0xff] %v11092_v21 }
 0x2c6   : > { %6640 = vmatmul.mubr.msk.f32.gmra.mrb[126].mxu0 %vm7230_vm3, %v11069_v31 }
 0x2c7   : > { %1988 = vmatprep.mubr.f32.mxu0 %v10496_v9  ;;  %v1107_v9 = vld [vmem:[#allocation6 + $0x338] sm:$0xff] }
 0x2ca   : > { %1989 = vmatmul.mubr.f32.vlgmr.msra.gmra.mrb[0].mxu0 %v9152_v5  ;;  %v1106_v5 = vld [vmem:[#allocation6 + $0x330] sm:$0xff] }
 0x2cb   : > { %7845 = vmatpush1.bf16.msra.mxu0 %v7844_v46  ;;  %6642 = vmatprep.mubr.msk.f32.mxu0 %vm7230_vm3, %v10503_v29  ;;  %v11084_v46 = vld [vmem:[%s9735_s8 + $0x10] sm:$0xff]  ;;  %v7853_v29 = vpack.c.bf16 %v1107_v9, %v1106_v5  ;;  %v1113_v5 = vld [vmem:[#allocation6 + $0x368] sm:$0xff] }
 0x2cc   : > { %7846 = vmatprep.subr.bf16.mxu0 %v15501_v20  ;;  %v11106_v9 = vld [vmem:[%s9735_s8 + $0x28] sm:$0xff] }
 0x2cd   : > { %15654 = vst [vmem:[#allocation73_spill] sm:$0xff] %v11106_v9 }
 0x2ce   : > { %1994 = vmatmul.mubr.f32.gmra.mrb[2].mxu0 %v9153_v27  ;;  %v1109_v27 = vld [vmem:[#allocation6 + $0x348] sm:$0xff] }
 0x2cf   : > { %1998 = vmatprep.mubr.f32.mxu0 %v10177_v54  ;;  %7848 = vmatpush1.bf16.msra.mxu0 %v7847_v7  ;;  %v1108_v54 = vld [vmem:[#allocation6 + $0x340] sm:$0xff] }
 0x2d0   : > { %7849 = vmatprep.subr.bf16.mxu0 %v15501_v20  ;;  %v7856_v45 = vpack.c.bf16 %v1109_v27, %v1108_v54  ;;  %v11098_v7 = vld [vmem:[%s9735_s8 + $0x20] sm:$0xff]  ;;  %v1114_v54 = vld [vmem:[#allocation6 + $0x370] sm:$0xff]  ;;  %v1115_v27 = vld [vmem:[#allocation6 + $0x378] sm:$0xff] }
 0x2d1   : > { %15653 = vst [vmem:[#allocation72_spill] sm:$0xff] %v11098_v7 }
 0x2d2   : > { %1999 = vmatmul.mubr.f32.gmra.mrb[4].mxu0 %v11084_v46 }
 0x2d3   : > { %6644 = vmatprep.mubr.msk.f32.mxu0 %vm7230_vm3, %v10192_v0  ;;  %7851 = vmatpush1.bf16.msra.mxu0 %v7850_v44  ;;  %v1112_v44 = vld [vmem:[#allocation6 + $0x360] sm:$0xff] }
 0x2d4   : > { %7852 = vmatprep.subr.bf16.mxu0 %v15501_v20 }
 0x2d6   : > { %2004 = vmatmul.mubr.f32.gmra.mrb[6].mxu0 %v11092_v21  ;;  %v1143_v21 = vld [vmem:[#allocation6 + $0x458] sm:$0xff] }
 0x2d7   : > { %2008 = vmatprep.mubr.f32.mxu0 %v10526_v15  ;;  %7854 = vmatpush1.bf16.msra.mxu0 %v7853_v29  ;;  %v7862_v29 = vpack.c.bf16 %v1113_v5, %v1112_v44  ;;  %v7868_v44 = vpack.c.bf16 %v1117_v50, %v1116_v8  ;;  %v1118_v5 = vld [vmem:[#allocation6 + $0x390] sm:$0xff]  ;;  %v11134_v8 = vld [vmem:[%s9735_s8 + $0x48] sm:$0xff] }
 0x2d8   : > { %7855 = vmatprep.subr.bf16.mxu0 %v15501_v20  ;;  %15658 = vst [vmem:[#allocation81_spill] sm:$0xff] %v11134_v8 }
 0x2da   : > { %2009 = vmatmul.mubr.f32.gmra.mrb[8].mxu0 %v11098_v7  ;;  %v11112_v7 = vld [vmem:[%s9735_s8 + $0x30] sm:$0xff] }
 0x2db   : > { %6646 = vmatprep.mubr.msk.f32.mxu0 %vm7230_vm3, %v10533_v32  ;;  %7857 = vmatpush1.bf16.msra.mxu0 %v7856_v45  ;;  %15655 = vst [vmem:[#allocation76_spill] sm:$0xff] %v11112_v7  ;;  %v7865_v45 = vpack.c.bf16 %v1115_v27, %v1114_v54  ;;  %v1120_v27 = vld [vmem:[#allocation6 + $0x3a0] sm:$0xff] }
 0x2dc   : > { %7858 = vmatprep.subr.bf16.mxu0 %v15501_v20 }
 0x2de   : > { %2014 = vmatmul.mubr.f32.gmra.mrb[10].mxu0 %v11106_v9  ;;  %v11235_v9 = vld [vmem:[%s9735_s8 + $0xc8] sm:$0xff] }
 0x2df   : > { %2018 = vmatprep.mubr.f32.mxu0 %v10546_v3  ;;  %7860 = vmatpush1.bf16.msra.mxu0 %v7859_v59  ;;  %v11120_v59 = vld [vmem:[%s9735_s8 + $0x38] sm:$0xff]  ;;  %15674 = vst [vmem:[#allocation116_spill] sm:$0xff] %v11235_v9 }
 0x2e0   : > { %7861 = vmatprep.subr.bf16.mxu0 %v15501_v20  ;;  %15656 = vst [vmem:[#allocation77_spill] sm:$0xff] %v11120_v59 }
 0x2e2   : > { %2019 = vmatmul.mubr.f32.gmra.mrb[12].mxu0 %v11112_v7  ;;  %v1119_v7 = vld [vmem:[#allocation6 + $0x398] sm:$0xff] }
 0x2e3   : > { %6648 = vmatprep.mubr.msk.f32.mxu0 %vm7230_vm3, %v10553_v1  ;;  %7863 = vmatpush1.bf16.msra.mxu0 %v7862_v29  ;;  %v11126_v29 = vld [vmem:[%s9735_s8 + $0x40] sm:$0xff]  ;;  %v7871_v54 = vpack.c.bf16 %v1119_v7, %v1118_v5  ;;  %v11148_v7 = vld [vmem:[%s9735_s8 + $0x58] sm:$0xff]  ;;  %v1122_v5 = vld [vmem:[#allocation6 + $0x3b0] sm:$0xff] }
 0x2e4   : > { %7864 = vmatprep.subr.bf16.mxu0 %v15501_v20  ;;  %15657 = vst [vmem:[#allocation80_spill] sm:$0xff] %v11126_v29  ;;  %15660 = vst [vmem:[#allocation85_spill] sm:$0xff] %v11148_v7 }
 0x2e6   : > { %2024 = vmatmul.mubr.f32.gmra.mrb[14].mxu0 %v11120_v59 }
 0x2e7   : > { %2028 = vmatprep.mubr.f32.mxu0 %v10566_v22  ;;  %7866 = vmatpush1.bf16.msra.mxu0 %v7865_v45  ;;  %v1121_v45 = vld [vmem:[#allocation6 + $0x3a8] sm:$0xff] }
 0x2e8   : > { %7867 = vmatprep.subr.bf16.mxu0 %v15501_v20  ;;  %v7874_v50 = vpack.c.bf16 %v1121_v45, %v1120_v27  ;;  %v11160_v45 = vld [vmem:[%s9735_s8 + $0x68] sm:$0xff] }
 0x2e9   : > { %15662 = vst [vmem:[#allocation89_spill] sm:$0xff] %v11160_v45 }
 0x2ea   : > { %2029 = vmatmul.mubr.f32.gmra.mrb[16].mxu0 %v11126_v29  ;;  %v11140_v29 = vld [vmem:[%s9735_s8 + $0x50] sm:$0xff] }
 0x2eb   : > { %6650 = vmatprep.mubr.msk.f32.mxu0 %vm7230_vm3, %v10573_v42  ;;  %7869 = vmatpush1.bf16.msra.mxu0 %v7868_v44  ;;  %15659 = vst [vmem:[#allocation84_spill] sm:$0xff] %v11140_v29  ;;  %v11153_v44 = vld [vmem:[%s9735_s8 + $0x60] sm:$0xff] }
 0x2ec   : > { %7870 = vmatprep.subr.bf16.mxu0 %v15501_v20  ;;  %15661 = vst [vmem:[#allocation88_spill] sm:$0xff] %v11153_v44 }
 0x2ee   : > { %2034 = vmatmul.mubr.f32.gmra.mrb[18].mxu0 %v11134_v8  ;;  %v1135_v8 = vld [vmem:[#allocation6 + $0x418] sm:$0xff] }
 0x2ef   : > { %2038 = vmatprep.mubr.f32.mxu0 %v10586_v28  ;;  %7872 = vmatpush1.bf16.msra.mxu0 %v7871_v54  ;;  %v1123_v54 = vld [vmem:[#allocation6 + $0x3b8] sm:$0xff] }
 0x2f0   : > { %7873 = vmatprep.subr.bf16.mxu0 %v15501_v20  ;;  %v7877_v27 = vpack.c.bf16 %v1123_v54, %v1122_v5  ;;  %v11173_v5 = vld [vmem:[%s9735_s8 + $0x78] sm:$0xff]  ;;  %v11178_v54 = vld [vmem:[%s9735_s8 + $0x80] sm:$0xff] }
 0x2f1   : > { %15664 = vst [vmem:[#allocation93_spill] sm:$0xff] %v11173_v5  ;;  %15665 = vst [vmem:[#allocation96_spill] sm:$0xff] %v11178_v54 }
 0x2f2   : > { %2039 = vmatmul.mubr.f32.gmra.mrb[20].mxu0 %v11140_v29 }
 0x2f3   : > { %6652 = vmatprep.mubr.msk.f32.mxu0 %vm7230_vm3, %v10592_v58  ;;  %7875 = vmatpush1.bf16.msra.mxu0 %v7874_v50  ;;  %v11166_v50 = vld [vmem:[%s9735_s8 + $0x70] sm:$0xff] }
 0x2f4   : > { %7876 = vmatprep.subr.bf16.mxu0 %v15501_v20  ;;  %15663 = vst [vmem:[#allocation92_spill] sm:$0xff] %v11166_v50 }
 0x2f6   : > { %2044 = vmatmul.mubr.f32.gmra.mrb[22].mxu0 %v11148_v7  ;;  %v1128_v7 = vld [vmem:[#allocation6 + $0x3e0] sm:$0xff] }
 0x2f7   : > { %2048 = vmatprep.mubr.f32.mxu0 %v10605_v4  ;;  %7878 = vmatpush1.bf16.msra.mxu0 %v7877_v27  ;;  %v1124_v27 = vld [vmem:[#allocation6 + $0x3c0] sm:$0xff] }
 0x2f8   : > { %7879 = vmatprep.subr.bf16.mxu0 %v15501_v20 }
 0x2fa   : > { %2049 = vmatmul.mubr.f32.gmra.mrb[24].mxu0 %v11153_v44  ;;  %v11185_v44 = vld [vmem:[%s9735_s8 + $0x88] sm:$0xff] }
 0x2fb   : > { %6654 = vmatprep.mubr.msk.f32.mxu0 %vm7230_vm3, %v10611_v63  ;;  %15666 = vst [vmem:[#allocation97_spill] sm:$0xff] %v11185_v44 }
 0x2fe   : > { %2054 = vmatmul.mubr.f32.gmra.mrb[26].mxu0 %v11160_v45  ;;  %v1125_v45 = vld [vmem:[#allocation6 + $0x3c8] sm:$0xff] }
 0x2ff   : > { %2058 = vmatprep.mubr.f32.mxu0 %v10623_v56 }
 0x302   : > { %2059 = vmatmul.mubr.f32.gmra.mrb[28].mxu0 %v11166_v50  ;;  %v7880_v50 = vpack.c.bf16 %v1125_v45, %v1124_v27  ;;  %v11198_v45 = vld [vmem:[%s9735_s8 + $0x98] sm:$0xff]  ;;  %v1126_v27 = vld [vmem:[#allocation6 + $0x3d0] sm:$0xff] }
 0x303   : > { %6656 = vmatprep.mubr.msk.f32.mxu0 %vm7230_vm3, %v10629_v14  ;;  %15668 = vst [vmem:[#allocation101_spill] sm:$0xff] %v11198_v45 }
 0x304   : > { %7881 = vmatpush1.bf16.msra.mxu0 %v7880_v50  ;;  %v11203_v50 = vld [vmem:[%s9735_s8 + $0xa0] sm:$0xff] }
 0x305   : > { %7882 = vmatprep.subr.bf16.mxu0 %v15501_v20  ;;  %15669 = vst [vmem:[#allocation104_spill] sm:$0xff] %v11203_v50 }
 0x306   : > { %2064 = vmatmul.mubr.f32.gmra.mrb[30].mxu0 %v11173_v5  ;;  %v11191_v5 = vld [vmem:[%s9735_s8 + $0x90] sm:$0xff] }
 0x307   : > { %2068 = vmatprep.mubr.f32.mxu0 %v10642_v30  ;;  %15667 = vst [vmem:[#allocation100_spill] sm:$0xff] %v11191_v5 }
 0x30a   : > { %2069 = vmatmul.mubr.f32.gmra.mrb[32].mxu0 %v11178_v54  ;;  %v11210_v54 = vld [vmem:[%s9735_s8 + $0xa8] sm:$0xff] }
 0x30b   : > { %6658 = vmatprep.mubr.msk.f32.mxu0 %vm7230_vm3, %v10648_v24  ;;  %15670 = vst [vmem:[#allocation105_spill] sm:$0xff] %v11210_v54 }
 0x30e   : > { %2074 = vmatmul.mubr.f32.gmra.mrb[34].mxu0 %v11185_v44  ;;  %v1127_v44 = vld [vmem:[#allocation6 + $0x3d8] sm:$0xff] }
 0x30f   : > { %2078 = vmatprep.mubr.f32.mxu0 %v10660_v16 }
 0x312   : > { %2079 = vmatmul.mubr.f32.gmra.mrb[36].mxu0 %v11191_v5  ;;  %v7883_v5 = vpack.c.bf16 %v1127_v44, %v1126_v27  ;;  %v1132_v44 = vld [vmem:[#allocation6 + $0x400] sm:$0xff] }
 0x313   : > { %6660 = vmatprep.mubr.msk.f32.mxu0 %vm7230_vm3, %v10666_v37 }
 0x314   : > { %7884 = vmatpush1.bf16.msra.mxu0 %v7883_v5  ;;  %v1133_v5 = vld [vmem:[#allocation6 + $0x408] sm:$0xff] }
 0x315   : > { %7885 = vmatprep.subr.bf16.mxu0 %v15501_v20  ;;  %v7891_v27 = vpack.c.bf16 %v1133_v5, %v1132_v44  ;;  %v1136_v44 = vld [vmem:[#allocation6 + $0x420] sm:$0xff]  ;;  %v11241_v5 = vld [vmem:[%s9735_s8 + $0xd0] sm:$0xff] }
 0x316   : > { %2084 = vmatmul.mubr.f32.gmra.mrb[38].mxu0 %v11198_v45  ;;  %v11216_v45 = vld [vmem:[%s9735_s8 + $0xb0] sm:$0xff]  ;;  %15675 = vst [vmem:[#allocation117_spill] sm:$0xff] %v11241_v5 }
 0x317   : > { %2088 = vmatprep.mubr.f32.mxu0 %v10679_v61  ;;  %15671 = vst [vmem:[#allocation108_spill] sm:$0xff] %v11216_v45  ;;  %7892 = vmatprep.subr.bf16.mxu1 %v7891_v27 }
 0x318   : > { %7894 = vmatpush3.bf16.msra.mxu1 %v7891_v27  ;;  %v11248_v27 = vld [vmem:[%s9735_s8 + $0xd8] sm:$0xff] }
 0x319   : > { %15676 = vst [vmem:[#allocation118_spill] sm:$0xff] %v11248_v27 }
 0x31a   : > { %2089 = vmatmul.mubr.f32.gmra.mrb[40].mxu0 %v11203_v50  ;;  %v11223_v50 = vld [vmem:[%s9735_s8 + $0xb8] sm:$0xff] }
 0x31b   : > { %6662 = vmatprep.mubr.msk.f32.mxu0 %vm7230_vm3, %v10685_v47  ;;  %15672 = vst [vmem:[#allocation109_spill] sm:$0xff] %v11223_v50 }
 0x31e   : > { %2094 = vmatmul.mubr.f32.gmra.mrb[42].mxu0 %v11210_v54  ;;  %v11228_v54 = vld [vmem:[%s9735_s8 + $0xc0] sm:$0xff] }
 0x31f   : > { %2098 = vmatprep.mubr.f32.mxu0 %v10697_v57  ;;  %15673 = vst [vmem:[#allocation115_spill] sm:$0xff] %v11228_v54 }
 0x322   : > { %2099 = vmatmul.mubr.f32.gmra.mrb[44].mxu0 %v11216_v45  ;;  %v1129_v45 = vld [vmem:[#allocation6 + $0x3e8] sm:$0xff] }
 0x323   : > { %6664 = vmatprep.mubr.msk.f32.mxu0 %vm7230_vm3, %v10703_v10  ;;  %v7886_v29 = vpack.c.bf16 %v1129_v45, %v1128_v7  ;;  %v1137_v7 = vld [vmem:[#allocation6 + $0x428] sm:$0xff] }
 0x324   : > { %v7899_v45 = vpack.c.bf16 %v1137_v7, %v1136_v44  ;;  %v835_v44 = vrot.slane %v10730_v34, 1  ;;  %v1140_v7 = vld [vmem:[#allocation6 + $0x440] sm:$0xff] }
 0x325   : > { %7887 = vmatpush1.bf16.msra.mxu0 %v7886_v29  ;;  %v1138_v29 = vld [vmem:[#allocation6 + $0x430] sm:$0xff] }
 0x326   : > { %2104 = vmatmul.mubr.f32.gmra.mrb[46].mxu0 %v11223_v50  ;;  %v1134_v50 = vld [vmem:[#allocation6 + $0x410] sm:$0xff]  ;;  %7888 = vmatprep.subr.bf16.mxu0 %v15501_v20 }
 0x327   : > { %2108 = vmatprep.mubr.f32.mxu0 %v10716_v40  ;;  %v7895_v59 = vpack.c.bf16 %v1135_v8, %v1134_v50  ;;  %v1139_v8 = vld [vmem:[#allocation6 + $0x438] sm:$0xff] }
 0x328   : > { %v7903_v50 = vpack.c.bf16 %v1139_v8, %v1138_v29  ;;  %v1130_v29 = vld [vmem:[#allocation6 + $0x3f0] sm:$0xff]  ;;  %v1131_v8 = vld [vmem:[#allocation6 + $0x3f8] sm:$0xff] }
 0x329   : > { %7896 = vmatprep.subr.bf16.mxu1 %v7895_v59 }
 0x32a   : > { %2109 = vmatmul.mubr.f32.gmra.mrb[48].mxu0 %v11228_v54  ;;  %7898 = vmatpush3.bf16.msra.mxu1 %v7895_v59  ;;  %v799_v59 = vrot.slane %v10727_v6, 1 }
 0x32b   : > { %6666 = vmatprep.mubr.msk.f32.mxu0 %vm7230_vm3, %v10722_v17  ;;  %7900 = vmatprep.subr.bf16.mxu1 %v7899_v45 }
 0x32c   : > { %v11263_v54 = vsel %vm855_vm2, %v799_v59, %v835_v44 }
 0x32e   : > { %2114 = vmatmul.mubr.f32.gmra.mrb[50].mxu0 %v11235_v9  ;;  %7902 = vmatpush3.bf16.msra.mxu1 %v7899_v45  ;;  %v11255_v45 = vld [vmem:[%s9735_s8 + $0xe0] sm:$0xff] }
 0x32f   : > { %2118 = vmatprep.mubr.f32.mxu0 %v10740_v18  ;;  %7904 = vmatprep.subr.bf16.mxu1 %v7903_v50  ;;  %15677 = vst [vmem:[#allocation119_spill] sm:$0xff] %v11255_v45 }
 0x332   : > { %2119 = vmatmul.mubr.f32.gmra.mrb[52].mxu0 %v11241_v5  ;;  %7906 = vmatpush3.bf16.msra.mxu1 %v7903_v50  ;;  %v1141_v5 = vld [vmem:[#allocation6 + $0x448] sm:$0xff]  ;;  %v1142_v50 = vld [vmem:[#allocation6 + $0x450] sm:$0xff] }
 0x333   : > { %6668 = vmatprep.mubr.msk.f32.mxu0 %vm7230_vm3, %v10748_v43  ;;  %v7907_v9 = vpack.c.bf16 %v1141_v5, %v1140_v7  ;;  %v7911_v5 = vpack.c.bf16 %v1143_v21, %v1142_v50  ;;  %v11266_v7 = vld [vmem:[%s9735_s8 + $0xe8] sm:$0xff]  ;;  %v1146_v21 = vld [vmem:[#allocation6 + $0x470] sm:$0xff] }
 0x335   : > { %7908 = vmatprep.subr.bf16.mxu1 %v7907_v9 }
 0x336   : > { %2124 = vmatmul.mubr.f32.gmra.mrb[54].mxu0 %v11248_v27  ;;  %v7889_v27 = vpack.c.bf16 %v1131_v8, %v1130_v29  ;;  %7910 = vmatpush3.bf16.msra.mxu1 %v7907_v9  ;;  %v11272_v29 = vsel %vm855_vm2, %v835_v44, %v799_v59  ;;  %v1144_v8 = vld [vmem:[#allocation6 + $0x460] sm:$0xff]  ;;  %v11571_v44 = vld [vmem:[%s9735_s8 + $0x1e8] sm:$0xff] }
 0x337   : > { %2128 = vmatprep.mubr.f32.mxu0 %v10765_v26  ;;  %7912 = vmatprep.subr.bf16.mxu1 %v7911_v5 }
 0x338   : > { %7890 = vmatpush1.bf16.msra.mxu0 %v7889_v27  ;;  %v1147_v27 = vld [vmem:[#allocation6 + $0x478] sm:$0xff] }
 0x339   : > { %v7919_v50 = vpack.c.bf16 %v1147_v27, %v1146_v21  ;;  %v15701_v21 = vld [vmem:[#allocation77_spill] sm:$0xff]  ;;  %v15702_v27 = vld [vmem:[#allocation24_spill] sm:$0xff] }
 0x33a   : > { %2129 = vmatmul.mubr.f32.gmra.mrb[56].mxu0 %v11255_v45  ;;  %7914 = vmatpush3.bf16.msra.mxu1 %v7911_v5  ;;  %v1145_v45 = vld [vmem:[#allocation6 + $0x468] sm:$0xff]  ;;  %v15696_v5 = vld [vmem:[#allocation21_spill] sm:$0xff] }
 0x33b   : > { %6670 = vmatprep.mubr.msk.f32.mxu0 %vm7230_vm3, %v10775_v53  ;;  %v7915_v9 = vpack.c.bf16 %v1145_v45, %v1144_v8  ;;  %v15695_v45 = vld [vmem:[#allocation72_spill] sm:$0xff] }
 0x33c   : > { %v15699_v8 = vld [vmem:[#allocation76_spill] sm:$0xff] }
 0x33d   : > { %7916 = vmatprep.subr.bf16.mxu1 %v7915_v9 }
 0x33e   : > { %2134 = vmatmul.mubr.f32.gmra.mrb[58].mxu0 %v11266_v7  ;;  %7918 = vmatpush3.bf16.msra.mxu1 %v7915_v9  ;;  %v15700_v9 = vld [vmem:[#allocation23_spill] sm:$0xff] }
 0x33f   : > { %2138 = vmatprep.mubr.f32.mxu0 %v11263_v54  ;;  %7920 = vmatprep.subr.bf16.mxu1 %v7919_v50 }
 0x342   : > { %2139 = vmatmul.mubr.f32.gmra.mrb[60].mxu0 %v10727_v6  ;;  %7922 = vmatpush3.bf16.msra.mxu1 %v7919_v50  ;;  %v9182_v6 = vld [vmem:[%s9735_s8 + $0x100] sm:$0xff]  ;;  %v15703_v50 = vld [vmem:[#allocation80_spill] sm:$0xff] }
 0x343   : > { %6672 = vmatprep.mubr.msk.f32.mxu0 %vm7230_vm3, %v11272_v29  ;;  %7923 = vmatprep.subr.bf16.mxu1 %v15501_v20 }
 0x345   : > { %7441 = vmatmul.mubr.msk.f32.vlgmr.msra.gmra.mrb[0].mxu1 %vm7230_vm3, %v10192_v0  ;;  %v11307_v0 = vld [vmem:[%s9735_s8 + $0x118] sm:$0xff] }
 0x346   : > { %2144 = vmatmul.mubr.f32.gmra.mrb[62].mxu0 %v10730_v34  ;;  %7443 = vmatprep.mubr.f32.mxu1 %v10526_v15  ;;  %v9183_v34 = vld [vmem:[%s9735_s8 + $0x108] sm:$0xff]  ;;  %v11316_v15 = vld [vmem:[%s9735_s8 + $0x120] sm:$0xff] }
 0x347   : > { %2148 = vmatprep.mubr.f32.mxu0 %v10795_v35  ;;  %v11296_v35 = vld [vmem:[%s9735_s8 + $0x110] sm:$0xff] }
 0x349   : > { %7444 = vmatmul.mubr.msk.f32.gmra.mrb[2].mxu1 %vm7230_vm3, %v10533_v32  ;;  %v11327_v32 = vld [vmem:[%s9735_s8 + $0x128] sm:$0xff] }
 0x34a   : > { %2149 = vmatmul.mubr.f32.gmra.mrb[64].mxu0 %v9182_v6  ;;  %7446 = vmatprep.mubr.f32.mxu1 %v10546_v3  ;;  %v11336_v3 = vld [vmem:[%s9735_s8 + $0x130] sm:$0xff]  ;;  %v15704_v6 = vld [vmem:[#allocation25_spill] sm:$0xff] }
 0x34b   : > { %6674 = vmatprep.mubr.msk.f32.mxu0 %vm7230_vm3, %v10801_v25  ;;  %v11527_v25 = vld [vmem:[%s9735_s8 + $0x1c8] sm:$0xff] }
 0x34d   : > { %7447 = vmatmul.mubr.msk.f32.gmra.mrb[4].mxu1 %vm7230_vm3, %v10553_v1  ;;  %v11347_v1 = vld [vmem:[%s9735_s8 + $0x138] sm:$0xff] }
 0x34e   : > { %2154 = vmatmul.mubr.f32.gmra.mrb[66].mxu0 %v9183_v34  ;;  %7449 = vmatprep.mubr.f32.mxu1 %v10566_v22  ;;  %v11356_v22 = vld [vmem:[%s9735_s8 + $0x140] sm:$0xff] }
 0x34f   : > { %2158 = vmatprep.mubr.f32.mxu0 %v10813_v60  ;;  %v15705_v34 = vld [vmem:[#allocation81_spill] sm:$0xff] }
 0x351   : > { %7450 = vmatmul.mubr.msk.f32.gmra.mrb[6].mxu1 %vm7230_vm3, %v10573_v42  ;;  %v11367_v42 = vld [vmem:[%s9735_s8 + $0x148] sm:$0xff] }
 0x352   : > { %2159 = vmatmul.mubr.f32.gmra.mrb[68].mxu0 %v11296_v35  ;;  %7452 = vmatprep.mubr.f32.mxu1 %v10586_v28  ;;  %v11376_v28 = vld [vmem:[%s9735_s8 + $0x150] sm:$0xff] }
 0x353   : > { %6676 = vmatprep.mubr.msk.f32.mxu0 %vm7230_vm3, %v10819_v11 }
 0x355   : > { %7453 = vmatmul.mubr.msk.f32.gmra.mrb[8].mxu1 %vm7230_vm3, %v10592_v58  ;;  %v11387_v58 = vld [vmem:[%s9735_s8 + $0x158] sm:$0xff] }
 0x356   : > { %2164 = vmatmul.mubr.f32.gmra.mrb[70].mxu0 %v11307_v0  ;;  %7455 = vmatprep.mubr.f32.mxu1 %v10605_v4  ;;  %v11396_v4 = vld [vmem:[%s9735_s8 + $0x160] sm:$0xff] }
 0x357   : > { %2168 = vmatprep.mubr.f32.mxu0 %v10831_v36 }
 0x359   : > { %7456 = vmatmul.mubr.msk.f32.gmra.mrb[10].mxu1 %vm7230_vm3, %v10611_v63  ;;  %v11407_v63 = vld [vmem:[%s9735_s8 + $0x168] sm:$0xff] }
 0x35a   : > { %2169 = vmatmul.mubr.f32.gmra.mrb[72].mxu0 %v11316_v15  ;;  %7458 = vmatprep.mubr.f32.mxu1 %v10623_v56  ;;  %v11416_v56 = vld [vmem:[%s9735_s8 + $0x170] sm:$0xff] }
 0x35b   : > { %6678 = vmatprep.mubr.msk.f32.mxu0 %vm7230_vm3, %v10837_v55 }
 0x35d   : > { %7459 = vmatmul.mubr.msk.f32.gmra.mrb[12].mxu1 %vm7230_vm3, %v10629_v14  ;;  %v15679_v14 = vld [vmem:[#allocation113_spill] sm:$0xff] }
 0x35e   : > { %2174 = vmatmul.mubr.f32.gmra.mrb[74].mxu0 %v11327_v32  ;;  %7461 = vmatprep.mubr.f32.mxu1 %v10642_v30  ;;  %v11427_v30 = vld [vmem:[%s9735_s8 + $0x178] sm:$0xff] }
 0x35f   : > { %2178 = vmatprep.mubr.f32.mxu0 %v10849_v23 }
 0x361   : > { %7462 = vmatmul.mubr.msk.f32.gmra.mrb[14].mxu1 %vm7230_vm3, %v10648_v24  ;;  %v15680_v24 = vld [vmem:[#allocation45_spill] sm:$0xff] }
 0x362   : > { %2179 = vmatmul.mubr.f32.gmra.mrb[76].mxu0 %v11336_v3  ;;  %7464 = vmatprep.mubr.f32.mxu1 %v10660_v16  ;;  %v11436_v16 = vld [vmem:[%s9735_s8 + $0x180] sm:$0xff] }
 0x363   : > { %6680 = vmatprep.mubr.msk.f32.mxu0 %vm7230_vm3, %v10855_v2 }
 0x365   : > { %7465 = vmatmul.mubr.msk.f32.gmra.mrb[16].mxu1 %vm7230_vm3, %v10666_v37  ;;  %v15681_v37 = vld [vmem:[#allocation48_spill] sm:$0xff] }
 0x366   : > { %2184 = vmatmul.mubr.f32.gmra.mrb[78].mxu0 %v11347_v1  ;;  %7467 = vmatprep.mubr.f32.mxu1 %v10679_v61  ;;  %v11447_v61 = vld [vmem:[%s9735_s8 + $0x188] sm:$0xff] }
 0x367   : > { %2188 = vmatprep.mubr.f32.mxu0 %v10867_v13 }
 0x369   : > { %7468 = vmatmul.mubr.msk.f32.gmra.mrb[18].mxu1 %vm7230_vm3, %v10685_v47  ;;  %v11456_v47 = vld [vmem:[%s9735_s8 + $0x190] sm:$0xff] }
 0x36a   : > { %2189 = vmatmul.mubr.f32.gmra.mrb[80].mxu0 %v11356_v22  ;;  %7470 = vmatprep.mubr.f32.mxu1 %v10697_v57  ;;  %v15683_v57 = vld [vmem:[#allocation55_spill] sm:$0xff] }
 0x36b   : > { %6682 = vmatprep.mubr.msk.f32.mxu0 %vm7230_vm3, %v10873_v12 }
 0x36d   : > { %7471 = vmatmul.mubr.msk.f32.gmra.mrb[20].mxu1 %vm7230_vm3, %v10703_v10  ;;  %v11476_v10 = vld [vmem:[%s9735_s8 + $0x1a0] sm:$0xff] }
 0x36e   : > { %2194 = vmatmul.mubr.f32.gmra.mrb[82].mxu0 %v11367_v42  ;;  %7473 = vmatprep.mubr.f32.mxu1 %v10716_v40  ;;  %v15685_v40 = vld [vmem:[#allocation53_spill] sm:$0xff] }
 0x36f   : > { %2198 = vmatprep.mubr.f32.mxu0 %v10885_v62 }
 0x371   : > { %7474 = vmatmul.mubr.msk.f32.gmra.mrb[22].mxu1 %vm7230_vm3, %v10722_v17  ;;  %v11496_v17 = vld [vmem:[%s9735_s8 + $0x1b0] sm:$0xff] }
 0x372   : > { %2199 = vmatmul.mubr.f32.gmra.mrb[84].mxu0 %v11376_v28  ;;  %7476 = vmatprep.mubr.f32.mxu1 %v10740_v18  ;;  %v15687_v18 = vld [vmem:[#allocation56_spill] sm:$0xff] }
 0x373   : > { %6684 = vmatprep.mubr.msk.f32.mxu0 %vm7230_vm3, %v10891_v48 }
 0x375   : > { %7477 = vmatmul.mubr.msk.f32.gmra.mrb[24].mxu1 %vm7230_vm3, %v10748_v43  ;;  %v15678_v43 = vld [vmem:[#allocation44_spill] sm:$0xff] }
 0x376   : > { %2204 = vmatmul.mubr.f32.gmra.mrb[86].mxu0 %v11387_v58  ;;  %7479 = vmatprep.mubr.f32.mxu1 %v10765_v26  ;;  %v11516_v26 = vld [vmem:[%s9735_s8 + $0x1c0] sm:$0xff] }
 0x377   : > { %2208 = vmatprep.mubr.f32.mxu0 %v10903_v52 }
 0x379   : > { %7480 = vmatmul.mubr.msk.f32.gmra.mrb[26].mxu1 %vm7230_vm3, %v10775_v53  ;;  %v15689_v53 = vld [vmem:[#allocation60_spill] sm:$0xff] }
 0x37a   : > { %2209 = vmatmul.mubr.f32.gmra.mrb[88].mxu0 %v11396_v4  ;;  %7482 = vmatprep.mubr.f32.mxu1 %v11263_v54  ;;  %v11558_v54 = vld [vmem:[%s9735_s8 + $0x1e0] sm:$0xff] }
 0x37b   : > { %6686 = vmatprep.mubr.msk.f32.mxu0 %vm7230_vm3, %v10909_v38 }
 0x37d   : > { %7483 = vmatmul.mubr.msk.f32.gmra.mrb[28].mxu1 %vm7230_vm3, %v11272_v29  ;;  %v15697_v29 = vld [vmem:[#allocation73_spill] sm:$0xff] }
 0x37e   : > { %2214 = vmatmul.mubr.f32.gmra.mrb[90].mxu0 %v11407_v63  ;;  %7485 = vmatprep.mubr.f32.mxu1 %v15679_v14 }
 0x37f   : > { %2218 = vmatprep.mubr.f32.mxu0 %v10921_v39 }
 0x381   : > { %7486 = vmatmul.mubr.msk.f32.gmra.mrb[30].mxu1 %vm7230_vm3, %v15679_v14 }
 0x382   : > { %2219 = vmatmul.mubr.f32.gmra.mrb[92].mxu0 %v11416_v56  ;;  %7488 = vmatprep.mubr.f32.mxu1 %v10813_v60  ;;  %v15682_v60 = vld [vmem:[#allocation49_spill] sm:$0xff] }
 0x383   : > { %6688 = vmatprep.mubr.msk.f32.mxu0 %vm7230_vm3, %v15678_v43 }
 0x385   : > { %7489 = vmatmul.mubr.msk.f32.gmra.mrb[32].mxu1 %vm7230_vm3, %v10819_v11  ;;  %v11536_v11 = vld [vmem:[%s9735_s8 + $0x1d0] sm:$0xff] }
 0x386   : > { %2224 = vmatmul.mubr.f32.gmra.mrb[94].mxu0 %v11427_v30  ;;  %7491 = vmatprep.mubr.f32.mxu1 %v10831_v36  ;;  %v11467_v36 = vld [vmem:[%s9735_s8 + $0x198] sm:$0xff] }
 0x387   : > { %2228 = vmatprep.mubr.f32.mxu0 %v15680_v24 }
 0x389   : > { %7492 = vmatmul.mubr.msk.f32.gmra.mrb[34].mxu1 %vm7230_vm3, %v10837_v55  ;;  %v11547_v55 = vld [vmem:[%s9735_s8 + $0x1d8] sm:$0xff] }
 0x38a   : > { %2229 = vmatmul.mubr.f32.gmra.mrb[96].mxu0 %v11436_v16  ;;  %7494 = vmatprep.mubr.f32.mxu1 %v10849_v23  ;;  %v15684_v23 = vld [vmem:[#allocation58_spill] sm:$0xff] }
 0x38b   : > { %6690 = vmatprep.mubr.msk.f32.mxu0 %vm7230_vm3, %v15681_v37 }
 0x38d   : > { %7495 = vmatmul.mubr.msk.f32.gmra.mrb[36].mxu1 %vm7230_vm3, %v10855_v2  ;;  %v15690_v2 = vld [vmem:[#allocation61_spill] sm:$0xff] }
 0x38e   : > { %2234 = vmatmul.mubr.f32.gmra.mrb[98].mxu0 %v11447_v61  ;;  %7497 = vmatprep.mubr.f32.mxu1 %v10867_v13  ;;  %v11487_v13 = vld [vmem:[%s9735_s8 + $0x1a8] sm:$0xff] }
 0x38f   : > { %2238 = vmatprep.mubr.f32.mxu0 %v15682_v60 }
 0x391   : > { %7498 = vmatmul.mubr.msk.f32.gmra.mrb[38].mxu1 %vm7230_vm3, %v10873_v12  ;;  %v817_v12 = vrot.slane %v15690_v2, 1 }
 0x392   : > { %2239 = vmatmul.mubr.f32.gmra.mrb[100].mxu0 %v11456_v47  ;;  %7500 = vmatprep.mubr.f32.mxu1 %v10885_v62  ;;  %v15686_v62 = vld [vmem:[#allocation54_spill] sm:$0xff] }
 0x393   : > { %6692 = vmatprep.mubr.msk.f32.mxu0 %vm7230_vm3, %v15683_v57 }
 0x395   : > { %7501 = vmatmul.mubr.msk.f32.gmra.mrb[40].mxu1 %vm7230_vm3, %v10891_v48  ;;  %v15691_v48 = vld [vmem:[#allocation64_spill] sm:$0xff] }
 0x396   : > { %2244 = vmatmul.mubr.f32.gmra.mrb[102].mxu0 %v11467_v36  ;;  %7503 = vmatprep.mubr.f32.mxu1 %v10903_v52  ;;  %v11507_v52 = vld [vmem:[%s9735_s8 + $0x1b8] sm:$0xff] }
 0x397   : > { %2248 = vmatprep.mubr.f32.mxu0 %v15684_v23 }
 0x399   : > { %7504 = vmatmul.mubr.msk.f32.gmra.mrb[42].mxu1 %vm7230_vm3, %v10909_v38  ;;  %v853_v38 = vrot.slane %v15691_v48, 1 }
 0x39a   : > { %2249 = vmatmul.mubr.f32.gmra.mrb[104].mxu0 %v11476_v10  ;;  %7506 = vmatprep.mubr.f32.mxu1 %v10921_v39  ;;  %v15688_v39 = vld [vmem:[#allocation57_spill] sm:$0xff] }
 0x39b   : > { %6694 = vmatprep.mubr.msk.f32.mxu0 %vm7230_vm3, %v15685_v40  ;;  %v890_v59 = vsel %vm855_vm2, %v817_v12, %v853_v38 }
 0x39d   : > { %7507 = vmatmul.mubr.msk.f32.gmra.mrb[44].mxu1 %vm7230_vm3, %v15678_v43  ;;  %v15706_v43 = vld [vmem:[#allocation26_spill] sm:$0xff] }
 0x39e   : > { %2254 = vmatmul.mubr.f32.gmra.mrb[106].mxu0 %v11487_v13  ;;  %7509 = vmatprep.mubr.f32.mxu1 %v15680_v24  ;;  %v15707_v24 = vld [vmem:[#allocation84_spill] sm:$0xff] }
 0x39f   : > { %2258 = vmatprep.mubr.f32.mxu0 %v15686_v62 }
 0x3a1   : > { %7510 = vmatmul.mubr.msk.f32.gmra.mrb[46].mxu1 %vm7230_vm3, %v15681_v37  ;;  %v15708_v37 = vld [vmem:[#allocation27_spill] sm:$0xff] }
 0x3a2   : > { %2259 = vmatmul.mubr.f32.gmra.mrb[108].mxu0 %v11496_v17  ;;  %7512 = vmatprep.mubr.f32.mxu1 %v15682_v60  ;;  %v15709_v60 = vld [vmem:[#allocation85_spill] sm:$0xff] }
 0x3a3   : > { %6696 = vmatprep.mubr.msk.f32.mxu0 %vm7230_vm3, %v15687_v18 }
 0x3a5   : > { %7513 = vmatmul.mubr.msk.f32.gmra.mrb[48].mxu1 %vm7230_vm3, %v15683_v57  ;;  %v15710_v57 = vld [vmem:[#allocation28_spill] sm:$0xff] }
 0x3a6   : > { %2264 = vmatmul.mubr.f32.gmra.mrb[110].mxu0 %v11507_v52  ;;  %7515 = vmatprep.mubr.f32.mxu1 %v15684_v23  ;;  %v15711_v23 = vld [vmem:[#allocation88_spill] sm:$0xff] }
 0x3a7   : > { %2268 = vmatprep.mubr.f32.mxu0 %v15688_v39 }
 0x3a9   : > { %7516 = vmatmul.mubr.msk.f32.gmra.mrb[50].mxu1 %vm7230_vm3, %v15685_v40  ;;  %v15712_v40 = vld [vmem:[#allocation29_spill] sm:$0xff] }
 0x3aa   : > { %2269 = vmatmul.mubr.f32.gmra.mrb[112].mxu0 %v11516_v26  ;;  %7518 = vmatprep.mubr.f32.mxu1 %v15686_v62  ;;  %v15713_v62 = vld [vmem:[#allocation89_spill] sm:$0xff] }
 0x3ab   : > { %6698 = vmatprep.mubr.msk.f32.mxu0 %vm7230_vm3, %v15689_v53 }
 0x3ad   : > { %7519 = vmatmul.mubr.msk.f32.gmra.mrb[52].mxu1 %vm7230_vm3, %v15687_v18  ;;  %v15714_v18 = vld [vmem:[#allocation30_spill] sm:$0xff] }
 0x3ae   : > { %2274 = vmatmul.mubr.f32.gmra.mrb[114].mxu0 %v11527_v25  ;;  %7521 = vmatprep.mubr.f32.mxu1 %v15688_v39  ;;  %v15715_v39 = vld [vmem:[#allocation92_spill] sm:$0xff] }
 0x3af   : > { %2278 = vmatprep.mubr.f32.mxu0 %v11035_v19 }
 0x3b1   : > { %7522 = vmatmul.mubr.msk.f32.gmra.mrb[54].mxu1 %vm7230_vm3, %v15689_v53  ;;  %v15716_v53 = vld [vmem:[#allocation31_spill] sm:$0xff] }
 0x3b2   : > { %2279 = vmatmul.mubr.f32.gmra.mrb[116].mxu0 %v11536_v11  ;;  %7524 = vmatprep.mubr.f32.mxu1 %v11035_v19  ;;  %v926_v19 = vsel %vm855_vm2, %v853_v38, %v817_v12  ;;  %v15718_v12 = vld [vmem:[#allocation32_spill] sm:$0xff]  ;;  %v15720_v38 = vld [vmem:[#allocation33_spill] sm:$0xff] }
 0x3b3   : > { %6700 = vmatprep.mubr.msk.f32.mxu0 %vm7230_vm3, %v11043_v33 }
 0x3b5   : > { %7525 = vmatmul.mubr.msk.f32.gmra.mrb[56].mxu1 %vm7230_vm3, %v11043_v33  ;;  %v15692_v33 = vld [vmem:[#allocation19_spill] sm:$0xff] }
 0x3b6   : > { %2284 = vmatmul.mubr.f32.gmra.mrb[118].mxu0 %v11547_v55  ;;  %7527 = vmatprep.mubr.f32.mxu1 %v11059_v41 }
 0x3b7   : > { %2288 = vmatprep.mubr.f32.mxu0 %v11059_v41  ;;  %v15693_v41 = vld [vmem:[#allocation69_spill] sm:$0xff] }
 0x3b9   : > { %7528 = vmatmul.mubr.msk.f32.gmra.mrb[58].mxu1 %vm7230_vm3, %v11069_v31 }
 0x3ba   : > { %2289 = vmatmul.mubr.f32.gmra.mrb[120].mxu0 %v11558_v54  ;;  %7530 = vmatprep.mubr.f32.mxu1 %v890_v59 }
 0x3bb   : > { %6702 = vmatprep.mubr.msk.f32.mxu0 %vm7230_vm3, %v11069_v31  ;;  %v15694_v31 = vld [vmem:[#allocation20_spill] sm:$0xff] }
 0x3bd   : > { %7531 = vmatmul.mubr.msk.f32.gmra.mrb[60].mxu1 %vm7230_vm3, %v926_v19 }
 0x3be   : > { %2294 = vmatmul.mubr.f32.gmra.mrb[122].mxu0 %v11571_v44  ;;  %7533 = vmatprep.mubr.f32.mxu1 %v15679_v14 }
 0x3bf   : > { %2298 = vmatprep.mubr.f32.mxu0 %v890_v59  ;;  %v15721_v59 = vld [vmem:[#allocation97_spill] sm:$0xff] }
 0x3c1   : > { %7534 = vmatmul.mubr.msk.f32.gmra.mrb[62].mxu1 %vm7230_vm3, %v15679_v14 }
 0x3c2   : > { %2299 = vmatmul.mubr.f32.gmra.mrb[124].mxu0 %v15690_v2  ;;  %v15717_v2 = vld [vmem:[#allocation93_spill] sm:$0xff] }
 0x3c3   : > { %6704 = vmatprep.mubr.msk.f32.mxu0 %vm7230_vm3, %v926_v19  ;;  %v15722_v19 = vld [vmem:[#allocation34_spill] sm:$0xff] }
 0x3c6   : > { %2304 = vmatmul.mubr.f32.gmra.mrb[126].mxu0 %v15691_v48  ;;  %v15719_v48 = vld [vmem:[#allocation96_spill] sm:$0xff] }
 0x3c7   : > { %2373 = vmatprep.mubr.f32.mxu0 %v11084_v46  ;;  %v15698_v46 = vld [vmem:[#allocation22_spill] sm:$0xff] }
 0x3ca   : > { %6706 = vmatmul.mubr.msk.f32.vlgmr.msra.gmra.mrb[0].mxu0 %vm7229_vm0, %v15692_v33  ;;  %v15723_v33 = vld [vmem:[#allocation100_spill] sm:$0xff] }
 0x3cb   : > { %2378 = vmatprep.mubr.f32.mxu0 %v15693_v41  ;;  %v15724_v41 = vld [vmem:[#allocation35_spill] sm:$0xff] }
 0x3ce   : > { %2379 = vmatmul.mubr.f32.gmra.mrb[2].mxu0 %v15694_v31  ;;  %v15725_v31 = vld [vmem:[#allocation101_spill] sm:$0xff] }
 0x3cf   : > { %2383 = vmatprep.mubr.f32.mxu0 %v15695_v45  ;;  %v15726_v45 = vld [vmem:[#allocation36_spill] sm:$0xff] }
 0x3d2   : > { %6708 = vmatmul.mubr.msk.f32.gmra.mrb[4].mxu0 %vm7229_vm0, %v15696_v5  ;;  %v15727_v5 = vld [vmem:[#allocation104_spill] sm:$0xff] }
 0x3d3   : > { %2388 = vmatprep.mubr.f32.mxu0 %v15697_v29  ;;  %v15728_v29 = vld [vmem:[#allocation37_spill] sm:$0xff] }
 0x3d6   : > { %2389 = vmatmul.mubr.f32.gmra.mrb[6].mxu0 %v15698_v46  ;;  %v15729_v46 = vld [vmem:[#allocation105_spill] sm:$0xff] }
 0x3d7   : > { %2393 = vmatprep.mubr.f32.mxu0 %v15699_v8  ;;  %v15730_v8 = vld [vmem:[#allocation38_spill] sm:$0xff] }
 0x3da   : > { %6710 = vmatmul.mubr.msk.f32.gmra.mrb[8].mxu0 %vm7229_vm0, %v15700_v9  ;;  %v15731_v9 = vld [vmem:[#allocation108_spill] sm:$0xff] }
 0x3db   : > { %2398 = vmatprep.mubr.f32.mxu0 %v15701_v21  ;;  %v15732_v21 = vld [vmem:[#allocation39_spill] sm:$0xff] }
 0x3de   : > { %2399 = vmatmul.mubr.f32.gmra.mrb[10].mxu0 %v15702_v27  ;;  %v15733_v27 = vld [vmem:[#allocation109_spill] sm:$0xff] }
 0x3df   : > { %2403 = vmatprep.mubr.f32.mxu0 %v15703_v50  ;;  %v15734_v50 = vld [vmem:[#allocation42_spill] sm:$0xff] }
 0x3e2   : > { %6712 = vmatmul.mubr.msk.f32.gmra.mrb[12].mxu0 %vm7229_vm0, %v15704_v6 }
 0x3e3   : > { %2408 = vmatprep.mubr.f32.mxu0 %v15705_v34  ;;  %v15735_v34 = vld [vmem:[#allocation115_spill] sm:$0xff] }
 0x3e6   : > { %2409 = vmatmul.mubr.f32.gmra.mrb[14].mxu0 %v15706_v43 }
 0x3e7   : > { %2413 = vmatprep.mubr.f32.mxu0 %v15707_v24  ;;  %v15736_v24 = vld [vmem:[#allocation43_spill] sm:$0xff] }
 0x3ea   : > { %6714 = vmatmul.mubr.msk.f32.gmra.mrb[16].mxu0 %vm7229_vm0, %v15708_v37  ;;  %v15737_v37 = vld [vmem:[#allocation116_spill] sm:$0xff] }
 0x3eb   : > { %2418 = vmatprep.mubr.f32.mxu0 %v15709_v60  ;;  %v15738_v60 = vld [vmem:[#allocation46_spill] sm:$0xff] }
 0x3ee   : > { %2419 = vmatmul.mubr.f32.gmra.mrb[18].mxu0 %v15710_v57 }
 0x3ef   : > { %2423 = vmatprep.mubr.f32.mxu0 %v15711_v23  ;;  %v15739_v23 = vld [vmem:[#allocation117_spill] sm:$0xff] }
 0x3f2   : > { %6716 = vmatmul.mubr.msk.f32.gmra.mrb[20].mxu0 %vm7229_vm0, %v15712_v40 }
 0x3f3   : > { %2428 = vmatprep.mubr.f32.mxu0 %v15713_v62  ;;  %v15740_v62 = vld [vmem:[#allocation47_spill] sm:$0xff] }
 0x3f6   : > { %2429 = vmatmul.mubr.f32.gmra.mrb[22].mxu0 %v15714_v18  ;;  %v15741_v18 = vld [vmem:[#allocation118_spill] sm:$0xff] }
 0x3f7   : > { %2433 = vmatprep.mubr.f32.mxu0 %v15715_v39  ;;  %v15742_v39 = vld [vmem:[#allocation50_spill] sm:$0xff] }
 0x3fa   : > { %6718 = vmatmul.mubr.msk.f32.gmra.mrb[24].mxu0 %vm7229_vm0, %v15716_v53 }
 0x3fb   : > { %2438 = vmatprep.mubr.f32.mxu0 %v15717_v2  ;;  %v15743_v2 = vld [vmem:[#allocation119_spill] sm:$0xff] }
 0x3fe   : > { %2439 = vmatmul.mubr.f32.gmra.mrb[26].mxu0 %v15718_v12 }
 0x3ff   : > { %2443 = vmatprep.mubr.f32.mxu0 %v15719_v48  ;;  %v15744_v48 = vld [vmem:[#allocation51_spill] sm:$0xff] }
 0x402   : > { %6720 = vmatmul.mubr.msk.f32.gmra.mrb[28].mxu0 %vm7229_vm0, %v15720_v38  ;;  %v15745_v38 = vld [vmem:[#allocation52_spill] sm:$0xff] }
 0x403   : > { %2448 = vmatprep.mubr.f32.mxu0 %v15721_v59 }
 0x406   : > { %2449 = vmatmul.mubr.f32.gmra.mrb[30].mxu0 %v15722_v19  ;;  %v9212_v19 = vld [vmem:[%s9735_s8 + $0xf0] sm:$0xff] }
 0x407   : > { %2453 = vmatprep.mubr.f32.mxu0 %v15723_v33 }
 0x40a   : > { %6722 = vmatmul.mubr.msk.f32.gmra.mrb[32].mxu0 %vm7229_vm0, %v15724_v41  ;;  %v15746_v41 = vld [vmem:[#allocation40_spill] sm:$0xff] }
 0x40b   : > { %2458 = vmatprep.mubr.f32.mxu0 %v15725_v31  ;;  %v9213_v31 = vld [vmem:[%s9735_s8 + $0xf8] sm:$0xff] }
 0x40e   : > { %2459 = vmatmul.mubr.f32.gmra.mrb[34].mxu0 %v15726_v45  ;;  %v15747_v45 = vld [vmem:[#allocation41_spill] sm:$0xff] }
 0x40f   : > { %2463 = vmatprep.mubr.f32.mxu0 %v15727_v5 }
 0x412   : > { %6724 = vmatmul.mubr.msk.f32.gmra.mrb[36].mxu0 %vm7229_vm0, %v15728_v29  ;;  %v15748_v29 = vmov 0.0  }
 0x413   : > { %2468 = vmatprep.mubr.f32.mxu0 %v15729_v46  ;;  %v15749_v46 = vld [vmem:[#allocation18_spill] sm:$0xff]  ;;  %7568 = vmatprep.mubr.msk.f32.mxu1 %vm9479_vm4, %v15748_v29 }
 0x416   : > { %2469 = vmatmul.mubr.f32.gmra.mrb[38].mxu0 %v15730_v8 }
 0x417   : > { %2473 = vmatprep.mubr.f32.mxu0 %v15731_v9 }
 0x418   : > { %v11655_v6 = vpop.f32.mrb[0].mxu1 }
 0x419   : > { %v11658_v43 = vpop.f32.mrb[1].mxu1 }
 0x41a   : > { %6726 = vmatmul.mubr.msk.f32.gmra.mrb[40].mxu0 %vm7229_vm0, %v15732_v21  ;;  %v15750_v21 = vld [vmem:[#allocation59_spill] sm:$0xff] }
 0x41b   : > { %2478 = vmatprep.mubr.f32.mxu0 %v15733_v27  ;;  %v15751_v27 = vld [vmem:[#allocation62_spill] sm:$0xff] }
 0x41c   : > { %v11665_v57 = vpop.f32.mrb[2].mxu1 }
 0x41d   : > { %v11668_v40 = vpop.f32.mrb[3].mxu1 }
 0x41e   : > { %2479 = vmatmul.mubr.f32.gmra.mrb[42].mxu0 %v15734_v50 }
 0x41f   : > { %2483 = vmatprep.mubr.f32.mxu0 %v15735_v34 }
 0x420   : > { %v11675_v53 = vpop.f32.mrb[4].mxu1 }
 0x421   : > { %v11678_v12 = vpop.f32.mrb[5].mxu1 }
 0x422   : > { %6728 = vmatmul.mubr.msk.f32.gmra.mrb[44].mxu0 %vm7229_vm0, %v15736_v24  ;;  %v15752_v24 = vld [vmem:[#allocation63_spill] sm:$0xff] }
 0x423   : > { %2488 = vmatprep.mubr.f32.mxu0 %v15737_v37 }
 0x424   : > { %v11685_v59 = vpop.f32.mrb[6].mxu1 }
 0x425   : > { %v11688_v33 = vpop.f32.mrb[7].mxu1 }
 0x426   : > { %2489 = vmatmul.mubr.f32.gmra.mrb[46].mxu0 %v15738_v60  ;;  %v15754_v60 = vld [vmem:[#allocation67_spill] sm:$0xff] }
 0x427   : > { %2493 = vmatprep.mubr.f32.mxu0 %v15739_v23 }
 0x428   : > { %v11695_v5 = vpop.f32.mrb[8].mxu1 }
 0x42a   : > { %6730 = vmatmul.mubr.msk.f32.gmra.mrb[48].mxu0 %vm7229_vm0, %v15740_v62  ;;  %v15756_v62 = vld [vmem:[#allocation71_spill] sm:$0xff] }
 0x42b   : > { %2498 = vmatprep.mubr.f32.mxu0 %v15741_v18 }
 0x42e   : > { %2499 = vmatmul.mubr.f32.gmra.mrb[50].mxu0 %v15742_v39  ;;  %v15758_v39 = vld [vmem:[#allocation75_spill] sm:$0xff] }
 0x42f   : > { %2503 = vmatprep.mubr.f32.mxu0 %v15743_v2 }
 0x432   : > { %6732 = vmatmul.mubr.msk.f32.gmra.mrb[52].mxu0 %vm7229_vm0, %v15744_v48  ;;  %v15760_v48 = vld [vmem:[#allocation79_spill] sm:$0xff] }
 0x433   : > { %2508 = vmatprep.mubr.f32.mxu0 %v11266_v7  ;;  %v11698_v7 = vpop.f32.mrb[9].mxu1 }
 0x434   : > { %v11705_v8 = vpop.f32.mrb[10].mxu1 }
 0x435   : > { %v11708_v9 = vpop.f32.mrb[11].mxu1 }
 0x436   : > { %2509 = vmatmul.mubr.f32.gmra.mrb[54].mxu0 %v15745_v38  ;;  %v11715_v50 = vpop.f32.mrb[12].mxu1 }
 0x437   : > { %2513 = vmatprep.mubr.f32.mxu0 %v9212_v19  ;;  %v11718_v34 = vpop.f32.mrb[13].mxu1  ;;  %v15762_v19 = vld [vmem:[#allocation83_spill] sm:$0xff] }
 0x438   : > { %v11725_v37 = vpop.f32.mrb[14].mxu1 }
 0x43a   : > { %6734 = vmatmul.mubr.msk.f32.gmra.mrb[56].mxu0 %vm7229_vm0, %v15746_v41 }
 0x43b   : > { %2518 = vmatprep.mubr.f32.mxu0 %v9213_v31  ;;  %v15764_v31 = vld [vmem:[#allocation87_spill] sm:$0xff] }
 0x43e   : > { %2519 = vmatmul.mubr.f32.gmra.mrb[58].mxu0 %v15747_v45 }
 0x43f   : > { %2523 = vmatprep.mubr.f32.mxu0 %v15748_v29 }
 0x442   : > { %6736 = vmatmul.mubr.msk.f32.gmra.mrb[60].mxu0 %vm7229_vm0, %v15749_v46 }
 0x443   : > { %2528 = vmatprep.mubr.f32.mxu0 %v15748_v29 }
 0x446   : > { %2529 = vmatmul.mubr.f32.gmra.mrb[62].mxu0 %v15749_v46 }
 0x447   : > { %2533 = vmatprep.mubr.f32.mxu0 %v11296_v35  ;;  %v15753_v35 = vld [vmem:[#allocation66_spill] sm:$0xff] }
 0x44a   : > { %6738 = vmatmul.mubr.msk.f32.gmra.mrb[64].mxu0 %vm7229_vm0, %v15750_v21  ;;  %v15766_v21 = vld [vmem:[#allocation91_spill] sm:$0xff] }
 0x44b   : > { %2538 = vmatprep.mubr.f32.mxu0 %v11307_v0  ;;  %v11728_v0 = vpop.f32.mrb[15].mxu1 }
 0x44c   : > { %v11735_v23 = vpop.f32.mrb[16].mxu1 }
 0x44e   : > { %2539 = vmatmul.mubr.f32.gmra.mrb[66].mxu0 %v15751_v27 }
 0x44f   : > { %2543 = vmatprep.mubr.f32.mxu0 %v11316_v15  ;;  %v15755_v15 = vld [vmem:[#allocation70_spill] sm:$0xff] }
 0x452   : > { %6740 = vmatmul.mubr.msk.f32.gmra.mrb[68].mxu0 %vm7229_vm0, %v15752_v24  ;;  %v15768_v24 = vld [vmem:[#allocation95_spill] sm:$0xff] }
 0x453   : > { %2548 = vmatprep.mubr.f32.mxu0 %v11327_v32  ;;  %v11738_v32 = vpop.f32.mrb[17].mxu1 }
 0x454   : > { %v11745_v18 = vpop.f32.mrb[18].mxu1 }
 0x456   : > { %2549 = vmatmul.mubr.f32.gmra.mrb[70].mxu0 %v15753_v35 }
 0x457   : > { %2553 = vmatprep.mubr.f32.mxu0 %v11336_v3  ;;  %v15757_v3 = vld [vmem:[#allocation74_spill] sm:$0xff] }
 0x45a   : > { %6742 = vmatmul.mubr.msk.f32.gmra.mrb[72].mxu0 %vm7229_vm0, %v15754_v60  ;;  %v15770_v60 = vld [vmem:[#allocation99_spill] sm:$0xff] }
 0x45b   : > { %2558 = vmatprep.mubr.f32.mxu0 %v11347_v1  ;;  %v11748_v1 = vpop.f32.mrb[19].mxu1 }
 0x45c   : > { %v11755_v2 = vpop.f32.mrb[20].mxu1 }
 0x45e   : > { %2559 = vmatmul.mubr.f32.gmra.mrb[74].mxu0 %v15755_v15 }
 0x45f   : > { %2563 = vmatprep.mubr.f32.mxu0 %v11356_v22  ;;  %v15759_v22 = vld [vmem:[#allocation78_spill] sm:$0xff] }
 0x462   : > { %6744 = vmatmul.mubr.msk.f32.gmra.mrb[76].mxu0 %vm7229_vm0, %v15756_v62 }
 0x463   : > { %2568 = vmatprep.mubr.f32.mxu0 %v11367_v42  ;;  %v11758_v42 = vpop.f32.mrb[21].mxu1 }
 0x464   : > { %v11765_v38 = vpop.f32.mrb[22].mxu1 }
 0x466   : > { %2569 = vmatmul.mubr.f32.gmra.mrb[78].mxu0 %v15757_v3  ;;  %v15771_v3 = vld [vmem:[#allocation102_spill] sm:$0xff] }
 0x467   : > { %2573 = vmatprep.mubr.f32.mxu0 %v11376_v28  ;;  %v15761_v28 = vld [vmem:[#allocation82_spill] sm:$0xff] }
 0x46a   : > { %6746 = vmatmul.mubr.msk.f32.gmra.mrb[80].mxu0 %vm7229_vm0, %v15758_v39 }
 0x46b   : > { %2578 = vmatprep.mubr.f32.mxu0 %v11387_v58  ;;  %v11768_v58 = vpop.f32.mrb[23].mxu1 }
 0x46c   : > { %v11775_v41 = vpop.f32.mrb[24].mxu1 }
 0x46e   : > { %2579 = vmatmul.mubr.f32.gmra.mrb[82].mxu0 %v15759_v22 }
 0x46f   : > { %2583 = vmatprep.mubr.f32.mxu0 %v11396_v4  ;;  %v15763_v4 = vld [vmem:[#allocation86_spill] sm:$0xff] }
 0x472   : > { %6748 = vmatmul.mubr.msk.f32.gmra.mrb[84].mxu0 %vm7229_vm0, %v15760_v48 }
 0x473   : > { %2588 = vmatprep.mubr.f32.mxu0 %v11407_v63  ;;  %v11778_v63 = vpop.f32.mrb[25].mxu1 }
 0x474   : > { %v11785_v45 = vpop.f32.mrb[26].mxu1 }
 0x476   : > { %2589 = vmatmul.mubr.f32.gmra.mrb[86].mxu0 %v15761_v28 }
 0x477   : > { %2593 = vmatprep.mubr.f32.mxu0 %v11416_v56  ;;  %v15765_v56 = vld [vmem:[#allocation90_spill] sm:$0xff] }
 0x47a   : > { %6750 = vmatmul.mubr.msk.f32.gmra.mrb[88].mxu0 %vm7229_vm0, %v15762_v19 }
 0x47b   : > { %2598 = vmatprep.mubr.f32.mxu0 %v11427_v30  ;;  %v11788_v30 = vpop.f32.mrb[27].mxu1 }
 0x47c   : > { %v11795_v27 = vpop.f32.mrb[28].mxu1 }
 0x47e   : > { %2599 = vmatmul.mubr.f32.gmra.mrb[90].mxu0 %v15763_v4 }
 0x47f   : > { %2603 = vmatprep.mubr.f32.mxu0 %v11436_v16  ;;  %v15767_v16 = vld [vmem:[#allocation94_spill] sm:$0xff] }
 0x482   : > { %6752 = vmatmul.mubr.msk.f32.gmra.mrb[92].mxu0 %vm7229_vm0, %v15764_v31 }
 0x483   : > { %2608 = vmatprep.mubr.f32.mxu0 %v11447_v61  ;;  %v11798_v61 = vpop.f32.mrb[29].mxu1 }
 0x484   : > { %v11805_v35 = vpop.f32.mrb[30].mxu1 }
 0x486   : > { %2609 = vmatmul.mubr.f32.gmra.mrb[94].mxu0 %v15765_v56 }
 0x487   : > { %2613 = vmatprep.mubr.f32.mxu0 %v11456_v47  ;;  %v15769_v47 = vld [vmem:[#allocation98_spill] sm:$0xff] }
 0x48a   : > { %6754 = vmatmul.mubr.msk.f32.gmra.mrb[96].mxu0 %vm7229_vm0, %v15766_v21  ;;  %v15773_v21 = vld [vmem:[#allocation106_spill] sm:$0xff] }
 0x48b   : > { %2618 = vmatprep.mubr.f32.mxu0 %v11467_v36  ;;  %v11808_v36 = vpop.f32.mrb[31].mxu1 }
 0x48e   : > { %2619 = vmatmul.mubr.f32.gmra.mrb[98].mxu0 %v15767_v16 }
 0x48f   : > { %2623 = vmatprep.mubr.f32.mxu0 %v11476_v10  ;;  %v11816_v10 = vld [vmem:[%s14913_s2] ss:$0 sm:$0xff] }
 0x492   : > { %6756 = vmatmul.mubr.msk.f32.gmra.mrb[100].mxu0 %vm7229_vm0, %v15768_v24 }
 0x493   : > { %2628 = vmatprep.mubr.f32.mxu0 %v11487_v13 }
 0x496   : > { %2629 = vmatmul.mubr.f32.gmra.mrb[102].mxu0 %v15769_v47 }
 0x497   : > { %2633 = vmatprep.mubr.f32.mxu0 %v11496_v17  ;;  %v11821_v17 = vpop.f32.mrb[32].mxu1 }
 0x498   : > { %v11824_v39 = vpop.f32.mrb[33].mxu1 }
 0x49a   : > { %6758 = vmatmul.mubr.msk.f32.gmra.mrb[104].mxu0 %vm7229_vm0, %v15770_v60  ;;  %v15774_v60 = vld [vmem:[#allocation107_spill] sm:$0xff] }
 0x49b   : > { %2638 = vmatprep.mubr.f32.mxu0 %v11507_v52  ;;  %v15772_v52 = vld [vmem:[#allocation103_spill] sm:$0xff] }
 0x49d   : > { %v2375_v13 = vpop.f32.mrb[0].mxu0 }
 0x49e   : > { %v8171_v15 = vadd.f32 %v11816_v10, %v2375_v13  ;;  %v2377_v62 = vpop.f32.mrb[1].mxu0  ;;  %2639 = vmatmul.mubr.f32.gmra.mrb[106].mxu0 %v15771_v3  ;;  %v15775_v3 = vld [vmem:[#allocation110_spill] sm:$0xff] }
 0x49f   : > { %2643 = vmatprep.mubr.f32.mxu0 %v11516_v26 }
 0x4a0   : > { %v11827_v22 = vadd.f32 %v8171_v15, %v11658_v43  ;;  %v11839_v43 = vpop.f32.mrb[34].mxu1 }
 0x4a1   : > { %v2380_v48 = vpop.f32.mrb[2].mxu0  ;;  %v11842_v16 = vpop.f32.mrb[35].mxu1 }
 0x4a2   : > { %v8172_v28 = vadd.f32 %v11816_v10, %v2380_v48  ;;  %v2382_v19 = vpop.f32.mrb[3].mxu0  ;;  %6760 = vmatmul.mubr.msk.f32.gmra.mrb[108].mxu0 %vm7229_vm0, %v15772_v52  ;;  %v15776_v52 = vld [vmem:[#allocation111_spill] sm:$0xff]  ;;  %vm3079_vm6 = vcmp.gt.f32.partialorder %v11827_v22, 0.0 }
 0x4a3   : > { %2648 = vmatprep.mubr.f32.mxu0 %v11527_v25 }
 0x4a4   : > { %v11835_v4 = vadd.f32 %v8172_v28, %v11655_v6 }
 0x4a5   : > { %v2385_v31 = vpop.f32.mrb[4].mxu0 }
 0x4a6   : > { %v8173_v26 = vadd.f32 %v11816_v10, %v2385_v31  ;;  %v2387_v56 = vpop.f32.mrb[5].mxu0  ;;  %2649 = vmatmul.mubr.f32.gmra.mrb[110].mxu0 %v15773_v21  ;;  %vm3080_vm5 = vcmp.gt.f32.partialorder %v11835_v4, 0.0 }
 0x4a7   : > { %2653 = vmatprep.mubr.f32.mxu0 %v11536_v11 }
 0x4a8   : > { %v11845_v24 = vadd.f32 %v8173_v26, %v11668_v40  ;;  %v11857_v40 = vpop.f32.mrb[36].mxu1 }
 0x4a9   : > { %v2390_v47 = vpop.f32.mrb[6].mxu0  ;;  %v11860_v48 = vpop.f32.mrb[37].mxu1 }
 0x4aa   : > { %v8174_v25 = vadd.f32 %v11816_v10, %v2390_v47  ;;  %v2392_v6 = vpop.f32.mrb[7].mxu0  ;;  %6762 = vmatmul.mubr.msk.f32.gmra.mrb[112].mxu0 %vm7229_vm0, %v15774_v60  ;;  %v11875_v21 = vpop.f32.mrb[38].mxu1  ;;  %v9214_v47 = vld [vmem:[%s9735_s8 + $0x1f0] sm:$0xff]  ;;  %v3349_v60 = vld [vmem:[#allocation9 + $0x8] sm:$0xff]  ;;  %vm3081_vm7 = vcmp.gt.f32.partialorder %v11845_v24, 0.0 }
 0x4ab   : > { %2658 = vmatprep.mubr.f32.mxu0 %v11547_v55 }
 0x4ac   : > { %v11853_v13 = vadd.f32 %v8174_v25, %v11665_v57  ;;  %v11878_v25 = vpop.f32.mrb[39].mxu1 }
 0x4ad   : > { %v2395_v15 = vpop.f32.mrb[8].mxu0 }
 0x4ae   : > { %v8175_v11 = vadd.f32 %v11816_v10, %v2395_v15  ;;  %v2397_v62 = vpop.f32.mrb[9].mxu0  ;;  %2659 = vmatmul.mubr.f32.gmra.mrb[114].mxu0 %v15775_v3  ;;  %v15778_v3 = vld [vmem:[#allocation65_spill] sm:$0xff]  ;;  %vm3082_vm8 = vcmp.gt.f32.partialorder %v11853_v13, 0.0 }
 0x4af   : > { %2663 = vmatprep.mubr.f32.mxu0 %v11558_v54 }
 0x4b0   : > { %v11863_v28 = vadd.f32 %v8175_v11, %v11678_v12  ;;  %v15777_v12 = vld [vmem:[#allocation112_spill] sm:$0xff] }
 0x4b1   : > { %v2400_v55 = vpop.f32.mrb[10].mxu0 }
 0x4b2   : > { %v8176_v57 = vadd.f32 %v11816_v10, %v2400_v55  ;;  %v2402_v19 = vpop.f32.mrb[11].mxu0  ;;  %6764 = vmatmul.mubr.msk.f32.gmra.mrb[116].mxu0 %vm7229_vm0, %v15776_v52  ;;  %v9215_v55 = vld [vmem:[%s9735_s8 + $0x1f8] sm:$0xff]  ;;  %vm3083_vm9 = vcmp.gt.f32.partialorder %v11863_v28, 0.0 }
 0x4b3   : > { %2668 = vmatprep.mubr.f32.mxu0 %v11571_v44  ;;  %v3348_v44 = vld [vmem:[#allocation9] sm:$0xff] }
 0x4b4   : > { %v11871_v31 = vadd.f32 %v8176_v57, %v11675_v53  ;;  %v7924_v15 = vpack.c.bf16 %v3349_v60, %v3348_v44 }
 0x4b5   : > { %v2405_v26 = vpop.f32.mrb[12].mxu0 }
 0x4b6   : > { %v8177_v54 = vadd.f32 %v11816_v10, %v2405_v26  ;;  %v2407_v56 = vpop.f32.mrb[13].mxu0  ;;  %2669 = vmatmul.mubr.f32.gmra.mrb[118].mxu0 %v15777_v12  ;;  %7925 = vmatpush3.bf16.msra.mxu1 %v7924_v15  ;;  %v15779_v26 = vld [vmem:[#allocation68_spill] sm:$0xff]  ;;  %vm3084_vm10 = vcmp.gt.f32.partialorder %v11871_v31, 0.0 }
 0x4b7   : > { %2673 = vmatprep.mubr.f32.mxu0 %v9214_v47  ;;  %7926 = vmatprep.subr.bf16.mxu1 %v15501_v20 }
 0x4b8   : > { %v11881_v6 = vadd.f32 %v8177_v54, %v11688_v33  ;;  %v11894_v54 = vpop.f32.mrb[40].mxu1 }
 0x4b9   : > { %v2410_v53 = vpop.f32.mrb[14].mxu0  ;;  %v11897_v56 = vpop.f32.mrb[41].mxu1 }
 0x4ba   : > { %v8178_v11 = vadd.f32 %v11816_v10, %v2410_v53  ;;  %v2412_v62 = vpop.f32.mrb[15].mxu0  ;;  %6766 = vmatmul.mubr.msk.f32.gmra.mrb[120].mxu0 %vm7229_vm0, %v15778_v3  ;;  %vm3085_vm11 = vcmp.gt.f32.partialorder %v11881_v6, 0.0 }
 0x4bb   : > { %2678 = vmatprep.mubr.f32.mxu0 %v9215_v55  ;;  %v3350_v55 = vld [vmem:[#allocation9 + $0x10] sm:$0xff] }
 0x4bc   : > { %v11889_v57 = vadd.f32 %v8178_v11, %v11685_v59 }
 0x4bd   : > { %v2415_v33 = vpop.f32.mrb[16].mxu0 }
 0x4be   : > { %v8179_v19 = vadd.f32 %v11816_v10, %v2415_v33  ;;  %v2417_v52 = vpop.f32.mrb[17].mxu0  ;;  %2679 = vmatmul.mubr.f32.gmra.mrb[122].mxu0 %v15779_v26  ;;  %v3351_v33 = vld [vmem:[#allocation9 + $0x18] sm:$0xff]  ;;  %vm3086_vm12 = vcmp.gt.f32.partialorder %v11889_v57, 0.0 }
 0x4bf   : > { %2683 = vmatprep.mubr.f32.mxu0 %v15748_v29  ;;  %v7927_v52 = vpack.c.bf16 %v3351_v33, %v3350_v55 }
 0x4c0   : > { %v11900_v12 = vadd.f32 %v8179_v19, %v11698_v7  ;;  %v11912_v7 = vpop.f32.mrb[42].mxu1 }
 0x4c1   : > { %v2420_v47 = vpop.f32.mrb[18].mxu0  ;;  %v11914_v62 = vpop.f32.mrb[43].mxu1  ;;  %7928 = vmatpush3.bf16.msra.mxu1 %v7927_v52 }
 0x4c2   : > { %v8180_v59 = vadd.f32 %v11816_v10, %v2420_v47  ;;  %v2422_v44 = vpop.f32.mrb[19].mxu0  ;;  %6768 = vmatmul.mubr.msk.f32.gmra.mrb[124].mxu0 %vm7229_vm0, %v15749_v46  ;;  %7929 = vmatprep.subr.bf16.mxu1 %v15501_v20  ;;  %vm3087_vm13 = vcmp.gt.f32.partialorder %v11900_v12, 0.0 }
 0x4c3   : > { %2688 = vmatprep.mubr.f32.mxu0 %v15748_v29 }
 0x4c4   : > { %v11908_v60 = vadd.f32 %v8180_v59, %v11695_v5 }
 0x4c5   : > { %v2425_v53 = vpop.f32.mrb[20].mxu0 }
 0x4c6   : > { %v8181_v15 = vadd.f32 %v11816_v10, %v2425_v53  ;;  %v2427_v11 = vpop.f32.mrb[21].mxu0  ;;  %2689 = vmatmul.mubr.f32.gmra.mrb[126].mxu0 %v15749_v46  ;;  %vm3088_vm14 = vcmp.gt.f32.partialorder %v11908_v60, 0.0 }
 0x4c7   : > { %v11925_v11 = vpop.f32.mrb[44].mxu1 }
 0x4c8   : > { %v11917_v3 = vadd.f32 %v8181_v15, %v11708_v9  ;;  %v11927_v9 = vpop.f32.mrb[45].mxu1 }
 0x4c9   : > { %v2430_v19 = vpop.f32.mrb[22].mxu0 }
 0x4ca   : > { %v8182_v5 = vadd.f32 %v11816_v10, %v2430_v19  ;;  %v2432_v26 = vpop.f32.mrb[23].mxu0  ;;  %vm3089_vm15 = vcmp.gt.f32.partialorder %v11917_v3, 0.0 }
 0x4cc   : > { %v11921_v47 = vadd.f32 %v8182_v5, %v11705_v8 }
 0x4cd   : > { %v2435_v59 = vpop.f32.mrb[24].mxu0 }
 0x4ce   : > { %v8183_v44 = vadd.f32 %v11816_v10, %v2435_v59  ;;  %v2437_v53 = vpop.f32.mrb[25].mxu0  ;;  %v11937_v59 = vpop.f32.mrb[46].mxu1  ;;  %vm3090_vm4 = vcmp.gt.f32.partialorder %v11921_v47, 0.0 }
 0x4cf   : > { %15780 = vst [vmem:[#allocation44_spill] sm:$0xff] %v11937_v59  ;;  %v11939_v53 = vpop.f32.mrb[47].mxu1 }
 0x4d0   : > { %v11930_v15 = vadd.f32 %v8183_v44, %v11718_v34  ;;  %v3352_v34 = vld [vmem:[#allocation9 + $0x20] sm:$0xff]  ;;  %v3353_v44 = vld [vmem:[#allocation9 + $0x28] sm:$0xff]  ;;  %v11950_v46 = vpop.f32.mrb[48].mxu1 }
 0x4d1   : > { %v2440_v55 = vpop.f32.mrb[26].mxu0  ;;  %v7930_v51 = vpack.c.bf16 %v3353_v44, %v3352_v34  ;;  %15781 = vst [vmem:[#allocation45_spill] sm:$0xff] %v11950_v46 }
 0x4d2   : > { %v8184_v33 = vadd.f32 %v11816_v10, %v2440_v55  ;;  %v2442_v19 = vpop.f32.mrb[27].mxu0 }
 0x4d3   : > { %7931 = vmatpush3.bf16.msra.mxu1 %v7930_v51 }
 0x4d4   : > { %v11934_v8 = vadd.f32 %v8184_v33, %v11715_v50  ;;  %7932 = vmatprep.subr.bf16.mxu1 %v15501_v20 }
 0x4d5   : > { %v2445_v52 = vpop.f32.mrb[28].mxu0 }
 0x4d6   : > { %v8185_v5 = vadd.f32 %v11816_v10, %v2445_v52  ;;  %v2447_v26 = vpop.f32.mrb[29].mxu0 }
 0x4d8   : > { %v11942_v14 = vadd.f32 %v8185_v5, %v11728_v0  ;;  %v11952_v0 = vpop.f32.mrb[49].mxu1 }
 0x4d9   : > { %v2450_v49 = vpop.f32.mrb[30].mxu0  ;;  %15782 = vst [vmem:[#allocation48_spill] sm:$0xff] %v11952_v0 }
 0x4da   : > { %v8186_v55 = vadd.f32 %v11816_v10, %v2450_v49  ;;  %v2452_v19 = vpop.f32.mrb[31].mxu0 }
 0x4dc   : > { %v11946_v50 = vadd.f32 %v8186_v55, %v11725_v37 }
 0x4dd   : > { %v2455_v33 = vpop.f32.mrb[32].mxu0 }
 0x4de   : > { %v8187_v52 = vadd.f32 %v11816_v10, %v2455_v33  ;;  %v2457_v26 = vpop.f32.mrb[33].mxu0  ;;  %v11962_v33 = vpop.f32.mrb[50].mxu1 }
 0x4df   : > { %15783 = vst [vmem:[#allocation49_spill] sm:$0xff] %v11962_v33  ;;  %v11964_v26 = vpop.f32.mrb[51].mxu1 }
 0x4e0   : > { %v11955_v5 = vadd.f32 %v8187_v52, %v11738_v32  ;;  %v3354_v32 = vld [vmem:[#allocation9 + $0x30] sm:$0xff]  ;;  %v3355_v52 = vld [vmem:[#allocation9 + $0x38] sm:$0xff]  ;;  %v11975_v33 = vpop.f32.mrb[52].mxu1 }
 0x4e1   : > { %v2460_v34 = vpop.f32.mrb[34].mxu0  ;;  %v7933_v59 = vpack.c.bf16 %v3355_v52, %v3354_v32  ;;  %15784 = vst [vmem:[#allocation55_spill] sm:$0xff] %v11975_v33 }
 0x4e2   : > { %v8188_v49 = vadd.f32 %v11816_v10, %v2460_v34  ;;  %v2462_v51 = vpop.f32.mrb[35].mxu0 }
 0x4e3   : > { %7934 = vmatpush3.bf16.msra.mxu1 %v7933_v59 }
 0x4e4   : > { %v11959_v37 = vadd.f32 %v8188_v49, %v11735_v23  ;;  %7935 = vmatprep.subr.bf16.mxu1 %v15501_v20 }
 0x4e5   : > { %v2465_v44 = vpop.f32.mrb[36].mxu0 }
 0x4e6   : > { %v8189_v55 = vadd.f32 %v11816_v10, %v2465_v44  ;;  %v2467_v19 = vpop.f32.mrb[37].mxu0 }
 0x4e8   : > { %v11967_v46 = vadd.f32 %v8189_v55, %v11748_v1  ;;  %v11977_v1 = vpop.f32.mrb[53].mxu1 }
 0x4e9   : > { %v2470_v0 = vpop.f32.mrb[38].mxu0  ;;  %15785 = vst [vmem:[#allocation58_spill] sm:$0xff] %v11977_v1 }
 0x4ea   : > { %v8190_v34 = vadd.f32 %v11816_v10, %v2470_v0  ;;  %v2472_v51 = vpop.f32.mrb[39].mxu0 }
 0x4ec   : > { %v11971_v23 = vadd.f32 %v8190_v34, %v11745_v18 }
 0x4ed   : > { %v2475_v49 = vpop.f32.mrb[40].mxu0 }
 0x4ee   : > { %v8191_v44 = vadd.f32 %v11816_v10, %v2475_v49  ;;  %v2477_v19 = vpop.f32.mrb[41].mxu0  ;;  %v11987_v49 = vpop.f32.mrb[54].mxu1 }
 0x4ef   : > { %15787 = vst [vmem:[#allocation54_spill] sm:$0xff] %v11987_v49  ;;  %v11989_v19 = vpop.f32.mrb[55].mxu1 }
 0x4f0   : > { %v11980_v55 = vadd.f32 %v8191_v44, %v11758_v42  ;;  %15788 = vst [vmem:[#allocation56_spill] sm:$0xff] %v11989_v19  ;;  %v3356_v42 = vld [vmem:[#allocation9 + $0x40] sm:$0xff]  ;;  %v3357_v44 = vld [vmem:[#allocation9 + $0x48] sm:$0xff]  ;;  %v12000_v49 = vpop.f32.mrb[56].mxu1 }
 0x4f1   : > { %v2480_v32 = vpop.f32.mrb[42].mxu0  ;;  %15789 = vst [vmem:[#allocation57_spill] sm:$0xff] %v12000_v49 }
 0x4f2   : > { %15786 = vst [vmem:[#allocation53_spill] sm:$0xff] %v11980_v55  ;;  %v8192_v0 = vadd.f32 %v11816_v10, %v2480_v32  ;;  %v2482_v59 = vpop.f32.mrb[43].mxu0  ;;  %v7936_v55 = vpack.c.bf16 %v3357_v44, %v3356_v42 }
 0x4f4   : > { %v11984_v18 = vadd.f32 %v8192_v0, %v11755_v2  ;;  %7937 = vmatpush3.bf16.msra.mxu1 %v7936_v55 }
 0x4f5   : > { %v2485_v52 = vpop.f32.mrb[44].mxu0  ;;  %7938 = vmatprep.subr.bf16.mxu1 %v15501_v20 }
 0x4f6   : > { %v8193_v34 = vadd.f32 %v11816_v10, %v2485_v52  ;;  %v2487_v51 = vpop.f32.mrb[45].mxu0 }
 0x4f8   : > { %v11992_v33 = vadd.f32 %v8193_v34, %v11768_v58  ;;  %v12002_v58 = vpop.f32.mrb[57].mxu1 }
 0x4f9   : > { %v2490_v1 = vpop.f32.mrb[46].mxu0  ;;  %15790 = vst [vmem:[#allocation60_spill] sm:$0xff] %v12002_v58 }
 0x4fa   : > { %v8194_v32 = vadd.f32 %v11816_v10, %v2490_v1  ;;  %v2492_v59 = vpop.f32.mrb[47].mxu0 }
 0x4fc   : > { %v11996_v2 = vadd.f32 %v8194_v32, %v11765_v38 }
 0x4fd   : > { %v2495_v0 = vpop.f32.mrb[48].mxu0 }
 0x4fe   : > { %v8195_v52 = vadd.f32 %v11816_v10, %v2495_v0  ;;  %v2497_v51 = vpop.f32.mrb[49].mxu0  ;;  %v12012_v0 = vpop.f32.mrb[58].mxu1 }
 0x4ff   : > { %15791 = vst [vmem:[#allocation61_spill] sm:$0xff] %v12012_v0  ;;  %v12014_v51 = vpop.f32.mrb[59].mxu1 }
 0x500   : > { %v12005_v34 = vadd.f32 %v8195_v52, %v11778_v63  ;;  %15792 = vst [vmem:[#allocation64_spill] sm:$0xff] %v12014_v51  ;;  %v3358_v63 = vld [vmem:[#allocation9 + $0x50] sm:$0xff]  ;;  %v3359_v52 = vld [vmem:[#allocation9 + $0x58] sm:$0xff]  ;;  %v12025_v0 = vpop.f32.mrb[60].mxu1 }
 0x501   : > { %v2500_v42 = vpop.f32.mrb[50].mxu0  ;;  %v7939_v19 = vpack.c.bf16 %v3359_v52, %v3358_v63  ;;  %15793 = vst [vmem:[#allocation19_spill] sm:$0xff] %v12025_v0 }
 0x502   : > { %v8196_v1 = vadd.f32 %v11816_v10, %v2500_v42  ;;  %v2502_v55 = vpop.f32.mrb[51].mxu0 }
 0x503   : > { %7940 = vmatpush3.bf16.msra.mxu1 %v7939_v19 }
 0x504   : > { %v12009_v38 = vadd.f32 %v8196_v1, %v11775_v41  ;;  %7941 = vmatprep.subr.bf16.mxu1 %v15501_v20 }
 0x505   : > { %v2505_v44 = vpop.f32.mrb[52].mxu0 }
 0x506   : > { %v8197_v32 = vadd.f32 %v11816_v10, %v2505_v44  ;;  %v2507_v59 = vpop.f32.mrb[53].mxu0 }
 0x508   : > { %v12017_v49 = vadd.f32 %v8197_v32, %v11788_v30  ;;  %v12027_v30 = vpop.f32.mrb[61].mxu1 }
 0x509   : > { %v2510_v58 = vpop.f32.mrb[54].mxu0  ;;  %15794 = vst [vmem:[#allocation69_spill] sm:$0xff] %v12027_v30 }
 0x50a   : > { %v8198_v42 = vadd.f32 %v11816_v10, %v2510_v58  ;;  %v2512_v55 = vpop.f32.mrb[55].mxu0 }
 0x50c   : > { %v12021_v41 = vadd.f32 %v8198_v42, %v11785_v45 }
 0x50d   : > { %v2515_v1 = vpop.f32.mrb[56].mxu0 }
 0x50e   : > { %v8199_v44 = vadd.f32 %v11816_v10, %v2515_v1  ;;  %v2517_v59 = vpop.f32.mrb[57].mxu0  ;;  %v12037_v1 = vpop.f32.mrb[62].mxu1 }
 0x50f   : > { %15795 = vst [vmem:[#allocation20_spill] sm:$0xff] %v12037_v1  ;;  %v12039_v59 = vpop.f32.mrb[63].mxu1 }
 0x510   : > { %v12030_v32 = vadd.f32 %v8199_v44, %v11798_v61  ;;  %15796 = vst [vmem:[#allocation72_spill] sm:$0xff] %v12039_v59  ;;  %v3360_v61 = vld [vmem:[#allocation9 + $0x60] sm:$0xff]  ;;  %v3361_v44 = vld [vmem:[#allocation9 + $0x68] sm:$0xff] }
 0x511   : > { %v2520_v63 = vpop.f32.mrb[58].mxu0  ;;  %v7942_v51 = vpack.c.bf16 %v3361_v44, %v3360_v61 }
 0x512   : > { %v8200_v58 = vadd.f32 %v11816_v10, %v2520_v63  ;;  %v2522_v19 = vpop.f32.mrb[59].mxu0 }
 0x513   : > { %7943 = vmatpush3.bf16.msra.mxu1 %v7942_v51 }
 0x514   : > { %v12034_v45 = vadd.f32 %v8200_v58, %v11795_v27  ;;  %7944 = vmatprep.subr.bf16.mxu1 %v15501_v20 }
 0x515   : > { %v2525_v52 = vpop.f32.mrb[60].mxu0 }
 0x516   : > { %v8201_v42 = vadd.f32 %v11816_v10, %v2525_v52  ;;  %v2527_v55 = vpop.f32.mrb[61].mxu0 }
 0x518   : > { %v12042_v0 = vadd.f32 %v8201_v42, %v11808_v36 }
 0x519   : > { %v2530_v30 = vpop.f32.mrb[62].mxu0 }
 0x51a   : > { %v8202_v63 = vadd.f32 %v11816_v10, %v2530_v30  ;;  %v2532_v19 = vpop.f32.mrb[63].mxu0 }
 0x51c   : > { %v12046_v27 = vadd.f32 %v8202_v63, %v11805_v35 }
 0x51d   : > { %v2535_v58 = vpop.f32.mrb[64].mxu0 }
 0x51e   : > { %v8203_v52 = vadd.f32 %v11816_v10, %v2535_v58  ;;  %v2537_v55 = vpop.f32.mrb[65].mxu0  ;;  %v3362_v58 = vld [vmem:[#allocation9 + $0x70] sm:$0xff] }
 0x51f   : > { %v3363_v55 = vld [vmem:[#allocation9 + $0x78] sm:$0xff] }
 0x520   : > { %v12051_v36 = vadd.f32 %v8203_v52, %v11824_v39  ;;  %v7945_v59 = vpack.c.bf16 %v3363_v55, %v3362_v58 }
 0x521   : > { %v2540_v42 = vpop.f32.mrb[66].mxu0 }
 0x522   : > { %v8204_v1 = vadd.f32 %v11816_v10, %v2540_v42  ;;  %v2542_v61 = vpop.f32.mrb[67].mxu0  ;;  %7946 = vmatpush3.bf16.msra.mxu1 %v7945_v59 }
 0x523   : > { %7947 = vmatprep.subr.bf16.mxu1 %v15501_v20 }
 0x524   : > { %v12055_v30 = vadd.f32 %v8204_v1, %v11821_v17 }
 0x525   : > { %v2545_v51 = vpop.f32.mrb[68].mxu0 }
 0x526   : > { %v8205_v35 = vadd.f32 %v11816_v10, %v2545_v51  ;;  %v2547_v44 = vpop.f32.mrb[69].mxu0 }
 0x528   : > { %v12059_v63 = vadd.f32 %v8205_v35, %v11842_v16 }
 0x529   : > { %v2550_v19 = vpop.f32.mrb[70].mxu0 }
 0x52a   : > { %v8206_v39 = vadd.f32 %v11816_v10, %v2550_v19  ;;  %v2552_v52 = vpop.f32.mrb[71].mxu0 }
 0x52c   : > { %v12064_v17 = vadd.f32 %v8206_v39, %v11839_v43 }
 0x52d   : > { %v2555_v1 = vpop.f32.mrb[72].mxu0 }
 0x52e   : > { %v8207_v16 = vadd.f32 %v11816_v10, %v2555_v1  ;;  %v2557_v42 = vpop.f32.mrb[73].mxu0 }
 0x52f   : > { %v3144_v42 = vmul.f32 0.2, %v11835_v4 }
 0x530   : > { %v12069_v61 = vadd.f32 %v8207_v16, %v11860_v48 }
 0x531   : > { %v2560_v51 = vpop.f32.mrb[74].mxu0 }
 0x532   : > { %v8208_v35 = vadd.f32 %v11816_v10, %v2560_v51  ;;  %v2562_v44 = vpop.f32.mrb[75].mxu0 }
 0x534   : > { %v12073_v19 = vadd.f32 %v8208_v35, %v11857_v40  ;;  %v3143_v35 = vmul.f32 0.2, %v11827_v22 }
 0x535   : > { %v2565_v58 = vpop.f32.mrb[76].mxu0 }
 0x536   : > { %v8209_v43 = vadd.f32 %v11816_v10, %v2565_v58  ;;  %v2567_v59 = vpop.f32.mrb[77].mxu0  ;;  %v12094_v58 = vsel %vm3080_vm5, %v11835_v4, %v3144_v42  ;;  %vm3091_vm5 = vcmp.gt.f32.partialorder %v11930_v15, 0.0 }
 0x538   : > { %v12077_v55 = vadd.f32 %v8209_v43, %v11878_v25  ;;  %v3145_v25 = vmul.f32 0.2, %v11845_v24  ;;  %v3146_v43 = vmul.f32 0.2, %v11853_v13 }
 0x539   : > { %v2570_v39 = vpop.f32.mrb[78].mxu0 }
 0x53a   : > { %v8210_v52 = vadd.f32 %v11816_v10, %v2570_v39  ;;  %v2572_v1 = vpop.f32.mrb[79].mxu0 }
 0x53b   : > { %v3147_v1 = vmul.f32 0.2, %v11863_v28 }
 0x53c   : > { %v12081_v48 = vadd.f32 %v8210_v52, %v11875_v21  ;;  %v12100_v52 = vsel %vm3079_vm6, %v11827_v22, %v3143_v35  ;;  %v3148_v22 = vmul.f32 0.2, %v11871_v31  ;;  %vm3092_vm6 = vcmp.gt.f32.partialorder %v11934_v8, 0.0 }
 0x53d   : > { %v2575_v16 = vpop.f32.mrb[80].mxu0  ;;  %v3271_v4 = vadd.f32 %v12094_v58, %v12100_v52 }
 0x53e   : > { %v8211_v40 = vadd.f32 %v11816_v10, %v2575_v16  ;;  %v2577_v51 = vpop.f32.mrb[81].mxu0 }
 0x540   : > { %v12089_v44 = vadd.f32 %v8211_v40, %v11897_v56  ;;  %v12103_v56 = vsel %vm3081_vm7, %v11845_v24, %v3145_v25  ;;  %v12113_v40 = vsel %vm3082_vm8, %v11853_v13, %v3146_v43  ;;  %v3149_v25 = vmul.f32 0.2, %v11881_v6 }
 0x541   : > { %v2580_v21 = vpop.f32.mrb[82].mxu0  ;;  %v3272_v35 = vadd.f32 %v3271_v4, %v12103_v56  ;;  %vm3093_vm7 = vcmp.gt.f32.partialorder %v11942_v14, 0.0  ;;  %vm3094_vm8 = vcmp.gt.f32.partialorder %v11946_v50, 0.0 }
 0x542   : > { %v8212_v59 = vadd.f32 %v11816_v10, %v2580_v21  ;;  %v2582_v39 = vpop.f32.mrb[83].mxu0 }
 0x543   : > { %v3273_v13 = vadd.f32 %v3272_v35, %v12113_v40  ;;  %v3150_v39 = vmul.f32 0.2, %v11889_v57  ;;  %v3152_v35 = vmul.f32 0.2, %v11908_v60 }
 0x544   : > { %v12107_v16 = vadd.f32 %v8212_v59, %v11894_v54  ;;  %v12120_v54 = vsel %vm3083_vm9, %v11863_v28, %v3147_v1  ;;  %v12129_v59 = vsel %vm3084_vm10, %v11871_v31, %v3148_v22  ;;  %v3151_v1 = vmul.f32 0.2, %v11900_v12 }
 0x545   : > { %v2585_v42 = vpop.f32.mrb[84].mxu0  ;;  %v3274_v28 = vadd.f32 %v3273_v13, %v12120_v54  ;;  %vm3095_vm9 = vcmp.gt.f32.partialorder %v11955_v5, 0.0  ;;  %vm3096_vm10 = vcmp.gt.f32.partialorder %v11959_v37, 0.0 }
 0x546   : > { %v8213_v51 = vadd.f32 %v11816_v10, %v2585_v42  ;;  %v2587_v24 = vpop.f32.mrb[85].mxu0 }
 0x547   : > { %v3275_v31 = vadd.f32 %v3274_v28, %v12129_v59  ;;  %v12145_v24 = vsel %vm3086_vm12, %v11889_v57, %v3150_v39  ;;  %v3154_v28 = vmul.f32 0.2, %v11921_v47  ;;  %vm3111_vm12 = vcmp.gt.f32.partialorder %v12051_v36, 0.0 }
 0x548   : > { %v12124_v21 = vadd.f32 %v8213_v51, %v11914_v62  ;;  %v12136_v62 = vsel %vm3085_vm11, %v11881_v6, %v3149_v25  ;;  %v3153_v25 = vmul.f32 0.2, %v11917_v3  ;;  %vm3112_vm11 = vcmp.gt.f32.partialorder %v12055_v30, 0.0 }
 0x549   : > { %v2590_v43 = vpop.f32.mrb[86].mxu0  ;;  %v3276_v6 = vadd.f32 %v3275_v31, %v12136_v62 }
 0x54a   : > { %v8214_v4 = vadd.f32 %v11816_v10, %v2590_v43  ;;  %v2592_v42 = vpop.f32.mrb[87].mxu0 }
 0x54b   : > { %v3277_v57 = vadd.f32 %v3276_v6, %v12145_v24  ;;  %v12161_v42 = vsel %vm3088_vm14, %v11908_v60, %v3152_v35  ;;  %v3156_v6 = vmul.f32 0.2, %v11934_v8  ;;  %vm3097_vm14 = vcmp.gt.f32.partialorder %v11967_v46, 0.0 }
 0x54c   : > { %v12140_v51 = vadd.f32 %v8214_v4, %v11912_v7  ;;  %v12152_v7 = vsel %vm3087_vm13, %v11900_v12, %v3151_v1  ;;  %v3155_v1 = vmul.f32 0.2, %v11930_v15  ;;  %vm3113_vm13 = vcmp.gt.f32.partialorder %v12059_v63, 0.0 }
 0x54d   : > { %v2595_v22 = vpop.f32.mrb[88].mxu0  ;;  %v3278_v12 = vadd.f32 %v3277_v57, %v12152_v7 }
 0x54e   : > { %v8215_v13 = vadd.f32 %v11816_v10, %v2595_v22  ;;  %v2597_v43 = vpop.f32.mrb[89].mxu0 }
 0x54f   : > { %v3279_v60 = vadd.f32 %v3278_v12, %v12161_v42  ;;  %v12177_v43 = vsel %vm3090_vm4, %v11921_v47, %v3154_v28  ;;  %v3158_v12 = vmul.f32 0.2, %v11946_v50  ;;  %vm3115_vm4 = vcmp.gt.f32.partialorder %v12069_v61, 0.0 }
 0x550   : > { %v12156_v4 = vadd.f32 %v8215_v13, %v11927_v9  ;;  %v12168_v9 = vsel %vm3089_vm15, %v11917_v3, %v3153_v25  ;;  %15797 = vst [vmem:[#allocation21_spill] sm:$0xff] %v12177_v43  ;;  %v3157_v25 = vmul.f32 0.2, %v11942_v14  ;;  %vm3114_vm15 = vcmp.gt.f32.partialorder %v12064_v17, 0.0 }
 0x551   : > { %v2600_v39 = vpop.f32.mrb[90].mxu0  ;;  %v3280_v3 = vadd.f32 %v3279_v60, %v12168_v9 }
 0x552   : > { %v8216_v31 = vadd.f32 %v11816_v10, %v2600_v39  ;;  %v2602_v22 = vpop.f32.mrb[91].mxu0 }
 0x553   : > { %v3281_v47 = vadd.f32 %v3280_v3, %v12177_v43  ;;  %v12193_v22 = vsel %vm3092_vm6, %v11934_v8, %v3156_v6  ;;  %v15801_v8 = vld [vmem:[#allocation44_spill] sm:$0xff]  ;;  %v3176_v43 = vmul.f32 0.2, %v12055_v30  ;;  %vm3116_vm6 = vcmp.gt.f32.partialorder %v12073_v19, 0.0 }
 0x554   : > { %v12172_v13 = vadd.f32 %v8216_v31, %v11925_v11  ;;  %v12184_v11 = vsel %vm3091_vm5, %v11930_v15, %v3155_v1  ;;  %15799 = vst [vmem:[#allocation22_spill] sm:$0xff] %v12193_v22  ;;  %v4240_v1 = vld [vmem:[#allocation8 + $0x400] sm:$0xff]  ;;  %vm3098_vm5 = vcmp.gt.f32.partialorder %v11971_v23, 0.0 }
 0x555   : > { %v2605_v35 = vpop.f32.mrb[92].mxu0  ;;  %15798 = vst [vmem:[#allocation73_spill] sm:$0xff] %v12184_v11  ;;  %v3282_v15 = vadd.f32 %v3281_v47, %v12184_v11  ;;  %v12210_v11 = vsel %vm3094_vm8, %v11946_v50, %v3158_v12  ;;  %v4242_v50 = vld [vmem:[#allocation8 + $0x410] sm:$0xff]  ;;  %v4243_v12 = vld [vmem:[#allocation8 + $0x418] sm:$0xff]  ;;  %vm3118_vm8 = vcmp.gt.f32.partialorder %v12081_v48, 0.0 }
 0x556   : > { %v8217_v57 = vadd.f32 %v11816_v10, %v2605_v35  ;;  %v2607_v39 = vpop.f32.mrb[93].mxu0 }
 0x557   : > { %v12201_v39 = vsel %vm3093_vm7, %v11942_v14, %v3157_v25  ;;  %vm3117_vm7 = vcmp.gt.f32.partialorder %v12077_v55, 0.0 }
 0x558   : > { %v12188_v31 = vadd.f32 %v8217_v57, %v11939_v53  ;;  %v3159_v53 = vmul.f32 0.2, %v11955_v5  ;;  %v4241_v57 = vld [vmem:[#allocation8 + $0x408] sm:$0xff]  ;;  %15800 = vst [vmem:[#allocation76_spill] sm:$0xff] %v12201_v39 }
 0x559   : > { %v2610_v28 = vpop.f32.mrb[94].mxu0  ;;  %v8139_v3 = vpack.c.bf16 %v4241_v57, %v4240_v1  ;;  %v3177_v57 = vmul.f32 0.2, %v12059_v63 }
 0x55a   : > { %v8218_v60 = vadd.f32 %v11816_v10, %v2610_v28  ;;  %v2612_v35 = vpop.f32.mrb[95].mxu0  ;;  %v3283_v28 = vadd.f32 %v3282_v15, %v12193_v22  ;;  %v12217_v1 = vsel %vm3095_vm9, %v11955_v5, %v3159_v53  ;;  %v3175_v15 = vmul.f32 0.2, %v12051_v36 }
 0x55b   : > { %v3160_v35 = vmul.f32 0.2, %v11959_v37  ;;  %8140 = vmatprep.subr.bf16.mxu0 %v8139_v3  ;;  %v3178_v22 = vmul.f32 0.2, %v12064_v17 }
 0x55c   : > { %v12205_v6 = vadd.f32 %v8218_v60, %v15801_v8  ;;  %v3284_v60 = vadd.f32 %v3283_v28, %v12201_v39  ;;  %8142 = vmatpush3.bf16.msra.mxu0 %v8139_v3  ;;  %v15802_v8 = vld [vmem:[#allocation48_spill] sm:$0xff]  ;;  %v3161_v3 = vmul.f32 0.2, %v11967_v46  ;;  %v12235_v39 = vsel %vm3112_vm11, %v12055_v30, %v3176_v43  ;;  %v4244_v30 = vld [vmem:[#allocation8 + $0x420] sm:$0xff]  ;;  %v4245_v43 = vld [vmem:[#allocation8 + $0x428] sm:$0xff] }
 0x55d   : > { %v2615_v47 = vpop.f32.mrb[96].mxu0  ;;  %v12230_v5 = vsel %vm3096_vm10, %v11959_v37, %v3160_v35  ;;  %15803 = vst [vmem:[#allocation23_spill] sm:$0xff] %v12235_v39  ;;  %v12244_v37 = vsel %vm3111_vm12, %v12051_v36, %v3175_v15  ;;  %v12248_v35 = vsel %vm3113_vm13, %v12059_v63, %v3177_v57  ;;  %v12262_v63 = vsel %vm3114_vm15, %v12064_v17, %v3178_v22 }
 0x55e   : > { %v8219_v14 = vadd.f32 %v11816_v10, %v2615_v47  ;;  %v2617_v25 = vpop.f32.mrb[97].mxu0  ;;  %v3285_v28 = vadd.f32 %v3284_v60, %v12210_v11  ;;  %15804 = vst [vmem:[#allocation77_spill] sm:$0xff] %v12244_v37  ;;  %v3308_v36 = vadd.f32 %v12235_v39, %v12244_v37  ;;  %15806 = vst [vmem:[#allocation24_spill] sm:$0xff] %v12262_v63  ;;  %v3180_v57 = vmul.f32 0.2, %v12073_v19 }
 0x55f   : > { %v8143_v25 = vpack.c.bf16 %v4243_v12, %v4242_v50  ;;  %v3179_v12 = vmul.f32 0.2, %v12069_v61  ;;  %v3181_v22 = vmul.f32 0.2, %v12077_v55  ;;  %v3182_v37 = vmul.f32 0.2, %v12081_v48 }
 0x560   : > { %v12224_v47 = vadd.f32 %v8219_v14, %v15802_v8  ;;  %v3286_v60 = vadd.f32 %v3285_v28, %v12217_v1  ;;  %v15805_v8 = vld [vmem:[#allocation45_spill] sm:$0xff]  ;;  %v8147_v28 = vpack.c.bf16 %v4245_v43, %v4244_v30  ;;  %v3309_v30 = vadd.f32 %v3308_v36, %v12248_v35 }
 0x561   : > { %v2620_v53 = vpop.f32.mrb[98].mxu0  ;;  %8144 = vmatprep.subr.bf16.mxu0 %v8143_v25  ;;  %v12271_v17 = vsel %vm3115_vm4, %v12069_v61, %v3179_v12  ;;  %vm3119_vm10 = vcmp.gt.f32.partialorder %v12089_v44, 0.0  ;;  %vm3100_vm11 = vcmp.gt.f32.partialorder %v11984_v18, 0.0  ;;  %vm3120_vm12 = vcmp.gt.f32.partialorder %v12107_v16, 0.0 }
 0x562   : > { %v8220_v14 = vadd.f32 %v11816_v10, %v2620_v53  ;;  %v2622_v50 = vpop.f32.mrb[99].mxu0  ;;  %8146 = vmatpush3.bf16.msra.mxu0 %v8143_v25  ;;  %v12259_v25 = vsel %vm3097_vm14, %v11967_v46, %v3161_v3  ;;  %v4246_v46 = vld [vmem:[#allocation8 + $0x430] sm:$0xff]  ;;  %v4247_v3 = vld [vmem:[#allocation8 + $0x438] sm:$0xff]  ;;  %vm3121_vm13 = vcmp.gt.f32.partialorder %v12124_v21, 0.0  ;;  %vm3101_vm14 = vcmp.gt.f32.partialorder %v11992_v33, 0.0 }
 0x563   : > { %v3287_v50 = vadd.f32 %v3286_v60, %v12230_v5  ;;  %8148 = vmatprep.subr.bf16.mxu0 %v8147_v28  ;;  %v3162_v60 = vmul.f32 0.2, %v11971_v23  ;;  %vm3122_vm15 = vcmp.gt.f32.partialorder %v12140_v51, 0.0  ;;  %vm3123_vm4 = vcmp.gt.f32.partialorder %v12156_v4, 0.0 }
 0x564   : > { %v12252_v53 = vadd.f32 %v8220_v14, %v15805_v8 }
 0x565   : > { %v2625_v15 = vpop.f32.mrb[100].mxu0  ;;  %v3288_v36 = vadd.f32 %v3287_v50, %v12259_v25  ;;  %v4249_v50 = vld [vmem:[#allocation8 + $0x448] sm:$0xff] }
 0x566   : > { %v8221_v14 = vadd.f32 %v11816_v10, %v2625_v15  ;;  %v2627_v8 = vpop.f32.mrb[101].mxu0  ;;  %8150 = vmatpush3.bf16.msra.mxu0 %v8147_v28  ;;  %v8151_v15 = vpack.c.bf16 %v4247_v3, %v4246_v46  ;;  %v12281_v28 = vsel %vm3116_vm6, %v12073_v19, %v3180_v57  ;;  %v4248_v19 = vld [vmem:[#allocation8 + $0x440] sm:$0xff]  ;;  %v12294_v57 = vsel %vm3117_vm7, %v12077_v55, %v3181_v22 }
 0x567   : > { %v3310_v8 = vadd.f32 %v3309_v30, %v12262_v63  ;;  %15807 = vst [vmem:[#allocation80_spill] sm:$0xff] %v12281_v28  ;;  %v15809_v3 = vld [vmem:[#allocation49_spill] sm:$0xff]  ;;  %v8155_v63 = vpack.c.bf16 %v4249_v50, %v4248_v19  ;;  %v12306_v55 = vsel %vm3118_vm8, %v12081_v48, %v3182_v37  ;;  %v3184_v22 = vmul.f32 0.2, %v12107_v16  ;;  %v15810_v37 = vld [vmem:[#allocation58_spill] sm:$0xff] }
 0x568   : > { %v12275_v43 = vadd.f32 %v8221_v14, %v11964_v26  ;;  %8152 = vmatprep.subr.bf16.mxu0 %v8151_v15  ;;  %v12288_v26 = vsel %vm3098_vm5, %v11971_v23, %v3162_v60  ;;  %v15808_v14 = vld [vmem:[#allocation53_spill] sm:$0xff]  ;;  %v3164_v23 = vmul.f32 0.2, %v11984_v18  ;;  %v3185_v48 = vmul.f32 0.2, %v12124_v21 }
 0x569   : > { %v2630_v39 = vpop.f32.mrb[102].mxu0  ;;  %v3163_v30 = vmul.f32 0.2, %v15808_v14  ;;  %v3311_v46 = vadd.f32 %v3310_v8, %v12271_v17  ;;  %vm3099_vm9 = vcmp.gt.f32.partialorder %v15808_v14, 0.0  ;;  %v3289_v19 = vadd.f32 %v3288_v36, %v12288_v26 }
 0x56a   : > { %v8222_v61 = vadd.f32 %v11816_v10, %v2630_v39  ;;  %v2632_v12 = vpop.f32.mrb[103].mxu0  ;;  %8154 = vmatpush3.bf16.msra.mxu0 %v8151_v15  ;;  %v3183_v39 = vmul.f32 0.2, %v12089_v44  ;;  %v3165_v36 = vmul.f32 0.2, %v11992_v33  ;;  %vm3102_vm5 = vcmp.gt.f32.partialorder %v11996_v2, 0.0 }
 0x56b   : > { %v3312_v60 = vadd.f32 %v3311_v46, %v12281_v28  ;;  %8156 = vmatprep.subr.bf16.mxu0 %v8155_v63  ;;  %v12314_v46 = vsel %vm3099_vm9, %v15808_v14, %v3163_v30  ;;  %v3186_v14 = vmul.f32 0.2, %v12140_v51  ;;  %vm3124_vm6 = vcmp.gt.f32.partialorder %v12172_v13, 0.0 }
 0x56c   : > { %v12298_v12 = vadd.f32 %v8222_v61, %v15809_v3  ;;  %v12317_v3 = vsel %vm3119_vm10, %v12089_v44, %v3183_v39  ;;  %v12331_v44 = vsel %vm3120_vm12, %v12107_v16, %v3184_v22  ;;  %v12346_v16 = vsel %vm3101_vm14, %v11992_v33, %v3165_v36 }
 0x56d   : > { %v2635_v15 = vpop.f32.mrb[104].mxu0  ;;  %v3313_v50 = vadd.f32 %v3312_v60, %v12294_v57  ;;  %15811 = vst [vmem:[#allocation25_spill] sm:$0xff] %v12331_v44  ;;  %v3167_v33 = vmul.f32 0.2, %v12005_v34  ;;  %vm3103_vm7 = vcmp.gt.f32.partialorder %v12005_v34, 0.0  ;;  %vm3125_vm8 = vcmp.gt.f32.partialorder %v12188_v31, 0.0 }
 0x56e   : > { %v8223_v8 = vadd.f32 %v11816_v10, %v2635_v15  ;;  %v2637_v61 = vpop.f32.mrb[105].mxu0  ;;  %8158 = vmatpush3.bf16.msra.mxu0 %v8155_v63  ;;  %v12324_v15 = vsel %vm3100_vm11, %v11984_v18, %v3164_v23  ;;  %v3290_v18 = vadd.f32 %v3289_v19, %v12314_v46  ;;  %vm3126_vm9 = vcmp.gt.f32.partialorder %v12205_v6, 0.0 }
 0x56f   : > { %v3314_v60 = vadd.f32 %v3313_v50, %v12306_v55  ;;  %v3187_v61 = vmul.f32 0.2, %v12156_v4  ;;  %v15813_v50 = vld [vmem:[#allocation55_spill] sm:$0xff]  ;;  %vm3104_vm10 = vcmp.gt.f32.partialorder %v12009_v38, 0.0  ;;  %vm3127_vm11 = vcmp.gt.f32.partialorder %v12224_v47, 0.0 }
 0x570   : > { %v12321_v28 = vadd.f32 %v8223_v8, %v15810_v37  ;;  %v12339_v8 = vsel %vm3121_vm13, %v12124_v21, %v3185_v48  ;;  %v3291_v22 = vadd.f32 %v3290_v18, %v12324_v15  ;;  %v12353_v21 = vsel %vm3122_vm15, %v12140_v51, %v3186_v14  ;;  %v15814_v14 = vld [vmem:[#allocation56_spill] sm:$0xff] }
 0x571   : > { %v2640_v63 = vpop.f32.mrb[106].mxu0  ;;  %v3315_v23 = vadd.f32 %v3314_v60, %v12317_v3  ;;  %15812 = vst [vmem:[#allocation81_spill] sm:$0xff] %v12339_v8  ;;  %v3166_v60 = vmul.f32 0.2, %v11996_v2  ;;  %v3188_v48 = vmul.f32 0.2, %v12172_v13  ;;  %v12363_v18 = vsel %vm3123_vm4, %v12156_v4, %v3187_v61 }
 0x572   : > { %v8224_v30 = vadd.f32 %v11816_v10, %v2640_v63  ;;  %v2642_v39 = vpop.f32.mrb[107].mxu0  ;;  %v3189_v51 = vmul.f32 0.2, %v12188_v31  ;;  %v3190_v4 = vmul.f32 0.2, %v12205_v6  ;;  %vm3128_vm12 = vcmp.gt.f32.partialorder %v12252_v53, 0.0 }
 0x573   : > { %v3316_v63 = vadd.f32 %v3315_v23, %v12331_v44  ;;  %vm3105_vm13 = vcmp.gt.f32.partialorder %v12017_v49, 0.0  ;;  %vm3129_vm14 = vcmp.gt.f32.partialorder %v12275_v43, 0.0  ;;  %vm3106_vm15 = vcmp.gt.f32.partialorder %v12021_v41, 0.0 }
 0x574   : > { %v12343_v37 = vadd.f32 %v8224_v30, %v15813_v50  ;;  %v3292_v50 = vadd.f32 %v3291_v22, %v12346_v16  ;;  %v3168_v22 = vmul.f32 0.2, %v12009_v38  ;;  %vm3130_vm4 = vcmp.gt.f32.partialorder %v12298_v12, 0.0 }
 0x575   : > { %v2645_v19 = vpop.f32.mrb[108].mxu0  ;;  %v3317_v36 = vadd.f32 %v3316_v63, %v12339_v8  ;;  %v12373_v63 = vsel %vm3102_vm5, %v11996_v2, %v3166_v60  ;;  %v12376_v8 = vsel %vm3124_vm6, %v12172_v13, %v3188_v48  ;;  %v12388_v2 = vsel %vm3125_vm8, %v12188_v31, %v3189_v51  ;;  %v15817_v60 = vld [vmem:[#allocation54_spill] sm:$0xff] }
 0x576   : > { %v8225_v30 = vadd.f32 %v11816_v10, %v2645_v19  ;;  %v2647_v39 = vpop.f32.mrb[109].mxu0  ;;  %15815 = vst [vmem:[#allocation26_spill] sm:$0xff] %v12376_v8  ;;  %15816 = vst [vmem:[#allocation84_spill] sm:$0xff] %v12388_v2  ;;  %v3191_v13 = vmul.f32 0.2, %v12224_v47  ;;  %vm3131_vm5 = vcmp.gt.f32.partialorder %v12321_v28, 0.0 }
 0x577   : > { %v3318_v19 = vadd.f32 %v3317_v36, %v12353_v21  ;;  %vm3107_vm6 = vcmp.gt.f32.partialorder %v12030_v32, 0.0  ;;  %vm3108_vm8 = vcmp.gt.f32.partialorder %v12034_v45, 0.0 }
 0x578   : > { %v12367_v23 = vadd.f32 %v8225_v30, %v15814_v14  ;;  %v12381_v30 = vsel %vm3103_vm7, %v12005_v34, %v3167_v33  ;;  %v12398_v14 = vsel %vm3126_vm9, %v12205_v6, %v3190_v4  ;;  %v3193_v6 = vmul.f32 0.2, %v12275_v43  ;;  %v15819_v4 = vld [vmem:[#allocation60_spill] sm:$0xff] }
 0x579   : > { %v2650_v39 = vpop.f32.mrb[110].mxu0  ;;  %v3319_v36 = vadd.f32 %v3318_v19, %v12363_v18  ;;  %15818 = vst [vmem:[#allocation27_spill] sm:$0xff] %v12398_v14  ;;  %v3192_v19 = vmul.f32 0.2, %v12252_v53  ;;  %vm3132_vm7 = vcmp.gt.f32.partialorder %v12343_v37, 0.0 }
 0x57a   : > { %v8226_v61 = vadd.f32 %v11816_v10, %v2650_v39  ;;  %v2652_v44 = vpop.f32.mrb[111].mxu0  ;;  %vm3133_vm9 = vcmp.gt.f32.partialorder %v12367_v23, 0.0 }
 0x57b   : > { %v3293_v44 = vadd.f32 %v3292_v50, %v12373_v63  ;;  %v3320_v34 = vadd.f32 %v3319_v36, %v12376_v8  ;;  %v3169_v36 = vmul.f32 0.2, %v12017_v49 }
 0x57c   : > { %v12392_v48 = vadd.f32 %v8226_v61, %v15817_v60  ;;  %v12404_v61 = vsel %vm3104_vm10, %v12009_v38, %v3168_v22  ;;  %v12410_v60 = vsel %vm3127_vm11, %v12224_v47, %v3191_v13  ;;  %v3194_v47 = vmul.f32 0.2, %v12298_v12  ;;  %v12428_v13 = vld [vmem:[%s14913_s2] ss:$0 sm:$0xff] }
 0x57d   : > { %v2655_v33 = vpop.f32.mrb[112].mxu0  ;;  %v3294_v39 = vadd.f32 %v3293_v44, %v12381_v30  ;;  %v3321_v50 = vadd.f32 %v3320_v34, %v12388_v2  ;;  %v12422_v44 = vsel %vm3128_vm12, %v12252_v53, %v3192_v19  ;;  %v12438_v53 = vsel %vm3129_vm14, %v12275_v43, %v3193_v6 }
 0x57e   : > { %v8227_v31 = vadd.f32 %v11816_v10, %v2655_v33  ;;  %v2657_v51 = vpop.f32.mrb[113].mxu0  ;;  %v3170_v10 = vmul.f32 0.2, %v12021_v41  ;;  %15820 = vst [vmem:[#allocation85_spill] sm:$0xff] %v12438_v53  ;;  %v3195_v19 = vmul.f32 0.2, %v12321_v28 }
 0x57f   : > { %v3322_v38 = vadd.f32 %v3321_v50, %v12398_v14  ;;  %v12435_v50 = vsel %vm3105_vm13, %v12017_v49, %v3169_v36  ;;  %v12450_v49 = vsel %vm3130_vm4, %v12298_v12, %v3194_v47  ;;  %v3196_v43 = vmul.f32 0.2, %v12343_v37  ;;  %v15823_v47 = vld [vmem:[#allocation64_spill] sm:$0xff] }
 0x580   : > { %v12414_v8 = vadd.f32 %v8227_v31, %v15819_v4  ;;  %v3295_v31 = vadd.f32 %v3294_v39, %v12404_v61  ;;  %v15821_v4 = vld [vmem:[#allocation57_spill] sm:$0xff]  ;;  %v12443_v2 = vsel %vm3106_vm15, %v12021_v41, %v3170_v10  ;;  %v3172_v10 = vmul.f32 0.2, %v12034_v45 }
 0x581   : > { %v2660_v22 = vpop.f32.mrb[114].mxu0  ;;  %v3323_v51 = vadd.f32 %v3322_v38, %v12410_v60  ;;  %v3197_v12 = vmul.f32 0.2, %v12367_v23  ;;  %vm3109_vm10 = vcmp.gt.f32.partialorder %v12042_v0, 0.0  ;;  %vm3134_vm11 = vcmp.gt.f32.partialorder %v12392_v48, 0.0 }
 0x582   : > { %v8228_v34 = vadd.f32 %v12428_v13, %v2660_v22  ;;  %v2662_v33 = vpop.f32.mrb[115].mxu0  ;;  %v3171_v22 = vmul.f32 0.2, %v12030_v32  ;;  %v3296_v41 = vadd.f32 %v3295_v31, %v12435_v50  ;;  %vm3110_vm12 = vcmp.gt.f32.partialorder %v12046_v27, 0.0 }
 0x583   : > { %v3324_v39 = vadd.f32 %v3323_v51, %v12422_v44  ;;  %v12460_v33 = vsel %vm3131_vm5, %v12321_v28, %v3195_v19  ;;  %v3198_v28 = vmul.f32 0.2, %v12392_v48  ;;  %vm3135_vm13 = vcmp.gt.f32.partialorder %v12414_v8, 0.0 }
 0x584   : > { %v3046_v14 = vadd.f32 %v8228_v34, %v15821_v4  ;;  %15822 = vst [vmem:[#allocation28_spill] sm:$0xff] %v12460_v33  ;;  %v12465_v4 = vsel %vm3107_vm6, %v12030_v32, %v3171_v22  ;;  %v3297_v31 = vadd.f32 %v3296_v41, %v12443_v2  ;;  %v12477_v32 = vsel %vm3108_vm8, %v12034_v45, %v3172_v10 }
 0x585   : > { %v2665_v38 = vpop.f32.mrb[116].mxu0  ;;  %v3325_v34 = vadd.f32 %v3324_v39, %v12438_v53  ;;  %v12472_v53 = vsel %vm3132_vm7, %v12343_v37, %v3196_v43  ;;  %v3174_v41 = vmul.f32 0.2, %v12046_v27  ;;  %v3199_v37 = vmul.f32 0.2, %v12414_v8  ;;  %v15826_v43 = vld [vmem:[#allocation61_spill] sm:$0xff] }
 0x586   : > { %v8229_v36 = vadd.f32 %v12428_v13, %v2665_v38  ;;  %v2667_v6 = vpop.f32.mrb[117].mxu0  ;;  %15824 = vst [vmem:[#allocation88_spill] sm:$0xff] %v12472_v53  ;;  %vm3136_vm14 = vcmp.gt.f32.partialorder %v3046_v14, 0.0 }
 0x587   : > { %v3326_v38 = vadd.f32 %v3325_v34, %v12450_v49  ;;  %v3173_v6 = vmul.f32 0.2, %v12042_v0  ;;  %v12484_v34 = vsel %vm3133_vm9, %v12367_v23, %v3197_v12  ;;  %v3200_v23 = vmul.f32 0.2, %v3046_v14 }
 0x588   : > { %v3051_v51 = vadd.f32 %v8229_v36, %v15823_v47  ;;  %15825 = vst [vmem:[#allocation29_spill] sm:$0xff] %v12484_v34  ;;  %vm3373_vm9 = vcmask 1041409  }
 0x589   : > { %v2670_v39 = vpop.f32.mrb[118].mxu0  ;;  %v3327_v22 = vadd.f32 %v3326_v38, %v12460_v33  ;;  %v12493_v38 = vsel %vm3109_vm10, %v12042_v0, %v3173_v6  ;;  %v15829_v6 = vld [vmem:[#allocation69_spill] sm:$0xff] }
 0x58a   : > { %v8230_v19 = vadd.f32 %v12428_v13, %v2670_v39  ;;  %v2672_v36 = vpop.f32.mrb[119].mxu0  ;;  %v3298_v39 = vadd.f32 %v3297_v31, %v12465_v4  ;;  %v3201_v0 = vmul.f32 0.2, %v3051_v51  ;;  %vm3137_vm15 = vcmp.gt.f32.partialorder %v3051_v51, 0.0 }
 0x58b   : > { %v3328_v45 = vadd.f32 %v3327_v22, %v12472_v53  ;;  %v12496_v36 = vsel %vm3134_vm11, %v12392_v48, %v3198_v28  ;;  %v12502_v22 = vsel %vm3110_vm12, %v12046_v27, %v3174_v41 }
 0x58c   : > { %v3056_v47 = vadd.f32 %v8230_v19, %v15826_v43  ;;  %15827 = vst [vmem:[#allocation89_spill] sm:$0xff] %v12496_v36  ;;  %v3299_v19 = vadd.f32 %v3298_v39, %v12477_v32  ;;  %v12505_v43 = vsel %vm3135_vm13, %v12414_v8, %v3199_v37  ;;  %v12515_v41 = vsel %vm3137_vm15, %v3051_v51, %v3201_v0  ;;  %v15834_v51 = vld [vmem:[#allocation72_spill] sm:$0xff] }
 0x58d   : > { %v2675_v10 = vpop.f32.mrb[120].mxu0  ;;  %v3329_v31 = vadd.f32 %v3328_v45, %v12484_v34  ;;  %15828 = vst [vmem:[#allocation30_spill] sm:$0xff] %v12505_v43 }
 0x58e   : > { %v8231_v12 = vadd.f32 %v12428_v13, %v2675_v10  ;;  %v2677_v33 = vpop.f32.mrb[121].mxu0  ;;  %v3300_v48 = vadd.f32 %v3299_v19, %v12493_v38  ;;  %v12510_v10 = vsel %vm3136_vm14, %v3046_v14, %v3200_v23  ;;  %v3202_v39 = vmul.f32 0.2, %v3056_v47 }
 0x58f   : > { %v3330_v28 = vadd.f32 %v3329_v31, %v12496_v36  ;;  %15830 = vst [vmem:[#allocation92_spill] sm:$0xff] %v12510_v10  ;;  %vm3138_vm4 = vcmp.gt.f32.partialorder %v3056_v47, 0.0 }
 0x590   : > { %v3061_v53 = vadd.f32 %v8231_v12, %v15829_v6  ;;  %v3301_v27 = vadd.f32 %v3300_v48, %v12502_v22  ;;  %v15831_v12 = vld [vmem:[#allocation19_spill] sm:$0xff]  ;;  %v12519_v14 = vsel %vm3138_vm4, %v3056_v47, %v3202_v39 }
 0x591   : > { %v2680_v33 = vpop.f32.mrb[122].mxu0  ;;  %v3331_v8 = vadd.f32 %v3330_v28, %v12505_v43  ;;  %15832 = vst [vmem:[#allocation31_spill] sm:$0xff] %v12519_v14 }
 0x592   : > { %v8232_v45 = vadd.f32 %v12428_v13, %v2680_v33  ;;  %v2682_v34 = vpop.f32.mrb[123].mxu0  ;;  %v3203_v37 = vmul.f32 0.2, %v3061_v53  ;;  %vm3139_vm5 = vcmp.gt.f32.partialorder %v3061_v53, 0.0  ;;  %v3302_v36 = vrot.slane %v3301_v27, 4 }
 0x593   : > { %v3332_v31 = vadd.f32 %v3331_v8, %v12510_v10 }
 0x594   : > { %v3066_v19 = vadd.f32 %v8232_v45, %v15831_v12  ;;  %v12523_v28 = vsel %vm3139_vm5, %v3061_v53, %v3203_v37 }
 0x595   : > { %v2685_v6 = vpop.f32.mrb[124].mxu0  ;;  %v3333_v48 = vadd.f32 %v3332_v31, %v12515_v41  ;;  %15833 = vst [vmem:[#allocation93_spill] sm:$0xff] %v12523_v28  ;;  %v15836_v31 = vld [vmem:[#allocation20_spill] sm:$0xff] }
 0x596   : > { %v3204_v23 = vmul.f32 0.2, %v3066_v19  ;;  %v8233_v33 = vadd.f32 %v12428_v13, %v2685_v6  ;;  %v2687_v34 = vpop.f32.mrb[125].mxu0  ;;  %vm3140_vm6 = vcmp.gt.f32.partialorder %v3066_v19, 0.0  ;;  %v3303_v6 = vadd.f32 %v3302_v36, %v3301_v27 }
 0x597   : > { %v3334_v45 = vadd.f32 %v3333_v48, %v12519_v14 }
 0x598   : > { %v3071_v0 = vadd.f32 %v8233_v33, %v15834_v51  ;;  %v12527_v8 = vsel %vm3140_vm6, %v3066_v19, %v3204_v23  ;;  %v3304_v48 = vrot.slane %v3303_v6, 2 }
 0x599   : > { %v2690_v12 = vpop.f32.mrb[126].mxu0  ;;  %15835 = vst [vmem:[#allocation32_spill] sm:$0xff] %v12527_v8  ;;  %v3335_v34 = vadd.f32 %v3334_v45, %v12523_v28 }
 0x59a   : > { %vm3141_vm7 = vcmp.gt.f32.partialorder %v3071_v0, 0.0  ;;  %v3205_v47 = vmul.f32 0.2, %v3071_v0  ;;  %v8234_v39 = vadd.f32 %v12428_v13, %v2690_v12  ;;  %v2692_v10 = vpop.f32.mrb[127].mxu0  ;;  %v3305_v13 = vadd.f32 %v3304_v48, %v3303_v6  ;;  %v4116_v48 = vld [vmem:[#allocation8 + $0x20] sm:$0xff] }
 0x59b   : > { %v3336_v37 = vadd.f32 %v3335_v34, %v12527_v8 }
 0x59c   : > { %v12531_v43 = vsel %vm3141_vm7, %v3071_v0, %v3205_v47  ;;  %v3076_v53 = vadd.f32 %v8234_v39, %v15836_v31  ;;  %v3306_v45 = vrot.slane %v3305_v13, 1  ;;  %v4112_v39 = vld [vmem:[#allocation8] sm:$0xff]  ;;  %v4113_v31 = vld [vmem:[#allocation8 + $0x8] sm:$0xff] }
 0x59d   : > { %v3337_v19 = vadd.f32 %v3336_v37, %v12531_v43  ;;  %v7948_v14 = vpack.c.bf16 %v4113_v31, %v4112_v39  ;;  %v4114_v37 = vld [vmem:[#allocation8 + $0x10] sm:$0xff] }
 0x59e   : > { %vm3142_vm8 = vcmp.gt.f32.partialorder %v3076_v53, 0.0  ;;  %v3206_v33 = vmul.f32 0.2, %v3076_v53  ;;  %v3307_v12 = vadd.f32 %v3306_v45, %v3305_v13  ;;  %v4118_v13 = vld [vmem:[#allocation8 + $0x30] sm:$0xff]  ;;  %v4123_v45 = vld [vmem:[#allocation8 + $0x58] sm:$0xff] }
 0x59f   : > { %v4126_v31 = vld [vmem:[#allocation8 + $0x70] sm:$0xff] }
 0x5a0   : > { %v12536_v23 = vsel %vm3142_vm8, %v3076_v53, %v3206_v33  ;;  %v3346_v8 = vmul.f32 0.00390625, %v3307_v12  ;;  %v4115_v53 = vld [vmem:[#allocation8 + $0x18] sm:$0xff]  ;;  %v4124_v12 = vld [vmem:[#allocation8 + $0x60] sm:$0xff] }
 0x5a1   : > { %v3338_v51 = vadd.f32 %v3337_v19, %v12536_v23  ;;  %v7951_v6 = vpack.c.bf16 %v4115_v53, %v4114_v37  ;;  %v4117_v19 = vld [vmem:[#allocation8 + $0x28] sm:$0xff]  ;;  %v4128_v53 = vld [vmem:[#allocation8 + $0x80] sm:$0xff] }
 0x5a3   : > { %v3339_v10 = vrot.slane %v3338_v51, 4 }
 0x5a5   : > { %v3340_v36 = vadd.f32 %v3339_v10, %v3338_v51  ;;  %v7954_v51 = vpack.c.bf16 %v4117_v19, %v4116_v48  ;;  %v4119_v10 = vld [vmem:[#allocation8 + $0x38] sm:$0xff]  ;;  %v4130_v48 = vld [vmem:[#allocation8 + $0x90] sm:$0xff] }
 0x5a6   : > { %v4131_v19 = vld [vmem:[#allocation8 + $0x98] sm:$0xff] }
 0x5a7   : > { %v3341_v27 = vrot.slane %v3340_v36, 2 }
 0x5a9   : > { %v3342_v0 = vadd.f32 %v3341_v27, %v3340_v36  ;;  %v7957_v36 = vpack.c.bf16 %v4119_v10, %v4118_v13  ;;  %v4122_v27 = vld [vmem:[#allocation8 + $0x50] sm:$0xff]  ;;  %v4132_v13 = vld [vmem:[#allocation8 + $0xa0] sm:$0xff]  ;;  %v4133_v10 = vld [vmem:[#allocation8 + $0xa8] sm:$0xff] }
 0x5ab   : > { %v3343_v47 = vrot.slane %v3342_v0, 1 }
 0x5ad   : > { %v3344_v34 = vadd.f32 %v3343_v47, %v3342_v0  ;;  %v7963_v0 = vpack.c.bf16 %v4123_v45, %v4122_v27  ;;  %v4125_v47 = vld [vmem:[#allocation8 + $0x68] sm:$0xff]  ;;  %v4136_v27 = vld [vmem:[#allocation8 + $0xc0] sm:$0xff] }
 0x5ae   : > { %v7966_v39 = vpack.c.bf16 %v4125_v47, %v4124_v12  ;;  %v4137_v45 = vld [vmem:[#allocation8 + $0xc8] sm:$0xff]  ;;  %v4138_v12 = vld [vmem:[#allocation8 + $0xd0] sm:$0xff]  ;;  %v4139_v47 = vld [vmem:[#allocation8 + $0xd8] sm:$0xff] }
 0x5af   : > { %v3347_v28 = vmul.f32 0.00390625, %v3344_v34  ;;  %v4127_v34 = vld [vmem:[#allocation8 + $0x78] sm:$0xff] }
 0x5b0   : > { %v7969_v37 = vpack.c.bf16 %v4127_v34, %v4126_v31  ;;  %v4140_v31 = vld [vmem:[#allocation8 + $0xe0] sm:$0xff]  ;;  %v4141_v34 = vld [vmem:[#allocation8 + $0xe8] sm:$0xff] }
 0x5b1   : > { %v3374_v33 = vsel %vm3373_vm9, %v3347_v28, %v3346_v8  ;;  %v4120_v28 = vld [vmem:[#allocation8 + $0x40] sm:$0xff]  ;;  %v4121_v8 = vld [vmem:[#allocation8 + $0x48] sm:$0xff] }
 0x5b2   : > { %7569 = vmatmul.mubr.f32.vlgmr.msra.gmra.mrb[64].mxu1 %v3374_v33  ;;  %v4129_v33 = vld [vmem:[#allocation8 + $0x88] sm:$0xff] }
 0x5b3   : > { %7949 = vmatpush1.bf16.msra.mxu1 %v7948_v14  ;;  %4326 = vmatprep.mubr.f32.mxu1 %v15748_v29  ;;  %v7960_v14 = vpack.c.bf16 %v4121_v8, %v4120_v28  ;;  %v4134_v28 = vld [vmem:[#allocation8 + $0xb0] sm:$0xff]  ;;  %v4135_v8 = vld [vmem:[#allocation8 + $0xb8] sm:$0xff] }
 0x5b4   : > { %7950 = vmatprep.subr.bf16.mxu1 %v15501_v20 }
 0x5b7   : > { %7952 = vmatpush1.bf16.msra.mxu1 %v7951_v6  ;;  %v7972_v6 = vpack.c.bf16 %v4129_v33, %v4128_v53  ;;  %v4142_v53 = vld [vmem:[#allocation8 + $0xf0] sm:$0xff]  ;;  %v4143_v33 = vld [vmem:[#allocation8 + $0xf8] sm:$0xff] }
 0x5b8   : > { %7953 = vmatprep.subr.bf16.mxu1 %v15501_v20 }
 0x5bb   : > { %7955 = vmatpush1.bf16.msra.mxu1 %v7954_v51  ;;  %v7975_v51 = vpack.c.bf16 %v4131_v19, %v4130_v48  ;;  %v7993_v48 = vpack.c.bf16 %v4143_v33, %v4142_v53  ;;  %v4251_v19 = vld [vmem:[#allocation8 + $0x458] sm:$0xff]  ;;  %v4149_v53 = vld [vmem:[#allocation8 + $0x128] sm:$0xff] }
 0x5bc   : > { %7956 = vmatprep.subr.bf16.mxu1 %v15501_v20 }
 0x5bf   : > { %7958 = vmatpush1.bf16.msra.mxu1 %v7957_v36  ;;  %v7978_v36 = vpack.c.bf16 %v4133_v10, %v4132_v13  ;;  %v4252_v13 = vld [vmem:[#allocation8 + $0x460] sm:$0xff]  ;;  %v4253_v10 = vld [vmem:[#allocation8 + $0x468] sm:$0xff] }
 0x5c0   : > { %7959 = vmatprep.subr.bf16.mxu1 %v15501_v20 }
 0x5c3   : > { %7961 = vmatpush1.bf16.msra.mxu1 %v7960_v14  ;;  %v7981_v14 = vpack.c.bf16 %v4135_v8, %v4134_v28  ;;  %v15837_v28 = vld [vmem:[#allocation18_spill] sm:$0xff]  ;;  %v15838_v8 = vld [vmem:[#allocation17_spill] sm:$0xff] }
 0x5c4   : > { %7962 = vmatprep.subr.bf16.mxu1 %v15501_v20 }
 0x5c7   : > { %7964 = vmatpush1.bf16.msra.mxu1 %v7963_v0  ;;  %v7984_v0 = vpack.c.bf16 %v4137_v45, %v4136_v27  ;;  %v4255_v27 = vld [vmem:[#allocation8 + $0x478] sm:$0xff] }
 0x5c8   : > { %7965 = vmatprep.subr.bf16.mxu1 %v15501_v20 }
 0x5cb   : > { %7967 = vmatpush1.bf16.msra.mxu1 %v7966_v39  ;;  %v7987_v39 = vpack.c.bf16 %v4139_v47, %v4138_v12  ;;  %v4145_v12 = vld [vmem:[#allocation8 + $0x108] sm:$0xff] }
 0x5cc   : > { %7968 = vmatprep.subr.bf16.mxu1 %v15501_v20 }
 0x5cf   : > { %7970 = vmatpush1.bf16.msra.mxu1 %v7969_v37  ;;  %v7990_v37 = vpack.c.bf16 %v4141_v34, %v4140_v31  ;;  %v4147_v31 = vld [vmem:[#allocation8 + $0x118] sm:$0xff] }
 0x5d0   : > { %7971 = vmatprep.subr.bf16.mxu1 %v15501_v20 }
 0x5d3   : > { %7973 = vmatpush1.bf16.msra.mxu1 %v7972_v6  ;;  %v4250_v6 = vld [vmem:[#allocation8 + $0x450] sm:$0xff] }
 0x5d4   : > { %7974 = vmatprep.subr.bf16.mxu1 %v15501_v20 }
 0x5d7   : > { %7976 = vmatpush1.bf16.msra.mxu1 %v7975_v51  ;;  %v8159_v51 = vpack.c.bf16 %v4251_v19, %v4250_v6  ;;  %v4150_v6 = vld [vmem:[#allocation8 + $0x130] sm:$0xff] }
 0x5d8   : > { %7977 = vmatprep.subr.bf16.mxu1 %v15501_v20 }
 0x5d9   : > { %8160 = vmatprep.subr.bf16.mxu0 %v8159_v51 }
 0x5da   : > { %8162 = vmatpush3.bf16.msra.mxu0 %v8159_v51  ;;  %v4152_v51 = vld [vmem:[#allocation8 + $0x140] sm:$0xff] }
 0x5db   : > { %7979 = vmatpush1.bf16.msra.mxu1 %v7978_v36  ;;  %v8163_v36 = vpack.c.bf16 %v4253_v10, %v4252_v13  ;;  %v4153_v13 = vld [vmem:[#allocation8 + $0x148] sm:$0xff] }
 0x5dc   : > { %7980 = vmatprep.subr.bf16.mxu1 %v15501_v20  ;;  %v8008_v10 = vpack.c.bf16 %v4153_v13, %v4152_v51 }
 0x5dd   : > { %8164 = vmatprep.subr.bf16.mxu0 %v8163_v36 }
 0x5de   : > { %8166 = vmatpush3.bf16.msra.mxu0 %v8163_v36  ;;  %v4154_v36 = vld [vmem:[#allocation8 + $0x150] sm:$0xff] }
 0x5df   : > { %7982 = vmatpush1.bf16.msra.mxu1 %v7981_v14  ;;  %v4254_v14 = vld [vmem:[#allocation8 + $0x470] sm:$0xff] }
 0x5e0   : > { %7983 = vmatprep.subr.bf16.mxu1 %v15501_v20  ;;  %v8167_v45 = vpack.c.bf16 %v4255_v27, %v4254_v14  ;;  %v4155_v14 = vld [vmem:[#allocation8 + $0x158] sm:$0xff] }
 0x5e1   : > { %v8011_v27 = vpack.c.bf16 %v4155_v14, %v4154_v36  ;;  %v4159_v36 = vld [vmem:[#allocation8 + $0x178] sm:$0xff] }
 0x5e2   : > { %8168 = vmatprep.subr.bf16.mxu0 %v8167_v45 }
 0x5e3   : > { %7985 = vmatpush1.bf16.msra.mxu1 %v7984_v0  ;;  %v4144_v0 = vld [vmem:[#allocation8 + $0x100] sm:$0xff]  ;;  %8170 = vmatpush3.bf16.msra.mxu0 %v8167_v45 }
 0x5e4   : > { %7986 = vmatprep.subr.bf16.mxu1 %v15501_v20  ;;  %v7996_v47 = vpack.c.bf16 %v4145_v12, %v4144_v0  ;;  %v4156_v45 = vld [vmem:[#allocation8 + $0x160] sm:$0xff]  ;;  %v4157_v0 = vld [vmem:[#allocation8 + $0x168] sm:$0xff] }
 0x5e5   : > { %v8014_v12 = vpack.c.bf16 %v4157_v0, %v4156_v45 }
 0x5e7   : > { %7988 = vmatpush1.bf16.msra.mxu1 %v7987_v39  ;;  %v4146_v39 = vld [vmem:[#allocation8 + $0x110] sm:$0xff] }
 0x5e8   : > { %7989 = vmatprep.subr.bf16.mxu1 %v15501_v20  ;;  %v7999_v34 = vpack.c.bf16 %v4147_v31, %v4146_v39 }
 0x5eb   : > { %7991 = vmatpush1.bf16.msra.mxu1 %v7990_v37  ;;  %v4148_v37 = vld [vmem:[#allocation8 + $0x120] sm:$0xff] }
 0x5ec   : > { %7992 = vmatprep.subr.bf16.mxu1 %v15501_v20  ;;  %v8002_v33 = vpack.c.bf16 %v4149_v53, %v4148_v37 }
 0x5ef   : > { %7994 = vmatpush1.bf16.msra.mxu1 %v7993_v48  ;;  %v4151_v48 = vld [vmem:[#allocation8 + $0x138] sm:$0xff] }
 0x5f0   : > { %7995 = vmatprep.subr.bf16.mxu1 %v15501_v20  ;;  %v8005_v19 = vpack.c.bf16 %v4151_v48, %v4150_v6 }
 0x5f2   : > { %6836 = vmatmul.mubr.msk.f32.vlgmr.msra.gmra.mrb[66].mxu1 %vm7229_vm0, %v15837_v28 }
 0x5f3   : > { %4331 = vmatprep.mubr.f32.mxu1 %v15748_v29  ;;  %7997 = vmatpush1.bf16.msra.mxu1 %v7996_v47  ;;  %v9480_v47 = vmov 1966171168  }
 0x5f4   : > { %7998 = vmatprep.subr.bf16.mxu1 %v15501_v20  ;;  %v3448_v39 = vunpack.c.l.s4 %v9480_v47 }
 0x5f6   : > { %4332 = vmatmul.mubr.f32.gmra.mrb[68].mxu1 %v15837_v28  ;;  %v3449_v31 = vunpack.c.0.s8 %v3448_v39 }
 0x5f7   : > { %8000 = vmatpush1.bf16.msra.mxu1 %v7999_v34  ;;  %v6833_v34 = vld [vmem:[%s14917_s6] ss:$0 sm:$0xff] }
 0x5f8   : > { %8001 = vmatprep.subr.bf16.mxu1 %v15501_v20  ;;  %v3452_v37 = vsub.s32 %v3449_v31, %v15838_v8 }
 0x5fb   : > { %8003 = vmatpush1.bf16.msra.mxu1 %v8002_v33 }
 0x5fc   : > { %8004 = vmatprep.subr.bf16.mxu1 %v15501_v20 }
 0x5ff   : > { %8006 = vmatpush1.bf16.msra.mxu1 %v8005_v19  ;;  %v3471_v19 = vsub.s32 0, %v15838_v8 }
 0x600   : > { %8007 = vmatprep.subr.bf16.mxu1 %v15501_v20 }
 0x603   : > { %8009 = vmatpush1.bf16.msra.mxu1 %v8008_v10  ;;  %v4158_v10 = vld [vmem:[#allocation8 + $0x170] sm:$0xff] }
 0x604   : > { %8010 = vmatprep.subr.bf16.mxu1 %v15501_v20  ;;  %v8017_v14 = vpack.c.bf16 %v4159_v36, %v4158_v10 }
 0x607   : > { %8012 = vmatpush1.bf16.msra.mxu1 %v8011_v27 }
 0x608   : > { %8013 = vmatprep.subr.bf16.mxu1 %v15501_v20 }
 0x60b   : > { %8015 = vmatpush1.bf16.msra.mxu1 %v8014_v12 }
 0x60c   : > { %8016 = vmatprep.subr.bf16.mxu1 %v15501_v20 }
 0x60f   : > { %8018 = vmatpush1.bf16.msra.mxu1 %v8017_v14 }
 0x610   : > { %8019 = vmatprep.subr.bf16.mxu1 %v15501_v20 }
 0x685   : > { %v3442_v53 = vpop.f32.mrb[64].mxu1 }
 0x686   : > { %v3443_v33 = vadd.f32 %v6833_v34, %v3442_v53  ;;  %v7570_v6 = vpop.f32.mrb[65].mxu1 }
 0x688   : > { %v3453_v48 = vrot.slane %v3443_v33, %v3452_v37 }
 0x68a   : > { %v3454_v51 = vcombine.high %v3453_v48, %v3453_v48  ;;  %v3461_v13 = vrot.slane %v3453_v48, %v3452_v37 }
 0x68c   : > { %v3468_v27 = vrot.slane %v3454_v51, %v3452_v37  ;;  %v12573_v45 = vrot.slane %v3461_v13, %v3471_v19 }
 0x68e   : > { %v12575_v0 = vrot.slane %v3468_v27, %v3471_v19  ;;  %v12579_v12 = vmul.f32 %v12573_v45, %v12100_v52  ;;  %v12585_v47 = vmul.f32 %v12573_v45, %v12094_v58  ;;  %v12589_v39 = vmul.f32 %v12573_v45, %v12103_v56 }
 0x68f   : > { %v12593_v31 = vmul.f32 %v12573_v45, %v12113_v40  ;;  %v12597_v52 = vmul.f32 %v12573_v45, %v12120_v54  ;;  %v12601_v34 = vmul.f32 %v12573_v45, %v12129_v59  ;;  %v12605_v58 = vmul.f32 %v12573_v45, %v12136_v62 }
 0x690   : > { %4336 = vmatprep.mubr.f32.mxu1 %v12579_v12  ;;  %15839 = vst [vmem:[#allocation96_spill] sm:$0xff] %v12589_v39  ;;  %v3681_v37 = vrot.slane %v12579_v12, 7  ;;  %v3717_v56 = vrot.slane %v12585_v47, 7  ;;  %v3898_v53 = vrot.slane %v12589_v39, 1  ;;  %v12612_v40 = vmul.f32 %v12573_v45, %v12145_v24 }
 0x691   : > { %15840 = vst [vmem:[#allocation33_spill] sm:$0xff] %v12593_v31  ;;  %15841 = vst [vmem:[#allocation97_spill] sm:$0xff] %v12597_v52  ;;  %v3934_v54 = vrot.slane %v12593_v31, 1  ;;  %v3899_v33 = vrot.slane %v12597_v52, 1  ;;  %v3935_v59 = vrot.slane %v12601_v34, 1  ;;  %v12634_v48 = vmul.f32 %v12573_v45, %v12152_v7 }
 0x692   : > { %15842 = vst [vmem:[#allocation34_spill] sm:$0xff] %v12601_v34  ;;  %15843 = vst [vmem:[#allocation100_spill] sm:$0xff] %v12605_v58  ;;  %v12619_v62 = vsel %vm634_vm1, %v3717_v56, %v3681_v37  ;;  %v12640_v19 = vmul.f32 %v12573_v45, %v12161_v42  ;;  %v3900_v10 = vrot.slane %v12605_v58, 1  ;;  %v3936_v7 = vrot.slane %v12612_v40, 1 }
 0x693   : > { %15844 = vst [vmem:[#allocation35_spill] sm:$0xff] %v12612_v40  ;;  %6838 = vmatmul.mubr.msk.f32.gmra.mrb[70].mxu1 %vm7229_vm0, %v12619_v62  ;;  %v12626_v6 = vsel %vm855_vm2, %v3898_v53, %v3934_v54  ;;  %v12630_v24 = vsel %vm855_vm2, %v3934_v54, %v3898_v53  ;;  %15847 = vst [vmem:[#allocation104_spill] sm:$0xff] %v12634_v48  ;;  %v12647_v13 = vsel %vm855_vm2, %v3899_v33, %v3935_v59  ;;  %v15853_v54 = vld [vmem:[#allocation21_spill] sm:$0xff] }
 0x694   : > { %15845 = vst [vmem:[#allocation101_spill] sm:$0xff] %v12626_v6  ;;  %15846 = vst [vmem:[#allocation36_spill] sm:$0xff] %v12630_v24  ;;  %7603 = vmatprep.mubr.f32.mxu0 %v12626_v6  ;;  %4341 = vmatprep.mubr.f32.mxu1 %v12585_v47  ;;  %v12654_v36 = vsel %vm634_vm1, %v3681_v37, %v3717_v56  ;;  %v3682_v42 = vrot.slane %v12589_v39, 7  ;;  %v3718_v14 = vrot.slane %v12593_v31, 7 }
 0x695   : > { %15848 = vst [vmem:[#allocation37_spill] sm:$0xff] %v12640_v19  ;;  %7604 = vmatmul.mubr.msk.f32.vlgmr.msra.gmra.mrb[128].mxu0 %vm7230_vm3, %v12630_v24  ;;  %15850 = vst [vmem:[#allocation105_spill] sm:$0xff] %v12647_v13  ;;  %v12661_v27 = vmul.f32 %v12573_v45, %v12168_v9  ;;  %v12666_v53 = vsel %vm855_vm2, %v3935_v59, %v3899_v33  ;;  %v12670_v37 = vmul.f32 %v12573_v45, %v15853_v54  ;;  %v15857_v59 = vld [vmem:[#allocation73_spill] sm:$0xff] }
 0x696   : > { %7606 = vmatprep.mubr.f32.mxu0 %v12647_v13  ;;  %15852 = vst [vmem:[#allocation108_spill] sm:$0xff] %v12666_v53  ;;  %v12677_v56 = vsel %vm855_vm2, %v3900_v10, %v3936_v7  ;;  %v3901_v9 = vrot.slane %v12634_v48, 1  ;;  %v12684_v33 = vsel %vm634_vm1, %v3718_v14, %v3682_v42  ;;  %v12691_v54 = vmul.f32 %v12573_v45, %v15857_v59  ;;  %v15860_v13 = vld [vmem:[#allocation22_spill] sm:$0xff] }
 0x697   : > { %4342 = vmatmul.mubr.f32.gmra.mrb[72].mxu1 %v12654_v36  ;;  %15851 = vst [vmem:[#allocation38_spill] sm:$0xff] %v12661_v27  ;;  %15854 = vst [vmem:[#allocation39_spill] sm:$0xff] %v12670_v37  ;;  %v3902_v59 = vrot.slane %v12661_v27, 1 }
 0x698   : > { %4346 = vmatprep.mubr.f32.mxu1 %v12589_v39  ;;  %15855 = vst [vmem:[#allocation109_spill] sm:$0xff] %v12677_v56  ;;  %v3937_v39 = vrot.slane %v12640_v19, 1  ;;  %15856 = vst [vmem:[#allocation42_spill] sm:$0xff] %v12684_v33 }
 0x699   : > { %7607 = vmatmul.mubr.msk.f32.gmra.mrb[130].mxu0 %vm7230_vm3, %v12666_v53  ;;  %15858 = vst [vmem:[#allocation115_spill] sm:$0xff] %v12691_v54  ;;  %v12696_v53 = vsel %vm855_vm2, %v3936_v7, %v3900_v10  ;;  %v12714_v10 = vsel %vm634_vm1, %v3682_v42, %v3718_v14  ;;  %v3719_v7 = vrot.slane %v12601_v34, 7  ;;  %v12730_v42 = vmul.f32 %v12573_v45, %v12210_v11 }
 0x69a   : > { %7609 = vmatprep.mubr.f32.mxu0 %v12677_v56  ;;  %15859 = vst [vmem:[#allocation43_spill] sm:$0xff] %v12696_v53  ;;  %v12700_v56 = vmul.f32 %v12573_v45, %v15860_v13  ;;  %v12707_v24 = vsel %vm855_vm2, %v3901_v9, %v3937_v39  ;;  %15863 = vst [vmem:[#allocation117_spill] sm:$0xff] %v12714_v10  ;;  %v3683_v13 = vrot.slane %v12597_v52, 7 }
 0x69b   : > { %6840 = vmatmul.mubr.msk.f32.gmra.mrb[74].mxu1 %vm7229_vm0, %v12684_v33  ;;  %15862 = vst [vmem:[#allocation46_spill] sm:$0xff] %v12707_v24  ;;  %v12726_v33 = vsel %vm855_vm2, %v3937_v39, %v3901_v9  ;;  %15867 = vst [vmem:[#allocation50_spill] sm:$0xff] %v12730_v42  ;;  %v12751_v11 = vmul.f32 %v12573_v45, %v12217_v1 }
 0x69c   : > { %4351 = vmatprep.mubr.f32.mxu1 %v12593_v31  ;;  %15861 = vst [vmem:[#allocation116_spill] sm:$0xff] %v12700_v56  ;;  %v3938_v31 = vrot.slane %v12670_v37, 1  ;;  %15866 = vst [vmem:[#allocation118_spill] sm:$0xff] %v12726_v33  ;;  %v12744_v39 = vsel %vm634_vm1, %v3719_v7, %v3683_v13 }
 0x69d   : > { %7610 = vmatmul.mubr.msk.f32.gmra.mrb[132].mxu0 %vm7230_vm3, %v12696_v53  ;;  %v15864_v53 = vld [vmem:[#allocation76_spill] sm:$0xff]  ;;  %15869 = vst [vmem:[#allocation51_spill] sm:$0xff] %v12744_v39  ;;  %15870 = vst [vmem:[#allocation52_spill] sm:$0xff] %v12751_v11 }
 0x69e   : > { %7612 = vmatprep.mubr.f32.mxu0 %v12707_v24  ;;  %v12721_v6 = vmul.f32 %v12573_v45, %v15864_v53  ;;  %v12737_v14 = vsel %vm855_vm2, %v3902_v59, %v3938_v31  ;;  %v3903_v53 = vrot.slane %v12691_v54, 1  ;;  %v12756_v9 = vsel %vm855_vm2, %v3938_v31, %v3902_v59  ;;  %v16182_v8 = vld [vmem:[#allocation108_spill] sm:$0xff] }
 0x69f   : > { %4352 = vmatmul.mubr.f32.gmra.mrb[76].mxu1 %v12714_v10  ;;  %15868 = vst [vmem:[#allocation119_spill] sm:$0xff] %v12737_v14  ;;  %15871 = vst [vmem:[#allocation40_spill] sm:$0xff] %v12756_v9  ;;  %v12774_v31 = vsel %vm634_vm1, %v3683_v13, %v3719_v7  ;;  %v3720_v59 = vrot.slane %v12612_v40, 7  ;;  %v12790_v13 = vmul.f32 %v12573_v45, %v12288_v26 }
 0x6a0   : > { %15865 = vst [vmem:[#allocation47_spill] sm:$0xff] %v12721_v6  ;;  %4356 = vmatprep.mubr.f32.mxu1 %v12597_v52  ;;  %v3939_v52 = vrot.slane %v12700_v56, 1  ;;  %v3904_v1 = vrot.slane %v12721_v6, 1  ;;  %15874 = vst [vmem:[#allocation62_spill] sm:$0xff] %v12774_v31  ;;  %v12811_v26 = vmul.f32 %v12573_v45, %v12314_v46 }
 0x6a1   : > { %7613 = vmatmul.mubr.msk.f32.gmra.mrb[134].mxu0 %vm7230_vm3, %v12726_v33  ;;  %15877 = vst [vmem:[#allocation67_spill] sm:$0xff] %v12790_v13 }
 0x6a2   : > { %7615 = vmatprep.mubr.f32.mxu0 %v12737_v14  ;;  %v12760_v14 = vmul.f32 %v12573_v45, %v12230_v5  ;;  %v12767_v33 = vsel %vm855_vm2, %v3903_v53, %v3939_v52  ;;  %v3684_v5 = vrot.slane %v12605_v58, 7  ;;  %v12786_v24 = vsel %vm855_vm2, %v3939_v52, %v3903_v53  ;;  %15880 = vst [vmem:[#allocation74_spill] sm:$0xff] %v12811_v26 }
 0x6a3   : > { %6842 = vmatmul.mubr.msk.f32.gmra.mrb[78].mxu1 %vm7229_vm0, %v12744_v39  ;;  %15873 = vst [vmem:[#allocation59_spill] sm:$0xff] %v12767_v33  ;;  %15876 = vst [vmem:[#allocation66_spill] sm:$0xff] %v12786_v24 }
 0x6a4   : > { %4361 = vmatprep.mubr.f32.mxu1 %v12601_v34  ;;  %15872 = vst [vmem:[#allocation41_spill] sm:$0xff] %v12760_v14  ;;  %v3940_v34 = vrot.slane %v12730_v42, 1  ;;  %v12804_v52 = vsel %vm634_vm1, %v3720_v59, %v3684_v5 }
 0x6a5   : > { %7616 = vmatmul.mubr.msk.f32.gmra.mrb[136].mxu0 %vm7230_vm3, %v12756_v9  ;;  %v12781_v9 = vmul.f32 %v12573_v45, %v12259_v25  ;;  %v3905_v25 = vrot.slane %v12751_v11, 1  ;;  %15879 = vst [vmem:[#allocation71_spill] sm:$0xff] %v12804_v52 }
 0x6a6   : > { %7618 = vmatprep.mubr.f32.mxu0 %v12767_v33  ;;  %v12797_v7 = vsel %vm855_vm2, %v3904_v1, %v3940_v34  ;;  %v12816_v53 = vsel %vm855_vm2, %v3940_v34, %v3904_v1  ;;  %v12834_v34 = vsel %vm634_vm1, %v3684_v5, %v3720_v59  ;;  %v3721_v1 = vrot.slane %v12640_v19, 7 }
 0x6a7   : > { %4362 = vmatmul.mubr.f32.gmra.mrb[80].mxu1 %v12774_v31  ;;  %15875 = vst [vmem:[#allocation63_spill] sm:$0xff] %v12781_v9  ;;  %15878 = vst [vmem:[#allocation70_spill] sm:$0xff] %v12797_v7  ;;  %v3906_v46 = vrot.slane %v12781_v9, 1  ;;  %v12850_v5 = vmul.f32 %v12573_v45, %v12373_v63  ;;  %v12871_v63 = vmul.f32 %v12573_v45, %v12381_v30  ;;  %v16257_v51 = vld [vmem:[#allocation62_spill] sm:$0xff] }
 0x6a8   : > { %4366 = vmatprep.mubr.f32.mxu1 %v12605_v58  ;;  %v3941_v58 = vrot.slane %v12760_v14, 1  ;;  %15881 = vst [vmem:[#allocation75_spill] sm:$0xff] %v12816_v53  ;;  %15884 = vst [vmem:[#allocation82_spill] sm:$0xff] %v12834_v34 }
 0x6a9   : > { %7619 = vmatmul.mubr.msk.f32.gmra.mrb[138].mxu0 %vm7230_vm3, %v12786_v24  ;;  %15887 = vst [vmem:[#allocation87_spill] sm:$0xff] %v12850_v5  ;;  %15890 = vst [vmem:[#allocation94_spill] sm:$0xff] %v12871_v63 }
 0x6aa   : > { %7621 = vmatprep.mubr.f32.mxu0 %v12797_v7  ;;  %v12820_v7 = vmul.f32 %v12573_v45, %v12324_v15  ;;  %v12827_v24 = vsel %vm855_vm2, %v3905_v25, %v3941_v58  ;;  %v3685_v15 = vrot.slane %v12634_v48, 7  ;;  %v12846_v33 = vsel %vm855_vm2, %v3941_v58, %v3905_v25 }
 0x6ab   : > { %6844 = vmatmul.mubr.msk.f32.gmra.mrb[82].mxu1 %vm7229_vm0, %v12804_v52  ;;  %15883 = vst [vmem:[#allocation79_spill] sm:$0xff] %v12827_v24  ;;  %15886 = vst [vmem:[#allocation86_spill] sm:$0xff] %v12846_v33  ;;  %v12962_v52 = vmul.f32 %v12573_v45, %v12493_v38 }
 0x6ac   : > { %4371 = vmatprep.mubr.f32.mxu1 %v12612_v40  ;;  %15882 = vst [vmem:[#allocation78_spill] sm:$0xff] %v12820_v7  ;;  %v3942_v40 = vrot.slane %v12790_v13, 1  ;;  %v12864_v58 = vsel %vm634_vm1, %v3721_v1, %v3685_v15 }
 0x6ad   : > { %7622 = vmatmul.mubr.msk.f32.gmra.mrb[140].mxu0 %vm7230_vm3, %v12816_v53  ;;  %v12841_v53 = vmul.f32 %v12573_v45, %v12346_v16  ;;  %v3907_v16 = vrot.slane %v12811_v26, 1  ;;  %15889 = vst [vmem:[#allocation91_spill] sm:$0xff] %v12864_v58  ;;  %15905 = vst [vmem:[#allocation45_spill] sm:$0xff] %v12962_v52 }
 0x6ae   : > { %7624 = vmatprep.mubr.f32.mxu0 %v12827_v24  ;;  %v12857_v59 = vsel %vm855_vm2, %v3906_v46, %v3942_v40  ;;  %v12876_v25 = vsel %vm855_vm2, %v3942_v40, %v3906_v46  ;;  %v12894_v40 = vsel %vm634_vm1, %v3685_v15, %v3721_v1  ;;  %v3722_v46 = vrot.slane %v12670_v37, 7 }
 0x6af   : > { %4372 = vmatmul.mubr.f32.gmra.mrb[84].mxu1 %v12834_v34  ;;  %15885 = vst [vmem:[#allocation83_spill] sm:$0xff] %v12841_v53  ;;  %15888 = vst [vmem:[#allocation90_spill] sm:$0xff] %v12857_v59  ;;  %v3908_v30 = vrot.slane %v12841_v53, 1  ;;  %v12910_v15 = vmul.f32 %v12573_v45, %v12443_v2  ;;  %v12940_v34 = vmul.f32 %v12573_v45, %v12477_v32  ;;  %v3687_v32 = vrot.slane %v12691_v54, 7 }
 0x6b0   : > { %4376 = vmatprep.mubr.f32.mxu1 %v12634_v48  ;;  %v3943_v48 = vrot.slane %v12820_v7, 1  ;;  %15891 = vst [vmem:[#allocation95_spill] sm:$0xff] %v12876_v25  ;;  %15894 = vst [vmem:[#allocation102_spill] sm:$0xff] %v12894_v40 }
 0x6b1   : > { %7625 = vmatmul.mubr.msk.f32.gmra.mrb[142].mxu0 %vm7230_vm3, %v12846_v33  ;;  %15897 = vst [vmem:[#allocation107_spill] sm:$0xff] %v12910_v15  ;;  %15902 = vst [vmem:[#allocation68_spill] sm:$0xff] %v12940_v34 }
 0x6b2   : > { %7627 = vmatprep.mubr.f32.mxu0 %v12857_v59  ;;  %v12880_v59 = vmul.f32 %v12573_v45, %v12404_v61  ;;  %v12887_v33 = vsel %vm855_vm2, %v3907_v16, %v3943_v48  ;;  %v3686_v61 = vrot.slane %v12661_v27, 7  ;;  %v12906_v24 = vsel %vm855_vm2, %v3943_v48, %v3907_v16  ;;  %v4162_v48 = vld [vmem:[#allocation8 + $0x190] sm:$0xff]  ;;  %v4163_v16 = vld [vmem:[#allocation8 + $0x198] sm:$0xff] }
 0x6b3   : > { %6846 = vmatmul.mubr.msk.f32.gmra.mrb[86].mxu1 %vm7229_vm0, %v12864_v58  ;;  %15893 = vst [vmem:[#allocation99_spill] sm:$0xff] %v12887_v33  ;;  %15896 = vst [vmem:[#allocation106_spill] sm:$0xff] %v12906_v24 }
 0x6b4   : > { %4381 = vmatprep.mubr.f32.mxu1 %v12640_v19  ;;  %15892 = vst [vmem:[#allocation98_spill] sm:$0xff] %v12880_v59  ;;  %v3944_v19 = vrot.slane %v12850_v5, 1  ;;  %v12924_v2 = vsel %vm634_vm1, %v3722_v46, %v3686_v61 }
 0x6b5   : > { %7628 = vmatmul.mubr.msk.f32.gmra.mrb[144].mxu0 %vm7230_vm3, %v12876_v25  ;;  %v12901_v25 = vmul.f32 %v12573_v45, %v12435_v50  ;;  %v3909_v50 = vrot.slane %v12871_v63, 1  ;;  %15899 = vst [vmem:[#allocation111_spill] sm:$0xff] %v12924_v2 }
 0x6b6   : > { %7630 = vmatprep.mubr.f32.mxu0 %v12887_v33  ;;  %v12917_v1 = vsel %vm855_vm2, %v3908_v30, %v3944_v19  ;;  %v4160_v33 = vld [vmem:[#allocation8 + $0x180] sm:$0xff]  ;;  %v12936_v58 = vsel %vm855_vm2, %v3944_v19, %v3908_v30  ;;  %v12954_v19 = vsel %vm634_vm1, %v3686_v61, %v3722_v46  ;;  %v8023_v30 = vpack.c.bf16 %v4163_v16, %v4162_v48 }
 0x6b7   : > { %4382 = vmatmul.mubr.f32.gmra.mrb[88].mxu1 %v12894_v40  ;;  %15895 = vst [vmem:[#allocation103_spill] sm:$0xff] %v12901_v25  ;;  %15898 = vst [vmem:[#allocation110_spill] sm:$0xff] %v12917_v1  ;;  %v4161_v40 = vld [vmem:[#allocation8 + $0x188] sm:$0xff]  ;;  %v12971_v46 = vmul.f32 %v12573_v45, %v12502_v22  ;;  %v3947_v48 = vrot.slane %v12940_v34, 1 }
 0x6b8   : > { %4386 = vmatprep.mubr.f32.mxu1 %v12661_v27  ;;  %v3945_v27 = vrot.slane %v12880_v59, 1  ;;  %15901 = vst [vmem:[#allocation65_spill] sm:$0xff] %v12936_v58  ;;  %15904 = vst [vmem:[#allocation48_spill] sm:$0xff] %v12954_v19 }
 0x6b9   : > { %7631 = vmatmul.mubr.msk.f32.gmra.mrb[146].mxu0 %vm7230_vm3, %v12906_v24  ;;  %v12931_v24 = vmul.f32 %v12573_v45, %v12465_v4  ;;  %v3910_v4 = vrot.slane %v12901_v25, 1  ;;  %15907 = vst [vmem:[#allocation49_spill] sm:$0xff] %v12971_v46  ;;  %v4166_v45 = vld [vmem:[#allocation8 + $0x1b0] sm:$0xff] }
 0x6ba   : > { %7633 = vmatprep.mubr.f32.mxu0 %v12917_v1  ;;  %v8020_v1 = vpack.c.bf16 %v4161_v40, %v4160_v33  ;;  %v3723_v33 = vrot.slane %v12700_v56, 7  ;;  %v4164_v40 = vld [vmem:[#allocation8 + $0x1a0] sm:$0xff]  ;;  %v12967_v61 = vsel %vm855_vm2, %v3945_v27, %v3909_v50 }
 0x6bb   : > { %6848 = vmatmul.mubr.msk.f32.gmra.mrb[90].mxu1 %vm7229_vm0, %v12924_v2  ;;  %15900 = vst [vmem:[#allocation112_spill] sm:$0xff] %v12931_v24  ;;  %v12947_v2 = vsel %vm855_vm2, %v3909_v50, %v3945_v27  ;;  %15906 = vst [vmem:[#allocation53_spill] sm:$0xff] %v12967_v61  ;;  %v3911_v38 = vrot.slane %v12931_v24, 1  ;;  %v4167_v50 = vld [vmem:[#allocation8 + $0x1b8] sm:$0xff] }
 0x6bc   : > { %4391 = vmatprep.mubr.f32.mxu1 %v12670_v37  ;;  %15903 = vst [vmem:[#allocation44_spill] sm:$0xff] %v12947_v2  ;;  %v3946_v37 = vrot.slane %v12910_v15, 1  ;;  %8021 = vmatpush1.bf16.msra.mxu1 %v8020_v1  ;;  %v12985_v27 = vsel %vm634_vm1, %v3723_v33, %v3687_v32 }
 0x6bd   : > { %7634 = vmatmul.mubr.msk.f32.gmra.mrb[148].mxu0 %vm7230_vm3, %v12936_v58  ;;  %8022 = vmatprep.subr.bf16.mxu1 %v15501_v20  ;;  %v4165_v58 = vld [vmem:[#allocation8 + $0x1a8] sm:$0xff]  ;;  %15909 = vst [vmem:[#allocation55_spill] sm:$0xff] %v12985_v27 }
 0x6be   : > { %7636 = vmatprep.mubr.f32.mxu0 %v12947_v2  ;;  %v12978_v1 = vsel %vm855_vm2, %v3910_v4, %v3946_v37  ;;  %v8026_v22 = vpack.c.bf16 %v4165_v58, %v4164_v40  ;;  %v12994_v16 = vsel %vm855_vm2, %v3946_v37, %v3910_v4  ;;  %v13001_v58 = vsel %vm855_vm2, %v3911_v38, %v3947_v48 }
 0x6bf   : > { %4392 = vmatmul.mubr.f32.gmra.mrb[92].mxu1 %v12954_v19  ;;  %15908 = vst [vmem:[#allocation58_spill] sm:$0xff] %v12978_v1  ;;  %15910 = vst [vmem:[#allocation56_spill] sm:$0xff] %v12994_v16  ;;  %v3948_v40 = vrot.slane %v12971_v46, 1  ;;  %v3688_v37 = vrot.slane %v12721_v6, 7  ;;  %v3724_v4 = vrot.slane %v12730_v42, 7 }
 0x6c0   : > { %4396 = vmatprep.mubr.f32.mxu1 %v12691_v54  ;;  %8024 = vmatpush1.bf16.msra.mxu1 %v8023_v30  ;;  %15911 = vst [vmem:[#allocation54_spill] sm:$0xff] %v13001_v58  ;;  %v3912_v30 = vrot.slane %v12962_v52, 1  ;;  %v8029_v54 = vpack.c.bf16 %v4167_v50, %v4166_v45  ;;  %v4168_v45 = vld [vmem:[#allocation8 + $0x1c0] sm:$0xff]  ;;  %v4169_v50 = vld [vmem:[#allocation8 + $0x1c8] sm:$0xff] }
 0x6c1   : > { %7637 = vmatmul.mubr.msk.f32.gmra.mrb[150].mxu0 %vm7230_vm3, %v12967_v61  ;;  %8025 = vmatprep.subr.bf16.mxu1 %v15501_v20 }
 0x6c2   : > { %7639 = vmatprep.mubr.f32.mxu0 %v12978_v1  ;;  %v4171_v1 = vld [vmem:[#allocation8 + $0x1d8] sm:$0xff] }
 0x6c3   : > { %6850 = vmatmul.mubr.msk.f32.gmra.mrb[94].mxu1 %vm7229_vm0, %v12985_v27 }
 0x6c4   : > { %4401 = vmatprep.mubr.f32.mxu1 %v12700_v56  ;;  %v13008_v56 = vsel %vm634_vm1, %v3687_v32, %v3723_v33  ;;  %8027 = vmatpush1.bf16.msra.mxu1 %v8026_v22  ;;  %v13021_v32 = vmul.f32 %v12575_v0, %v12248_v35  ;;  %v15915_v33 = vld [vmem:[#allocation24_spill] sm:$0xff]  ;;  %v13032_v22 = vsel %vm855_vm2, %v3912_v30, %v3948_v40 }
 0x6c5   : > { %7640 = vmatmul.mubr.msk.f32.gmra.mrb[152].mxu0 %vm7230_vm3, %v12994_v16  ;;  %15912 = vst [vmem:[#allocation60_spill] sm:$0xff] %v13008_v56  ;;  %8028 = vmatprep.subr.bf16.mxu1 %v15501_v20  ;;  %v13017_v16 = vsel %vm855_vm2, %v3947_v48, %v3911_v38  ;;  %15917 = vst [vmem:[#allocation69_spill] sm:$0xff] %v13032_v22  ;;  %v13037_v38 = vsel %vm634_vm1, %v3724_v4, %v3688_v37 }
 0x6c6   : > { %7642 = vmatprep.mubr.f32.mxu0 %v13001_v58  ;;  %15913 = vst [vmem:[#allocation57_spill] sm:$0xff] %v13017_v16  ;;  %15914 = vst [vmem:[#allocation64_spill] sm:$0xff] %v13021_v32  ;;  %v13025_v58 = vmul.f32 %v12575_v0, %v15915_v33  ;;  %v13045_v35 = vmul.f32 %v12575_v0, %v12271_v17  ;;  %v13050_v48 = vsel %vm855_vm2, %v3948_v40, %v3912_v30  ;;  %v15921_v33 = vld [vmem:[#allocation80_spill] sm:$0xff]  ;;  %v15924_v30 = vld [vmem:[#allocation113_spill] sm:$0xff] }
 0x6c7   : > { %4402 = vmatmul.mubr.f32.gmra.mrb[96].mxu1 %v13008_v56  ;;  %15918 = vst [vmem:[#allocation19_spill] sm:$0xff] %v13037_v38  ;;  %15920 = vst [vmem:[#allocation20_spill] sm:$0xff] %v13050_v48  ;;  %v3689_v40 = vrot.slane %v12751_v11, 7 }
 0x6c8   : > { %4406 = vmatprep.mubr.f32.mxu1 %v12721_v6  ;;  %15916 = vst [vmem:[#allocation61_spill] sm:$0xff] %v13025_v58  ;;  %8030 = vmatpush1.bf16.msra.mxu1 %v8029_v54  ;;  %15919 = vst [vmem:[#allocation72_spill] sm:$0xff] %v13045_v35  ;;  %v13054_v54 = vmul.f32 %v12575_v0, %v15921_v33  ;;  %v3952_v17 = vrot.slane %v13025_v58, 1  ;;  %v8032_v6 = vpack.c.bf16 %v4169_v50, %v4168_v45 }
 0x6c9   : > { %7643 = vmatmul.mubr.msk.f32.gmra.mrb[154].mxu0 %vm7230_vm3, %v13017_v16  ;;  %8031 = vmatprep.subr.bf16.mxu1 %v15501_v20  ;;  %v3725_v33 = vrot.slane %v12760_v14, 7  ;;  %v13076_v45 = vmul.f32 %v12575_v0, %v12306_v55 }
 0x6ca   : > { %7645 = vmatprep.mubr.f32.mxu0 %v13032_v22  ;;  %15922 = vst [vmem:[#allocation114_spill] sm:$0xff] %v13054_v54  ;;  %v3916_v22 = vrot.slane %v13021_v32, 1 }
 0x6cb   : > { %6852 = vmatmul.mubr.msk.f32.gmra.mrb[98].mxu1 %vm7229_vm0, %v13037_v38  ;;  %15926 = vst [vmem:[#allocation22_spill] sm:$0xff] %v13076_v45  ;;  %v13091_v55 = vsel %vm634_vm1, %v3725_v33, %v3689_v40 }
 0x6cc   : > { %4411 = vmatprep.mubr.f32.mxu1 %v12730_v42  ;;  %v13063_v42 = vsel %vm634_vm1, %v3688_v37, %v3724_v4  ;;  %8033 = vmatpush1.bf16.msra.mxu1 %v8032_v6  ;;  %v13083_v37 = vsel %vm855_vm2, %v3916_v22, %v3952_v17  ;;  %v3917_v4 = vrot.slane %v13045_v35, 1  ;;  %15928 = vst [vmem:[#allocation24_spill] sm:$0xff] %v13091_v55 }
 0x6cd   : > { %7646 = vmatmul.mubr.msk.f32.gmra.mrb[156].mxu0 %vm7230_vm3, %v13050_v48  ;;  %15923 = vst [vmem:[#allocation21_spill] sm:$0xff] %v13063_v42  ;;  %v13071_v48 = vmul.f32 %v12575_v0, %v12294_v57  ;;  %15927 = vst [vmem:[#allocation76_spill] sm:$0xff] %v13083_v37  ;;  %v3953_v57 = vrot.slane %v13054_v54, 1  ;;  %8034 = vmatprep.subr.bf16.mxu1 %v15501_v20  ;;  %v13098_v6 = vmul.f32 %v12575_v0, %v12317_v3 }
 0x6ce   : > { %7648 = vmatprep.mubr.f32.mxu0 %v15924_v30  ;;  %v13103_v50 = vsel %vm855_vm2, %v3952_v17, %v3916_v22  ;;  %v13121_v22 = vsel %vm634_vm1, %v3689_v40, %v3725_v33  ;;  %v3726_v17 = vrot.slane %v12790_v13, 7  ;;  %v13137_v40 = vmul.f32 %v12575_v0, %v12353_v21 }
 0x6cf   : > { %4412 = vmatmul.mubr.f32.gmra.mrb[100].mxu1 %v13063_v42  ;;  %15925 = vst [vmem:[#allocation73_spill] sm:$0xff] %v13071_v48  ;;  %15929 = vst [vmem:[#allocation80_spill] sm:$0xff] %v13098_v6  ;;  %v13114_v16 = vsel %vm855_vm2, %v3917_v4, %v3953_v57  ;;  %v3918_v3 = vrot.slane %v13071_v48, 1  ;;  %v13133_v52 = vsel %vm855_vm2, %v3953_v57, %v3917_v4  ;;  %v15942_v57 = vld [vmem:[#allocation26_spill] sm:$0xff] }
 0x6d0   : > { %4416 = vmatprep.mubr.f32.mxu1 %v12751_v11  ;;  %15930 = vst [vmem:[#allocation113_spill] sm:$0xff] %v13103_v50  ;;  %v15931_v11 = vld [vmem:[#allocation25_spill] sm:$0xff]  ;;  %15933 = vst [vmem:[#allocation120_spill] sm:$0xff] %v13114_v16  ;;  %v13158_v21 = vmul.f32 %v12575_v0, %v12363_v18 }
 0x6d1   : > { %7649 = vmatmul.mubr.msk.f32.gmra.mrb[158].mxu0 %vm7230_vm3, %v15924_v30  ;;  %15934 = vst [vmem:[#allocation121_spill] sm:$0xff] %v13121_v22  ;;  %15937 = vst [vmem:[#allocation122_spill] sm:$0xff] %v13133_v52 }
 0x6d2   : > { %7651 = vmatprep.mubr.f32.mxu0 %v13083_v37  ;;  %v13107_v37 = vmul.f32 %v12575_v0, %v15931_v11  ;;  %v3690_v11 = vrot.slane %v12781_v9, 7  ;;  %15938 = vst [vmem:[#allocation123_spill] sm:$0xff] %v13137_v40  ;;  %15941 = vst [vmem:[#allocation126_spill] sm:$0xff] %v13158_v21 }
 0x6d3   : > { %6854 = vmatmul.mubr.msk.f32.gmra.mrb[102].mxu1 %vm7229_vm0, %v13091_v55  ;;  %v4175_v55 = vld [vmem:[#allocation8 + $0x1f8] sm:$0xff] }
 0x6d4   : > { %4421 = vmatprep.mubr.f32.mxu1 %v12760_v14  ;;  %15932 = vst [vmem:[#allocation25_spill] sm:$0xff] %v13107_v37  ;;  %v3954_v14 = vrot.slane %v13076_v45, 1  ;;  %v13151_v4 = vsel %vm634_vm1, %v3726_v17, %v3690_v11 }
 0x6d5   : > { %7652 = vmatmul.mubr.msk.f32.gmra.mrb[160].mxu0 %vm7230_vm3, %v13103_v50  ;;  %v15935_v50 = vld [vmem:[#allocation81_spill] sm:$0xff]  ;;  %15940 = vst [vmem:[#allocation125_spill] sm:$0xff] %v13151_v4 }
 0x6d6   : > { %7654 = vmatprep.mubr.f32.mxu0 %v13114_v16  ;;  %v13128_v46 = vmul.f32 %v12575_v0, %v15935_v50  ;;  %v13144_v33 = vsel %vm855_vm2, %v3918_v3, %v3954_v14  ;;  %v3919_v50 = vrot.slane %v13098_v6, 1  ;;  %v4170_v16 = vld [vmem:[#allocation8 + $0x1d0] sm:$0xff] }
 0x6d7   : > { %4422 = vmatmul.mubr.f32.gmra.mrb[104].mxu1 %v13121_v22  ;;  %15939 = vst [vmem:[#allocation124_spill] sm:$0xff] %v13144_v33  ;;  %v8035_v2 = vpack.c.bf16 %v4171_v1, %v4170_v16  ;;  %v15950_v16 = vld [vmem:[#allocation27_spill] sm:$0xff] }
 0x6d8   : > { %15936 = vst [vmem:[#allocation81_spill] sm:$0xff] %v13128_v46  ;;  %4426 = vmatprep.mubr.f32.mxu1 %v12781_v9  ;;  %v3955_v9 = vrot.slane %v13107_v37, 1  ;;  %v3920_v61 = vrot.slane %v13128_v46, 1 }
 0x6d9   : > { %7655 = vmatmul.mubr.msk.f32.gmra.mrb[162].mxu0 %vm7230_vm3, %v13133_v52  ;;  %v13162_v52 = vmul.f32 %v12575_v0, %v15942_v57  ;;  %v3956_v57 = vrot.slane %v13137_v40, 1  ;;  %8036 = vmatpush1.bf16.msra.mxu1 %v8035_v2  ;;  %v13219_v2 = vmul.f32 %v12575_v0, %v12410_v60 }
 0x6da   : > { %7657 = vmatprep.mubr.f32.mxu0 %v13144_v33  ;;  %v13167_v33 = vsel %vm855_vm2, %v3954_v14, %v3918_v3  ;;  %v13174_v18 = vsel %vm855_vm2, %v3919_v50, %v3955_v9  ;;  %v13181_v14 = vsel %vm634_vm1, %v3690_v11, %v3726_v17  ;;  %v3691_v3 = vrot.slane %v12811_v26, 7  ;;  %8037 = vmatprep.subr.bf16.mxu1 %v15501_v20 }
 0x6db   : > { %6856 = vmatmul.mubr.msk.f32.gmra.mrb[106].mxu1 %vm7229_vm0, %v13151_v4  ;;  %15943 = vst [vmem:[#allocation26_spill] sm:$0xff] %v13162_v52  ;;  %15944 = vst [vmem:[#allocation127_spill] sm:$0xff] %v13167_v33  ;;  %v13193_v1 = vsel %vm855_vm2, %v3955_v9, %v3919_v50  ;;  %v13197_v11 = vmul.f32 %v12575_v0, %v15950_v16  ;;  %v13204_v17 = vsel %vm855_vm2, %v3920_v61, %v3956_v57 }
 0x6dc   : > { %4431 = vmatprep.mubr.f32.mxu1 %v12790_v13  ;;  %15945 = vst [vmem:[#allocation128_spill] sm:$0xff] %v13174_v18  ;;  %15946 = vst [vmem:[#allocation129_spill] sm:$0xff] %v13181_v14  ;;  %v3727_v13 = vrot.slane %v12820_v7, 7  ;;  %v13224_v50 = vsel %vm855_vm2, %v3956_v57, %v3920_v61  ;;  %v13228_v16 = vmul.f32 %v12575_v0, %v12422_v44  ;;  %v3692_v44 = vrot.slane %v12841_v53, 7 }
 0x6dd   : > { %7658 = vmatmul.mubr.msk.f32.gmra.mrb[164].mxu0 %vm7230_vm3, %v13167_v33  ;;  %v15947_v33 = vld [vmem:[#allocation84_spill] sm:$0xff]  ;;  %15949 = vst [vmem:[#allocation130_spill] sm:$0xff] %v13193_v1  ;;  %15951 = vst [vmem:[#allocation27_spill] sm:$0xff] %v13197_v11  ;;  %v3728_v57 = vrot.slane %v12850_v5, 7 }
 0x6de   : > { %7660 = vmatprep.mubr.f32.mxu0 %v13174_v18  ;;  %v13188_v4 = vmul.f32 %v12575_v0, %v15947_v33  ;;  %15952 = vst [vmem:[#allocation131_spill] sm:$0xff] %v13204_v17  ;;  %v3921_v33 = vrot.slane %v13158_v21, 1  ;;  %v13212_v9 = vsel %vm634_vm1, %v3727_v13, %v3691_v3  ;;  %15954 = vst [vmem:[#allocation133_spill] sm:$0xff] %v13219_v2 }
 0x6df   : > { %4432 = vmatmul.mubr.f32.gmra.mrb[108].mxu1 %v13181_v14  ;;  %15953 = vst [vmem:[#allocation132_spill] sm:$0xff] %v13212_v9  ;;  %15955 = vst [vmem:[#allocation134_spill] sm:$0xff] %v13224_v50  ;;  %v13242_v61 = vsel %vm634_vm1, %v3691_v3, %v3727_v13  ;;  %v13258_v13 = vmul.f32 %v12575_v0, %v12450_v49  ;;  %v15965_v49 = vld [vmem:[#allocation28_spill] sm:$0xff] }
 0x6e0   : > { %15948 = vst [vmem:[#allocation84_spill] sm:$0xff] %v13188_v4  ;;  %4436 = vmatprep.mubr.f32.mxu1 %v12811_v26  ;;  %v3957_v26 = vrot.slane %v13162_v52, 1  ;;  %15956 = vst [vmem:[#allocation135_spill] sm:$0xff] %v13228_v16  ;;  %v3922_v60 = vrot.slane %v13188_v4, 1 }
 0x6e1   : > { %7661 = vmatmul.mubr.msk.f32.gmra.mrb[166].mxu0 %vm7230_vm3, %v13193_v1  ;;  %15958 = vst [vmem:[#allocation137_spill] sm:$0xff] %v13242_v61  ;;  %15962 = vst [vmem:[#allocation139_spill] sm:$0xff] %v13258_v13 }
 0x6e2   : > { %7663 = vmatprep.mubr.f32.mxu0 %v13204_v17  ;;  %v13235_v17 = vsel %vm855_vm2, %v3921_v33, %v3957_v26  ;;  %v13254_v18 = vsel %vm855_vm2, %v3957_v26, %v3921_v33  ;;  %v13272_v26 = vsel %vm634_vm1, %v3728_v57, %v3692_v44  ;;  %v13279_v33 = vmul.f32 %v12575_v0, %v15965_v49 }
 0x6e3   : > { %6858 = vmatmul.mubr.msk.f32.gmra.mrb[110].mxu1 %vm7229_vm0, %v13212_v9  ;;  %15957 = vst [vmem:[#allocation136_spill] sm:$0xff] %v13235_v17  ;;  %15961 = vst [vmem:[#allocation138_spill] sm:$0xff] %v13254_v18  ;;  %v4173_v9 = vld [vmem:[#allocation8 + $0x1e8] sm:$0xff] }
 0x6e4   : > { %4441 = vmatprep.mubr.f32.mxu1 %v12820_v7  ;;  %v3958_v7 = vrot.slane %v13197_v11, 1  ;;  %15964 = vst [vmem:[#allocation141_spill] sm:$0xff] %v13272_v26  ;;  %15966 = vst [vmem:[#allocation28_spill] sm:$0xff] %v13279_v33 }
 0x6e5   : > { %7664 = vmatmul.mubr.msk.f32.gmra.mrb[168].mxu0 %vm7230_vm3, %v13224_v50  ;;  %v15959_v50 = vld [vmem:[#allocation85_spill] sm:$0xff] }
 0x6e6   : > { %7666 = vmatprep.mubr.f32.mxu0 %v13235_v17  ;;  %v13249_v1 = vmul.f32 %v12575_v0, %v15959_v50  ;;  %v13265_v3 = vsel %vm855_vm2, %v3922_v60, %v3958_v7  ;;  %v3923_v50 = vrot.slane %v13219_v2, 1 }
 0x6e7   : > { %4442 = vmatmul.mubr.f32.gmra.mrb[112].mxu1 %v13242_v61  ;;  %15963 = vst [vmem:[#allocation140_spill] sm:$0xff] %v13265_v3  ;;  %v4172_v61 = vld [vmem:[#allocation8 + $0x1e0] sm:$0xff] }
 0x6e8   : > { %15960 = vst [vmem:[#allocation85_spill] sm:$0xff] %v13249_v1  ;;  %4446 = vmatprep.mubr.f32.mxu1 %v12841_v53  ;;  %v3959_v53 = vrot.slane %v13228_v16, 1  ;;  %v8038_v14 = vpack.c.bf16 %v4173_v9, %v4172_v61  ;;  %v15975_v61 = vld [vmem:[#allocation89_spill] sm:$0xff] }
 0x6e9   : > { %7667 = vmatmul.mubr.msk.f32.gmra.mrb[170].mxu0 %vm7230_vm3, %v13254_v18  ;;  %v15967_v18 = vld [vmem:[#allocation88_spill] sm:$0xff] }
 0x6ea   : > { %7669 = vmatprep.mubr.f32.mxu0 %v13265_v3  ;;  %v13283_v17 = vmul.f32 %v12575_v0, %v15967_v18  ;;  %v13288_v3 = vsel %vm855_vm2, %v3958_v7, %v3922_v60  ;;  %v13295_v49 = vsel %vm855_vm2, %v3923_v50, %v3959_v53  ;;  %v3960_v18 = vrot.slane %v13258_v13, 1  ;;  %8039 = vmatpush1.bf16.msra.mxu1 %v8038_v14  ;;  %v15979_v14 = vld [vmem:[#allocation30_spill] sm:$0xff] }
 0x6eb   : > { %6860 = vmatmul.mubr.msk.f32.gmra.mrb[114].mxu1 %vm7229_vm0, %v13272_v26  ;;  %15969 = vst [vmem:[#allocation142_spill] sm:$0xff] %v13288_v3  ;;  %15970 = vst [vmem:[#allocation143_spill] sm:$0xff] %v13295_v49  ;;  %v3924_v26 = vrot.slane %v13249_v1, 1  ;;  %v13302_v7 = vsel %vm634_vm1, %v3692_v44, %v3728_v57  ;;  %v3693_v60 = vrot.slane %v12871_v63, 7  ;;  %v13314_v9 = vsel %vm855_vm2, %v3959_v53, %v3923_v50 }
 0x6ec   : > { %15968 = vst [vmem:[#allocation88_spill] sm:$0xff] %v13283_v17  ;;  %4451 = vmatprep.mubr.f32.mxu1 %v12850_v5  ;;  %15971 = vst [vmem:[#allocation144_spill] sm:$0xff] %v13302_v7  ;;  %v3729_v5 = vrot.slane %v12880_v59, 7  ;;  %v13318_v44 = vmul.f32 %v12575_v0, %v15975_v61  ;;  %8040 = vmatprep.subr.bf16.mxu1 %v15501_v20  ;;  %v13340_v50 = vmul.f32 %v12575_v0, %v15979_v14 }
 0x6ed   : > { %7670 = vmatmul.mubr.msk.f32.gmra.mrb[172].mxu0 %vm7230_vm3, %v13288_v3  ;;  %v15972_v3 = vld [vmem:[#allocation29_spill] sm:$0xff]  ;;  %15974 = vst [vmem:[#allocation145_spill] sm:$0xff] %v13314_v9  ;;  %v13325_v57 = vsel %vm855_vm2, %v3924_v26, %v3960_v18  ;;  %v13345_v61 = vsel %vm855_vm2, %v3960_v18, %v3924_v26  ;;  %v3694_v18 = vrot.slane %v12901_v25, 7 }
 0x6ee   : > { %7672 = vmatprep.mubr.f32.mxu0 %v13295_v49  ;;  %v13309_v22 = vmul.f32 %v12575_v0, %v15972_v3  ;;  %15976 = vst [vmem:[#allocation89_spill] sm:$0xff] %v13318_v44  ;;  %15977 = vst [vmem:[#allocation146_spill] sm:$0xff] %v13325_v57  ;;  %v3925_v3 = vrot.slane %v13279_v33, 1  ;;  %v13333_v53 = vsel %vm634_vm1, %v3729_v5, %v3693_v60 }
 0x6ef   : > { %4452 = vmatmul.mubr.f32.gmra.mrb[116].mxu1 %v13302_v7  ;;  %15978 = vst [vmem:[#allocation147_spill] sm:$0xff] %v13333_v53  ;;  %15980 = vst [vmem:[#allocation30_spill] sm:$0xff] %v13340_v50  ;;  %v13363_v26 = vsel %vm634_vm1, %v3693_v60, %v3729_v5  ;;  %v4174_v7 = vld [vmem:[#allocation8 + $0x1f0] sm:$0xff] }
 0x6f0   : > { %15973 = vst [vmem:[#allocation29_spill] sm:$0xff] %v13309_v22  ;;  %4456 = vmatprep.mubr.f32.mxu1 %v12871_v63  ;;  %v3961_v63 = vrot.slane %v13283_v17, 1  ;;  %15981 = vst [vmem:[#allocation148_spill] sm:$0xff] %v13345_v61  ;;  %v3926_v14 = vrot.slane %v13309_v22, 1  ;;  %v8041_v42 = vpack.c.bf16 %v4175_v55, %v4174_v7  ;;  %v13439_v7 = vmul.f32 %v12575_v0, %v12536_v23 }
 0x6f1   : > { %7673 = vmatmul.mubr.msk.f32.gmra.mrb[174].mxu0 %vm7230_vm3, %v13314_v9  ;;  %v15982_v9 = vld [vmem:[#allocation92_spill] sm:$0xff]  ;;  %15985 = vst [vmem:[#allocation150_spill] sm:$0xff] %v13363_v26 }
 0x6f2   : > { %7675 = vmatprep.mubr.f32.mxu0 %v13325_v57  ;;  %v13349_v57 = vmul.f32 %v12575_v0, %v15982_v9  ;;  %v13356_v49 = vsel %vm855_vm2, %v3925_v3, %v3961_v63  ;;  %v3730_v9 = vrot.slane %v12910_v15, 7  ;;  %8042 = vmatpush1.bf16.msra.mxu1 %v8041_v42  ;;  %15998 = vst [vmem:[#allocation157_spill] sm:$0xff] %v13439_v7 }
 0x6f3   : > { %6862 = vmatmul.mubr.msk.f32.gmra.mrb[118].mxu1 %vm7229_vm0, %v13333_v53  ;;  %15984 = vst [vmem:[#allocation149_spill] sm:$0xff] %v13356_v49  ;;  %v13375_v53 = vsel %vm855_vm2, %v3961_v63, %v3925_v3  ;;  %8043 = vmatprep.subr.bf16.mxu1 %v15501_v20 }
 0x6f4   : > { %4461 = vmatprep.mubr.f32.mxu1 %v12880_v59  ;;  %15983 = vst [vmem:[#allocation92_spill] sm:$0xff] %v13349_v57  ;;  %v3962_v59 = vrot.slane %v13318_v44, 1  ;;  %15987 = vst [vmem:[#allocation152_spill] sm:$0xff] %v13375_v53  ;;  %v13393_v63 = vsel %vm634_vm1, %v3730_v9, %v3694_v18 }
 0x6f5   : > { %7676 = vmatmul.mubr.msk.f32.gmra.mrb[176].mxu0 %vm7230_vm3, %v13345_v61  ;;  %v13370_v61 = vmul.f32 %v12575_v0, %v12515_v41  ;;  %v3927_v41 = vrot.slane %v13340_v50, 1  ;;  %15991 = vst [vmem:[#allocation154_spill] sm:$0xff] %v13393_v63 }
 0x6f6   : > { %7678 = vmatprep.mubr.f32.mxu0 %v13356_v49  ;;  %v15988_v49 = vld [vmem:[#allocation31_spill] sm:$0xff]  ;;  %v13386_v60 = vsel %vm855_vm2, %v3926_v14, %v3962_v59 }
 0x6f7   : > { %4462 = vmatmul.mubr.f32.gmra.mrb[120].mxu1 %v13363_v26  ;;  %15986 = vst [vmem:[#allocation151_spill] sm:$0xff] %v13370_v61  ;;  %v13379_v5 = vmul.f32 %v12575_v0, %v15988_v49  ;;  %15990 = vst [vmem:[#allocation153_spill] sm:$0xff] %v13386_v60  ;;  %v15992_v49 = vld [vmem:[#allocation93_spill] sm:$0xff] }
 0x6f8   : > { %4466 = vmatprep.mubr.f32.mxu1 %v12901_v25  ;;  %v3963_v25 = vrot.slane %v13349_v57, 1  ;;  %v13400_v3 = vmul.f32 %v12575_v0, %v15992_v49 }
 0x6f9   : > { %15989 = vst [vmem:[#allocation31_spill] sm:$0xff] %v13379_v5  ;;  %7679 = vmatmul.mubr.msk.f32.gmra.mrb[178].mxu0 %vm7230_vm3, %v13375_v53  ;;  %v15994_v53 = vld [vmem:[#allocation32_spill] sm:$0xff] }
 0x6fa   : > { %7681 = vmatprep.mubr.f32.mxu0 %v13386_v60  ;;  %15993 = vst [vmem:[#allocation93_spill] sm:$0xff] %v13400_v3  ;;  %v13404_v26 = vmul.f32 %v12575_v0, %v15994_v53  ;;  %v13409_v60 = vsel %vm855_vm2, %v3962_v59, %v3926_v14  ;;  %v13416_v49 = vsel %vm855_vm2, %v3927_v41, %v3963_v25  ;;  %v3964_v53 = vrot.slane %v13379_v5, 1 }
 0x6fb   : > { %6864 = vmatmul.mubr.msk.f32.gmra.mrb[122].mxu1 %vm7229_vm0, %v13393_v63  ;;  %15996 = vst [vmem:[#allocation155_spill] sm:$0xff] %v13409_v60  ;;  %v3928_v63 = vrot.slane %v13370_v61, 1  ;;  %v13423_v59 = vsel %vm634_vm1, %v3694_v18, %v3730_v9  ;;  %v3695_v14 = vrot.slane %v12931_v24, 7  ;;  %v13435_v55 = vsel %vm855_vm2, %v3963_v25, %v3927_v41 }
 0x6fc   : > { %15995 = vst [vmem:[#allocation32_spill] sm:$0xff] %v13404_v26  ;;  %4471 = vmatprep.mubr.f32.mxu1 %v12910_v15  ;;  %15997 = vst [vmem:[#allocation156_spill] sm:$0xff] %v13423_v59  ;;  %v3731_v15 = vrot.slane %v12940_v34, 7  ;;  %v3965_v9 = vrot.slane %v13404_v26, 1 }
 0x6fd   : > { %7682 = vmatmul.mubr.msk.f32.gmra.mrb[180].mxu0 %vm7230_vm3, %v13409_v60  ;;  %v13430_v60 = vmul.f32 %v12575_v0, %v12531_v43  ;;  %v13446_v18 = vsel %vm855_vm2, %v3928_v63, %v3964_v53  ;;  %v3929_v43 = vrot.slane %v13400_v3, 1  ;;  %v13462_v42 = vsel %vm855_vm2, %v3964_v53, %v3928_v63 }
 0x6fe   : > { %7684 = vmatprep.mubr.f32.mxu0 %v13416_v49  ;;  %v13454_v23 = vsel %vm634_vm1, %v3731_v15, %v3695_v14  ;;  %16000 = vst [vmem:[#allocation159_spill] sm:$0xff] %v13462_v42 }
 0x6ff   : > { %4472 = vmatmul.mubr.f32.gmra.mrb[124].mxu1 %v13423_v59  ;;  %15999 = vst [vmem:[#allocation158_spill] sm:$0xff] %v13454_v23  ;;  %v13469_v25 = vsel %vm855_vm2, %v3929_v43, %v3965_v9  ;;  %v3930_v41 = vrot.slane %v13430_v60, 1  ;;  %v13481_v63 = vsel %vm855_vm2, %v3965_v9, %v3929_v43 }
 0x700   : > { %4476 = vmatprep.mubr.f32.mxu1 %v12931_v24  ;;  %16001 = vst [vmem:[#allocation160_spill] sm:$0xff] %v13469_v25  ;;  %v3966_v24 = vrot.slane %v13439_v7, 1  ;;  %16003 = vst [vmem:[#allocation162_spill] sm:$0xff] %v13481_v63  ;;  %v4179_v7 = vld [vmem:[#allocation8 + $0x218] sm:$0xff] }
 0x701   : > { %7685 = vmatmul.mubr.msk.f32.gmra.mrb[182].mxu0 %vm7230_vm3, %v13435_v55 }
 0x702   : > { %7687 = vmatprep.mubr.f32.mxu0 %v13446_v18  ;;  %v13489_v53 = vsel %vm855_vm2, %v3930_v41, %v3966_v24  ;;  %v13505_v43 = vsel %vm855_vm2, %v3966_v24, %v3930_v41  ;;  %v3700_v41 = vrot.slane %v13021_v32, 7 }
 0x703   : > { %6866 = vmatmul.mubr.msk.f32.gmra.mrb[126].mxu1 %vm7229_vm0, %v13454_v23  ;;  %16004 = vst [vmem:[#allocation163_spill] sm:$0xff] %v13489_v53 }
 0x704   : > { %4481 = vmatprep.mubr.f32.mxu1 %v12940_v34  ;;  %v13476_v34 = vsel %vm634_vm1, %v3695_v14, %v3731_v15  ;;  %v16006_v14 = vld [vmem:[#allocation23_spill] sm:$0xff] }
 0x705   : > { %7688 = vmatmul.mubr.msk.f32.gmra.mrb[184].mxu0 %vm7230_vm3, %v13462_v42  ;;  %16002 = vst [vmem:[#allocation161_spill] sm:$0xff] %v13476_v34  ;;  %v13497_v42 = vmul.f32 %v12575_v0, %v16006_v14  ;;  %v3736_v14 = vrot.slane %v13025_v58, 7 }
 0x706   : > { %7690 = vmatprep.mubr.f32.mxu0 %v13469_v25  ;;  %v16005_v25 = vld [vmem:[#allocation77_spill] sm:$0xff] }
 0x707   : > { %4482 = vmatmul.mubr.f32.gmra.mrb[128].mxu1 %v13476_v34  ;;  %v13493_v15 = vmul.f32 %v12575_v0, %v16005_v25  ;;  %16007 = vst [vmem:[#allocation77_spill] sm:$0xff] %v13505_v43  ;;  %v3735_v0 = vrot.slane %v13497_v42, 7 }
 0x708   : > { %4486 = vmatprep.mubr.f32.mxu1 %v15748_v29 }
 0x709   : > { %7691 = vmatmul.mubr.msk.f32.gmra.mrb[186].mxu0 %vm7230_vm3, %v13481_v63  ;;  %v3699_v9 = vrot.slane %v13493_v15, 7 }
 0x70a   : > { %7693 = vmatprep.mubr.f32.mxu0 %v13489_v53  ;;  %v3738_v53 = vrot.slane %v13076_v45, 7 }
 0x70b   : > { %6868 = vmatmul.mubr.msk.f32.gmra.mrb[130].mxu1 %vm7229_vm0, %v15837_v28  ;;  %v13521_v24 = vsel %vm634_vm1, %v3735_v0, %v3699_v9  ;;  %v13529_v25 = vsel %vm634_vm1, %v3699_v9, %v3735_v0  ;;  %v13545_v9 = vsel %vm634_vm1, %v3700_v41, %v3736_v14  ;;  %v3701_v0 = vrot.slane %v13045_v35, 7 }
 0x70c   : > { %4491 = vmatprep.mubr.f32.mxu1 %v15748_v29  ;;  %16009 = vst [vmem:[#allocation164_spill] sm:$0xff] %v13545_v9  ;;  %v3737_v29 = vrot.slane %v13054_v54, 7 }
 0x70d   : > { %7694 = vmatmul.mubr.msk.f32.gmra.mrb[188].mxu0 %vm7230_vm3, %v13505_v43 }
 0x70e   : > { %7696 = vmatprep.mubr.f32.mxu0 %v15924_v30  ;;  %v13553_v43 = vsel %vm634_vm1, %v3737_v29, %v3701_v0 }
 0x70f   : > { %4492 = vmatmul.mubr.f32.gmra.mrb[132].mxu1 %v15837_v28  ;;  %v13537_v28 = vsel %vm634_vm1, %v3736_v14, %v3700_v41  ;;  %16010 = vst [vmem:[#allocation165_spill] sm:$0xff] %v13553_v43  ;;  %v13561_v41 = vsel %vm634_vm1, %v3701_v0, %v3737_v29  ;;  %v3702_v14 = vrot.slane %v13071_v48, 7  ;;  %v3703_v0 = vrot.slane %v13098_v6, 7 }
 0x710   : > { %4496 = vmatprep.mubr.f32.mxu1 %v13493_v15  ;;  %16008 = vst [vmem:[#allocation23_spill] sm:$0xff] %v13537_v28  ;;  %16011 = vst [vmem:[#allocation166_spill] sm:$0xff] %v13561_v41 }
 0x711   : > { %7697 = vmatmul.mubr.msk.f32.gmra.mrb[190].mxu0 %vm7230_vm3, %v15924_v30  ;;  %v13577_v29 = vsel %vm634_vm1, %v3702_v14, %v3738_v53 }
 0x712   : > { %16013 = vst [vmem:[#allocation168_spill] sm:$0xff] %v13577_v29 }
 0x713   : > { %6870 = vmatmul.mubr.msk.f32.gmra.mrb[134].mxu1 %vm7229_vm0, %v13521_v24 }
 0x714   : > { %4501 = vmatprep.mubr.f32.mxu1 %v13497_v42 }
 0x717   : > { %4502 = vmatmul.mubr.f32.gmra.mrb[136].mxu1 %v13529_v25 }
 0x718   : > { %4506 = vmatprep.mubr.f32.mxu1 %v13021_v32 }
 0x71b   : > { %6872 = vmatmul.mubr.msk.f32.gmra.mrb[138].mxu1 %vm7229_vm0, %v13537_v28 }
 0x71c   : > { %4511 = vmatprep.mubr.f32.mxu1 %v13025_v58 }
 0x71f   : > { %4512 = vmatmul.mubr.f32.gmra.mrb[140].mxu1 %v13545_v9 }
 0x720   : > { %4516 = vmatprep.mubr.f32.mxu1 %v13045_v35  ;;  %v13569_v35 = vsel %vm634_vm1, %v3738_v53, %v3702_v14  ;;  %v3704_v14 = vrot.slane %v13128_v46, 7 }
 0x721   : > { %16012 = vst [vmem:[#allocation167_spill] sm:$0xff] %v13569_v35 }
 0x723   : > { %6874 = vmatmul.mubr.msk.f32.gmra.mrb[142].mxu1 %vm7229_vm0, %v13553_v43 }
 0x724   : > { %4521 = vmatprep.mubr.f32.mxu1 %v13054_v54  ;;  %v3739_v54 = vrot.slane %v13107_v37, 7 }
 0x726   : > { %v13593_v53 = vsel %vm634_vm1, %v3703_v0, %v3739_v54 }
 0x727   : > { %4522 = vmatmul.mubr.f32.gmra.mrb[144].mxu1 %v13561_v41  ;;  %16015 = vst [vmem:[#allocation170_spill] sm:$0xff] %v13593_v53 }
 0x728   : > { %4526 = vmatprep.mubr.f32.mxu1 %v13071_v48  ;;  %v13585_v48 = vsel %vm634_vm1, %v3739_v54, %v3703_v0  ;;  %v3705_v0 = vrot.slane %v13158_v21, 7 }
 0x729   : > { %16014 = vst [vmem:[#allocation169_spill] sm:$0xff] %v13585_v48 }
 0x72b   : > { %6876 = vmatmul.mubr.msk.f32.gmra.mrb[146].mxu1 %vm7229_vm0, %v13569_v35 }
 0x72c   : > { %4531 = vmatprep.mubr.f32.mxu1 %v13076_v45  ;;  %v3740_v45 = vrot.slane %v13137_v40, 7 }
 0x72e   : > { %v13609_v54 = vsel %vm634_vm1, %v3704_v14, %v3740_v45 }
 0x72f   : > { %4532 = vmatmul.mubr.f32.gmra.mrb[148].mxu1 %v13577_v29  ;;  %16017 = vst [vmem:[#allocation172_spill] sm:$0xff] %v13609_v54 }
 0x730   : > { %4536 = vmatprep.mubr.f32.mxu1 %v13098_v6  ;;  %v13601_v6 = vsel %vm634_vm1, %v3740_v45, %v3704_v14  ;;  %v3706_v14 = vrot.slane %v13188_v4, 7 }
 0x731   : > { %16016 = vst [vmem:[#allocation171_spill] sm:$0xff] %v13601_v6 }
 0x733   : > { %6878 = vmatmul.mubr.msk.f32.gmra.mrb[150].mxu1 %vm7229_vm0, %v13585_v48 }
 0x734   : > { %4541 = vmatprep.mubr.f32.mxu1 %v13107_v37  ;;  %v3741_v37 = vrot.slane %v13162_v52, 7 }
 0x736   : > { %v13625_v45 = vsel %vm634_vm1, %v3705_v0, %v3741_v37 }
 0x737   : > { %4542 = vmatmul.mubr.f32.gmra.mrb[152].mxu1 %v13593_v53  ;;  %16019 = vst [vmem:[#allocation174_spill] sm:$0xff] %v13625_v45 }
 0x738   : > { %4546 = vmatprep.mubr.f32.mxu1 %v13128_v46  ;;  %v13617_v46 = vsel %vm634_vm1, %v3741_v37, %v3705_v0  ;;  %v3707_v0 = vrot.slane %v13219_v2, 7 }
 0x739   : > { %16018 = vst [vmem:[#allocation173_spill] sm:$0xff] %v13617_v46 }
 0x73b   : > { %6880 = vmatmul.mubr.msk.f32.gmra.mrb[154].mxu1 %vm7229_vm0, %v13601_v6 }
 0x73c   : > { %4551 = vmatprep.mubr.f32.mxu1 %v13137_v40  ;;  %v3742_v40 = vrot.slane %v13197_v11, 7 }
 0x73e   : > { %v13641_v37 = vsel %vm634_vm1, %v3706_v14, %v3742_v40 }
 0x73f   : > { %4552 = vmatmul.mubr.f32.gmra.mrb[156].mxu1 %v13609_v54  ;;  %16021 = vst [vmem:[#allocation176_spill] sm:$0xff] %v13641_v37 }
 0x740   : > { %4556 = vmatprep.mubr.f32.mxu1 %v13158_v21  ;;  %v13633_v21 = vsel %vm634_vm1, %v3742_v40, %v3706_v14  ;;  %v3708_v14 = vrot.slane %v13249_v1, 7 }
 0x741   : > { %16020 = vst [vmem:[#allocation175_spill] sm:$0xff] %v13633_v21 }
 0x743   : > { %6882 = vmatmul.mubr.msk.f32.gmra.mrb[158].mxu1 %vm7229_vm0, %v13617_v46 }
 0x744   : > { %4561 = vmatprep.mubr.f32.mxu1 %v13162_v52  ;;  %v3743_v52 = vrot.slane %v13228_v16, 7 }
 0x746   : > { %v13657_v40 = vsel %vm634_vm1, %v3707_v0, %v3743_v52 }
 0x747   : > { %4562 = vmatmul.mubr.f32.gmra.mrb[160].mxu1 %v13625_v45  ;;  %16023 = vst [vmem:[#allocation178_spill] sm:$0xff] %v13657_v40 }
 0x748   : > { %4566 = vmatprep.mubr.f32.mxu1 %v13188_v4  ;;  %v13649_v4 = vsel %vm634_vm1, %v3743_v52, %v3707_v0  ;;  %v3709_v0 = vrot.slane %v13279_v33, 7 }
 0x749   : > { %16022 = vst [vmem:[#allocation177_spill] sm:$0xff] %v13649_v4 }
 0x74b   : > { %6884 = vmatmul.mubr.msk.f32.gmra.mrb[162].mxu1 %vm7229_vm0, %v13633_v21 }
 0x74c   : > { %4571 = vmatprep.mubr.f32.mxu1 %v13197_v11  ;;  %v3744_v11 = vrot.slane %v13258_v13, 7 }
 0x74e   : > { %v13673_v52 = vsel %vm634_vm1, %v3708_v14, %v3744_v11 }
 0x74f   : > { %4572 = vmatmul.mubr.f32.gmra.mrb[164].mxu1 %v13641_v37  ;;  %16025 = vst [vmem:[#allocation180_spill] sm:$0xff] %v13673_v52 }
 0x750   : > { %4576 = vmatprep.mubr.f32.mxu1 %v13219_v2  ;;  %v13665_v2 = vsel %vm634_vm1, %v3744_v11, %v3708_v14  ;;  %v3710_v14 = vrot.slane %v13309_v22, 7 }
 0x751   : > { %16024 = vst [vmem:[#allocation179_spill] sm:$0xff] %v13665_v2 }
 0x753   : > { %6886 = vmatmul.mubr.msk.f32.gmra.mrb[166].mxu1 %vm7229_vm0, %v13649_v4 }
 0x754   : > { %4581 = vmatprep.mubr.f32.mxu1 %v13228_v16  ;;  %v3745_v16 = vrot.slane %v13283_v17, 7 }
 0x756   : > { %v13689_v11 = vsel %vm634_vm1, %v3709_v0, %v3745_v16 }
 0x757   : > { %4582 = vmatmul.mubr.f32.gmra.mrb[168].mxu1 %v13657_v40  ;;  %16027 = vst [vmem:[#allocation182_spill] sm:$0xff] %v13689_v11 }
 0x758   : > { %4586 = vmatprep.mubr.f32.mxu1 %v13249_v1  ;;  %v13681_v1 = vsel %vm634_vm1, %v3745_v16, %v3709_v0 }
 0x759   : > { %16026 = vst [vmem:[#allocation181_spill] sm:$0xff] %v13681_v1 }
 0x75b   : > { %6888 = vmatmul.mubr.msk.f32.gmra.mrb[170].mxu1 %vm7229_vm0, %v13665_v2 }
 0x75c   : > { %4591 = vmatprep.mubr.f32.mxu1 %v13258_v13  ;;  %v3746_v13 = vrot.slane %v13318_v44, 7 }
 0x75e   : > { %v13701_v32 = vsel %vm634_vm1, %v3746_v13, %v3710_v14 }
 0x75f   : > { %4592 = vmatmul.mubr.f32.gmra.mrb[172].mxu1 %v13673_v52  ;;  %16030 = vst [vmem:[#allocation185_spill] sm:$0xff] %v13701_v32 }
 0x760   : > { %4596 = vmatprep.mubr.f32.mxu1 %v13279_v33 }
 0x763   : > { %6890 = vmatmul.mubr.msk.f32.gmra.mrb[174].mxu1 %vm7229_vm0, %v13681_v1 }
 0x764   : > { %4601 = vmatprep.mubr.f32.mxu1 %v13283_v17 }
 0x767   : > { %4602 = vmatmul.mubr.f32.gmra.mrb[176].mxu1 %v13689_v11 }
 0x768   : > { %v13694_v33 = vpop.f32.mrb[128].mxu0  ;;  %4606 = vmatprep.mubr.f32.mxu1 %v13309_v22  ;;  %v3747_v22 = vrot.slane %v13349_v57, 7 }
 0x769   : > { %16028 = vst [vmem:[#allocation183_spill] sm:$0xff] %v13694_v33  ;;  %v13697_v58 = vpop.f32.mrb[129].mxu0  ;;  %v13713_v33 = vsel %vm634_vm1, %v3710_v14, %v3746_v13 }
 0x76a   : > { %16029 = vst [vmem:[#allocation184_spill] sm:$0xff] %v13697_v58  ;;  %16033 = vst [vmem:[#allocation188_spill] sm:$0xff] %v13713_v33  ;;  %v3711_v58 = vrot.slane %v13340_v50, 7 }
 0x76b   : > { %6892 = vmatmul.mubr.msk.f32.gmra.mrb[178].mxu1 %vm7229_vm0, %v13701_v32 }
 0x76c   : > { %v13706_v16 = vpop.f32.mrb[130].mxu0  ;;  %4611 = vmatprep.mubr.f32.mxu1 %v13318_v44 }
 0x76d   : > { %16031 = vst [vmem:[#allocation186_spill] sm:$0xff] %v13706_v16  ;;  %v13709_v0 = vpop.f32.mrb[131].mxu0  ;;  %v13725_v16 = vsel %vm634_vm1, %v3747_v22, %v3711_v58 }
 0x76e   : > { %16032 = vst [vmem:[#allocation187_spill] sm:$0xff] %v13709_v0  ;;  %16036 = vst [vmem:[#allocation191_spill] sm:$0xff] %v13725_v16  ;;  %v3748_v0 = vrot.slane %v13379_v5, 7 }
 0x76f   : > { %4612 = vmatmul.mubr.f32.gmra.mrb[180].mxu1 %v13713_v33 }
 0x770   : > { %v13718_v17 = vpop.f32.mrb[132].mxu0  ;;  %4616 = vmatprep.mubr.f32.mxu1 %v13340_v50 }
 0x771   : > { %16034 = vst [vmem:[#allocation189_spill] sm:$0xff] %v13718_v17  ;;  %v13721_v63 = vpop.f32.mrb[133].mxu0  ;;  %v13737_v17 = vsel %vm634_vm1, %v3711_v58, %v3747_v22 }
 0x772   : > { %16035 = vst [vmem:[#allocation190_spill] sm:$0xff] %v13721_v63  ;;  %16039 = vst [vmem:[#allocation194_spill] sm:$0xff] %v13737_v17  ;;  %v3712_v63 = vrot.slane %v13370_v61, 7 }
 0x773   : > { %6894 = vmatmul.mubr.msk.f32.gmra.mrb[182].mxu1 %vm7229_vm0, %v13725_v16 }
 0x774   : > { %v13730_v13 = vpop.f32.mrb[134].mxu0  ;;  %4621 = vmatprep.mubr.f32.mxu1 %v13349_v57 }
 0x775   : > { %16037 = vst [vmem:[#allocation192_spill] sm:$0xff] %v13730_v13  ;;  %v13733_v14 = vpop.f32.mrb[135].mxu0  ;;  %v13749_v13 = vsel %vm634_vm1, %v3748_v0, %v3712_v63 }
 0x776   : > { %16038 = vst [vmem:[#allocation193_spill] sm:$0xff] %v13733_v14  ;;  %16042 = vst [vmem:[#allocation197_spill] sm:$0xff] %v13749_v13  ;;  %v3749_v14 = vrot.slane %v13404_v26, 7 }
 0x777   : > { %4622 = vmatmul.mubr.f32.gmra.mrb[184].mxu1 %v13737_v17 }
 0x778   : > { %v13742_v50 = vpop.f32.mrb[136].mxu0  ;;  %4626 = vmatprep.mubr.f32.mxu1 %v13370_v61 }
 0x779   : > { %16040 = vst [vmem:[#allocation195_spill] sm:$0xff] %v13742_v50  ;;  %v13745_v44 = vpop.f32.mrb[137].mxu0  ;;  %v13761_v50 = vsel %vm634_vm1, %v3712_v63, %v3748_v0 }
 0x77a   : > { %16041 = vst [vmem:[#allocation196_spill] sm:$0xff] %v13745_v44  ;;  %16045 = vst [vmem:[#allocation200_spill] sm:$0xff] %v13761_v50  ;;  %v3713_v44 = vrot.slane %v13400_v3, 7 }
 0x77b   : > { %6896 = vmatmul.mubr.msk.f32.gmra.mrb[186].mxu1 %vm7229_vm0, %v13749_v13 }
 0x77c   : > { %v13754_v58 = vpop.f32.mrb[138].mxu0  ;;  %4631 = vmatprep.mubr.f32.mxu1 %v13379_v5 }
 0x77d   : > { %16043 = vst [vmem:[#allocation198_spill] sm:$0xff] %v13754_v58  ;;  %v13757_v22 = vpop.f32.mrb[139].mxu0  ;;  %v13773_v58 = vsel %vm634_vm1, %v3749_v14, %v3713_v44 }
 0x77e   : > { %16044 = vst [vmem:[#allocation199_spill] sm:$0xff] %v13757_v22  ;;  %16048 = vst [vmem:[#allocation203_spill] sm:$0xff] %v13773_v58  ;;  %v4176_v22 = vld [vmem:[#allocation8 + $0x200] sm:$0xff] }
 0x77f   : > { %4632 = vmatmul.mubr.f32.gmra.mrb[188].mxu1 %v13761_v50 }
 0x780   : > { %v13766_v61 = vpop.f32.mrb[140].mxu0  ;;  %4636 = vmatprep.mubr.f32.mxu1 %v13400_v3  ;;  %v13785_v3 = vsel %vm634_vm1, %v3713_v44, %v3749_v14 }
 0x781   : > { %16046 = vst [vmem:[#allocation201_spill] sm:$0xff] %v13766_v61  ;;  %v13769_v57 = vpop.f32.mrb[141].mxu0  ;;  %v4177_v61 = vld [vmem:[#allocation8 + $0x208] sm:$0xff]  ;;  %16051 = vst [vmem:[#allocation206_spill] sm:$0xff] %v13785_v3 }
 0x782   : > { %16047 = vst [vmem:[#allocation202_spill] sm:$0xff] %v13769_v57  ;;  %v8044_v5 = vpack.c.bf16 %v4177_v61, %v4176_v22  ;;  %v3933_v61 = vrot.slane %v12585_v47, 1 }
 0x783   : > { %6898 = vmatmul.mubr.msk.f32.gmra.mrb[190].mxu1 %vm7229_vm0, %v13773_v58 }
 0x784   : > { %v13778_v63 = vpop.f32.mrb[142].mxu0  ;;  %4641 = vmatprep.mubr.f32.mxu1 %v13404_v26  ;;  %v4178_v26 = vld [vmem:[#allocation8 + $0x210] sm:$0xff] }
 0x785   : > { %16049 = vst [vmem:[#allocation204_spill] sm:$0xff] %v13778_v63  ;;  %v13781_v0 = vpop.f32.mrb[143].mxu0  ;;  %v8047_v44 = vpack.c.bf16 %v4179_v7, %v4178_v26  ;;  %v4183_v7 = vld [vmem:[#allocation8 + $0x238] sm:$0xff] }
 0x786   : > { %16050 = vst [vmem:[#allocation205_spill] sm:$0xff] %v13781_v0 }
 0x787   : > { %4642 = vmatmul.mubr.f32.gmra.mrb[192].mxu1 %v13785_v3  ;;  %v4181_v3 = vld [vmem:[#allocation8 + $0x228] sm:$0xff] }
 0x788   : > { %v13788_v57 = vpop.f32.mrb[144].mxu0  ;;  %6900 = vmatprep.mubr.msk.f32.mxu1 %vm7229_vm0, %v12619_v62  ;;  %v3897_v62 = vrot.slane %v12579_v12, 1 }
 0x789   : > { %16052 = vst [vmem:[#allocation207_spill] sm:$0xff] %v13788_v57  ;;  %v13793_v63 = vpop.f32.mrb[145].mxu0  ;;  %v4180_v57 = vld [vmem:[#allocation8 + $0x220] sm:$0xff] }
 0x78a   : > { %16053 = vst [vmem:[#allocation208_spill] sm:$0xff] %v13793_v63 }
 0x78b   : > { %4712 = vmatmul.mubr.f32.vlgmr.msra.gmra.mrb[66].mxu1 %v15924_v30 }
 0x78c   : > { %v13796_v0 = vpop.f32.mrb[146].mxu0  ;;  %4716 = vmatprep.mubr.f32.mxu1 %v12654_v36  ;;  %8045 = vmatpush1.bf16.msra.mxu1 %v8044_v5  ;;  %v8050_v36 = vpack.c.bf16 %v4181_v3, %v4180_v57  ;;  %v4182_v5 = vld [vmem:[#allocation8 + $0x230] sm:$0xff]  ;;  %v4184_v57 = vld [vmem:[#allocation8 + $0x240] sm:$0xff]  ;;  %v4185_v3 = vld [vmem:[#allocation8 + $0x248] sm:$0xff] }
 0x78d   : > { %16054 = vst [vmem:[#allocation209_spill] sm:$0xff] %v13796_v0  ;;  %v13799_v14 = vpop.f32.mrb[147].mxu0  ;;  %8046 = vmatprep.subr.bf16.mxu1 %v15501_v20  ;;  %v16057_v0 = vld [vmem:[#allocation42_spill] sm:$0xff] }
 0x78e   : > { %16055 = vst [vmem:[#allocation210_spill] sm:$0xff] %v13799_v14  ;;  %v13817_v14 = vsel %vm855_vm2, %v3897_v62, %v3933_v61 }
 0x78f   : > { %6902 = vmatmul.mubr.msk.f32.gmra.mrb[68].mxu1 %vm7230_vm3, %v15924_v30 }
 0x790   : > { %v13807_v22 = vpop.f32.mrb[148].mxu0  ;;  %6904 = vmatprep.mubr.msk.f32.mxu1 %vm7229_vm0, %v16057_v0  ;;  %8048 = vmatpush1.bf16.msra.mxu1 %v8047_v44 }
 0x791   : > { %16056 = vst [vmem:[#allocation211_spill] sm:$0xff] %v13807_v22  ;;  %v13812_v26 = vpop.f32.mrb[149].mxu0  ;;  %8049 = vmatprep.subr.bf16.mxu1 %v15501_v20  ;;  %v8053_v22 = vpack.c.bf16 %v4183_v7, %v4182_v5  ;;  %v4186_v7 = vld [vmem:[#allocation8 + $0x250] sm:$0xff] }
 0x792   : > { %16058 = vst [vmem:[#allocation212_spill] sm:$0xff] %v13812_v26  ;;  %v13828_v26 = vsel %vm855_vm2, %v3933_v61, %v3897_v62  ;;  %v16063_v62 = vld [vmem:[#allocation101_spill] sm:$0xff] }
 0x793   : > { %4722 = vmatmul.mubr.f32.gmra.mrb[70].mxu1 %v13817_v14 }
 0x794   : > { %v13820_v63 = vpop.f32.mrb[150].mxu0  ;;  %4726 = vmatprep.mubr.f32.mxu1 %v12714_v10  ;;  %8051 = vmatpush1.bf16.msra.mxu1 %v8050_v36  ;;  %v8056_v36 = vpack.c.bf16 %v4185_v3, %v4184_v57  ;;  %v4189_v57 = vld [vmem:[#allocation8 + $0x268] sm:$0xff]  ;;  %v16066_v3 = vld [vmem:[#allocation36_spill] sm:$0xff] }
 0x795   : > { %16059 = vst [vmem:[#allocation213_spill] sm:$0xff] %v13820_v63  ;;  %v13823_v44 = vpop.f32.mrb[151].mxu0  ;;  %8052 = vmatprep.subr.bf16.mxu1 %v15501_v20  ;;  %v4187_v63 = vld [vmem:[#allocation8 + $0x258] sm:$0xff] }
 0x796   : > { %16060 = vst [vmem:[#allocation214_spill] sm:$0xff] %v13823_v44 }
 0x797   : > { %6906 = vmatmul.mubr.msk.f32.gmra.mrb[72].mxu1 %vm7230_vm3, %v13828_v26 }
 0x798   : > { %v13833_v0 = vpop.f32.mrb[152].mxu0  ;;  %6908 = vmatprep.mubr.msk.f32.mxu1 %vm7229_vm0, %v12744_v39  ;;  %8054 = vmatpush1.bf16.msra.mxu1 %v8053_v22  ;;  %v4188_v22 = vld [vmem:[#allocation8 + $0x260] sm:$0xff]  ;;  %v16068_v39 = vld [vmem:[#allocation71_spill] sm:$0xff] }
 0x799   : > { %16061 = vst [vmem:[#allocation215_spill] sm:$0xff] %v13833_v0  ;;  %v13838_v5 = vpop.f32.mrb[153].mxu0  ;;  %8055 = vmatprep.subr.bf16.mxu1 %v15501_v20  ;;  %v8059_v0 = vpack.c.bf16 %v4187_v63, %v4186_v7  ;;  %v4190_v63 = vld [vmem:[#allocation8 + $0x270] sm:$0xff]  ;;  %v4191_v7 = vld [vmem:[#allocation8 + $0x278] sm:$0xff] }
 0x79a   : > { %16062 = vst [vmem:[#allocation216_spill] sm:$0xff] %v13838_v5 }
 0x79b   : > { %4732 = vmatmul.mubr.f32.gmra.mrb[74].mxu1 %v16063_v62 }
 0x79c   : > { %v13842_v61 = vpop.f32.mrb[154].mxu0  ;;  %4736 = vmatprep.mubr.f32.mxu1 %v12774_v31  ;;  %8057 = vmatpush1.bf16.msra.mxu1 %v8056_v36  ;;  %v16071_v31 = vld [vmem:[#allocation82_spill] sm:$0xff] }
 0x79d   : > { %16064 = vst [vmem:[#allocation101_spill] sm:$0xff] %v13842_v61  ;;  %v13845_v44 = vpop.f32.mrb[155].mxu0  ;;  %8058 = vmatprep.subr.bf16.mxu1 %v15501_v20  ;;  %v8062_v61 = vpack.c.bf16 %v4189_v57, %v4188_v22  ;;  %v4193_v22 = vld [vmem:[#allocation8 + $0x288] sm:$0xff]  ;;  %v16074_v57 = vld [vmem:[#allocation108_spill] sm:$0xff] }
 0x79e   : > { %16065 = vst [vmem:[#allocation217_spill] sm:$0xff] %v13845_v44  ;;  %v16070_v44 = vld [vmem:[#allocation105_spill] sm:$0xff] }
 0x79f   : > { %6910 = vmatmul.mubr.msk.f32.gmra.mrb[76].mxu1 %vm7230_vm3, %v16066_v3 }
 0x7a0   : > { %v13851_v5 = vpop.f32.mrb[156].mxu0  ;;  %6912 = vmatprep.mubr.msk.f32.mxu1 %vm7229_vm0, %v16068_v39  ;;  %8060 = vmatpush1.bf16.msra.mxu1 %v8059_v0  ;;  %v4192_v0 = vld [vmem:[#allocation8 + $0x280] sm:$0xff]  ;;  %v16076_v39 = vld [vmem:[#allocation91_spill] sm:$0xff] }
 0x7a1   : > { %16067 = vst [vmem:[#allocation218_spill] sm:$0xff] %v13851_v5  ;;  %v13856_v36 = vpop.f32.mrb[157].mxu0  ;;  %8061 = vmatprep.subr.bf16.mxu1 %v15501_v20  ;;  %v8065_v5 = vpack.c.bf16 %v4191_v7, %v4190_v63  ;;  %v4194_v63 = vld [vmem:[#allocation8 + $0x290] sm:$0xff]  ;;  %v4195_v7 = vld [vmem:[#allocation8 + $0x298] sm:$0xff] }
 0x7a2   : > { %16069 = vst [vmem:[#allocation219_spill] sm:$0xff] %v13856_v36 }
 0x7a3   : > { %4742 = vmatmul.mubr.f32.gmra.mrb[78].mxu1 %v16070_v44  ;;  %v16080_v44 = vld [vmem:[#allocation102_spill] sm:$0xff] }
 0x7a4   : > { %4746 = vmatprep.mubr.f32.mxu1 %v16071_v31  ;;  %v13861_v10 = vpop.f32.mrb[158].mxu0  ;;  %8063 = vmatpush1.bf16.msra.mxu1 %v8062_v61 }
 0x7a5   : > { %16072 = vst [vmem:[#allocation220_spill] sm:$0xff] %v13861_v10  ;;  %v13863_v3 = vpop.f32.mrb[159].mxu0  ;;  %8064 = vmatprep.subr.bf16.mxu1 %v15501_v20  ;;  %v8068_v10 = vpack.c.bf16 %v4193_v22, %v4192_v0  ;;  %v4197_v0 = vld [vmem:[#allocation8 + $0x2a8] sm:$0xff]  ;;  %v16082_v22 = vld [vmem:[#allocation43_spill] sm:$0xff] }
 0x7a6   : > { %16073 = vst [vmem:[#allocation221_spill] sm:$0xff] %v13863_v3  ;;  %v16078_v3 = vld [vmem:[#allocation109_spill] sm:$0xff] }
 0x7a7   : > { %6914 = vmatmul.mubr.msk.f32.gmra.mrb[80].mxu1 %vm7230_vm3, %v16074_v57 }
 0x7a8   : > { %v13869_v36 = vpop.f32.mrb[160].mxu0  ;;  %6916 = vmatprep.mubr.msk.f32.mxu1 %vm7229_vm0, %v16076_v39  ;;  %8066 = vmatpush1.bf16.msra.mxu1 %v8065_v5  ;;  %v4196_v5 = vld [vmem:[#allocation8 + $0x2a0] sm:$0xff]  ;;  %v16084_v39 = vld [vmem:[#allocation111_spill] sm:$0xff] }
 0x7a9   : > { %16075 = vst [vmem:[#allocation222_spill] sm:$0xff] %v13869_v36  ;;  %v13874_v61 = vpop.f32.mrb[161].mxu0  ;;  %8067 = vmatprep.subr.bf16.mxu1 %v15501_v20  ;;  %v8071_v36 = vpack.c.bf16 %v4195_v7, %v4194_v63  ;;  %v16086_v63 = vld [vmem:[#allocation46_spill] sm:$0xff] }
 0x7aa   : > { %16077 = vst [vmem:[#allocation223_spill] sm:$0xff] %v13874_v61 }
 0x7ab   : > { %4752 = vmatmul.mubr.f32.gmra.mrb[82].mxu1 %v16078_v3 }
 0x7ac   : > { %v13878_v31 = vpop.f32.mrb[162].mxu0  ;;  %4756 = vmatprep.mubr.f32.mxu1 %v16080_v44  ;;  %8069 = vmatpush1.bf16.msra.mxu1 %v8068_v10 }
 0x7ad   : > { %16079 = vst [vmem:[#allocation109_spill] sm:$0xff] %v13878_v31  ;;  %v13881_v57 = vpop.f32.mrb[163].mxu0  ;;  %8070 = vmatprep.subr.bf16.mxu1 %v15501_v20  ;;  %v8074_v31 = vpack.c.bf16 %v4197_v0, %v4196_v5  ;;  %v16092_v0 = vld [vmem:[#allocation119_spill] sm:$0xff] }
 0x7ae   : > { %16081 = vst [vmem:[#allocation224_spill] sm:$0xff] %v13881_v57 }
 0x7af   : > { %6918 = vmatmul.mubr.msk.f32.gmra.mrb[84].mxu1 %vm7230_vm3, %v16082_v22 }
 0x7b0   : > { %v13887_v61 = vpop.f32.mrb[164].mxu0  ;;  %6920 = vmatprep.mubr.msk.f32.mxu1 %vm7229_vm0, %v16084_v39  ;;  %8072 = vmatpush1.bf16.msra.mxu1 %v8071_v36  ;;  %v16095_v39 = vld [vmem:[#allocation40_spill] sm:$0xff] }
 0x7b1   : > { %16083 = vst [vmem:[#allocation43_spill] sm:$0xff] %v13887_v61  ;;  %v13892_v10 = vpop.f32.mrb[165].mxu0  ;;  %8073 = vmatprep.subr.bf16.mxu1 %v15501_v20  ;;  %v16089_v61 = vld [vmem:[#allocation118_spill] sm:$0xff] }
 0x7b2   : > { %16085 = vst [vmem:[#allocation225_spill] sm:$0xff] %v13892_v10 }
 0x7b3   : > { %4762 = vmatmul.mubr.f32.gmra.mrb[86].mxu1 %v16086_v63 }
 0x7b4   : > { %v13896_v7 = vpop.f32.mrb[166].mxu0  ;;  %4766 = vmatprep.mubr.f32.mxu1 %v12954_v19  ;;  %8075 = vmatpush1.bf16.msra.mxu1 %v8074_v31  ;;  %v4198_v31 = vld [vmem:[#allocation8 + $0x2b0] sm:$0xff] }
 0x7b5   : > { %16087 = vst [vmem:[#allocation46_spill] sm:$0xff] %v13896_v7  ;;  %v13899_v57 = vpop.f32.mrb[167].mxu0  ;;  %8076 = vmatprep.subr.bf16.mxu1 %v15501_v20 }
 0x7b6   : > { %16088 = vst [vmem:[#allocation226_spill] sm:$0xff] %v13899_v57  ;;  %v4199_v57 = vld [vmem:[#allocation8 + $0x2b8] sm:$0xff] }
 0x7b7   : > { %6922 = vmatmul.mubr.msk.f32.gmra.mrb[88].mxu1 %vm7230_vm3, %v16089_v61  ;;  %v8077_v19 = vpack.c.bf16 %v4199_v57, %v4198_v31  ;;  %v16100_v57 = vld [vmem:[#allocation21_spill] sm:$0xff] }
 0x7b8   : > { %v13905_v36 = vpop.f32.mrb[168].mxu0  ;;  %6924 = vmatprep.mubr.msk.f32.mxu1 %vm7229_vm0, %v12985_v27 }
 0x7b9   : > { %16090 = vst [vmem:[#allocation118_spill] sm:$0xff] %v13905_v36  ;;  %v13910_v5 = vpop.f32.mrb[169].mxu0  ;;  %8078 = vmatpush1.bf16.msra.mxu1 %v8077_v19 }
 0x7ba   : > { %16091 = vst [vmem:[#allocation227_spill] sm:$0xff] %v13910_v5  ;;  %8079 = vmatprep.subr.bf16.mxu1 %v15501_v20 }
 0x7bb   : > { %4772 = vmatmul.mubr.f32.gmra.mrb[90].mxu1 %v16092_v0 }
 0x7bc   : > { %v13913_v7 = vpop.f32.mrb[170].mxu0  ;;  %4776 = vmatprep.mubr.f32.mxu1 %v13008_v56 }
 0x7bd   : > { %16093 = vst [vmem:[#allocation119_spill] sm:$0xff] %v13913_v7  ;;  %v13916_v10 = vpop.f32.mrb[171].mxu0  ;;  %v16098_v7 = vld [vmem:[#allocation59_spill] sm:$0xff] }
 0x7be   : > { %16094 = vst [vmem:[#allocation228_spill] sm:$0xff] %v13916_v10  ;;  %v16102_v10 = vld [vmem:[#allocation66_spill] sm:$0xff] }
 0x7bf   : > { %6926 = vmatmul.mubr.msk.f32.gmra.mrb[92].mxu1 %vm7230_vm3, %v16095_v39 }
 0x7c0   : > { %v13921_v36 = vpop.f32.mrb[172].mxu0  ;;  %6928 = vmatprep.mubr.msk.f32.mxu1 %vm7229_vm0, %v13037_v38  ;;  %v16104_v38 = vld [vmem:[#allocation24_spill] sm:$0xff] }
 0x7c1   : > { %16096 = vst [vmem:[#allocation40_spill] sm:$0xff] %v13921_v36  ;;  %v13926_v5 = vpop.f32.mrb[173].mxu0 }
 0x7c2   : > { %16097 = vst [vmem:[#allocation229_spill] sm:$0xff] %v13926_v5  ;;  %v16106_v5 = vld [vmem:[#allocation70_spill] sm:$0xff] }
 0x7c3   : > { %4782 = vmatmul.mubr.f32.gmra.mrb[94].mxu1 %v16098_v7 }
 0x7c4   : > { %v13930_v56 = vpop.f32.mrb[174].mxu0  ;;  %4786 = vmatprep.mubr.f32.mxu1 %v16100_v57  ;;  %v4200_v57 = vld [vmem:[#allocation8 + $0x2c0] sm:$0xff] }
 0x7c5   : > { %16099 = vst [vmem:[#allocation230_spill] sm:$0xff] %v13930_v56  ;;  %v13933_v31 = vpop.f32.mrb[175].mxu0  ;;  %v16108_v56 = vld [vmem:[#allocation121_spill] sm:$0xff] }
 0x7c6   : > { %16101 = vst [vmem:[#allocation231_spill] sm:$0xff] %v13933_v31  ;;  %v4201_v31 = vld [vmem:[#allocation8 + $0x2c8] sm:$0xff] }
 0x7c7   : > { %6930 = vmatmul.mubr.msk.f32.gmra.mrb[96].mxu1 %vm7230_vm3, %v16102_v10  ;;  %v8080_v7 = vpack.c.bf16 %v4201_v31, %v4200_v57  ;;  %v16110_v10 = vld [vmem:[#allocation75_spill] sm:$0xff]  ;;  %v16116_v57 = vld [vmem:[#allocation129_spill] sm:$0xff] }
 0x7c8   : > { %v13938_v36 = vpop.f32.mrb[176].mxu0  ;;  %6932 = vmatprep.mubr.msk.f32.mxu1 %vm7229_vm0, %v16104_v38  ;;  %v16112_v38 = vld [vmem:[#allocation125_spill] sm:$0xff] }
 0x7c9   : > { %16103 = vst [vmem:[#allocation232_spill] sm:$0xff] %v13938_v36  ;;  %v13943_v19 = vpop.f32.mrb[177].mxu0  ;;  %8081 = vmatpush1.bf16.msra.mxu1 %v8080_v7 }
 0x7ca   : > { %16105 = vst [vmem:[#allocation233_spill] sm:$0xff] %v13943_v19  ;;  %8082 = vmatprep.subr.bf16.mxu1 %v15501_v20 }
 0x7cb   : > { %4792 = vmatmul.mubr.f32.gmra.mrb[98].mxu1 %v16106_v5 }
 0x7cc   : > { %v13946_v27 = vpop.f32.mrb[178].mxu0  ;;  %4796 = vmatprep.mubr.f32.mxu1 %v16108_v56 }
 0x7cd   : > { %16107 = vst [vmem:[#allocation234_spill] sm:$0xff] %v13946_v27  ;;  %v13949_v44 = vpop.f32.mrb[179].mxu0  ;;  %v16114_v27 = vld [vmem:[#allocation79_spill] sm:$0xff] }
 0x7ce   : > { %16109 = vst [vmem:[#allocation235_spill] sm:$0xff] %v13949_v44  ;;  %v16118_v44 = vld [vmem:[#allocation86_spill] sm:$0xff] }
 0x7cf   : > { %6934 = vmatmul.mubr.msk.f32.gmra.mrb[100].mxu1 %vm7230_vm3, %v16110_v10 }
 0x7d0   : > { %v13954_v36 = vpop.f32.mrb[180].mxu0  ;;  %6936 = vmatprep.mubr.msk.f32.mxu1 %vm7229_vm0, %v16112_v38  ;;  %v16120_v38 = vld [vmem:[#allocation132_spill] sm:$0xff] }
 0x7d1   : > { %16111 = vst [vmem:[#allocation236_spill] sm:$0xff] %v13954_v36  ;;  %v13959_v19 = vpop.f32.mrb[181].mxu0 }
 0x7d2   : > { %16113 = vst [vmem:[#allocation237_spill] sm:$0xff] %v13959_v19  ;;  %v16122_v19 = vld [vmem:[#allocation90_spill] sm:$0xff] }
 0x7d3   : > { %4802 = vmatmul.mubr.f32.gmra.mrb[102].mxu1 %v16114_v27 }
 0x7d4   : > { %v13963_v56 = vpop.f32.mrb[182].mxu0  ;;  %4806 = vmatprep.mubr.f32.mxu1 %v16116_v57  ;;  %v4202_v57 = vld [vmem:[#allocation8 + $0x2d0] sm:$0xff] }
 0x7d5   : > { %16115 = vst [vmem:[#allocation238_spill] sm:$0xff] %v13963_v56  ;;  %v13966_v31 = vpop.f32.mrb[183].mxu0  ;;  %v16124_v56 = vld [vmem:[#allocation137_spill] sm:$0xff] }
 0x7d6   : > { %16117 = vst [vmem:[#allocation239_spill] sm:$0xff] %v13966_v31  ;;  %v4203_v31 = vld [vmem:[#allocation8 + $0x2d8] sm:$0xff] }
 0x7d7   : > { %6938 = vmatmul.mubr.msk.f32.gmra.mrb[104].mxu1 %vm7230_vm3, %v16118_v44  ;;  %v8083_v5 = vpack.c.bf16 %v4203_v31, %v4202_v57  ;;  %v16126_v44 = vld [vmem:[#allocation95_spill] sm:$0xff]  ;;  %v16132_v57 = vld [vmem:[#allocation106_spill] sm:$0xff] }
 0x7d8   : > { %v13971_v36 = vpop.f32.mrb[184].mxu0  ;;  %6940 = vmatprep.mubr.msk.f32.mxu1 %vm7229_vm0, %v16120_v38  ;;  %v16128_v38 = vld [vmem:[#allocation141_spill] sm:$0xff]  ;;  %v16133_v31 = vld [vmem:[#allocation147_spill] sm:$0xff] }
 0x7d9   : > { %16119 = vst [vmem:[#allocation240_spill] sm:$0xff] %v13971_v36  ;;  %v13976_v7 = vpop.f32.mrb[185].mxu0  ;;  %8084 = vmatpush1.bf16.msra.mxu1 %v8083_v5  ;;  %v4204_v5 = vld [vmem:[#allocation8 + $0x2e0] sm:$0xff] }
 0x7da   : > { %16121 = vst [vmem:[#allocation241_spill] sm:$0xff] %v13976_v7  ;;  %8085 = vmatprep.subr.bf16.mxu1 %v15501_v20 }
 0x7db   : > { %4812 = vmatmul.mubr.f32.gmra.mrb[106].mxu1 %v16122_v19 }
 0x7dc   : > { %v13979_v27 = vpop.f32.mrb[186].mxu0  ;;  %4816 = vmatprep.mubr.f32.mxu1 %v16124_v56  ;;  %v16131_v56 = vld [vmem:[#allocation144_spill] sm:$0xff] }
 0x7dd   : > { %16123 = vst [vmem:[#allocation90_spill] sm:$0xff] %v13979_v27  ;;  %v13982_v10 = vpop.f32.mrb[187].mxu0  ;;  %v16130_v27 = vld [vmem:[#allocation99_spill] sm:$0xff] }
 0x7de   : > { %16125 = vst [vmem:[#allocation242_spill] sm:$0xff] %v13982_v10  ;;  %v16135_v10 = vld [vmem:[#allocation150_spill] sm:$0xff] }
 0x7df   : > { %6942 = vmatmul.mubr.msk.f32.gmra.mrb[108].mxu1 %vm7230_vm3, %v16126_v44  ;;  %v16136_v44 = vld [vmem:[#allocation65_spill] sm:$0xff] }
 0x7e0   : > { %v13987_v36 = vpop.f32.mrb[188].mxu0  ;;  %6944 = vmatprep.mubr.msk.f32.mxu1 %vm7229_vm0, %v16128_v38 }
 0x7e1   : > { %16127 = vst [vmem:[#allocation243_spill] sm:$0xff] %v13987_v36  ;;  %v13992_v7 = vpop.f32.mrb[189].mxu0  ;;  %v16134_v36 = vld [vmem:[#allocation110_spill] sm:$0xff] }
 0x7e2   : > { %16129 = vst [vmem:[#allocation244_spill] sm:$0xff] %v13992_v7  ;;  %v4205_v7 = vld [vmem:[#allocation8 + $0x2e8] sm:$0xff] }
 0x7e3   : > { %4822 = vmatmul.mubr.f32.gmra.mrb[110].mxu1 %v16130_v27  ;;  %v8086_v38 = vpack.c.bf16 %v4205_v7, %v4204_v5  ;;  %v16140_v7 = vld [vmem:[#allocation58_spill] sm:$0xff]  ;;  %v16141_v5 = vld [vmem:[#allocation45_spill] sm:$0xff] }
 0x7e4   : > { %4826 = vmatprep.mubr.f32.mxu1 %v16131_v56  ;;  %v16137_v56 = vld [vmem:[#allocation154_spill] sm:$0xff] }
 0x7e5   : > { %8087 = vmatpush1.bf16.msra.mxu1 %v8086_v38 }
 0x7e6   : > { %8088 = vmatprep.subr.bf16.mxu1 %v15501_v20 }
 0x7e7   : > { %6946 = vmatmul.mubr.msk.f32.gmra.mrb[112].mxu1 %vm7230_vm3, %v16132_v57  ;;  %v16138_v57 = vld [vmem:[#allocation44_spill] sm:$0xff] }
 0x7e8   : > { %6948 = vmatprep.mubr.msk.f32.mxu1 %vm7229_vm0, %v16133_v31  ;;  %v16139_v31 = vld [vmem:[#allocation53_spill] sm:$0xff] }
 0x7eb   : > { %4832 = vmatmul.mubr.f32.gmra.mrb[114].mxu1 %v16134_v36 }
 0x7ec   : > { %4836 = vmatprep.mubr.f32.mxu1 %v16135_v10  ;;  %v3696_v10 = vrot.slane %v16141_v5, 7 }
 0x7ef   : > { %6950 = vmatmul.mubr.msk.f32.gmra.mrb[116].mxu1 %vm7230_vm3, %v16136_v44  ;;  %v4206_v44 = vld [vmem:[#allocation8 + $0x2f0] sm:$0xff] }
 0x7f0   : > { %6952 = vmatprep.mubr.msk.f32.mxu1 %vm7229_vm0, %v16137_v56  ;;  %v16142_v56 = vld [vmem:[#allocation49_spill] sm:$0xff] }
 0x7f1   : > { %v3732_v38 = vrot.slane %v16142_v56, 7 }
 0x7f3   : > { %4842 = vmatmul.mubr.f32.gmra.mrb[118].mxu1 %v16138_v57  ;;  %v4207_v57 = vld [vmem:[#allocation8 + $0x2f8] sm:$0xff] }
 0x7f4   : > { %4846 = vmatprep.mubr.f32.mxu1 %v13423_v59  ;;  %v8089_v36 = vpack.c.bf16 %v4207_v57, %v4206_v44  ;;  %v16143_v59 = vld [vmem:[#allocation56_spill] sm:$0xff]  ;;  %v14038_v44 = vsel %vm634_vm1, %v3696_v10, %v3732_v38  ;;  %v16147_v57 = vld [vmem:[#allocation57_spill] sm:$0xff] }
 0x7f5   : > { %16146 = vst [vmem:[#allocation58_spill] sm:$0xff] %v14038_v44 }
 0x7f6   : > { %8090 = vmatpush1.bf16.msra.mxu1 %v8089_v36  ;;  %v3915_v36 = vrot.slane %v13493_v15, 1 }
 0x7f7   : > { %6954 = vmatmul.mubr.msk.f32.gmra.mrb[120].mxu1 %vm7230_vm3, %v16139_v31  ;;  %v14029_v31 = vsel %vm634_vm1, %v3732_v38, %v3696_v10  ;;  %8091 = vmatprep.subr.bf16.mxu1 %v15501_v20  ;;  %v16151_v38 = vld [vmem:[#allocation122_spill] sm:$0xff] }
 0x7f8   : > { %6956 = vmatprep.mubr.msk.f32.mxu1 %vm7229_vm0, %v13454_v23  ;;  %16144 = vst [vmem:[#allocation99_spill] sm:$0xff] %v14029_v31  ;;  %v16145_v23 = vld [vmem:[#allocation54_spill] sm:$0xff] }
 0x7fb   : > { %4852 = vmatmul.mubr.f32.gmra.mrb[122].mxu1 %v16140_v7 }
 0x7fc   : > { %4856 = vmatprep.mubr.f32.mxu1 %v13476_v34  ;;  %v4210_v34 = vld [vmem:[#allocation8 + $0x310] sm:$0xff] }
 0x7ff   : > { %6958 = vmatmul.mubr.msk.f32.gmra.mrb[124].mxu1 %vm7230_vm3, %v16143_v59 }
 0x800   : > { %6960 = vmatprep.mubr.msk.f32.mxu1 %vm7229_vm0, %v14029_v31  ;;  %v3951_v31 = vrot.slane %v13497_v42, 1 }
 0x802   : > { %v14059_v10 = vsel %vm855_vm2, %v3915_v36, %v3951_v31 }
 0x803   : > { %4862 = vmatmul.mubr.f32.gmra.mrb[126].mxu1 %v16145_v23 }
 0x804   : > { %4866 = vmatprep.mubr.f32.mxu1 %v14038_v44 }
 0x807   : > { %6962 = vmatmul.mubr.msk.f32.gmra.mrb[128].mxu1 %vm7230_vm3, %v16147_v57 }
 0x808   : > { %6964 = vmatprep.mubr.msk.f32.mxu1 %vm7229_vm0, %v13521_v24  ;;  %v14065_v24 = vsel %vm855_vm2, %v3951_v31, %v3915_v36  ;;  %v16150_v31 = vld [vmem:[#allocation120_spill] sm:$0xff] }
 0x809   : > { %v16152_v36 = vld [vmem:[#allocation124_spill] sm:$0xff] }
 0x80b   : > { %4872 = vmatmul.mubr.f32.gmra.mrb[130].mxu1 %v15924_v30 }
 0x80c   : > { %4876 = vmatprep.mubr.f32.mxu1 %v13529_v25  ;;  %v16149_v25 = vld [vmem:[#allocation113_spill] sm:$0xff] }
 0x80f   : > { %6966 = vmatmul.mubr.msk.f32.gmra.mrb[132].mxu1 %vm7230_vm3, %v15924_v30  ;;  %v16148_v30 = vld [vmem:[#allocation76_spill] sm:$0xff] }
 0x810   : > { %6968 = vmatprep.mubr.msk.f32.mxu1 %vm7229_vm0, %v13537_v28  ;;  %v16176_v28 = vld [vmem:[#allocation162_spill] sm:$0xff] }
 0x813   : > { %4882 = vmatmul.mubr.f32.gmra.mrb[134].mxu1 %v14059_v10 }
 0x814   : > { %4886 = vmatprep.mubr.f32.mxu1 %v13545_v9  ;;  %v4209_v9 = vld [vmem:[#allocation8 + $0x308] sm:$0xff] }
 0x817   : > { %6970 = vmatmul.mubr.msk.f32.gmra.mrb[136].mxu1 %vm7230_vm3, %v14065_v24 }
 0x818   : > { %6972 = vmatprep.mubr.msk.f32.mxu1 %vm7229_vm0, %v13553_v43 }
 0x81b   : > { %4892 = vmatmul.mubr.f32.gmra.mrb[138].mxu1 %v16148_v30 }
 0x81c   : > { %4896 = vmatprep.mubr.f32.mxu1 %v13561_v41  ;;  %v16153_v41 = vld [vmem:[#allocation127_spill] sm:$0xff] }
 0x81f   : > { %6974 = vmatmul.mubr.msk.f32.gmra.mrb[140].mxu1 %vm7230_vm3, %v16149_v25 }
 0x820   : > { %6976 = vmatprep.mubr.msk.f32.mxu1 %vm7229_vm0, %v13569_v35  ;;  %v16155_v35 = vld [vmem:[#allocation130_spill] sm:$0xff] }
 0x823   : > { %4902 = vmatmul.mubr.f32.gmra.mrb[142].mxu1 %v16150_v31 }
 0x824   : > { %4906 = vmatprep.mubr.f32.mxu1 %v13577_v29  ;;  %v16154_v29 = vld [vmem:[#allocation128_spill] sm:$0xff] }
 0x827   : > { %6978 = vmatmul.mubr.msk.f32.gmra.mrb[144].mxu1 %vm7230_vm3, %v16151_v38 }
 0x828   : > { %6980 = vmatprep.mubr.msk.f32.mxu1 %vm7229_vm0, %v13585_v48  ;;  %v16157_v48 = vld [vmem:[#allocation134_spill] sm:$0xff] }
 0x82b   : > { %4912 = vmatmul.mubr.f32.gmra.mrb[146].mxu1 %v16152_v36 }
 0x82c   : > { %4916 = vmatprep.mubr.f32.mxu1 %v13593_v53  ;;  %v16156_v53 = vld [vmem:[#allocation131_spill] sm:$0xff] }
 0x82f   : > { %6982 = vmatmul.mubr.msk.f32.gmra.mrb[148].mxu1 %vm7230_vm3, %v16153_v41 }
 0x830   : > { %6984 = vmatprep.mubr.msk.f32.mxu1 %vm7229_vm0, %v13601_v6  ;;  %v16159_v6 = vld [vmem:[#allocation138_spill] sm:$0xff] }
 0x833   : > { %4922 = vmatmul.mubr.f32.gmra.mrb[150].mxu1 %v16154_v29 }
 0x834   : > { %4926 = vmatprep.mubr.f32.mxu1 %v13609_v54  ;;  %v16158_v54 = vld [vmem:[#allocation136_spill] sm:$0xff] }
 0x837   : > { %6986 = vmatmul.mubr.msk.f32.gmra.mrb[152].mxu1 %vm7230_vm3, %v16155_v35 }
 0x838   : > { %6988 = vmatprep.mubr.msk.f32.mxu1 %vm7229_vm0, %v13617_v46  ;;  %v16161_v46 = vld [vmem:[#allocation142_spill] sm:$0xff] }
 0x83b   : > { %4932 = vmatmul.mubr.f32.gmra.mrb[154].mxu1 %v16156_v53 }
 0x83c   : > { %4936 = vmatprep.mubr.f32.mxu1 %v13625_v45  ;;  %v16160_v45 = vld [vmem:[#allocation140_spill] sm:$0xff] }
 0x83f   : > { %6990 = vmatmul.mubr.msk.f32.gmra.mrb[156].mxu1 %vm7230_vm3, %v16157_v48 }
 0x840   : > { %6992 = vmatprep.mubr.msk.f32.mxu1 %vm7229_vm0, %v13633_v21  ;;  %v16163_v21 = vld [vmem:[#allocation145_spill] sm:$0xff] }
 0x843   : > { %4942 = vmatmul.mubr.f32.gmra.mrb[158].mxu1 %v16158_v54 }
 0x844   : > { %4946 = vmatprep.mubr.f32.mxu1 %v13641_v37  ;;  %v16162_v37 = vld [vmem:[#allocation143_spill] sm:$0xff] }
 0x847   : > { %6994 = vmatmul.mubr.msk.f32.gmra.mrb[160].mxu1 %vm7230_vm3, %v16159_v6 }
 0x848   : > { %6996 = vmatprep.mubr.msk.f32.mxu1 %vm7229_vm0, %v13649_v4  ;;  %v16165_v4 = vld [vmem:[#allocation148_spill] sm:$0xff] }
 0x84b   : > { %4952 = vmatmul.mubr.f32.gmra.mrb[162].mxu1 %v16160_v45 }
 0x84c   : > { %4956 = vmatprep.mubr.f32.mxu1 %v13657_v40  ;;  %v16164_v40 = vld [vmem:[#allocation146_spill] sm:$0xff] }
 0x84f   : > { %6998 = vmatmul.mubr.msk.f32.gmra.mrb[164].mxu1 %vm7230_vm3, %v16161_v46 }
 0x850   : > { %7000 = vmatprep.mubr.msk.f32.mxu1 %vm7229_vm0, %v13665_v2  ;;  %v16167_v2 = vld [vmem:[#allocation152_spill] sm:$0xff] }
 0x853   : > { %4962 = vmatmul.mubr.f32.gmra.mrb[166].mxu1 %v16162_v37 }
 0x854   : > { %4966 = vmatprep.mubr.f32.mxu1 %v13673_v52  ;;  %v16166_v52 = vld [vmem:[#allocation149_spill] sm:$0xff] }
 0x857   : > { %7002 = vmatmul.mubr.msk.f32.gmra.mrb[168].mxu1 %vm7230_vm3, %v16163_v21 }
 0x858   : > { %7004 = vmatprep.mubr.msk.f32.mxu1 %vm7229_vm0, %v13681_v1  ;;  %v16169_v1 = vld [vmem:[#allocation155_spill] sm:$0xff] }
 0x85b   : > { %4972 = vmatmul.mubr.f32.gmra.mrb[170].mxu1 %v16164_v40 }
 0x85c   : > { %4976 = vmatprep.mubr.f32.mxu1 %v13689_v11  ;;  %v16168_v11 = vld [vmem:[#allocation153_spill] sm:$0xff] }
 0x85f   : > { %7006 = vmatmul.mubr.msk.f32.gmra.mrb[172].mxu1 %vm7230_vm3, %v16165_v4 }
 0x860   : > { %7008 = vmatprep.mubr.msk.f32.mxu1 %vm7229_vm0, %v13701_v32  ;;  %v16171_v32 = vld [vmem:[#allocation206_spill] sm:$0xff] }
 0x863   : > { %4982 = vmatmul.mubr.f32.gmra.mrb[174].mxu1 %v16166_v52 }
 0x864   : > { %4986 = vmatprep.mubr.f32.mxu1 %v13713_v33 }
 0x867   : > { %7010 = vmatmul.mubr.msk.f32.gmra.mrb[176].mxu1 %vm7230_vm3, %v16167_v2 }
 0x868   : > { %7012 = vmatprep.mubr.msk.f32.mxu1 %vm7229_vm0, %v13725_v16  ;;  %v16170_v16 = vld [vmem:[#allocation157_spill] sm:$0xff] }
 0x869   : > { %v3750_v33 = vrot.slane %v16170_v16, 7  ;;  %v4211_v16 = vld [vmem:[#allocation8 + $0x318] sm:$0xff] }
 0x86b   : > { %4992 = vmatmul.mubr.f32.gmra.mrb[178].mxu1 %v16168_v11 }
 0x86c   : > { %4996 = vmatprep.mubr.f32.mxu1 %v13737_v17  ;;  %v3714_v17 = vrot.slane %v13430_v60, 7 }
 0x86e   : > { %v14186_v43 = vsel %vm634_vm1, %v3714_v17, %v3750_v33 }
 0x86f   : > { %7014 = vmatmul.mubr.msk.f32.gmra.mrb[180].mxu1 %vm7230_vm3, %v16169_v1  ;;  %16175 = vst [vmem:[#allocation49_spill] sm:$0xff] %v14186_v43 }
 0x870   : > { %7016 = vmatprep.mubr.msk.f32.mxu1 %vm7229_vm0, %v13749_v13  ;;  %v16172_v13 = vld [vmem:[#allocation159_spill] sm:$0xff] }
 0x873   : > { %5002 = vmatmul.mubr.f32.gmra.mrb[182].mxu1 %v13416_v49 }
 0x874   : > { %5006 = vmatprep.mubr.f32.mxu1 %v13761_v50  ;;  %v14178_v50 = vsel %vm634_vm1, %v3750_v33, %v3714_v17  ;;  %v8095_v17 = vpack.c.bf16 %v4211_v16, %v4210_v34  ;;  %v4212_v33 = vld [vmem:[#allocation8 + $0x320] sm:$0xff] }
 0x875   : > { %16173 = vst [vmem:[#allocation45_spill] sm:$0xff] %v14178_v50  ;;  %v4216_v16 = vld [vmem:[#allocation8 + $0x340] sm:$0xff] }
 0x877   : > { %7018 = vmatmul.mubr.msk.f32.gmra.mrb[184].mxu1 %vm7230_vm3, %v13435_v55 }
 0x878   : > { %7020 = vmatprep.mubr.msk.f32.mxu1 %vm7229_vm0, %v13773_v58  ;;  %v16174_v58 = vld [vmem:[#allocation160_spill] sm:$0xff] }
 0x87b   : > { %5012 = vmatmul.mubr.f32.gmra.mrb[186].mxu1 %v13446_v18 }
 0x87c   : > { %5016 = vmatprep.mubr.f32.mxu1 %v16171_v32  ;;  %v4208_v32 = vld [vmem:[#allocation8 + $0x300] sm:$0xff] }
 0x87d   : > { %v8092_v44 = vpack.c.bf16 %v4209_v9, %v4208_v32  ;;  %v4214_v9 = vld [vmem:[#allocation8 + $0x330] sm:$0xff] }
 0x87f   : > { %7022 = vmatmul.mubr.msk.f32.gmra.mrb[188].mxu1 %vm7230_vm3, %v16172_v13 }
 0x880   : > { %7024 = vmatprep.mubr.msk.f32.mxu1 %vm7229_vm0, %v14178_v50  ;;  %v16178_v50 = vld [vmem:[#allocation36_spill] sm:$0xff] }
 0x883   : > { %5022 = vmatmul.mubr.f32.gmra.mrb[190].mxu1 %v16174_v58 }
 0x884   : > { %5026 = vmatprep.mubr.f32.mxu1 %v14186_v43  ;;  %v4213_v43 = vld [vmem:[#allocation8 + $0x328] sm:$0xff] }
 0x885   : > { %v8098_v32 = vpack.c.bf16 %v4213_v43, %v4212_v33  ;;  %v16181_v33 = vld [vmem:[#allocation97_spill] sm:$0xff] }
 0x887   : > { %7026 = vmatmul.mubr.msk.f32.gmra.mrb[192].mxu1 %vm7230_vm3, %v16176_v28 }
 0x888   : > { %5096 = vmatprep.mubr.f32.mxu1 %v13817_v14  ;;  %v16177_v14 = vld [vmem:[#allocation96_spill] sm:$0xff] }
 0x88b   : > { %5097 = vmatmul.mubr.f32.vlgmr.msra.gmra.mrb[66].mxu1 %v12579_v12  ;;  %v4215_v12 = vld [vmem:[#allocation8 + $0x338] sm:$0xff] }
 0x88c   : > { %7028 = vmatprep.mubr.msk.f32.mxu1 %vm7230_vm3, %v13828_v26  ;;  %8093 = vmatpush1.bf16.msra.mxu1 %v8092_v44  ;;  %v8101_v34 = vpack.c.bf16 %v4215_v12, %v4214_v9  ;;  %v16179_v26 = vld [vmem:[#allocation33_spill] sm:$0xff]  ;;  %v4218_v44 = vld [vmem:[#allocation8 + $0x350] sm:$0xff]  ;;  %v4221_v9 = vld [vmem:[#allocation8 + $0x368] sm:$0xff] }
 0x88d   : > { %8094 = vmatprep.subr.bf16.mxu1 %v15501_v20  ;;  %v16183_v12 = vld [vmem:[#allocation34_spill] sm:$0xff] }
 0x88f   : > { %5102 = vmatmul.mubr.f32.gmra.mrb[68].mxu1 %v12585_v47  ;;  %v4217_v47 = vld [vmem:[#allocation8 + $0x348] sm:$0xff] }
 0x890   : > { %5106 = vmatprep.mubr.f32.mxu1 %v16063_v62  ;;  %8096 = vmatpush1.bf16.msra.mxu1 %v8095_v17  ;;  %v16180_v62 = vld [vmem:[#allocation105_spill] sm:$0xff]  ;;  %v8104_v43 = vpack.c.bf16 %v4217_v47, %v4216_v16  ;;  %v4219_v17 = vld [vmem:[#allocation8 + $0x358] sm:$0xff]  ;;  %v4222_v16 = vld [vmem:[#allocation8 + $0x370] sm:$0xff] }
 0x891   : > { %8097 = vmatprep.subr.bf16.mxu1 %v15501_v20  ;;  %v4223_v47 = vld [vmem:[#allocation8 + $0x378] sm:$0xff] }
 0x893   : > { %5107 = vmatmul.mubr.f32.gmra.mrb[70].mxu1 %v16177_v14 }
 0x894   : > { %7030 = vmatprep.mubr.msk.f32.mxu1 %vm7230_vm3, %v16178_v50  ;;  %8099 = vmatpush1.bf16.msra.mxu1 %v8098_v32  ;;  %v8107_v50 = vpack.c.bf16 %v4219_v17, %v4218_v44  ;;  %v4220_v32 = vld [vmem:[#allocation8 + $0x360] sm:$0xff]  ;;  %v4225_v44 = vld [vmem:[#allocation8 + $0x388] sm:$0xff]  ;;  %v16185_v17 = vld [vmem:[#allocation35_spill] sm:$0xff] }
 0x895   : > { %8100 = vmatprep.subr.bf16.mxu1 %v15501_v20 }
 0x897   : > { %5112 = vmatmul.mubr.f32.gmra.mrb[72].mxu1 %v16179_v26 }
 0x898   : > { %5116 = vmatprep.mubr.f32.mxu1 %v16180_v62  ;;  %8102 = vmatpush1.bf16.msra.mxu1 %v8101_v34  ;;  %v8110_v34 = vpack.c.bf16 %v4221_v9, %v4220_v32  ;;  %v16184_v62 = vld [vmem:[#allocation100_spill] sm:$0xff] }
 0x899   : > { %8103 = vmatprep.subr.bf16.mxu1 %v15501_v20  ;;  %v4227_v32 = vld [vmem:[#allocation8 + $0x398] sm:$0xff] }
 0x89a   : > { %v16186_v9 = vld [vmem:[#allocation104_spill] sm:$0xff] }
 0x89b   : > { %5117 = vmatmul.mubr.f32.gmra.mrb[74].mxu1 %v16181_v33 }
 0x89c   : > { %7032 = vmatprep.mubr.msk.f32.mxu1 %vm7230_vm3, %v16182_v8  ;;  %8105 = vmatpush1.bf16.msra.mxu1 %v8104_v43  ;;  %v8113_v8 = vpack.c.bf16 %v4223_v47, %v4222_v16  ;;  %v4224_v43 = vld [vmem:[#allocation8 + $0x380] sm:$0xff]  ;;  %v4229_v16 = vld [vmem:[#allocation8 + $0x3a8] sm:$0xff] }
 0x89d   : > { %8106 = vmatprep.subr.bf16.mxu1 %v15501_v20  ;;  %v16187_v47 = vld [vmem:[#allocation37_spill] sm:$0xff] }
 0x89f   : > { %5122 = vmatmul.mubr.f32.gmra.mrb[76].mxu1 %v16183_v12 }
 0x8a0   : > { %5126 = vmatprep.mubr.f32.mxu1 %v16078_v3  ;;  %8108 = vmatpush1.bf16.msra.mxu1 %v8107_v50  ;;  %v8116_v3 = vpack.c.bf16 %v4225_v44, %v4224_v43  ;;  %v4226_v50 = vld [vmem:[#allocation8 + $0x390] sm:$0xff] }
 0x8a1   : > { %8109 = vmatprep.subr.bf16.mxu1 %v15501_v20  ;;  %v16190_v43 = vld [vmem:[#allocation59_spill] sm:$0xff] }
 0x8a2   : > { %v16191_v44 = vld [vmem:[#allocation115_spill] sm:$0xff] }
 0x8a3   : > { %5127 = vmatmul.mubr.f32.gmra.mrb[78].mxu1 %v16184_v62 }
 0x8a4   : > { %7034 = vmatprep.mubr.msk.f32.mxu1 %vm7230_vm3, %v16082_v22  ;;  %8111 = vmatpush1.bf16.msra.mxu1 %v8110_v34  ;;  %v8119_v22 = vpack.c.bf16 %v4227_v32, %v4226_v50  ;;  %v4228_v34 = vld [vmem:[#allocation8 + $0x3a0] sm:$0xff]  ;;  %v4231_v50 = vld [vmem:[#allocation8 + $0x3b8] sm:$0xff] }
 0x8a5   : > { %8112 = vmatprep.subr.bf16.mxu1 %v15501_v20 }
 0x8a7   : > { %5132 = vmatmul.mubr.f32.gmra.mrb[80].mxu1 %v16185_v17 }
 0x8a8   : > { %5136 = vmatprep.mubr.f32.mxu1 %v16086_v63  ;;  %8114 = vmatpush1.bf16.msra.mxu1 %v8113_v8  ;;  %v8122_v63 = vpack.c.bf16 %v4229_v16, %v4228_v34  ;;  %v16188_v8 = vld [vmem:[#allocation38_spill] sm:$0xff]  ;;  %v16196_v16 = vld [vmem:[#allocation75_spill] sm:$0xff] }
 0x8a9   : > { %8115 = vmatprep.subr.bf16.mxu1 %v15501_v20  ;;  %v16194_v34 = vld [vmem:[#allocation70_spill] sm:$0xff] }
 0x8ab   : > { %5137 = vmatmul.mubr.f32.gmra.mrb[82].mxu1 %v16186_v9 }
 0x8ac   : > { %7036 = vmatprep.mubr.msk.f32.mxu1 %vm7230_vm3, %v16089_v61  ;;  %8117 = vmatpush1.bf16.msra.mxu1 %v8116_v3  ;;  %v16189_v61 = vld [vmem:[#allocation39_spill] sm:$0xff] }
 0x8ad   : > { %8118 = vmatprep.subr.bf16.mxu1 %v15501_v20  ;;  %v4230_v3 = vld [vmem:[#allocation8 + $0x3b0] sm:$0xff] }
 0x8ae   : > { %v8125_v32 = vpack.c.bf16 %v4231_v50, %v4230_v3  ;;  %v16200_v3 = vld [vmem:[#allocation86_spill] sm:$0xff]  ;;  %v4232_v50 = vld [vmem:[#allocation8 + $0x3c0] sm:$0xff] }
 0x8af   : > { %5142 = vmatmul.mubr.f32.gmra.mrb[84].mxu1 %v16187_v47 }
 0x8b0   : > { %5146 = vmatprep.mubr.f32.mxu1 %v16092_v0  ;;  %8120 = vmatpush1.bf16.msra.mxu1 %v8119_v22  ;;  %v16192_v0 = vld [vmem:[#allocation66_spill] sm:$0xff]  ;;  %v16193_v22 = vld [vmem:[#allocation116_spill] sm:$0xff] }
 0x8b1   : > { %8121 = vmatprep.subr.bf16.mxu1 %v15501_v20 }
 0x8b3   : > { %5147 = vmatmul.mubr.f32.gmra.mrb[86].mxu1 %v16188_v8 }
 0x8b4   : > { %7038 = vmatprep.mubr.msk.f32.mxu1 %vm7230_vm3, %v16095_v39  ;;  %8123 = vmatpush1.bf16.msra.mxu1 %v8122_v63  ;;  %v16195_v39 = vld [vmem:[#allocation47_spill] sm:$0xff]  ;;  %v16197_v63 = vld [vmem:[#allocation50_spill] sm:$0xff] }
 0x8b5   : > { %8124 = vmatprep.subr.bf16.mxu1 %v15501_v20 }
 0x8b7   : > { %5152 = vmatmul.mubr.f32.gmra.mrb[88].mxu1 %v16189_v61 }
 0x8b8   : > { %5156 = vmatprep.mubr.f32.mxu1 %v16190_v43  ;;  %8126 = vmatpush1.bf16.msra.mxu1 %v8125_v32  ;;  %v16198_v43 = vld [vmem:[#allocation79_spill] sm:$0xff]  ;;  %v4233_v32 = vld [vmem:[#allocation8 + $0x3c8] sm:$0xff] }
 0x8b9   : > { %8127 = vmatprep.subr.bf16.mxu1 %v15501_v20 }
 0x8bb   : > { %5157 = vmatmul.mubr.f32.gmra.mrb[90].mxu1 %v16191_v44 }
 0x8bc   : > { %7040 = vmatprep.mubr.msk.f32.mxu1 %vm7230_vm3, %v16192_v0  ;;  %v16199_v0 = vld [vmem:[#allocation52_spill] sm:$0xff] }
 0x8bf   : > { %5162 = vmatmul.mubr.f32.gmra.mrb[92].mxu1 %v16193_v22  ;;  %v16201_v22 = vld [vmem:[#allocation41_spill] sm:$0xff] }
 0x8c0   : > { %5166 = vmatprep.mubr.f32.mxu1 %v16194_v34  ;;  %v8128_v34 = vpack.c.bf16 %v4233_v32, %v4232_v50  ;;  %v16206_v50 = vld [vmem:[#allocation106_spill] sm:$0xff]  ;;  %v4235_v32 = vld [vmem:[#allocation8 + $0x3d8] sm:$0xff] }
 0x8c2   : > { %8129 = vmatpush1.bf16.msra.mxu1 %v8128_v34 }
 0x8c3   : > { %5167 = vmatmul.mubr.f32.gmra.mrb[94].mxu1 %v16195_v39  ;;  %8130 = vmatprep.subr.bf16.mxu1 %v15501_v20 }
 0x8c4   : > { %7042 = vmatprep.mubr.msk.f32.mxu1 %vm7230_vm3, %v16196_v16  ;;  %v16202_v16 = vld [vmem:[#allocation63_spill] sm:$0xff] }
 0x8c7   : > { %5172 = vmatmul.mubr.f32.gmra.mrb[96].mxu1 %v16197_v63  ;;  %v16203_v63 = vld [vmem:[#allocation95_spill] sm:$0xff] }
 0x8c8   : > { %5176 = vmatprep.mubr.f32.mxu1 %v16198_v43  ;;  %v16204_v43 = vld [vmem:[#allocation67_spill] sm:$0xff] }
 0x8cb   : > { %5177 = vmatmul.mubr.f32.gmra.mrb[98].mxu1 %v16199_v0 }
 0x8cc   : > { %7044 = vmatprep.mubr.msk.f32.mxu1 %vm7230_vm3, %v16200_v3  ;;  %v16205_v3 = vld [vmem:[#allocation74_spill] sm:$0xff] }
 0x8cf   : > { %5182 = vmatmul.mubr.f32.gmra.mrb[100].mxu1 %v16201_v22  ;;  %v16207_v22 = vld [vmem:[#allocation78_spill] sm:$0xff] }
 0x8d0   : > { %5186 = vmatprep.mubr.f32.mxu1 %v16122_v19  ;;  %v4234_v19 = vld [vmem:[#allocation8 + $0x3d0] sm:$0xff] }
 0x8d1   : > { %v8131_v34 = vpack.c.bf16 %v4235_v32, %v4234_v19  ;;  %v16214_v19 = vld [vmem:[#allocation53_spill] sm:$0xff]  ;;  %v4237_v32 = vld [vmem:[#allocation8 + $0x3e8] sm:$0xff] }
 0x8d3   : > { %5187 = vmatmul.mubr.f32.gmra.mrb[102].mxu1 %v16202_v16  ;;  %v16208_v16 = vld [vmem:[#allocation110_spill] sm:$0xff] }
 0x8d4   : > { %7046 = vmatprep.mubr.msk.f32.mxu1 %vm7230_vm3, %v16203_v63  ;;  %8132 = vmatpush1.bf16.msra.mxu1 %v8131_v34  ;;  %v16209_v63 = vld [vmem:[#allocation83_spill] sm:$0xff] }
 0x8d5   : > { %8133 = vmatprep.subr.bf16.mxu1 %v15501_v20 }
 0x8d7   : > { %5192 = vmatmul.mubr.f32.gmra.mrb[104].mxu1 %v16204_v43  ;;  %v16210_v43 = vld [vmem:[#allocation65_spill] sm:$0xff] }
 0x8d8   : > { %5196 = vmatprep.mubr.f32.mxu1 %v16130_v27  ;;  %v16211_v27 = vld [vmem:[#allocation87_spill] sm:$0xff] }
 0x8db   : > { %5197 = vmatmul.mubr.f32.gmra.mrb[106].mxu1 %v16205_v3  ;;  %v16212_v3 = vld [vmem:[#allocation44_spill] sm:$0xff] }
 0x8dc   : > { %7048 = vmatprep.mubr.msk.f32.mxu1 %vm7230_vm3, %v16206_v50  ;;  %v16213_v50 = vld [vmem:[#allocation94_spill] sm:$0xff] }
 0x8df   : > { %5202 = vmatmul.mubr.f32.gmra.mrb[108].mxu1 %v16207_v22  ;;  %v16215_v22 = vld [vmem:[#allocation98_spill] sm:$0xff] }
 0x8e0   : > { %5206 = vmatprep.mubr.f32.mxu1 %v16208_v16  ;;  %v4236_v16 = vld [vmem:[#allocation8 + $0x3e0] sm:$0xff] }
 0x8e1   : > { %v8134_v34 = vpack.c.bf16 %v4237_v32, %v4236_v16  ;;  %v4239_v16 = vld [vmem:[#allocation8 + $0x3f8] sm:$0xff] }
 0x8e3   : > { %5207 = vmatmul.mubr.f32.gmra.mrb[110].mxu1 %v16209_v63 }
 0x8e4   : > { %7050 = vmatprep.mubr.msk.f32.mxu1 %vm7230_vm3, %v16210_v43  ;;  %8135 = vmatpush1.bf16.msra.mxu1 %v8134_v34  ;;  %v16216_v43 = vld [vmem:[#allocation103_spill] sm:$0xff]  ;;  %v16220_v34 = vld [vmem:[#allocation69_spill] sm:$0xff] }
 0x8e5   : > { %8136 = vmatprep.subr.bf16.mxu1 %v15501_v20  ;;  %v16219_v20 = vld [vmem:[#allocation68_spill] sm:$0xff] }
 0x8e7   : > { %5212 = vmatmul.mubr.f32.gmra.mrb[112].mxu1 %v16211_v27 }
 0x8e8   : > { %5216 = vmatprep.mubr.f32.mxu1 %v16212_v3  ;;  %v16217_v3 = vld [vmem:[#allocation107_spill] sm:$0xff] }
 0x8eb   : > { %5217 = vmatmul.mubr.f32.gmra.mrb[114].mxu1 %v16213_v50 }
 0x8ec   : > { %7052 = vmatprep.mubr.msk.f32.mxu1 %vm7230_vm3, %v16214_v19  ;;  %v16218_v19 = vld [vmem:[#allocation112_spill] sm:$0xff] }
 0x8ef   : > { %5222 = vmatmul.mubr.f32.gmra.mrb[116].mxu1 %v16215_v22 }
 0x8f0   : > { %5226 = vmatprep.mubr.f32.mxu1 %v16140_v7  ;;  %v4238_v7 = vld [vmem:[#allocation8 + $0x3f0] sm:$0xff] }
 0x8f1   : > { %v8137_v32 = vpack.c.bf16 %v4239_v16, %v4238_v7  ;;  %v16256_v7 = vld [vmem:[#allocation51_spill] sm:$0xff]  ;;  %v16265_v16 = vld [vmem:[#allocation116_spill] sm:$0xff] }
 0x8f3   : > { %5227 = vmatmul.mubr.f32.gmra.mrb[118].mxu1 %v16216_v43 }
 0x8f4   : > { %7054 = vmatprep.mubr.msk.f32.mxu1 %vm7230_vm3, %v16143_v59  ;;  %8138 = vmatpush1.bf16.msra.mxu1 %v8137_v32  ;;  %v16221_v59 = vld [vmem:[#allocation20_spill] sm:$0xff]  ;;  %v16268_v32 = vld [vmem:[#allocation50_spill] sm:$0xff] }
 0x8f7   : > { %5232 = vmatmul.mubr.f32.gmra.mrb[120].mxu1 %v16217_v3 }
 0x8f8   : > { %5236 = vmatprep.mubr.f32.mxu1 %v16145_v23  ;;  %v16222_v23 = vld [vmem:[#allocation64_spill] sm:$0xff] }
 0x8fb   : > { %5237 = vmatmul.mubr.f32.gmra.mrb[122].mxu1 %v16218_v19 }
 0x8fc   : > { %7056 = vmatprep.mubr.msk.f32.mxu1 %vm7230_vm3, %v16147_v57  ;;  %v16223_v57 = vld [vmem:[#allocation61_spill] sm:$0xff] }
 0x8ff   : > { %5242 = vmatmul.mubr.f32.gmra.mrb[124].mxu1 %v16219_v20 }
 0x900   : > { %5246 = vmatprep.mubr.f32.mxu1 %v16220_v34  ;;  %v16271_v34 = vld [vmem:[#allocation41_spill] sm:$0xff] }
 0x903   : > { %5247 = vmatmul.mubr.f32.gmra.mrb[126].mxu1 %v16141_v5 }
 0x904   : > { %7058 = vmatprep.mubr.msk.f32.mxu1 %vm7230_vm3, %v16221_v59  ;;  %v16272_v59 = vld [vmem:[#allocation121_spill] sm:$0xff] }
 0x907   : > { %5252 = vmatmul.mubr.f32.gmra.mrb[128].mxu1 %v16142_v56 }
 0x908   : > { %5256 = vmatprep.mubr.f32.mxu1 %v14059_v10  ;;  %v16224_v10 = vld [vmem:[#allocation72_spill] sm:$0xff] }
 0x90b   : > { %5257 = vmatmul.mubr.f32.gmra.mrb[130].mxu1 %v13493_v15  ;;  %v16225_v15 = vld [vmem:[#allocation114_spill] sm:$0xff] }
 0x90c   : > { %7060 = vmatprep.mubr.msk.f32.mxu1 %vm7230_vm3, %v14065_v24  ;;  %v16227_v24 = vld [vmem:[#allocation22_spill] sm:$0xff] }
 0x90f   : > { %5262 = vmatmul.mubr.f32.gmra.mrb[132].mxu1 %v13497_v42  ;;  %v16226_v42 = vld [vmem:[#allocation73_spill] sm:$0xff] }
 0x910   : > { %5266 = vmatprep.mubr.f32.mxu1 %v16148_v30  ;;  %v16228_v30 = vld [vmem:[#allocation80_spill] sm:$0xff] }
 0x913   : > { %5267 = vmatmul.mubr.f32.gmra.mrb[134].mxu1 %v16222_v23 }
 0x914   : > { %7062 = vmatprep.mubr.msk.f32.mxu1 %vm7230_vm3, %v16149_v25  ;;  %v16229_v25 = vld [vmem:[#allocation25_spill] sm:$0xff] }
 0x917   : > { %5272 = vmatmul.mubr.f32.gmra.mrb[136].mxu1 %v16223_v57 }
 0x918   : > { %5276 = vmatprep.mubr.f32.mxu1 %v16150_v31  ;;  %v16230_v31 = vld [vmem:[#allocation81_spill] sm:$0xff] }
 0x91b   : > { %5277 = vmatmul.mubr.f32.gmra.mrb[138].mxu1 %v16224_v10 }
 0x91c   : > { %7064 = vmatprep.mubr.msk.f32.mxu1 %vm7230_vm3, %v16151_v38  ;;  %v16250_v38 = vld [vmem:[#allocation163_spill] sm:$0xff] }
 0x91f   : > { %5282 = vmatmul.mubr.f32.gmra.mrb[140].mxu1 %v16225_v15 }
 0x920   : > { %5286 = vmatprep.mubr.f32.mxu1 %v16152_v36 }
 0x923   : > { %5287 = vmatmul.mubr.f32.gmra.mrb[142].mxu1 %v16226_v42 }
 0x924   : > { %7066 = vmatprep.mubr.msk.f32.mxu1 %vm7230_vm3, %v16153_v41  ;;  %v16231_v41 = vld [vmem:[#allocation123_spill] sm:$0xff] }
 0x927   : > { %5292 = vmatmul.mubr.f32.gmra.mrb[144].mxu1 %v16227_v24 }
 0x928   : > { %5296 = vmatprep.mubr.f32.mxu1 %v16154_v29  ;;  %v16232_v29 = vld [vmem:[#allocation126_spill] sm:$0xff] }
 0x92b   : > { %5297 = vmatmul.mubr.f32.gmra.mrb[146].mxu1 %v16228_v30 }
 0x92c   : > { %7068 = vmatprep.mubr.msk.f32.mxu1 %vm7230_vm3, %v16155_v35  ;;  %v16233_v35 = vld [vmem:[#allocation26_spill] sm:$0xff] }
 0x92f   : > { %5302 = vmatmul.mubr.f32.gmra.mrb[148].mxu1 %v16229_v25 }
 0x930   : > { %5306 = vmatprep.mubr.f32.mxu1 %v16156_v53  ;;  %v16234_v53 = vld [vmem:[#allocation84_spill] sm:$0xff] }
 0x933   : > { %5307 = vmatmul.mubr.f32.gmra.mrb[150].mxu1 %v16230_v31 }
 0x934   : > { %7070 = vmatprep.mubr.msk.f32.mxu1 %vm7230_vm3, %v16157_v48  ;;  %v16235_v48 = vld [vmem:[#allocation27_spill] sm:$0xff] }
 0x937   : > { %5312 = vmatmul.mubr.f32.gmra.mrb[152].mxu1 %v16231_v41 }
 0x938   : > { %5316 = vmatprep.mubr.f32.mxu1 %v16158_v54  ;;  %v16236_v54 = vld [vmem:[#allocation133_spill] sm:$0xff] }
 0x93b   : > { %5317 = vmatmul.mubr.f32.gmra.mrb[154].mxu1 %v16232_v29 }
 0x93c   : > { %7072 = vmatprep.mubr.msk.f32.mxu1 %vm7230_vm3, %v16159_v6  ;;  %v16237_v6 = vld [vmem:[#allocation135_spill] sm:$0xff] }
 0x93f   : > { %5322 = vmatmul.mubr.f32.gmra.mrb[156].mxu1 %v16233_v35 }
 0x940   : > { %5326 = vmatprep.mubr.f32.mxu1 %v16160_v45  ;;  %v16238_v45 = vld [vmem:[#allocation85_spill] sm:$0xff] }
 0x943   : > { %5327 = vmatmul.mubr.f32.gmra.mrb[158].mxu1 %v16234_v53 }
 0x944   : > { %7074 = vmatprep.mubr.msk.f32.mxu1 %vm7230_vm3, %v16161_v46  ;;  %v16239_v46 = vld [vmem:[#allocation139_spill] sm:$0xff] }
 0x947   : > { %5332 = vmatmul.mubr.f32.gmra.mrb[160].mxu1 %v16235_v48 }
 0x948   : > { %5336 = vmatprep.mubr.f32.mxu1 %v16162_v37  ;;  %v16240_v37 = vld [vmem:[#allocation28_spill] sm:$0xff] }
 0x94b   : > { %5337 = vmatmul.mubr.f32.gmra.mrb[162].mxu1 %v16236_v54 }
 0x94c   : > { %7076 = vmatprep.mubr.msk.f32.mxu1 %vm7230_vm3, %v16163_v21  ;;  %v16241_v21 = vld [vmem:[#allocation88_spill] sm:$0xff] }
 0x94f   : > { %5342 = vmatmul.mubr.f32.gmra.mrb[164].mxu1 %v16237_v6 }
 0x950   : > { %5346 = vmatprep.mubr.f32.mxu1 %v16164_v40  ;;  %v16242_v40 = vld [vmem:[#allocation29_spill] sm:$0xff] }
 0x953   : > { %5347 = vmatmul.mubr.f32.gmra.mrb[166].mxu1 %v16238_v45 }
 0x954   : > { %7078 = vmatprep.mubr.msk.f32.mxu1 %vm7230_vm3, %v16165_v4  ;;  %v16243_v4 = vld [vmem:[#allocation89_spill] sm:$0xff] }
 0x957   : > { %5352 = vmatmul.mubr.f32.gmra.mrb[168].mxu1 %v16239_v46 }
 0x958   : > { %5356 = vmatprep.mubr.f32.mxu1 %v16166_v52  ;;  %v16244_v52 = vld [vmem:[#allocation30_spill] sm:$0xff] }
 0x95b   : > { %5357 = vmatmul.mubr.f32.gmra.mrb[170].mxu1 %v16240_v37 }
 0x95c   : > { %7080 = vmatprep.mubr.msk.f32.mxu1 %vm7230_vm3, %v16167_v2  ;;  %v16245_v2 = vld [vmem:[#allocation92_spill] sm:$0xff] }
 0x95f   : > { %5362 = vmatmul.mubr.f32.gmra.mrb[172].mxu1 %v16241_v21 }
 0x960   : > { %5366 = vmatprep.mubr.f32.mxu1 %v16168_v11  ;;  %v16246_v11 = vld [vmem:[#allocation151_spill] sm:$0xff] }
 0x963   : > { %5367 = vmatmul.mubr.f32.gmra.mrb[174].mxu1 %v16242_v40 }
 0x964   : > { %7082 = vmatprep.mubr.msk.f32.mxu1 %vm7230_vm3, %v16169_v1  ;;  %v16247_v1 = vld [vmem:[#allocation31_spill] sm:$0xff] }
 0x967   : > { %5372 = vmatmul.mubr.f32.gmra.mrb[176].mxu1 %v16243_v4 }
 0x968   : > { %5376 = vmatprep.mubr.f32.mxu1 %v13416_v49  ;;  %v16248_v49 = vld [vmem:[#allocation93_spill] sm:$0xff] }
 0x96b   : > { %5377 = vmatmul.mubr.f32.gmra.mrb[178].mxu1 %v16244_v52 }
 0x96c   : > { %7084 = vmatprep.mubr.msk.f32.mxu1 %vm7230_vm3, %v13435_v55  ;;  %v16249_v55 = vld [vmem:[#allocation32_spill] sm:$0xff] }
 0x96f   : > { %5382 = vmatmul.mubr.f32.gmra.mrb[180].mxu1 %v16245_v2 }
 0x970   : > { %5386 = vmatprep.mubr.f32.mxu1 %v13446_v18  ;;  %v16251_v18 = vld [vmem:[#allocation77_spill] sm:$0xff] }
 0x973   : > { %5387 = vmatmul.mubr.f32.gmra.mrb[182].mxu1 %v16246_v11 }
 0x974   : > { %7086 = vmatprep.mubr.msk.f32.mxu1 %vm7230_vm3, %v16172_v13  ;;  %v16252_v13 = vld [vmem:[#allocation157_spill] sm:$0xff] }
 0x977   : > { %5392 = vmatmul.mubr.f32.gmra.mrb[184].mxu1 %v16247_v1 }
 0x978   : > { %5396 = vmatprep.mubr.f32.mxu1 %v16174_v58  ;;  %v16253_v58 = vld [vmem:[#allocation42_spill] sm:$0xff] }
 0x97b   : > { %5397 = vmatmul.mubr.f32.gmra.mrb[186].mxu1 %v16248_v49 }
 0x97c   : > { %7088 = vmatprep.mubr.msk.f32.mxu1 %vm7230_vm3, %v16176_v28  ;;  %v16255_v28 = vld [vmem:[#allocation117_spill] sm:$0xff] }
 0x97f   : > { %5402 = vmatmul.mubr.f32.gmra.mrb[188].mxu1 %v16249_v55 }
 0x980   : > { %5406 = vmatprep.mubr.f32.mxu1 %v16250_v38  ;;  %v16273_v38 = vld [vmem:[#allocation63_spill] sm:$0xff] }
 0x983   : > { %5407 = vmatmul.mubr.f32.gmra.mrb[190].mxu1 %v13430_v60 }
 0x984   : > { %7090 = vmatprep.mubr.msk.f32.mxu1 %vm7230_vm3, %v16251_v18  ;;  %v16275_v18 = vld [vmem:[#allocation67_spill] sm:$0xff] }
 0x987   : > { %5412 = vmatmul.mubr.f32.gmra.mrb[192].mxu1 %v16252_v13 }
 0x988   : > { %5481 = vmatprep.mubr.f32.mxu1 %v16177_v14  ;;  %v16258_v14 = vld [vmem:[#allocation71_spill] sm:$0xff] }
 0x98b   : > { %7092 = vmatmul.mubr.msk.f32.vlgmr.msra.gmra.mrb[66].mxu1 %vm7229_vm0, %v16253_v58  ;;  %v16276_v58 = vld [vmem:[#allocation129_spill] sm:$0xff] }
 0x98c   : > { %5486 = vmatprep.mubr.f32.mxu1 %v16179_v26  ;;  %v16259_v26 = vld [vmem:[#allocation82_spill] sm:$0xff] }
 0x98f   : > { %5487 = vmatmul.mubr.f32.gmra.mrb[68].mxu1 %v16255_v28  ;;  %v16277_v28 = vld [vmem:[#allocation74_spill] sm:$0xff] }
 0x990   : > { %5491 = vmatprep.mubr.f32.mxu1 %v16181_v33  ;;  %v16260_v33 = vld [vmem:[#allocation91_spill] sm:$0xff] }
 0x993   : > { %7094 = vmatmul.mubr.msk.f32.gmra.mrb[70].mxu1 %vm7229_vm0, %v16256_v7  ;;  %v16279_v7 = vld [vmem:[#allocation78_spill] sm:$0xff] }
 0x994   : > { %5496 = vmatprep.mubr.f32.mxu1 %v16183_v12  ;;  %v16261_v12 = vld [vmem:[#allocation102_spill] sm:$0xff] }
 0x997   : > { %5497 = vmatmul.mubr.f32.gmra.mrb[72].mxu1 %v16257_v51  ;;  %v16280_v51 = vld [vmem:[#allocation137_spill] sm:$0xff] }
 0x998   : > { %5501 = vmatprep.mubr.f32.mxu1 %v16184_v62  ;;  %v16262_v62 = vld [vmem:[#allocation111_spill] sm:$0xff] }
 0x99b   : > { %7096 = vmatmul.mubr.msk.f32.gmra.mrb[74].mxu1 %vm7229_vm0, %v16258_v14  ;;  %v16281_v14 = vld [vmem:[#allocation141_spill] sm:$0xff] }
 0x99c   : > { %5506 = vmatprep.mubr.f32.mxu1 %v16185_v17  ;;  %v16263_v17 = vld [vmem:[#allocation48_spill] sm:$0xff] }
 0x99f   : > { %5507 = vmatmul.mubr.f32.gmra.mrb[76].mxu1 %v16259_v26  ;;  %v16282_v26 = vld [vmem:[#allocation144_spill] sm:$0xff] }
 0x9a0   : > { %5511 = vmatprep.mubr.f32.mxu1 %v16186_v9  ;;  %v16264_v9 = vld [vmem:[#allocation55_spill] sm:$0xff] }
 0x9a3   : > { %7098 = vmatmul.mubr.msk.f32.gmra.mrb[78].mxu1 %vm7229_vm0, %v16260_v33  ;;  %v16283_v33 = vld [vmem:[#allocation147_spill] sm:$0xff] }
 0x9a4   : > { %5516 = vmatprep.mubr.f32.mxu1 %v16187_v47  ;;  %v16266_v47 = vld [vmem:[#allocation60_spill] sm:$0xff] }
 0x9a7   : > { %5517 = vmatmul.mubr.f32.gmra.mrb[80].mxu1 %v16261_v12  ;;  %v16284_v12 = vld [vmem:[#allocation150_spill] sm:$0xff] }
 0x9a8   : > { %5521 = vmatprep.mubr.f32.mxu1 %v16188_v8  ;;  %v16267_v8 = vld [vmem:[#allocation19_spill] sm:$0xff] }
 0x9ab   : > { %7100 = vmatmul.mubr.msk.f32.gmra.mrb[82].mxu1 %vm7229_vm0, %v16262_v62  ;;  %v16291_v62 = vmov 0.0  }
 0x9ac   : > { %5526 = vmatprep.mubr.f32.mxu1 %v16189_v61  ;;  %v16269_v61 = vld [vmem:[#allocation21_spill] sm:$0xff] }
 0x9af   : > { %5527 = vmatmul.mubr.f32.gmra.mrb[84].mxu1 %v16263_v17  ;;  %v16296_v17 = vld [vmem:[#allocation166_spill] sm:$0xff] }
 0x9b0   : > { %5531 = vmatprep.mubr.f32.mxu1 %v16191_v44  ;;  %v16270_v44 = vld [vmem:[#allocation24_spill] sm:$0xff] }
 0x9b3   : > { %7102 = vmatmul.mubr.msk.f32.gmra.mrb[86].mxu1 %vm7229_vm0, %v16264_v9 }
 0x9b4   : > { %5536 = vmatprep.mubr.f32.mxu1 %v16265_v16  ;;  %v16314_v16 = vld [vmem:[#allocation188_spill] sm:$0xff] }
 0x9b7   : > { %5537 = vmatmul.mubr.f32.gmra.mrb[88].mxu1 %v16266_v47 }
 0x9b8   : > { %5541 = vmatprep.mubr.f32.mxu1 %v16195_v39  ;;  %v16274_v39 = vld [vmem:[#allocation125_spill] sm:$0xff] }
 0x9bb   : > { %7104 = vmatmul.mubr.msk.f32.gmra.mrb[90].mxu1 %vm7229_vm0, %v16267_v8 }
 0x9bc   : > { %5546 = vmatprep.mubr.f32.mxu1 %v16268_v32  ;;  %v9217_v32 = vld [vmem:[%s9735_s8] sm:$0xff] }
 0x9bf   : > { %5547 = vmatmul.mubr.f32.gmra.mrb[92].mxu1 %v16269_v61 }
 0x9c0   : > { %5551 = vmatprep.mubr.f32.mxu1 %v16199_v0  ;;  %v16278_v0 = vld [vmem:[#allocation132_spill] sm:$0xff] }
 0x9c3   : > { %7106 = vmatmul.mubr.msk.f32.gmra.mrb[94].mxu1 %vm7229_vm0, %v16270_v44 }
 0x9c4   : > { %5556 = vmatprep.mubr.f32.mxu1 %v16271_v34  ;;  %v16316_v34 = vld [vmem:[#allocation191_spill] sm:$0xff] }
 0x9c7   : > { %5557 = vmatmul.mubr.f32.gmra.mrb[96].mxu1 %v16272_v59 }
 0x9c8   : > { %5561 = vmatprep.mubr.f32.mxu1 %v16273_v38 }
 0x9cb   : > { %7108 = vmatmul.mubr.msk.f32.gmra.mrb[98].mxu1 %vm7229_vm0, %v16274_v39  ;;  %v9218_v39 = vld [vmem:[%s9735_s8 + $0x8] sm:$0xff] }
 0x9cc   : > { %5566 = vmatprep.mubr.f32.mxu1 %v16275_v18 }
 0x9cf   : > { %5567 = vmatmul.mubr.f32.gmra.mrb[100].mxu1 %v16276_v58 }
 0x9d0   : > { %5571 = vmatprep.mubr.f32.mxu1 %v16277_v28 }
 0x9d3   : > { %7110 = vmatmul.mubr.msk.f32.gmra.mrb[102].mxu1 %vm7229_vm0, %v16278_v0  ;;  %v16318_v0 = vld [vmem:[#allocation194_spill] sm:$0xff] }
 0x9d4   : > { %5576 = vmatprep.mubr.f32.mxu1 %v16279_v7 }
 0x9d7   : > { %5577 = vmatmul.mubr.f32.gmra.mrb[104].mxu1 %v16280_v51 }
 0x9d8   : > { %5581 = vmatprep.mubr.f32.mxu1 %v16209_v63  ;;  %v16285_v63 = vld [vmem:[#allocation154_spill] sm:$0xff] }
 0x9db   : > { %7112 = vmatmul.mubr.msk.f32.gmra.mrb[106].mxu1 %vm7229_vm0, %v16281_v14  ;;  %v9219_v14 = vld [vmem:[%s9735_s8 + $0x10] sm:$0xff] }
 0x9dc   : > { %5586 = vmatprep.mubr.f32.mxu1 %v16211_v27  ;;  %v16286_v27 = vld [vmem:[#allocation156_spill] sm:$0xff] }
 0x9df   : > { %5587 = vmatmul.mubr.f32.gmra.mrb[108].mxu1 %v16282_v26 }
 0x9e0   : > { %5591 = vmatprep.mubr.f32.mxu1 %v16213_v50  ;;  %v16287_v50 = vld [vmem:[#allocation158_spill] sm:$0xff] }
 0x9e3   : > { %7114 = vmatmul.mubr.msk.f32.gmra.mrb[110].mxu1 %vm7229_vm0, %v16283_v33 }
 0x9e4   : > { %5596 = vmatprep.mubr.f32.mxu1 %v16215_v22  ;;  %v16288_v22 = vld [vmem:[#allocation161_spill] sm:$0xff] }
 0x9e7   : > { %5597 = vmatmul.mubr.f32.gmra.mrb[112].mxu1 %v16284_v12 }
 0x9e8   : > { %5601 = vmatprep.mubr.f32.mxu1 %v16216_v43  ;;  %v16289_v43 = vld [vmem:[#allocation99_spill] sm:$0xff] }
 0x9eb   : > { %7116 = vmatmul.mubr.msk.f32.gmra.mrb[114].mxu1 %vm7229_vm0, %v16285_v63  ;;  %v16320_v63 = vld [vmem:[#allocation197_spill] sm:$0xff] }
 0x9ec   : > { %5606 = vmatprep.mubr.f32.mxu1 %v16217_v3  ;;  %v16290_v3 = vld [vmem:[#allocation58_spill] sm:$0xff] }
 0x9ef   : > { %5607 = vmatmul.mubr.f32.gmra.mrb[116].mxu1 %v16286_v27  ;;  %v16321_v27 = vld [vmem:[#allocation186_spill] sm:$0xff] }
 0x9f0   : > { %5611 = vmatprep.mubr.f32.mxu1 %v16218_v19  ;;  %v16292_v19 = vld [vmem:[#allocation18_spill] sm:$0xff] }
 0x9f3   : > { %7118 = vmatmul.mubr.msk.f32.gmra.mrb[118].mxu1 %vm7229_vm0, %v16287_v50 }
 0x9f4   : > { %5616 = vmatprep.mubr.f32.mxu1 %v16219_v20  ;;  %v16295_v20 = vld [vmem:[#allocation165_spill] sm:$0xff] }
 0x9f7   : > { %5617 = vmatmul.mubr.f32.gmra.mrb[120].mxu1 %v16288_v22  ;;  %v9220_v22 = vld [vmem:[%s9735_s8 + $0x18] sm:$0xff] }
 0x9f8   : > { %5621 = vmatprep.mubr.f32.mxu1 %v16141_v5  ;;  %v16293_v5 = vld [vmem:[#allocation23_spill] sm:$0xff] }
 0x9fb   : > { %7120 = vmatmul.mubr.msk.f32.gmra.mrb[122].mxu1 %vm7229_vm0, %v16289_v43 }
 0x9fc   : > { %5626 = vmatprep.mubr.f32.mxu1 %v16142_v56  ;;  %v16294_v56 = vld [vmem:[#allocation164_spill] sm:$0xff] }
 0x9ff   : > { %5627 = vmatmul.mubr.f32.gmra.mrb[124].mxu1 %v16290_v3 }
 0xa00   : > { %5631 = vmatprep.mubr.f32.mxu1 %v16291_v62 }
 0xa03   : > { %7122 = vmatmul.mubr.msk.f32.gmra.mrb[126].mxu1 %vm7229_vm0, %v16292_v19 }
 0xa04   : > { %5636 = vmatprep.mubr.f32.mxu1 %v16291_v62 }
 0xa07   : > { %5637 = vmatmul.mubr.f32.gmra.mrb[128].mxu1 %v16292_v19 }
 0xa08   : > { %5641 = vmatprep.mubr.f32.mxu1 %v16222_v23  ;;  %v16297_v23 = vld [vmem:[#allocation167_spill] sm:$0xff] }
 0xa0b   : > { %7124 = vmatmul.mubr.msk.f32.gmra.mrb[130].mxu1 %vm7229_vm0, %v16293_v5 }
 0xa0c   : > { %5646 = vmatprep.mubr.f32.mxu1 %v16223_v57  ;;  %v16298_v57 = vld [vmem:[#allocation168_spill] sm:$0xff] }
 0xa0f   : > { %5647 = vmatmul.mubr.f32.gmra.mrb[132].mxu1 %v16294_v56  ;;  %v16322_v56 = vld [vmem:[#allocation200_spill] sm:$0xff] }
 0xa10   : > { %5651 = vmatprep.mubr.f32.mxu1 %v16224_v10  ;;  %v16299_v10 = vld [vmem:[#allocation169_spill] sm:$0xff] }
 0xa13   : > { %7126 = vmatmul.mubr.msk.f32.gmra.mrb[134].mxu1 %vm7229_vm0, %v16295_v20  ;;  %v16323_v20 = vld [vmem:[#allocation190_spill] sm:$0xff] }
 0xa14   : > { %5656 = vmatprep.mubr.f32.mxu1 %v16225_v15  ;;  %v16300_v15 = vld [vmem:[#allocation170_spill] sm:$0xff] }
 0xa17   : > { %5657 = vmatmul.mubr.f32.gmra.mrb[136].mxu1 %v16296_v17 }
 0xa18   : > { %5661 = vmatprep.mubr.f32.mxu1 %v16226_v42  ;;  %v16301_v42 = vld [vmem:[#allocation171_spill] sm:$0xff] }
 0xa1b   : > { %7128 = vmatmul.mubr.msk.f32.gmra.mrb[138].mxu1 %vm7229_vm0, %v16297_v23 }
 0xa1c   : > { %5666 = vmatprep.mubr.f32.mxu1 %v16227_v24  ;;  %v16302_v24 = vld [vmem:[#allocation172_spill] sm:$0xff] }
 0xa1f   : > { %5667 = vmatmul.mubr.f32.gmra.mrb[140].mxu1 %v16298_v57 }
 0xa20   : > { %5671 = vmatprep.mubr.f32.mxu1 %v16228_v30  ;;  %v16303_v30 = vld [vmem:[#allocation173_spill] sm:$0xff] }
 0xa23   : > { %7130 = vmatmul.mubr.msk.f32.gmra.mrb[142].mxu1 %vm7229_vm0, %v16299_v10 }
 0xa24   : > { %5676 = vmatprep.mubr.f32.mxu1 %v16229_v25  ;;  %v16304_v25 = vld [vmem:[#allocation174_spill] sm:$0xff] }
 0xa27   : > { %5677 = vmatmul.mubr.f32.gmra.mrb[144].mxu1 %v16300_v15 }
 0xa28   : > { %5681 = vmatprep.mubr.f32.mxu1 %v16230_v31  ;;  %v16305_v31 = vld [vmem:[#allocation175_spill] sm:$0xff] }
 0xa2b   : > { %7132 = vmatmul.mubr.msk.f32.gmra.mrb[146].mxu1 %vm7229_vm0, %v16301_v42  ;;  %v16324_v42 = vld [vmem:[#allocation203_spill] sm:$0xff] }
 0xa2c   : > { %5686 = vmatprep.mubr.f32.mxu1 %v16231_v41  ;;  %v16306_v41 = vld [vmem:[#allocation176_spill] sm:$0xff] }
 0xa2f   : > { %5687 = vmatmul.mubr.f32.gmra.mrb[148].mxu1 %v16302_v24  ;;  %v16325_v24 = vld [vmem:[#allocation189_spill] sm:$0xff] }
 0xa30   : > { %5691 = vmatprep.mubr.f32.mxu1 %v16232_v29  ;;  %v16307_v29 = vld [vmem:[#allocation177_spill] sm:$0xff] }
 0xa33   : > { %7134 = vmatmul.mubr.msk.f32.gmra.mrb[150].mxu1 %vm7229_vm0, %v16303_v30 }
 0xa34   : > { %5696 = vmatprep.mubr.f32.mxu1 %v16233_v35  ;;  %v16308_v35 = vld [vmem:[#allocation178_spill] sm:$0xff] }
 0xa37   : > { %5697 = vmatmul.mubr.f32.gmra.mrb[152].mxu1 %v16304_v25  ;;  %v9222_v25 = vld [vmem:[%s9735_s8 + $0x28] sm:$0xff] }
 0xa38   : > { %5701 = vmatprep.mubr.f32.mxu1 %v16234_v53  ;;  %v16309_v53 = vld [vmem:[#allocation179_spill] sm:$0xff] }
 0xa3b   : > { %7136 = vmatmul.mubr.msk.f32.gmra.mrb[154].mxu1 %vm7229_vm0, %v16305_v31 }
 0xa3c   : > { %5706 = vmatprep.mubr.f32.mxu1 %v16235_v48  ;;  %v16310_v48 = vld [vmem:[#allocation180_spill] sm:$0xff] }
 0xa3f   : > { %5707 = vmatmul.mubr.f32.gmra.mrb[156].mxu1 %v16306_v41 }
 0xa40   : > { %5711 = vmatprep.mubr.f32.mxu1 %v16236_v54  ;;  %v16311_v54 = vld [vmem:[#allocation181_spill] sm:$0xff] }
 0xa43   : > { %7138 = vmatmul.mubr.msk.f32.gmra.mrb[158].mxu1 %vm7229_vm0, %v16307_v29 }
 0xa44   : > { %5716 = vmatprep.mubr.f32.mxu1 %v16237_v6  ;;  %v16312_v6 = vld [vmem:[#allocation182_spill] sm:$0xff] }
 0xa47   : > { %5717 = vmatmul.mubr.f32.gmra.mrb[160].mxu1 %v16308_v35  ;;  %v16326_v35 = vld [vmem:[#allocation206_spill] sm:$0xff] }
 0xa48   : > { %5721 = vmatprep.mubr.f32.mxu1 %v16238_v45  ;;  %v16313_v45 = vld [vmem:[#allocation185_spill] sm:$0xff] }
 0xa4b   : > { %7140 = vmatmul.mubr.msk.f32.gmra.mrb[162].mxu1 %vm7229_vm0, %v16309_v53  ;;  %v16327_v53 = vld [vmem:[#allocation193_spill] sm:$0xff] }
 0xa4c   : > { %5726 = vmatprep.mubr.f32.mxu1 %v16239_v46  ;;  %v14563_v46 = vld [vmem:[%s14915_s4] ss:$0 sm:$0xff] }
 0xa4f   : > { %5727 = vmatmul.mubr.f32.gmra.mrb[164].mxu1 %v16310_v48 }
 0xa50   : > { %5731 = vmatprep.mubr.f32.mxu1 %v16240_v37 }
 0xa53   : > { %7142 = vmatmul.mubr.msk.f32.gmra.mrb[166].mxu1 %vm7229_vm0, %v16311_v54 }
 0xa54   : > { %5736 = vmatprep.mubr.f32.mxu1 %v16241_v21 }
 0xa57   : > { %5737 = vmatmul.mubr.f32.gmra.mrb[168].mxu1 %v16312_v6 }
 0xa58   : > { %5741 = vmatprep.mubr.f32.mxu1 %v16242_v40  ;;  %v16315_v40 = vld [vmem:[#allocation184_spill] sm:$0xff] }
 0xa5b   : > { %7144 = vmatmul.mubr.msk.f32.gmra.mrb[170].mxu1 %vm7229_vm0, %v16313_v45 }
 0xa5c   : > { %5746 = vmatprep.mubr.f32.mxu1 %v16243_v4 }
 0xa5e   : > { %v5483_v37 = vpop.f32.mrb[66].mxu1 }
 0xa5f   : > { %v8235_v9 = vadd.f32 %v14563_v46, %v5483_v37  ;;  %v5485_v21 = vpop.f32.mrb[67].mxu1  ;;  %5747 = vmatmul.mubr.f32.gmra.mrb[172].mxu1 %v16314_v16 }
 0xa60   : > { %5751 = vmatprep.mubr.f32.mxu1 %v16244_v52  ;;  %v16317_v52 = vld [vmem:[#allocation183_spill] sm:$0xff]  ;;  %v16329_v21 = vld [vmem:[#allocation192_spill] sm:$0xff] }
 0xa61   : > { %v5869_v47 = vadd.f32 %v8235_v9, %v16315_v40  ;;  %v16328_v9 = vld [vmem:[#allocation45_spill] sm:$0xff]  ;;  %v9224_v40 = vld [vmem:[%s9735_s8 + $0x38] sm:$0xff] }
 0xa62   : > { %v5488_v8 = vpop.f32.mrb[68].mxu1 }
 0xa63   : > { %v6187_v61 = vadd.f32 %v9217_v32, %v5869_v47  ;;  %v8236_v4 = vadd.f32 %v14563_v46, %v5488_v8  ;;  %v5490_v44 = vpop.f32.mrb[69].mxu1  ;;  %7146 = vmatmul.mubr.msk.f32.gmra.mrb[174].mxu1 %vm7229_vm0, %v16316_v34  ;;  %v9225_v34 = vld [vmem:[%s9735_s8 + $0x40] sm:$0xff] }
 0xa64   : > { %5756 = vmatprep.mubr.f32.mxu1 %v16245_v2  ;;  %v16319_v2 = vld [vmem:[#allocation187_spill] sm:$0xff] }
 0xa65   : > { %6251 = vst [vmem:[%s14577_s21] sm:$0xff] %v6187_v61  ;;  %v5874_v59 = vadd.f32 %v8236_v4, %v16317_v52  ;;  %v16330_v61 = vld [vmem:[#allocation49_spill] sm:$0xff]  ;;  %v16331_v4 = vld [vmem:[#allocation196_spill] sm:$0xff] }
 0xa66   : > { %v5493_v38 = vpop.f32.mrb[70].mxu1 }
 0xa67   : > { %v6188_v18 = vadd.f32 %v9218_v39, %v5874_v59  ;;  %v8237_v58 = vadd.f32 %v14563_v46, %v5493_v38  ;;  %v5495_v28 = vpop.f32.mrb[71].mxu1  ;;  %5757 = vmatmul.mubr.f32.gmra.mrb[176].mxu1 %v16318_v0  ;;  %v16332_v39 = vld [vmem:[#allocation195_spill] sm:$0xff] }
 0xa68   : > { %5761 = vmatprep.mubr.f32.mxu1 %v16246_v11  ;;  %v9226_v28 = vld [vmem:[%s9735_s8 + $0x48] sm:$0xff] }
 0xa69   : > { %6252 = vst [vmem:[%s14577_s21 + $0x8] sm:$0xff] %v6188_v18  ;;  %v5879_v7 = vadd.f32 %v8237_v58, %v16319_v2 }
 0xa6a   : > { %v5498_v51 = vpop.f32.mrb[72].mxu1 }
 0xa6b   : > { %v6189_v26 = vadd.f32 %v9219_v14, %v5879_v7  ;;  %v8238_v33 = vadd.f32 %v14563_v46, %v5498_v51  ;;  %v5500_v12 = vpop.f32.mrb[73].mxu1  ;;  %7148 = vmatmul.mubr.msk.f32.gmra.mrb[178].mxu1 %vm7229_vm0, %v16320_v63  ;;  %v16333_v51 = vld [vmem:[#allocation199_spill] sm:$0xff]  ;;  %v16334_v63 = vld [vmem:[#allocation198_spill] sm:$0xff] }
 0xa6c   : > { %5766 = vmatprep.mubr.f32.mxu1 %v16247_v1  ;;  %v9221_v1 = vld [vmem:[%s9735_s8 + $0x20] sm:$0xff] }
 0xa6d   : > { %6253 = vst [vmem:[%s14577_s21 + $0x10] sm:$0xff] %v6189_v26  ;;  %v5884_v11 = vadd.f32 %v8238_v33, %v16321_v27 }
 0xa6e   : > { %v5503_v50 = vpop.f32.mrb[74].mxu1 }
 0xa6f   : > { %v6190_v43 = vadd.f32 %v9220_v22, %v5884_v11  ;;  %v8239_v3 = vadd.f32 %v14563_v46, %v5503_v50  ;;  %v5505_v5 = vpop.f32.mrb[75].mxu1  ;;  %5767 = vmatmul.mubr.f32.gmra.mrb[180].mxu1 %v16322_v56  ;;  %v9228_v50 = vld [vmem:[%s9735_s8 + $0x58] sm:$0xff] }
 0xa70   : > { %5771 = vmatprep.mubr.f32.mxu1 %v16248_v49 }
 0xa71   : > { %6254 = vst [vmem:[%s14577_s21 + $0x18] sm:$0xff] %v6190_v43  ;;  %v5889_v17 = vadd.f32 %v8239_v3, %v16323_v20  ;;  %v16335_v3 = vld [vmem:[#allocation202_spill] sm:$0xff]  ;;  %v9229_v20 = vld [vmem:[%s9735_s8 + $0x60] sm:$0xff] }
 0xa72   : > { %v5508_v23 = vpop.f32.mrb[76].mxu1 }
 0xa73   : > { %v6191_v57 = vadd.f32 %v9221_v1, %v5889_v17  ;;  %v8240_v10 = vadd.f32 %v14563_v46, %v5508_v23  ;;  %v5510_v15 = vpop.f32.mrb[77].mxu1  ;;  %7150 = vmatmul.mubr.msk.f32.gmra.mrb[182].mxu1 %vm7229_vm0, %v16324_v42  ;;  %v9230_v42 = vld [vmem:[%s9735_s8 + $0x68] sm:$0xff] }
 0xa74   : > { %5776 = vmatprep.mubr.f32.mxu1 %v16249_v55  ;;  %v9223_v55 = vld [vmem:[%s9735_s8 + $0x30] sm:$0xff] }
 0xa75   : > { %6255 = vst [vmem:[%s14577_s21 + $0x20] sm:$0xff] %v6191_v57  ;;  %v5894_v49 = vadd.f32 %v8240_v10, %v16325_v24  ;;  %v16336_v57 = vld [vmem:[#allocation201_spill] sm:$0xff] }
 0xa76   : > { %v5513_v30 = vpop.f32.mrb[78].mxu1 }
 0xa77   : > { %v6192_v31 = vadd.f32 %v9222_v25, %v5894_v49  ;;  %v8241_v41 = vadd.f32 %v14563_v46, %v5513_v30  ;;  %v5515_v29 = vpop.f32.mrb[79].mxu1  ;;  %5777 = vmatmul.mubr.f32.gmra.mrb[184].mxu1 %v16326_v35  ;;  %v16337_v25 = vld [vmem:[#allocation205_spill] sm:$0xff] }
 0xa78   : > { %5781 = vmatprep.mubr.f32.mxu1 %v13430_v60  ;;  %v9231_v29 = vld [vmem:[%s9735_s8 + $0x70] sm:$0xff] }
 0xa79   : > { %6256 = vst [vmem:[%s14577_s21 + $0x28] sm:$0xff] %v6192_v31  ;;  %v5899_v48 = vadd.f32 %v8241_v41, %v16327_v53 }
 0xa7a   : > { %v5518_v54 = vpop.f32.mrb[80].mxu1 }
 0xa7b   : > { %v6193_v6 = vadd.f32 %v9223_v55, %v5899_v48  ;;  %v8242_v45 = vadd.f32 %v14563_v46, %v5518_v54  ;;  %v5520_v37 = vpop.f32.mrb[81].mxu1  ;;  %7152 = vmatmul.mubr.msk.f32.gmra.mrb[186].mxu1 %vm7229_vm0, %v16328_v9  ;;  %v16338_v54 = vld [vmem:[#allocation204_spill] sm:$0xff] }
 0xa7c   : > { %5786 = vmatprep.mubr.f32.mxu1 %v16252_v13 }
 0xa7d   : > { %6257 = vst [vmem:[%s14577_s21 + $0x30] sm:$0xff] %v6193_v6  ;;  %v5904_v60 = vadd.f32 %v8242_v45, %v16329_v21  ;;  %v9232_v45 = vld [vmem:[%s9735_s8 + $0x78] sm:$0xff] }
 0xa7e   : > { %v5523_v16 = vpop.f32.mrb[82].mxu1 }
 0xa7f   : > { %v6194_v47 = vadd.f32 %v9224_v40, %v5904_v60  ;;  %v8243_v8 = vadd.f32 %v14563_v46, %v5523_v16  ;;  %v5525_v32 = vpop.f32.mrb[83].mxu1  ;;  %5787 = vmatmul.mubr.f32.gmra.mrb[188].mxu1 %v16330_v61  ;;  %v16339_v60 = vld [vmem:[#allocation208_spill] sm:$0xff] }
 0xa80   : > { %5791 = vmatprep.mubr.f32.mxu1 %v16291_v62 }
 0xa81   : > { %6258 = vst [vmem:[%s14577_s21 + $0x38] sm:$0xff] %v6194_v47  ;;  %v5909_v44 = vadd.f32 %v8243_v8, %v16331_v4  ;;  %v9233_v47 = vld [vmem:[%s9735_s8 + $0x80] sm:$0xff]  ;;  %v16340_v4 = vld [vmem:[#allocation207_spill] sm:$0xff] }
 0xa82   : > { %v5528_v13 = vpop.f32.mrb[84].mxu1 }
 0xa83   : > { %v6195_v52 = vadd.f32 %v9225_v34, %v5909_v44  ;;  %v8244_v59 = vadd.f32 %v14563_v46, %v5528_v13  ;;  %v5530_v38 = vpop.f32.mrb[85].mxu1  ;;  %7154 = vmatmul.mubr.msk.f32.gmra.mrb[190].mxu1 %vm7229_vm0, %v16292_v19  ;;  %v9234_v34 = vld [vmem:[%s9735_s8 + $0x88] sm:$0xff] }
 0xa84   : > { %5796 = vmatprep.mubr.f32.mxu1 %v16291_v62  ;;  %v9227_v62 = vld [vmem:[%s9735_s8 + $0x50] sm:$0xff] }
 0xa85   : > { %6259 = vst [vmem:[%s14577_s21 + $0x40] sm:$0xff] %v6195_v52  ;;  %v5914_v18 = vadd.f32 %v8244_v59, %v16332_v39  ;;  %v16341_v39 = vld [vmem:[#allocation210_spill] sm:$0xff] }
 0xa86   : > { %v5533_v58 = vpop.f32.mrb[86].mxu1 }
 0xa87   : > { %v6196_v0 = vadd.f32 %v9226_v28, %v5914_v18  ;;  %v8245_v2 = vadd.f32 %v14563_v46, %v5533_v58  ;;  %v5535_v7 = vpop.f32.mrb[87].mxu1  ;;  %5797 = vmatmul.mubr.f32.gmra.mrb[192].mxu1 %v16292_v19  ;;  %v9235_v28 = vld [vmem:[%s9735_s8 + $0x90] sm:$0xff] }
 0xa89   : > { %6260 = vst [vmem:[%s14577_s21 + $0x48] sm:$0xff] %v6196_v0  ;;  %v5919_v36 = vadd.f32 %v8245_v2, %v16333_v51  ;;  %v16342_v51 = vld [vmem:[#allocation209_spill] sm:$0xff] }
 0xa8a   : > { %v5538_v14 = vpop.f32.mrb[88].mxu1 }
 0xa8b   : > { %v6197_v26 = vadd.f32 %v9227_v62, %v5919_v36  ;;  %v8246_v33 = vadd.f32 %v14563_v46, %v5538_v14  ;;  %v5540_v12 = vpop.f32.mrb[89].mxu1  ;;  %v9236_v62 = vld [vmem:[%s9735_s8 + $0x98] sm:$0xff] }
 0xa8d   : > { %6261 = vst [vmem:[%s14577_s21 + $0x50] sm:$0xff] %v6197_v26  ;;  %v5924_v27 = vadd.f32 %v8246_v33, %v16334_v63  ;;  %v16343_v63 = vld [vmem:[#allocation212_spill] sm:$0xff] }
 0xa8e   : > { %v5543_v11 = vpop.f32.mrb[90].mxu1 }
 0xa8f   : > { %v6198_v22 = vadd.f32 %v9228_v50, %v5924_v27  ;;  %v8247_v19 = vadd.f32 %v14563_v46, %v5543_v11  ;;  %v5545_v43 = vpop.f32.mrb[91].mxu1  ;;  %v9237_v50 = vld [vmem:[%s9735_s8 + $0xa0] sm:$0xff] }
 0xa91   : > { %6262 = vst [vmem:[%s14577_s21 + $0x58] sm:$0xff] %v6198_v22  ;;  %v5929_v5 = vadd.f32 %v8247_v19, %v16335_v3  ;;  %v16344_v3 = vld [vmem:[#allocation211_spill] sm:$0xff] }
 0xa92   : > { %v5548_v56 = vpop.f32.mrb[92].mxu1 }
 0xa93   : > { %v6199_v17 = vadd.f32 %v9229_v20, %v5929_v5  ;;  %v8248_v23 = vadd.f32 %v14563_v46, %v5548_v56  ;;  %v5550_v1 = vpop.f32.mrb[93].mxu1  ;;  %v9238_v20 = vld [vmem:[%s9735_s8 + $0xa8] sm:$0xff] }
 0xa95   : > { %6263 = vst [vmem:[%s14577_s21 + $0x60] sm:$0xff] %v6199_v17  ;;  %v5934_v10 = vadd.f32 %v8248_v23, %v16336_v57  ;;  %v16345_v57 = vld [vmem:[#allocation214_spill] sm:$0xff] }
 0xa96   : > { %v5553_v15 = vpop.f32.mrb[94].mxu1 }
 0xa97   : > { %v6200_v24 = vadd.f32 %v9230_v42, %v5934_v10  ;;  %v8249_v49 = vadd.f32 %v14563_v46, %v5553_v15  ;;  %v5555_v30 = vpop.f32.mrb[95].mxu1  ;;  %v9239_v42 = vld [vmem:[%s9735_s8 + $0xb0] sm:$0xff] }
 0xa99   : > { %6264 = vst [vmem:[%s14577_s21 + $0x68] sm:$0xff] %v6200_v24  ;;  %v5939_v31 = vadd.f32 %v8249_v49, %v16337_v25  ;;  %v16346_v25 = vld [vmem:[#allocation213_spill] sm:$0xff] }
 0xa9a   : > { %v5558_v41 = vpop.f32.mrb[96].mxu1 }
 0xa9b   : > { %v6201_v35 = vadd.f32 %v9231_v29, %v5939_v31  ;;  %v8250_v53 = vadd.f32 %v14563_v46, %v5558_v41  ;;  %v5560_v48 = vpop.f32.mrb[97].mxu1  ;;  %v9240_v29 = vld [vmem:[%s9735_s8 + $0xb8] sm:$0xff] }
 0xa9d   : > { %6265 = vst [vmem:[%s14577_s21 + $0x70] sm:$0xff] %v6201_v35  ;;  %v5944_v55 = vadd.f32 %v8250_v53, %v16338_v54  ;;  %v16347_v54 = vld [vmem:[#allocation216_spill] sm:$0xff] }
 0xa9e   : > { %v5563_v6 = vpop.f32.mrb[98].mxu1 }
 0xa9f   : > { %v6202_v37 = vadd.f32 %v9232_v45, %v5944_v55  ;;  %v8251_v9 = vadd.f32 %v14563_v46, %v5563_v6  ;;  %v5565_v21 = vpop.f32.mrb[99].mxu1  ;;  %v9241_v45 = vld [vmem:[%s9735_s8 + $0xc0] sm:$0xff] }
 0xaa1   : > { %6266 = vst [vmem:[%s14577_s21 + $0x78] sm:$0xff] %v6202_v37  ;;  %v5949_v16 = vadd.f32 %v8251_v9, %v16339_v60  ;;  %v16348_v60 = vld [vmem:[#allocation215_spill] sm:$0xff] }
 0xaa2   : > { %v5568_v40 = vpop.f32.mrb[100].mxu1 }
 0xaa3   : > { %v6203_v8 = vadd.f32 %v9233_v47, %v5949_v16  ;;  %v8252_v32 = vadd.f32 %v14563_v46, %v5568_v40  ;;  %v5570_v61 = vpop.f32.mrb[101].mxu1  ;;  %v9242_v47 = vld [vmem:[%s9735_s8 + $0xc8] sm:$0xff] }
 0xaa5   : > { %6267 = vst [vmem:[%s14577_s21 + $0x80] sm:$0xff] %v6203_v8  ;;  %v5954_v44 = vadd.f32 %v8252_v32, %v16340_v4  ;;  %v16349_v4 = vld [vmem:[#allocation217_spill] sm:$0xff] }
 0xaa6   : > { %v5573_v13 = vpop.f32.mrb[102].mxu1 }
 0xaa7   : > { %v6204_v52 = vadd.f32 %v9234_v34, %v5954_v44  ;;  %v8253_v59 = vadd.f32 %v14563_v46, %v5573_v13  ;;  %v5575_v38 = vpop.f32.mrb[103].mxu1  ;;  %v9243_v34 = vld [vmem:[%s9735_s8 + $0xd0] sm:$0xff] }
 0xaa9   : > { %6268 = vst [vmem:[%s14577_s21 + $0x88] sm:$0xff] %v6204_v52  ;;  %v5959_v18 = vadd.f32 %v8253_v59, %v16341_v39  ;;  %v16350_v39 = vld [vmem:[#allocation101_spill] sm:$0xff] }
 0xaaa   : > { %v5578_v58 = vpop.f32.mrb[104].mxu1 }
 0xaab   : > { %v6205_v0 = vadd.f32 %v9235_v28, %v5959_v18  ;;  %v8254_v2 = vadd.f32 %v14563_v46, %v5578_v58  ;;  %v5580_v7 = vpop.f32.mrb[105].mxu1  ;;  %v9244_v28 = vld [vmem:[%s9735_s8 + $0xd8] sm:$0xff] }
 0xaad   : > { %6269 = vst [vmem:[%s14577_s21 + $0x90] sm:$0xff] %v6205_v0  ;;  %v5964_v36 = vadd.f32 %v8254_v2, %v16342_v51  ;;  %v16351_v51 = vld [vmem:[#allocation219_spill] sm:$0xff] }
 0xaae   : > { %v5583_v14 = vpop.f32.mrb[106].mxu1 }
 0xaaf   : > { %v6206_v26 = vadd.f32 %v9236_v62, %v5964_v36  ;;  %v8255_v33 = vadd.f32 %v14563_v46, %v5583_v14  ;;  %v5585_v12 = vpop.f32.mrb[107].mxu1  ;;  %v9245_v62 = vld [vmem:[%s9735_s8 + $0xe0] sm:$0xff] }
 0xab1   : > { %6270 = vst [vmem:[%s14577_s21 + $0x98] sm:$0xff] %v6206_v26  ;;  %v5969_v27 = vadd.f32 %v8255_v33, %v16343_v63  ;;  %v16352_v63 = vld [vmem:[#allocation218_spill] sm:$0xff] }
 0xab2   : > { %v5588_v11 = vpop.f32.mrb[108].mxu1 }
 0xab3   : > { %v6207_v22 = vadd.f32 %v9237_v50, %v5969_v27  ;;  %v8256_v19 = vadd.f32 %v14563_v46, %v5588_v11  ;;  %v5590_v43 = vpop.f32.mrb[109].mxu1  ;;  %v9246_v50 = vld [vmem:[%s9735_s8 + $0xe8] sm:$0xff] }
 0xab5   : > { %6271 = vst [vmem:[%s14577_s21 + $0xa0] sm:$0xff] %v6207_v22  ;;  %v5974_v5 = vadd.f32 %v8256_v19, %v16344_v3  ;;  %v16353_v3 = vld [vmem:[#allocation221_spill] sm:$0xff] }
 0xab6   : > { %v5593_v56 = vpop.f32.mrb[110].mxu1 }
 0xab7   : > { %v6208_v17 = vadd.f32 %v9238_v20, %v5974_v5  ;;  %v8257_v23 = vadd.f32 %v14563_v46, %v5593_v56  ;;  %v5595_v1 = vpop.f32.mrb[111].mxu1  ;;  %v14722_v56 = vpop.f32.mrb[190].mxu0 }
 0xab9   : > { %6272 = vst [vmem:[%s14577_s21 + $0xa8] sm:$0xff] %v6208_v17  ;;  %v5979_v10 = vadd.f32 %v8257_v23, %v16345_v57  ;;  %v14724_v17 = vpop.f32.mrb[191].mxu0  ;;  %v9247_v23 = vld [vmem:[%s9735_s8 + $0xf0] sm:$0xff] }
 0xaba   : > { %v5598_v15 = vpop.f32.mrb[112].mxu1 }
 0xabb   : > { %v6209_v24 = vadd.f32 %v9239_v42, %v5979_v10  ;;  %v8258_v49 = vadd.f32 %v14563_v46, %v5598_v15  ;;  %v5600_v30 = vpop.f32.mrb[113].mxu1  ;;  %v16354_v15 = vld [vmem:[#allocation220_spill] sm:$0xff] }
 0xabd   : > { %6273 = vst [vmem:[%s14577_s21 + $0xb0] sm:$0xff] %v6209_v24  ;;  %v5984_v31 = vadd.f32 %v8258_v49, %v16346_v25  ;;  %v9248_v49 = vld [vmem:[%s9735_s8 + $0xf8] sm:$0xff] }
 0xabe   : > { %v5603_v41 = vpop.f32.mrb[114].mxu1 }
 0xabf   : > { %v6210_v35 = vadd.f32 %v9240_v29, %v5984_v31  ;;  %v8259_v53 = vadd.f32 %v14563_v46, %v5603_v41  ;;  %v5605_v48 = vpop.f32.mrb[115].mxu1  ;;  %v16355_v41 = vld [vmem:[#allocation223_spill] sm:$0xff] }
 0xac1   : > { %6274 = vst [vmem:[%s14577_s21 + $0xb8] sm:$0xff] %v6210_v35  ;;  %v5989_v55 = vadd.f32 %v8259_v53, %v16347_v54  ;;  %v9249_v53 = vld [vmem:[%s9735_s8 + $0x100] sm:$0xff] }
 0xac2   : > { %v5608_v6 = vpop.f32.mrb[116].mxu1 }
 0xac3   : > { %v6211_v37 = vadd.f32 %v9241_v45, %v5989_v55  ;;  %v8260_v9 = vadd.f32 %v14563_v46, %v5608_v6  ;;  %v5610_v21 = vpop.f32.mrb[117].mxu1  ;;  %v16356_v6 = vld [vmem:[#allocation222_spill] sm:$0xff] }
 0xac5   : > { %6275 = vst [vmem:[%s14577_s21 + $0xc0] sm:$0xff] %v6211_v37  ;;  %v5994_v16 = vadd.f32 %v8260_v9, %v16348_v60  ;;  %v9250_v9 = vld [vmem:[%s9735_s8 + $0x108] sm:$0xff] }
 0xac6   : > { %v5613_v40 = vpop.f32.mrb[118].mxu1 }
 0xac7   : > { %v6212_v8 = vadd.f32 %v9242_v47, %v5994_v16  ;;  %v8261_v32 = vadd.f32 %v14563_v46, %v5613_v40  ;;  %v5615_v61 = vpop.f32.mrb[119].mxu1  ;;  %v16357_v40 = vld [vmem:[#allocation224_spill] sm:$0xff] }
 0xac9   : > { %6276 = vst [vmem:[%s14577_s21 + $0xc8] sm:$0xff] %v6212_v8  ;;  %v5999_v44 = vadd.f32 %v8261_v32, %v16349_v4  ;;  %v9251_v32 = vld [vmem:[%s9735_s8 + $0x110] sm:$0xff] }
 0xaca   : > { %v5618_v13 = vpop.f32.mrb[120].mxu1 }
 0xacb   : > { %v6213_v52 = vadd.f32 %v9243_v34, %v5999_v44  ;;  %v8262_v59 = vadd.f32 %v14563_v46, %v5618_v13  ;;  %v5620_v38 = vpop.f32.mrb[121].mxu1  ;;  %v16358_v13 = vld [vmem:[#allocation109_spill] sm:$0xff] }
 0xacd   : > { %6277 = vst [vmem:[%s14577_s21 + $0xd0] sm:$0xff] %v6213_v52  ;;  %v6004_v18 = vadd.f32 %v8262_v59, %v16350_v39  ;;  %v9252_v59 = vld [vmem:[%s9735_s8 + $0x118] sm:$0xff] }
 0xace   : > { %v5623_v58 = vpop.f32.mrb[122].mxu1 }
 0xacf   : > { %v6214_v0 = vadd.f32 %v9244_v28, %v6004_v18  ;;  %v8263_v2 = vadd.f32 %v14563_v46, %v5623_v58  ;;  %v5625_v7 = vpop.f32.mrb[123].mxu1  ;;  %v16359_v58 = vld [vmem:[#allocation225_spill] sm:$0xff] }
 0xad1   : > { %6278 = vst [vmem:[%s14577_s21 + $0xd8] sm:$0xff] %v6214_v0  ;;  %v6009_v36 = vadd.f32 %v8263_v2, %v16351_v51  ;;  %v9253_v2 = vld [vmem:[%s9735_s8 + $0x120] sm:$0xff] }
 0xad2   : > { %v5628_v14 = vpop.f32.mrb[124].mxu1 }
 0xad3   : > { %v6215_v26 = vadd.f32 %v9245_v62, %v6009_v36  ;;  %v8264_v33 = vadd.f32 %v14563_v46, %v5628_v14  ;;  %v5630_v12 = vpop.f32.mrb[125].mxu1  ;;  %v16360_v14 = vld [vmem:[#allocation43_spill] sm:$0xff] }
 0xad5   : > { %6279 = vst [vmem:[%s14577_s21 + $0xe0] sm:$0xff] %v6215_v26  ;;  %v6014_v27 = vadd.f32 %v8264_v33, %v16352_v63  ;;  %v9254_v33 = vld [vmem:[%s9735_s8 + $0x128] sm:$0xff] }
 0xad6   : > { %v5633_v11 = vpop.f32.mrb[126].mxu1 }
 0xad7   : > { %v6216_v22 = vadd.f32 %v9246_v50, %v6014_v27  ;;  %v8265_v19 = vadd.f32 %v14563_v46, %v5633_v11  ;;  %v5635_v43 = vpop.f32.mrb[127].mxu1  ;;  %v16361_v11 = vld [vmem:[#allocation226_spill] sm:$0xff] }
 0xad9   : > { %6280 = vst [vmem:[%s14577_s21 + $0xe8] sm:$0xff] %v6216_v22  ;;  %v6019_v5 = vadd.f32 %v8265_v19, %v16353_v3  ;;  %v9255_v19 = vld [vmem:[%s9735_s8 + $0x130] sm:$0xff] }
 0xada   : > { %v5638_v20 = vpop.f32.mrb[128].mxu1 }
 0xadb   : > { %v6217_v1 = vadd.f32 %v9247_v23, %v6019_v5  ;;  %v8266_v57 = vadd.f32 %v14563_v46, %v5638_v20  ;;  %v5640_v10 = vpop.f32.mrb[129].mxu1  ;;  %v16362_v20 = vld [vmem:[#allocation46_spill] sm:$0xff] }
 0xadd   : > { %6281 = vst [vmem:[%s14577_s21 + $0xf0] sm:$0xff] %v6217_v1  ;;  %v6024_v42 = vadd.f32 %v8266_v57, %v16354_v15  ;;  %v9256_v57 = vld [vmem:[%s9735_s8 + $0x138] sm:$0xff] }
 0xade   : > { %v5643_v24 = vpop.f32.mrb[130].mxu1 }
 0xadf   : > { %v6218_v30 = vadd.f32 %v9248_v49, %v6024_v42  ;;  %v8267_v25 = vadd.f32 %v14563_v46, %v5643_v24  ;;  %v5645_v31 = vpop.f32.mrb[131].mxu1  ;;  %v16363_v24 = vld [vmem:[#allocation227_spill] sm:$0xff] }
 0xae1   : > { %6282 = vst [vmem:[%s14577_s21 + $0xf8] sm:$0xff] %v6218_v30  ;;  %v6029_v29 = vadd.f32 %v8267_v25, %v16355_v41  ;;  %v9257_v25 = vld [vmem:[%s9735_s8 + $0x140] sm:$0xff] }
 0xae2   : > { %v5648_v35 = vpop.f32.mrb[132].mxu1 }
 0xae3   : > { %v6219_v48 = vadd.f32 %v9249_v53, %v6029_v29  ;;  %v8268_v54 = vadd.f32 %v14563_v46, %v5648_v35  ;;  %v5650_v55 = vpop.f32.mrb[133].mxu1  ;;  %v16364_v35 = vld [vmem:[#allocation118_spill] sm:$0xff] }
 0xae5   : > { %6283 = vst [vmem:[%s14577_s21 + $0x100] sm:$0xff] %v6219_v48  ;;  %v6034_v45 = vadd.f32 %v8268_v54, %v16356_v6  ;;  %v9258_v54 = vld [vmem:[%s9735_s8 + $0x148] sm:$0xff] }
 0xae6   : > { %v5653_v37 = vpop.f32.mrb[134].mxu1 }
 0xae7   : > { %v6220_v21 = vadd.f32 %v9250_v9, %v6034_v45  ;;  %v8269_v60 = vadd.f32 %v14563_v46, %v5653_v37  ;;  %v5655_v16 = vpop.f32.mrb[135].mxu1  ;;  %v16365_v37 = vld [vmem:[#allocation228_spill] sm:$0xff] }
 0xae9   : > { %6284 = vst [vmem:[%s14577_s21 + $0x108] sm:$0xff] %v6220_v21  ;;  %v6039_v47 = vadd.f32 %v8269_v60, %v16357_v40  ;;  %v9259_v60 = vld [vmem:[%s9735_s8 + $0x150] sm:$0xff] }
 0xaea   : > { %v5658_v8 = vpop.f32.mrb[136].mxu1 }
 0xaeb   : > { %v6221_v61 = vadd.f32 %v9251_v32, %v6039_v47  ;;  %v8270_v4 = vadd.f32 %v14563_v46, %v5658_v8  ;;  %v5660_v44 = vpop.f32.mrb[137].mxu1  ;;  %v16366_v8 = vld [vmem:[#allocation119_spill] sm:$0xff] }
 0xaed   : > { %6285 = vst [vmem:[%s14577_s21 + $0x110] sm:$0xff] %v6221_v61  ;;  %v6044_v34 = vadd.f32 %v8270_v4, %v16358_v13  ;;  %v9260_v4 = vld [vmem:[%s9735_s8 + $0x158] sm:$0xff] }
 0xaee   : > { %v5663_v52 = vpop.f32.mrb[138].mxu1 }
 0xaef   : > { %v6222_v38 = vadd.f32 %v9252_v59, %v6044_v34  ;;  %v8271_v39 = vadd.f32 %v14563_v46, %v5663_v52  ;;  %v5665_v18 = vpop.f32.mrb[139].mxu1  ;;  %v16367_v52 = vld [vmem:[#allocation229_spill] sm:$0xff] }
 0xaf1   : > { %6286 = vst [vmem:[%s14577_s21 + $0x118] sm:$0xff] %v6222_v38  ;;  %v6049_v28 = vadd.f32 %v8271_v39, %v16359_v58  ;;  %v9261_v39 = vld [vmem:[%s9735_s8 + $0x160] sm:$0xff] }
 0xaf2   : > { %v5668_v0 = vpop.f32.mrb[140].mxu1 }
 0xaf3   : > { %v6223_v7 = vadd.f32 %v9253_v2, %v6049_v28  ;;  %v8272_v51 = vadd.f32 %v14563_v46, %v5668_v0  ;;  %v5670_v36 = vpop.f32.mrb[141].mxu1  ;;  %v16368_v0 = vld [vmem:[#allocation40_spill] sm:$0xff] }
 0xaf5   : > { %6287 = vst [vmem:[%s14577_s21 + $0x120] sm:$0xff] %v6223_v7  ;;  %v6054_v62 = vadd.f32 %v8272_v51, %v16360_v14  ;;  %v9262_v51 = vld [vmem:[%s9735_s8 + $0x168] sm:$0xff] }
 0xaf6   : > { %v5673_v26 = vpop.f32.mrb[142].mxu1 }
 0xaf7   : > { %v6224_v12 = vadd.f32 %v9254_v33, %v6054_v62  ;;  %v8273_v63 = vadd.f32 %v14563_v46, %v5673_v26  ;;  %v5675_v27 = vpop.f32.mrb[143].mxu1  ;;  %v16369_v26 = vld [vmem:[#allocation231_spill] sm:$0xff] }
 0xaf9   : > { %6288 = vst [vmem:[%s14577_s21 + $0x128] sm:$0xff] %v6224_v12  ;;  %v6059_v50 = vadd.f32 %v8273_v63, %v16361_v11  ;;  %v9263_v63 = vld [vmem:[%s9735_s8 + $0x170] sm:$0xff] }
 0xafa   : > { %v5678_v22 = vpop.f32.mrb[144].mxu1 }
 0xafb   : > { %v6225_v43 = vadd.f32 %v9255_v19, %v6059_v50  ;;  %v8274_v3 = vadd.f32 %v14563_v46, %v5678_v22  ;;  %v5680_v5 = vpop.f32.mrb[145].mxu1  ;;  %v16370_v22 = vld [vmem:[#allocation230_spill] sm:$0xff] }
 0xafd   : > { %6289 = vst [vmem:[%s14577_s21 + $0x130] sm:$0xff] %v6225_v43  ;;  %v6064_v23 = vadd.f32 %v8274_v3, %v16362_v20  ;;  %v9264_v3 = vld [vmem:[%s9735_s8 + $0x178] sm:$0xff] }
 0xafe   : > { %v5683_v1 = vpop.f32.mrb[146].mxu1 }
 0xaff   : > { %v6226_v10 = vadd.f32 %v9256_v57, %v6064_v23  ;;  %v8275_v15 = vadd.f32 %v14563_v46, %v5683_v1  ;;  %v5685_v42 = vpop.f32.mrb[147].mxu1  ;;  %v16371_v1 = vld [vmem:[#allocation233_spill] sm:$0xff] }
 0xb01   : > { %6290 = vst [vmem:[%s14577_s21 + $0x138] sm:$0xff] %v6226_v10  ;;  %v6069_v49 = vadd.f32 %v8275_v15, %v16363_v24  ;;  %v9265_v15 = vld [vmem:[%s9735_s8 + $0x180] sm:$0xff] }
 0xb02   : > { %v5688_v30 = vpop.f32.mrb[148].mxu1 }
 0xb03   : > { %v6227_v31 = vadd.f32 %v9257_v25, %v6069_v49  ;;  %v8276_v41 = vadd.f32 %v14563_v46, %v5688_v30  ;;  %v5690_v29 = vpop.f32.mrb[149].mxu1  ;;  %v16372_v30 = vld [vmem:[#allocation232_spill] sm:$0xff] }
 0xb05   : > { %6291 = vst [vmem:[%s14577_s21 + $0x140] sm:$0xff] %v6227_v31  ;;  %v6074_v53 = vadd.f32 %v8276_v41, %v16364_v35  ;;  %v9266_v41 = vld [vmem:[%s9735_s8 + $0x188] sm:$0xff] }
 0xb06   : > { %v5693_v48 = vpop.f32.mrb[150].mxu1 }
 0xb07   : > { %v6228_v55 = vadd.f32 %v9258_v54, %v6074_v53  ;;  %v8277_v6 = vadd.f32 %v14563_v46, %v5693_v48  ;;  %v5695_v45 = vpop.f32.mrb[151].mxu1  ;;  %v16373_v48 = vld [vmem:[#allocation235_spill] sm:$0xff] }
 0xb09   : > { %6292 = vst [vmem:[%s14577_s21 + $0x148] sm:$0xff] %v6228_v55  ;;  %v6079_v9 = vadd.f32 %v8277_v6, %v16365_v37  ;;  %v9267_v6 = vld [vmem:[%s9735_s8 + $0x190] sm:$0xff] }
 0xb0a   : > { %v5698_v21 = vpop.f32.mrb[152].mxu1 }
 0xb0b   : > { %v6229_v16 = vadd.f32 %v9259_v60, %v6079_v9  ;;  %v8278_v40 = vadd.f32 %v14563_v46, %v5698_v21  ;;  %v5700_v47 = vpop.f32.mrb[153].mxu1  ;;  %v16374_v21 = vld [vmem:[#allocation234_spill] sm:$0xff] }
 0xb0d   : > { %6293 = vst [vmem:[%s14577_s21 + $0x150] sm:$0xff] %v6229_v16  ;;  %v6084_v32 = vadd.f32 %v8278_v40, %v16366_v8  ;;  %v9268_v40 = vld [vmem:[%s9735_s8 + $0x198] sm:$0xff] }
 0xb0e   : > { %v5703_v61 = vpop.f32.mrb[154].mxu1 }
 0xb0f   : > { %v6230_v44 = vadd.f32 %v9260_v4, %v6084_v32  ;;  %v8279_v13 = vadd.f32 %v14563_v46, %v5703_v61  ;;  %v5705_v34 = vpop.f32.mrb[155].mxu1  ;;  %v16375_v61 = vld [vmem:[#allocation237_spill] sm:$0xff] }
 0xb11   : > { %6294 = vst [vmem:[%s14577_s21 + $0x158] sm:$0xff] %v6230_v44  ;;  %v6089_v59 = vadd.f32 %v8279_v13, %v16367_v52  ;;  %v9269_v13 = vld [vmem:[%s9735_s8 + $0x1a0] sm:$0xff] }
 0xb12   : > { %v5708_v38 = vpop.f32.mrb[156].mxu1 }
 0xb13   : > { %v6231_v18 = vadd.f32 %v9261_v39, %v6089_v59  ;;  %v8280_v58 = vadd.f32 %v14563_v46, %v5708_v38  ;;  %v5710_v28 = vpop.f32.mrb[157].mxu1  ;;  %v16376_v38 = vld [vmem:[#allocation236_spill] sm:$0xff] }
 0xb15   : > { %6295 = vst [vmem:[%s14577_s21 + $0x160] sm:$0xff] %v6231_v18  ;;  %v6094_v2 = vadd.f32 %v8280_v58, %v16368_v0  ;;  %v9270_v58 = vld [vmem:[%s9735_s8 + $0x1a8] sm:$0xff] }
 0xb16   : > { %v5713_v7 = vpop.f32.mrb[158].mxu1 }
 0xb17   : > { %v6232_v36 = vadd.f32 %v9262_v51, %v6094_v2  ;;  %v8281_v14 = vadd.f32 %v14563_v46, %v5713_v7  ;;  %v5715_v62 = vpop.f32.mrb[159].mxu1  ;;  %v16377_v7 = vld [vmem:[#allocation239_spill] sm:$0xff] }
 0xb19   : > { %6296 = vst [vmem:[%s14577_s21 + $0x168] sm:$0xff] %v6232_v36  ;;  %v6099_v33 = vadd.f32 %v8281_v14, %v16369_v26  ;;  %v9271_v14 = vld [vmem:[%s9735_s8 + $0x1b0] sm:$0xff] }
 0xb1a   : > { %v5718_v12 = vpop.f32.mrb[160].mxu1 }
 0xb1b   : > { %v6233_v27 = vadd.f32 %v9263_v63, %v6099_v33  ;;  %v8282_v11 = vadd.f32 %v14563_v46, %v5718_v12  ;;  %v5720_v50 = vpop.f32.mrb[161].mxu1  ;;  %v16378_v12 = vld [vmem:[#allocation238_spill] sm:$0xff] }
 0xb1d   : > { %6297 = vst [vmem:[%s14577_s21 + $0x170] sm:$0xff] %v6233_v27  ;;  %v6104_v19 = vadd.f32 %v8282_v11, %v16370_v22  ;;  %v9272_v11 = vld [vmem:[%s9735_s8 + $0x1b8] sm:$0xff] }
 0xb1e   : > { %v5723_v43 = vpop.f32.mrb[162].mxu1 }
 0xb1f   : > { %v6234_v5 = vadd.f32 %v9264_v3, %v6104_v19  ;;  %v8283_v20 = vadd.f32 %v14563_v46, %v5723_v43  ;;  %v5725_v23 = vpop.f32.mrb[163].mxu1  ;;  %v16379_v43 = vld [vmem:[#allocation241_spill] sm:$0xff] }
 0xb21   : > { %6298 = vst [vmem:[%s14577_s21 + $0x178] sm:$0xff] %v6234_v5  ;;  %v6109_v57 = vadd.f32 %v8283_v20, %v16371_v1  ;;  %v9273_v20 = vld [vmem:[%s9735_s8 + $0x1c0] sm:$0xff] }
 0xb22   : > { %v5728_v10 = vpop.f32.mrb[164].mxu1 }
 0xb23   : > { %v6235_v42 = vadd.f32 %v9265_v15, %v6109_v57  ;;  %v8284_v24 = vadd.f32 %v14563_v46, %v5728_v10  ;;  %v5730_v49 = vpop.f32.mrb[165].mxu1  ;;  %v16380_v10 = vld [vmem:[#allocation240_spill] sm:$0xff] }
 0xb25   : > { %6299 = vst [vmem:[%s14577_s21 + $0x180] sm:$0xff] %v6235_v42  ;;  %v6114_v25 = vadd.f32 %v8284_v24, %v16372_v30  ;;  %v9274_v24 = vld [vmem:[%s9735_s8 + $0x1c8] sm:$0xff] }
 0xb26   : > { %v5733_v31 = vpop.f32.mrb[166].mxu1 }
 0xb27   : > { %v6236_v29 = vadd.f32 %v9266_v41, %v6114_v25  ;;  %v8285_v35 = vadd.f32 %v14563_v46, %v5733_v31  ;;  %v5735_v53 = vpop.f32.mrb[167].mxu1  ;;  %v16381_v31 = vld [vmem:[#allocation242_spill] sm:$0xff] }
 0xb29   : > { %6300 = vst [vmem:[%s14577_s21 + $0x188] sm:$0xff] %v6236_v29  ;;  %v6119_v54 = vadd.f32 %v8285_v35, %v16373_v48  ;;  %v9275_v35 = vld [vmem:[%s9735_s8 + $0x1d0] sm:$0xff] }
 0xb2a   : > { %v5738_v55 = vpop.f32.mrb[168].mxu1 }
 0xb2b   : > { %v6237_v45 = vadd.f32 %v9267_v6, %v6119_v54  ;;  %v8286_v37 = vadd.f32 %v14563_v46, %v5738_v55  ;;  %v5740_v9 = vpop.f32.mrb[169].mxu1  ;;  %v16382_v55 = vld [vmem:[#allocation90_spill] sm:$0xff] }
 0xb2d   : > { %6301 = vst [vmem:[%s14577_s21 + $0x190] sm:$0xff] %v6237_v45  ;;  %v6124_v60 = vadd.f32 %v8286_v37, %v16374_v21  ;;  %v9276_v37 = vld [vmem:[%s9735_s8 + $0x1d8] sm:$0xff] }
 0xb2e   : > { %v5743_v16 = vpop.f32.mrb[170].mxu1 }
 0xb2f   : > { %v6238_v47 = vadd.f32 %v9268_v40, %v6124_v60  ;;  %v8287_v8 = vadd.f32 %v14563_v46, %v5743_v16  ;;  %v5745_v32 = vpop.f32.mrb[171].mxu1  ;;  %v16383_v16 = vld [vmem:[#allocation244_spill] sm:$0xff] }
 0xb31   : > { %6302 = vst [vmem:[%s14577_s21 + $0x198] sm:$0xff] %v6238_v47  ;;  %v6129_v4 = vadd.f32 %v8287_v8, %v16375_v61  ;;  %v9277_v8 = vld [vmem:[%s9735_s8 + $0x1e0] sm:$0xff] }
 0xb32   : > { %v5748_v44 = vpop.f32.mrb[172].mxu1 }
 0xb33   : > { %v6239_v34 = vadd.f32 %v9269_v13, %v6129_v4  ;;  %v8288_v52 = vadd.f32 %v14563_v46, %v5748_v44  ;;  %v5750_v59 = vpop.f32.mrb[173].mxu1  ;;  %v16384_v44 = vld [vmem:[#allocation243_spill] sm:$0xff] }
 0xb35   : > { %6303 = vst [vmem:[%s14577_s21 + $0x1a0] sm:$0xff] %v6239_v34  ;;  %v6134_v39 = vadd.f32 %v8288_v52, %v16376_v38  ;;  %v9278_v52 = vld [vmem:[%s9735_s8 + $0x1e8] sm:$0xff] }
 0xb36   : > { %v5753_v18 = vpop.f32.mrb[174].mxu1 }
 0xb37   : > { %v6240_v28 = vadd.f32 %v9270_v58, %v6134_v39  ;;  %v8289_v0 = vadd.f32 %v14563_v46, %v5753_v18  ;;  %v5755_v2 = vpop.f32.mrb[175].mxu1 }
 0xb39   : > { %6304 = vst [vmem:[%s14577_s21 + $0x1a8] sm:$0xff] %v6240_v28  ;;  %v6139_v51 = vadd.f32 %v8289_v0, %v16377_v7  ;;  %v9279_v28 = vld [vmem:[%s9735_s8 + $0x1f0] sm:$0xff] }
 0xb3a   : > { %v5758_v36 = vpop.f32.mrb[176].mxu1 }
 0xb3b   : > { %v6241_v62 = vadd.f32 %v9271_v14, %v6139_v51  ;;  %v8290_v26 = vadd.f32 %v14563_v46, %v5758_v36  ;;  %v5760_v33 = vpop.f32.mrb[177].mxu1 }
 0xb3d   : > { %6305 = vst [vmem:[%s14577_s21 + $0x1b0] sm:$0xff] %v6241_v62  ;;  %v6144_v63 = vadd.f32 %v8290_v26, %v16378_v12 }
 0xb3e   : > { %v5763_v27 = vpop.f32.mrb[178].mxu1 }
 0xb3f   : > { %v6242_v50 = vadd.f32 %v9272_v11, %v6144_v63  ;;  %v8291_v22 = vadd.f32 %v14563_v46, %v5763_v27  ;;  %v5765_v19 = vpop.f32.mrb[179].mxu1 }
 0xb41   : > { %6306 = vst [vmem:[%s14577_s21 + $0x1b8] sm:$0xff] %v6242_v50  ;;  %v6149_v3 = vadd.f32 %v8291_v22, %v16379_v43 }
 0xb42   : > { %v5768_v5 = vpop.f32.mrb[180].mxu1 }
 0xb43   : > { %v6243_v23 = vadd.f32 %v9273_v20, %v6149_v3  ;;  %v8292_v1 = vadd.f32 %v14563_v46, %v5768_v5  ;;  %v5770_v57 = vpop.f32.mrb[181].mxu1 }
 0xb45   : > { %6307 = vst [vmem:[%s14577_s21 + $0x1c0] sm:$0xff] %v6243_v23  ;;  %v6154_v15 = vadd.f32 %v8292_v1, %v16380_v10 }
 0xb46   : > { %v5773_v42 = vpop.f32.mrb[182].mxu1 }
 0xb47   : > { %v6244_v49 = vadd.f32 %v9274_v24, %v6154_v15  ;;  %v8293_v30 = vadd.f32 %v14563_v46, %v5773_v42  ;;  %v5775_v25 = vpop.f32.mrb[183].mxu1 }
 0xb49   : > { %6308 = vst [vmem:[%s14577_s21 + $0x1c8] sm:$0xff] %v6244_v49  ;;  %v6159_v41 = vadd.f32 %v8293_v30, %v16381_v31 }
 0xb4a   : > { %v5778_v29 = vpop.f32.mrb[184].mxu1 }
 0xb4b   : > { %v6245_v53 = vadd.f32 %v9275_v35, %v6159_v41  ;;  %v8294_v48 = vadd.f32 %v14563_v46, %v5778_v29  ;;  %v5780_v54 = vpop.f32.mrb[185].mxu1 }
 0xb4d   : > { %6309 = vst [vmem:[%s14577_s21 + $0x1d0] sm:$0xff] %v6245_v53  ;;  %v6164_v6 = vadd.f32 %v8294_v48, %v16382_v55 }
 0xb4e   : > { %v5783_v45 = vpop.f32.mrb[186].mxu1 }
 0xb4f   : > { %v6246_v9 = vadd.f32 %v9276_v37, %v6164_v6  ;;  %v8295_v21 = vadd.f32 %v14563_v46, %v5783_v45  ;;  %v5785_v60 = vpop.f32.mrb[187].mxu1 }
 0xb51   : > { %6310 = vst [vmem:[%s14577_s21 + $0x1d8] sm:$0xff] %v6246_v9  ;;  %v6169_v40 = vadd.f32 %v8295_v21, %v16383_v16 }
 0xb52   : > { %v5788_v47 = vpop.f32.mrb[188].mxu1 }
 0xb53   : > { %v6247_v32 = vadd.f32 %v9277_v8, %v6169_v40  ;;  %v8296_v61 = vadd.f32 %v14563_v46, %v5788_v47  ;;  %v5790_v4 = vpop.f32.mrb[189].mxu1 }
 0xb55   : > { %6311 = vst [vmem:[%s14577_s21 + $0x1e0] sm:$0xff] %v6247_v32  ;;  %v6174_v13 = vadd.f32 %v8296_v61, %v16384_v44 }
 0xb56   : > { %v5793_v34 = vpop.f32.mrb[190].mxu1 }
 0xb57   : > { %v6248_v59 = vadd.f32 %v9278_v52, %v6174_v13  ;;  %v8297_v38 = vadd.f32 %v14563_v46, %v5793_v34  ;;  %v5795_v39 = vpop.f32.mrb[191].mxu1 }
 0xb59   : > { %6312 = vst [vmem:[%s14577_s21 + $0x1e8] sm:$0xff] %v6248_v59  ;;  %v6179_v18 = vadd.f32 %v8297_v38, %v14724_v17  ;;  %v9280_v17 = vld [vmem:[%s9735_s8 + $0x1f8] sm:$0xff] }
 0xb5a   : > { %v5798_v58 = vpop.f32.mrb[192].mxu1 }
 0xb5b   : > { %v6249_v0 = vadd.f32 %v9279_v28, %v6179_v18  ;;  %v8298_v2 = vadd.f32 %v14563_v46, %v5798_v58  ;;  %v5800_v7 = vpop.f32.mrb[193].mxu1 }
 0xb5d   : > { %6313 = vst [vmem:[%s14577_s21 + $0x1f0] sm:$0xff] %v6249_v0  ;;  %v6184_v51 = vadd.f32 %v8298_v2, %v14722_v56 }
 0xb5f   : > { %v6250_v36 = vadd.f32 %v9280_v17, %v6184_v51 }
 0xb61   : > { %6314 = vst [vmem:[%s14577_s21 + $0x1f8] sm:$0xff] %v6250_v36 }
 0xb62   : > { %9408 = shalt.err (!%p9405_p4)
}
 0xb63   : > { %s9409_s8 = scalar_lea.hbm %s14863_s30, 8192  ;;  %s9413_s20 = scalar_lea.hbm %s14918_s7, 16384 }
 0xb64   : > { %p9410_p9 = scmp.ne.s32.totalorder %s14863_s30, %s9409_s8  ;;  %p9414_p8 = scmp.lt.u32.totalorder %s14863_s30, %s14918_s7 }
 0xb65   : > { %p9415_p13 = scmp.lt.u32.totalorder %s9413_s20, %s9409_s8  ;;  %p9417_p10 = scmp.lt.u32.totalorder %s9409_s8, %s14863_s30 }
 0xb66   : > { %p9411_p0 = pnand %p9410_p9, %p9678_p5 }
 0xb67   : > { %p9416_p6 = por %p9415_p13, %p9414_p8 }
 0xb68   : > { %p9412_p11 = pneg %p9411_p0 }
 0xb69   : > { %p9418_p3 = por %p9417_p10, %p9416_p6 }
 0xb6b   : > { %p9419_p7 = pnand %p9418_p3, %p9412_p11 }
 0xb6d   : > { %9422 = shalt.err (!%p9419_p7)
}
 0xb6e   : > { %s9482_s23 = smov 128   ;;  %s9483_s11 = smov 8  }
 0xb6f   : > { %9081 = dma.vmem_to_hbm [thread:$0]  (%p9678_p5), %s14865_s29, 8192, %s14863_s30, %s6316_s9, %s9482_s23, %s9482_s23, %s9483_s11  }
 0xb70 PF: > { %s16385_s13 = sld [smem:[#allocation16_spill]]  ;;  %s6345_s28 = sand.u32 1, %s9457_s24  }
 0xb71   : > { %p16387_p1 = scmp.ge.s32.totalorder %s9469_s27, 2  ;;  %s6346_s15 = scalar_lea.sflag [#allocation5], %s6345_s28 }
 0xb76   : > { %p16386_p12 = scmp.ne.s32.totalorder %s16385_s13, 0 }
 0xb78   : > { %p9098_p2 = pnand %p16387_p1, %p16386_p12 }
 0xb7a   : > { %9452 = dma.done.wait (!%p9098_p2), %s6346_s15, 8192  }
 0xb7b   : > { %9454 = vsyncadd (!%p9098_p2), %s6346_s15, 4294959104  ;;  %p22_p4 = scmp.ge.s32.totalorder %s9664_s22, 4   ;;  %s16388_s24 = smov %s9461_s25 }
 0xb7c   : > { %s16389_s25 = smov %s9465_s26  ;;  %s16390_s26 = smov %s9674_s18 }
 0xb7d   : > { %s16391_s27 = smov %s9664_s22  ;;  %24 = sbr.rel (!%p22_p4) target bundleno = 7 (0x7), region = 107 }
 0xb84   :  { %6351 = vsyncpa [#allocation4], 1 }
 0xb85   :  { %6353 = vsyncpa [#allocation4 + $0x1], 1 }
 0xb86   :  { %6354 = vsyncpa [#allocation7], 1 }
 0xb87   :  { %6355 = vsyncpa [#allocation10], 1 }
 0xb88   :  { %6356 = vsyncpa [#allocation5], 1 }
 0xb89   :  { %6358 = vsyncpa [#allocation5 + $0x1], 1 }

</bundles_post_ra>
